<compile_context>
chip_gen: v7x
topology: tpu7x:2x2x1
jax: 0.10.0
libtpu: 0.0.40
codegen_flags: <defaults>
</compile_context>

<pallas_src>
import numpy as np
import jax
import jax.numpy as jnp
from jax import lax
from jax.experimental import pallas as pl
from jax.experimental.pallas import tpu as pltpu

HIDDEN = 32
C_IN = 246
C_IN_PAD = 256        # input / recon channels, lane-padded
C_MID = 128           # internal 64-wide channels, padded to 128 lanes
L_IN = 33             # input length (33 -> 17 -> 9 -> 6)
L1, L2, L3 = 17, 9, 6
LAT_W = 128           # mu | logvar | z | zero-pad (lane-dense latent output)
TB = 8                # samples per grid step (M of the big matmuls = TB*L)

_VMEM = getattr(pltpu, "MemorySpace", pltpu).VMEM   # version-robust VMEM enum

CONST_NAMES = (
    "sel_i1", "w_i1", "b_i1",
    "sel_i2", "w_i2", "b_i2",
    "sel_i3", "w_i3", "b_i3",
    "sel_f4", "w_f4", "b_f4",
    "w_f5", "b_f5",
    "w_o5", "b_o5",
    "w_o4", "b_o4",
    "sel_u4",
    "sel_t3", "w_t3", "b_t3",
    "sel_t2", "w_t2", "b_t2",
    "sel_t1", "w_t1", "b_t1",
)


# ----------------------------- fused Pallas kernel ---------------------------

def _conv_block(act, sel_ref, w_ref, b_ref):
    """Batched conv / conv-transpose / flatten-FC layer.

    act:     (TB*L_in, C_in_pad) channels-last, batch-major rows, f32 or bf16.
    sel_ref: (K, TB*L_out, TB*L_in) bf16 block-diagonal 0/1 gather constants.
    w_ref:   (K*C_in_pad, C_out_pad) bf16 pre-packed weight.
    b_ref:   (1, C_out_pad) f32 bias.
    Returns  (TB*L_out, C_out_pad) f32.
    """
    K = sel_ref.shape[0]
    a = act.astype(jnp.bfloat16)
    cols = [jnp.dot(sel_ref[k], a, preferred_element_type=jnp.float32)
            for k in range(K)]
    slab = jnp.concatenate(cols, axis=1).astype(jnp.bfloat16)   # (TB*L_out, K*C_in)
    return jnp.dot(slab, w_ref[...], preferred_element_type=jnp.float32) + b_ref[...]


def _vae_kernel(x_ref, eps_ref, *refs):
    c = dict(zip(CONST_NAMES, refs[:len(CONST_NAMES)]))
    recon_ref, latent_ref = refs[len(CONST_NAMES):]
    relu = lambda v: jnp.maximum(v, 0.0)
    H = HIDDEN

    # ------------------------------- encoder -------------------------------
    x = x_ref[...]                                                   # (TB*33, 256) f32
    h1 = _conv_block(x, c["sel_i1"], c["w_i1"], c["b_i1"])           # (TB*17, 128)
    h2 = _conv_block(relu(h1), c["sel_i2"], c["w_i2"], c["b_i2"])    # (TB*9, 128)
    h3 = _conv_block(relu(h2), c["sel_i3"], c["w_i3"], c["b_i3"])    # (TB*6, 128)
    # fc_i4 expressed as a "full-length conv": one (TB, 768) x (768, 256) matmul.
    h4 = _conv_block(relu(h3), c["sel_f4"], c["w_f4"], c["b_f4"])    # (TB, 256)

    # fused mu/logvar head + reparameterization (training branch); f32 VPU/EUP math.
    ml = jnp.dot(relu(h4).astype(jnp.bfloat16), c["w_f5"][...],
                 preferred_element_type=jnp.float32) + c["b_f5"][...]      # (TB, 128)
    mu, logvar = ml[:, :H], ml[:, H:2 * H]
    eps = eps_ref[...][:, :H]
    z = mu + eps * jnp.exp(0.5 * logvar)
    latent_ref[...] = jnp.concatenate(
        [mu, logvar, z, jnp.zeros((TB, LAT_W - 3 * H), jnp.float32)], axis=1)

    # ------------------------------- decoder -------------------------------
    h5 = jnp.dot(z.astype(jnp.bfloat16), c["w_o5"][...],
                 preferred_element_type=jnp.float32) + c["b_o5"][...]      # (TB, 256)
    h4d = jnp.dot(relu(h5).astype(jnp.bfloat16), c["w_o4"][...],
                  preferred_element_type=jnp.float32) + c["b_o4"][...]     # (TB, 768)
    h4r = relu(h4d).astype(jnp.bfloat16)
    # scatter (TB, 6*128) -> channels-last (TB*6, 128) rows via tiny 0/1 matmuls.
    h4m = jnp.zeros((TB * L3, C_MID), jnp.float32)
    for l in range(6):
        h4m = h4m + jnp.dot(c["sel_u4"][l], h4r[:, l * C_MID:(l + 1) * C_MID],
                            preferred_element_type=jnp.float32)
    d3 = _conv_block(h4m, c["sel_t3"], c["w_t3"], c["b_t3"])         # (TB*9, 128)
    d2 = _conv_block(relu(d3), c["sel_t2"], c["w_t2"], c["b_t2"])    # (TB*17, 128)
    d1 = _conv_block(relu(d2), c["sel_t1"], c["w_t1"], c["b_t1"])    # (TB*33, 256)
    recon_ref[...] = d1


# ------------------------------ wrapper ---------------------------------------

def vae_forward(consts, x, eps):
    """x:(B, 246, 33) NCL f32, eps:(B, hidden) f32 -> (recon, mu, logvar, z)."""
    B = x.shape[0]
    H = HIDDEN
    assert x.shape[1:] == (C_IN, L_IN)
    pB = pl.cdiv(B, TB) * TB          # pad batch to a multiple of TB
    steps = pB // TB                  # on v7x, large B naturally gives >=2 parallel steps

    x_nlc = jnp.pad(jnp.transpose(x, (0, 2, 1)),
                    ((0, pB - B), (0, 0), (0, C_IN_PAD - C_IN)))     # (pB, 33, 256)
    x_flat = x_nlc.reshape(pB * L_IN, C_IN_PAD)
    eps_p = jnp.pad(eps, ((0, pB - B), (0, LAT_W - H)))              # (pB, 128)

    const_list = [consts[k] for k in CONST_NAMES]
    vmem_spec = pl.BlockSpec(memory_space=_VMEM)                     # single resident copy

    in_specs = [
        pl.BlockSpec((TB * L_IN, C_IN_PAD), lambda i: (i, 0)),
        pl.BlockSpec((TB, LAT_W), lambda i: (i, 0)),
    ] + [vmem_spec] * len(const_list)

    out_shape = (
        jax.ShapeDtypeStruct((pB * L_IN, C_IN_PAD), jnp.float32),    # recon (ch-padded)
        jax.ShapeDtypeStruct((pB, LAT_W), jnp.float32),              # mu|logvar|z|pad
    )
    out_specs = (
        pl.BlockSpec((TB * L_IN, C_IN_PAD), lambda i: (i, 0)),
        pl.BlockSpec((TB, LAT_W), lambda i: (i, 0)),
    )

    const_bytes = sum(v.size * v.dtype.itemsize for v in const_list)
    act_bytes = 2 * pB * L_IN * C_IN_PAD * 4 + 2 * pB * LAT_W * 4
    cost = pl.CostEstimate(flops=int(4.5e7) * pB, transcendentals=pB * H,
                           bytes_accessed=int(const_bytes + act_bytes))

    recon_flat, latent = pl.pallas_call(
        _vae_kernel,
        out_shape=out_shape,
        grid=(steps,),
        in_specs=in_specs,
        out_specs=out_specs,
        compiler_params=pltpu.CompilerParams(
            dimension_semantics=("parallel",)),
        cost_estimate=cost,
    )(x_flat, eps_p, *const_list)

    recon = jnp.transpose(recon_flat.reshape(pB, L_IN, C_IN_PAD)[:B, :, :C_IN],
                          (0, 2, 1))                                 # (B, 246, 33)
    mu = latent[:B, :H]
    logvar = latent[:B, H:2 * H]
    z = latent[:B, 2 * H:3 * H]
    return recon, mu, logvar, z


# --------------------- host-side packing (once, outside jit) -----------------

def _make_sel(tb, l_out, l_in, k_taps, stride, pad, transposed):
    """Block-diagonal 0/1 selection constants, shape (K, tb*l_out, tb*l_in), bf16."""
    ro = np.arange(tb * l_out)
    ci = np.arange(tb * l_in)
    b_o, p_o = ro // l_out, ro % l_out
    b_i, p_i = ci // l_in, ci % l_in
    same = b_o[:, None] == b_i[None, :]
    mats = []
    for k in range(k_taps):
        off = k - pad
        if transposed:          # conv-transpose: out row o = stride*i + off
            hit = p_o[:, None] == stride * p_i[None, :] + off
        else:                   # conv: out row m gathers input col j = stride*m + off
            hit = p_i[None, :] == stride * p_o[:, None] + off
        mats.append((hit & same).astype(np.float32))
    return jnp.asarray(np.stack(mats, axis=0), dtype=jnp.bfloat16)


def pack_params(p):
    """Pre-pack PyTorch-layout params + constant gather/scatter matrices (host, once)."""
    f32 = np.float32

    def npy(a):
        return np.asarray(a, dtype=f32)

    def conv_pack(w, cin_pad, cout_pad):       # torch Conv1d weight (C_out, C_in, K)
        c_out, c_in, k = w.shape
        wt = np.transpose(npy(w), (2, 1, 0))   # (K, C_in, C_out)
        wt = np.pad(wt, ((0, 0), (0, cin_pad - c_in), (0, cout_pad - c_out)))
        return jnp.asarray(wt.reshape(k * cin_pad, cout_pad), dtype=jnp.bfloat16)

    def convT_pack(w, cin_pad, cout_pad):      # torch ConvTranspose1d weight (C_in, C_out, K)
        c_in, c_out, k = w.shape
        wt = np.transpose(npy(w), (2, 0, 1))   # (K, C_in, C_out)
        wt = np.pad(wt, ((0, 0), (0, cin_pad - c_in), (0, cout_pad - c_out)))
        return jnp.asarray(wt.reshape(k * cin_pad, cout_pad), dtype=jnp.bfloat16)

    def bias(b, pad_to):
        bb = np.pad(npy(b), (0, pad_to - b.shape[0]))
        return jnp.asarray(bb.reshape(1, -1), dtype=jnp.float32)

    # fc_i4: torch input index c*6+l  ->  packed row l*128+c (rows c>=64 are zero)
    w4 = np.transpose(npy(p["fc_i4_w"]).reshape(256, 64, 6), (2, 1, 0))    # (6, 64, 256)
    w4 = np.pad(w4, ((0, 0), (0, C_MID - 64), (0, 0))).reshape(6 * C_MID, 256)

    # fused mu/logvar head, padded to 128 output lanes
    w5 = np.zeros((256, LAT_W), f32)
    w5[:, :HIDDEN] = npy(p["fc_i5a_w"]).T
    w5[:, HIDDEN:2 * HIDDEN] = npy(p["fc_i5b_w"]).T
    b5 = np.zeros((1, LAT_W), f32)
    b5[0, :HIDDEN] = npy(p["fc_i5a_b"])
    b5[0, HIDDEN:2 * HIDDEN] = npy(p["fc_i5b_b"])

    # fc_o4: torch output index c*6+l  ->  packed column l*128+c (cols c>=64 are zero)
    wo4 = np.transpose(npy(p["fc_o4_w"]).reshape(64, 6, 256), (1, 0, 2))   # (6, 64, 256)
    wo4 = np.pad(wo4, ((0, 0), (0, C_MID - 64), (0, 0)))                   # (6, 128, 256)
    wo4 = np.transpose(wo4, (2, 0, 1)).reshape(256, 6 * C_MID)
    bo4 = np.pad(npy(p["fc_o4_b"]).reshape(64, 6).T, ((0, 0), (0, C_MID - 64)))
    bo4 = bo4.reshape(1, 6 * C_MID)

    return {
        # ---- constant block-diagonal gather / scatter matrices ----
        "sel_i1": _make_sel(TB, L1, L_IN, 5, 2, 2, False),
        "sel_i2": _make_sel(TB, L2, L1, 5, 2, 2, False),
        "sel_i3": _make_sel(TB, L3, L2, 3, 2, 2, False),
        "sel_f4": _make_sel(TB, 1, L3, 6, 1, 0, False),
        "sel_u4": _make_sel(TB, L3, 1, 6, 1, 0, True),
        "sel_t3": _make_sel(TB, L2, L3, 3, 2, 2, True),
        "sel_t2": _make_sel(TB, L1, L2, 5, 2, 2, True),
        "sel_t1": _make_sel(TB, L_IN, L1, 5, 2, 2, True),
        # ---- packed bf16 MXU weights, f32 biases ----
        "w_i1": conv_pack(p["conv_i1_w"], C_IN_PAD, 128), "b_i1": bias(p["conv_i1_b"], 128),
        "w_i2": conv_pack(p["conv_i2_w"], 128, C_MID),    "b_i2": bias(p["conv_i2_b"], C_MID),
        "w_i3": conv_pack(p["conv_i3_w"], C_MID, C_MID),  "b_i3": bias(p["conv_i3_b"], C_MID),
        "w_f4": jnp.asarray(w4, dtype=jnp.bfloat16),      "b_f4": bias(p["fc_i4_b"], 256),
        "w_f5": jnp.asarray(w5, dtype=jnp.bfloat16),      "b_f5": jnp.asarray(b5),
        "w_o5": jnp.asarray(npy(p["fc_o5_w"]).T, dtype=jnp.bfloat16),
        "b_o5": bias(p["fc_o5_b"], 256),
        "w_o4": jnp.asarray(wo4, dtype=jnp.bfloat16),     "b_o4": jnp.asarray(bo4),
        "w_t3": convT_pack(p["conv_o3_w"], C_MID, C_MID), "b_t3": bias(p["conv_o3_b"], C_MID),
        "w_t2": convT_pack(p["conv_o2_w"], C_MID, 128),   "b_t2": bias(p["conv_o2_b"], 128),
        # conv_o1 pad (channels 246:256) stays exactly zero -> recon crop is exact.
        "w_t1": convT_pack(p["conv_o1_w"], 128, C_IN_PAD),
        "b_t1": bias(p["conv_o1_b"], C_IN_PAD),
    }


# --------------------------------- parameters --------------------------------

def init_params(key, hidden_size):
    specs = {
        "conv_i1_w": (128, 246, 5), "conv_i1_b": (128,),
        "conv_i2_w": (64, 128, 5),  "conv_i2_b": (64,),
        "conv_i3_w": (64, 64, 3),   "conv_i3_b": (64,),
        "fc_i4_w": (256, 64 * 6),   "fc_i4_b": (256,),
        "fc_i5a_w": (hidden_size, 256), "fc_i5a_b": (hidden_size,),
        "fc_i5b_w": (hidden_size, 256), "fc_i5b_b": (hidden_size,),
        "fc_o5_w": (256, hidden_size),  "fc_o5_b": (256,),
        "fc_o4_w": (64 * 6, 256),   "fc_o4_b": (64 * 6,),
        "conv_o3_w": (64, 64, 3),   "conv_o3_b": (64,),     # (C_in, C_out, K)
        "conv_o2_w": (64, 128, 5),  "conv_o2_b": (128,),
        "conv_o1_w": (128, 246, 5), "conv_o1_b": (246,),
    }
    keys = jax.random.split(key, len(specs))
    params = {}
    for (name, shape), k in zip(specs.items(), keys):
        scale = 0.05 if name.endswith("_w") else 0.01
        params[name] = scale * jax.random.normal(k, shape, dtype=jnp.float32)
    return params


# -------------------- pure-XLA reference (sanity check) ----------------------

def _ref_conv1d(x, w, b, stride, padding):
    out = lax.conv_general_dilated(
        x, w, window_strides=(stride,), padding=[(padding, padding)],
        dimension_numbers=("NCH", "OIH", "NCH"), precision=lax.Precision.HIGHEST)
    return out + b[None, :, None]


def _ref_conv_transpose1d(x, w_t, b, stride, padding):
    K = w_t.shape[2]
    w_conv = jnp.transpose(w_t[:, :, ::-1], (1, 0, 2))
    out = lax.conv_general_dilated(
        x, w_conv, window_strides=(1,), padding=[(K - 1 - padding,) * 2],
        lhs_dilation=(stride,), dimension_numbers=("NCH", "OIH", "NCH"),
        precision=lax.Precision.HIGHEST)
    return out + b[None, :, None]


def ref_forward(params, x, eps):
    p, relu = params, jax.nn.relu
    h1 = _ref_conv1d(x, p["conv_i1_w"], p["conv_i1_b"], 2, 2)
    h2 = _ref_conv1d(relu(h1), p["conv_i2_w"], p["conv_i2_b"], 2, 2)
    h3 = _ref_conv1d(relu(h2), p["conv_i3_w"], p["conv_i3_b"], 2, 2)
    h3f = h3.reshape(x.shape[0], -1)
    h4 = relu(h3f) @ p["fc_i4_w"].T + p["fc_i4_b"]
    mu = relu(h4) @ p["fc_i5a_w"].T + p["fc_i5a_b"]
    logvar = relu(h4) @ p["fc_i5b_w"].T + p["fc_i5b_b"]
    z = mu + eps * jnp.exp(0.5 * logvar)
    h5 = z @ p["fc_o5_w"].T + p["fc_o5_b"]
    h4d = relu(h5) @ p["fc_o4_w"].T + p["fc_o4_b"]
    h4r = h4d.reshape(x.shape[0], 64, 6)
    h3d = _ref_conv_transpose1d(relu(h4r), p["conv_o3_w"], p["conv_o3_b"], 2, 2)
    h2d = _ref_conv_transpose1d(relu(h3d), p["conv_o2_w"], p["conv_o2_b"], 2, 2)
    recon = _ref_conv_transpose1d(relu(h2d), p["conv_o1_w"], p["conv_o1_b"], 2, 2)
    return recon, mu, logvar, z


# ------------------------------------ main ------------------------------------

if __name__ == "__main__":
    key = jax.random.PRNGKey(0)
    pkey, xkey, ekey = jax.random.split(key, 3)
    params = init_params(pkey, HIDDEN)
    consts = pack_params(params)      # weight packing + selection constants, once, on host

    B = 2
    x = jax.random.normal(xkey, (B, C_IN, L_IN), dtype=jnp.float32)
    # TODO(synk): torch.randn_like's RNG stream cannot be reproduced; eps is a
    # deterministic JAX standard-normal sample (training-mode reparameterization).
    eps = jax.random.normal(ekey, (B, HIDDEN), dtype=jnp.float32)

    fwd = jax.jit(vae_forward)
    recon, mu, logvar, z = fwd(consts, x, eps)
    jax.block_until_ready((recon, mu, logvar, z))

    assert recon.shape == (B, C_IN, L_IN)
    assert mu.shape == (B, HIDDEN)
    assert logvar.shape == (B, HIDDEN)
    assert z.shape == (B, HIDDEN)

    # numerical sanity check vs a pure-XLA f32 reference (kernel uses bf16 MXU
    # operands with f32 accumulation -> slightly looser tolerance than pure f32).
    r_recon, r_mu, r_logvar, r_z = ref_forward(params, x, eps)
    for got, want in ((recon, r_recon), (mu, r_mu), (logvar, r_logvar), (z, r_z)):
        assert jnp.allclose(got, want, atol=2e-2, rtol=2e-2)

    print("KERNEL_OK")
</pallas_src>

<mosaic_0001>
module attributes {stable_mosaic.version = 11 : i64} {
  func.func @_vae_kernel(%arg0: i32, %arg1: memref<264x256xf32, #tpu.memory_space<vmem>>, %arg2: memref<8x128xf32, #tpu.memory_space<vmem>>, %arg3: memref<5x136x264xbf16, #tpu.memory_space<vmem>>, %arg4: memref<1280x128xbf16, #tpu.memory_space<vmem>>, %arg5: memref<1x128xf32, #tpu.memory_space<vmem>>, %arg6: memref<5x72x136xbf16, #tpu.memory_space<vmem>>, %arg7: memref<640x128xbf16, #tpu.memory_space<vmem>>, %arg8: memref<1x128xf32, #tpu.memory_space<vmem>>, %arg9: memref<3x48x72xbf16, #tpu.memory_space<vmem>>, %arg10: memref<384x128xbf16, #tpu.memory_space<vmem>>, %arg11: memref<1x128xf32, #tpu.memory_space<vmem>>, %arg12: memref<6x8x48xbf16, #tpu.memory_space<vmem>>, %arg13: memref<768x256xbf16, #tpu.memory_space<vmem>>, %arg14: memref<1x256xf32, #tpu.memory_space<vmem>>, %arg15: memref<256x128xbf16, #tpu.memory_space<vmem>>, %arg16: memref<1x128xf32, #tpu.memory_space<vmem>>, %arg17: memref<32x256xbf16, #tpu.memory_space<vmem>>, %arg18: memref<1x256xf32, #tpu.memory_space<vmem>>, %arg19: memref<256x768xbf16, #tpu.memory_space<vmem>>, %arg20: memref<1x768xf32, #tpu.memory_space<vmem>>, %arg21: memref<6x48x8xbf16, #tpu.memory_space<vmem>>, %arg22: memref<3x72x48xbf16, #tpu.memory_space<vmem>>, %arg23: memref<384x128xbf16, #tpu.memory_space<vmem>>, %arg24: memref<1x128xf32, #tpu.memory_space<vmem>>, %arg25: memref<5x136x72xbf16, #tpu.memory_space<vmem>>, %arg26: memref<640x128xbf16, #tpu.memory_space<vmem>>, %arg27: memref<1x128xf32, #tpu.memory_space<vmem>>, %arg28: memref<5x264x136xbf16, #tpu.memory_space<vmem>>, %arg29: memref<640x256xbf16, #tpu.memory_space<vmem>>, %arg30: memref<1x256xf32, #tpu.memory_space<vmem>>, %arg31: memref<264x256xf32, #tpu.memory_space<vmem>>, %arg32: memref<8x128xf32, #tpu.memory_space<vmem>>) attributes {dimension_semantics = [#tpu.dimension_semantics<parallel>], iteration_bounds = array<i64: 1>, scalar_prefetch = 0 : i64, scratch_operands = 0 : i64, tpu.core_type = #tpu.core_type<tc>, window_params = [{transform_indices = @transform_0, window_bounds = array<i64: 264, 256>}, {transform_indices = @transform_1, window_bounds = array<i64: 8, 128>}, {pipeline_mode = #tpu.pipeline_mode<synchronous>, transform_indices = @transform_2, window_bounds = array<i64: 5, 136, 264>}, {pipeline_mode = #tpu.pipeline_mode<synchronous>, transform_indices = @transform_3, window_bounds = array<i64: 1280, 128>}, {pipeline_mode = #tpu.pipeline_mode<synchronous>, transform_indices = @transform_4, window_bounds = array<i64: 1, 128>}, {pipeline_mode = #tpu.pipeline_mode<synchronous>, transform_indices = @transform_5, window_bounds = array<i64: 5, 72, 136>}, {pipeline_mode = #tpu.pipeline_mode<synchronous>, transform_indices = @transform_6, window_bounds = array<i64: 640, 128>}, {pipeline_mode = #tpu.pipeline_mode<synchronous>, transform_indices = @transform_7, window_bounds = array<i64: 1, 128>}, {pipeline_mode = #tpu.pipeline_mode<synchronous>, transform_indices = @transform_8, window_bounds = array<i64: 3, 48, 72>}, {pipeline_mode = #tpu.pipeline_mode<synchronous>, transform_indices = @transform_9, window_bounds = array<i64: 384, 128>}, {pipeline_mode = #tpu.pipeline_mode<synchronous>, transform_indices = @transform_10, window_bounds = array<i64: 1, 128>}, {pipeline_mode = #tpu.pipeline_mode<synchronous>, transform_indices = @transform_11, window_bounds = array<i64: 6, 8, 48>}, {pipeline_mode = #tpu.pipeline_mode<synchronous>, transform_indices = @transform_12, window_bounds = array<i64: 768, 256>}, {pipeline_mode = #tpu.pipeline_mode<synchronous>, transform_indices = @transform_13, window_bounds = array<i64: 1, 256>}, {pipeline_mode = #tpu.pipeline_mode<synchronous>, transform_indices = @transform_14, window_bounds = array<i64: 256, 128>}, {pipeline_mode = #tpu.pipeline_mode<synchronous>, transform_indices = @transform_15, window_bounds = array<i64: 1, 128>}, {pipeline_mode = #tpu.pipeline_mode<synchronous>, transform_indices = @transform_16, window_bounds = array<i64: 32, 256>}, {pipeline_mode = #tpu.pipeline_mode<synchronous>, transform_indices = @transform_17, window_bounds = array<i64: 1, 256>}, {pipeline_mode = #tpu.pipeline_mode<synchronous>, transform_indices = @transform_18, window_bounds = array<i64: 256, 768>}, {pipeline_mode = #tpu.pipeline_mode<synchronous>, transform_indices = @transform_19, window_bounds = array<i64: 1, 768>}, {pipeline_mode = #tpu.pipeline_mode<synchronous>, transform_indices = @transform_20, window_bounds = array<i64: 6, 48, 8>}, {pipeline_mode = #tpu.pipeline_mode<synchronous>, transform_indices = @transform_21, window_bounds = array<i64: 3, 72, 48>}, {pipeline_mode = #tpu.pipeline_mode<synchronous>, transform_indices = @transform_22, window_bounds = array<i64: 384, 128>}, {pipeline_mode = #tpu.pipeline_mode<synchronous>, transform_indices = @transform_23, window_bounds = array<i64: 1, 128>}, {pipeline_mode = #tpu.pipeline_mode<synchronous>, transform_indices = @transform_24, window_bounds = array<i64: 5, 136, 72>}, {pipeline_mode = #tpu.pipeline_mode<synchronous>, transform_indices = @transform_25, window_bounds = array<i64: 640, 128>}, {pipeline_mode = #tpu.pipeline_mode<synchronous>, transform_indices = @transform_26, window_bounds = array<i64: 1, 128>}, {pipeline_mode = #tpu.pipeline_mode<synchronous>, transform_indices = @transform_27, window_bounds = array<i64: 5, 264, 136>}, {pipeline_mode = #tpu.pipeline_mode<synchronous>, transform_indices = @transform_28, window_bounds = array<i64: 640, 256>}, {pipeline_mode = #tpu.pipeline_mode<synchronous>, transform_indices = @transform_29, window_bounds = array<i64: 1, 256>}, {transform_indices = @transform_30, window_bounds = array<i64: 264, 256>}, {transform_indices = @transform_31, window_bounds = array<i64: 8, 128>}]} {
    %c0 = arith.constant 0 : index
    %c0_0 = arith.constant 0 : index
    %0 = vector.load %arg1[%c0, %c0_0] : memref<264x256xf32, #tpu.memory_space<vmem>>, vector<264x256xf32>
    %1 = arith.truncf %0 : vector<264x256xf32> to vector<264x256xbf16>
    %c0_1 = arith.constant 0 : index
    %c0_2 = arith.constant 0 : index
    %c0_3 = arith.constant 0 : index
    %2 = vector.load %arg3[%c0_1, %c0_2, %c0_3] : memref<5x136x264xbf16, #tpu.memory_space<vmem>>, vector<1x136x264xbf16>
    %3 = vector.shape_cast %2 : vector<1x136x264xbf16> to vector<136x264xbf16>
    %cst = arith.constant dense<0.000000e+00> : vector<136x256xf32>
    %4 = tpu.matmul %3, %1, %cst {dimension_numbers = #tpu.dot_dimension_numbers<[1], [0], [0], [1], [0, 0, 1, 1], [], []>} : vector<136x264xbf16>, vector<264x256xbf16>, vector<136x256xf32> -> vector<136x256xf32>
    %c1 = arith.constant 1 : index
    %c0_4 = arith.constant 0 : index
    %c0_5 = arith.constant 0 : index
    %5 = vector.load %arg3[%c1, %c0_4, %c0_5] : memref<5x136x264xbf16, #tpu.memory_space<vmem>>, vector<1x136x264xbf16>
    %6 = vector.shape_cast %5 : vector<1x136x264xbf16> to vector<136x264xbf16>
    %cst_6 = arith.constant dense<0.000000e+00> : vector<136x256xf32>
    %7 = tpu.matmul %6, %1, %cst_6 {dimension_numbers = #tpu.dot_dimension_numbers<[1], [0], [0], [1], [0, 0, 1, 1], [], []>} : vector<136x264xbf16>, vector<264x256xbf16>, vector<136x256xf32> -> vector<136x256xf32>
    %c2 = arith.constant 2 : index
    %c0_7 = arith.constant 0 : index
    %c0_8 = arith.constant 0 : index
    %8 = vector.load %arg3[%c2, %c0_7, %c0_8] : memref<5x136x264xbf16, #tpu.memory_space<vmem>>, vector<1x136x264xbf16>
    %9 = vector.shape_cast %8 : vector<1x136x264xbf16> to vector<136x264xbf16>
    %cst_9 = arith.constant dense<0.000000e+00> : vector<136x256xf32>
    %10 = tpu.matmul %9, %1, %cst_9 {dimension_numbers = #tpu.dot_dimension_numbers<[1], [0], [0], [1], [0, 0, 1, 1], [], []>} : vector<136x264xbf16>, vector<264x256xbf16>, vector<136x256xf32> -> vector<136x256xf32>
    %c3 = arith.constant 3 : index
    %c0_10 = arith.constant 0 : index
    %c0_11 = arith.constant 0 : index
    %11 = vector.load %arg3[%c3, %c0_10, %c0_11] : memref<5x136x264xbf16, #tpu.memory_space<vmem>>, vector<1x136x264xbf16>
    %12 = vector.shape_cast %11 : vector<1x136x264xbf16> to vector<136x264xbf16>
    %cst_12 = arith.constant dense<0.000000e+00> : vector<136x256xf32>
    %13 = tpu.matmul %12, %1, %cst_12 {dimension_numbers = #tpu.dot_dimension_numbers<[1], [0], [0], [1], [0, 0, 1, 1], [], []>} : vector<136x264xbf16>, vector<264x256xbf16>, vector<136x256xf32> -> vector<136x256xf32>
    %c4 = arith.constant 4 : index
    %c0_13 = arith.constant 0 : index
    %c0_14 = arith.constant 0 : index
    %14 = vector.load %arg3[%c4, %c0_13, %c0_14] : memref<5x136x264xbf16, #tpu.memory_space<vmem>>, vector<1x136x264xbf16>
    %15 = vector.shape_cast %14 : vector<1x136x264xbf16> to vector<136x264xbf16>
    %cst_15 = arith.constant dense<0.000000e+00> : vector<136x256xf32>
    %16 = tpu.matmul %15, %1, %cst_15 {dimension_numbers = #tpu.dot_dimension_numbers<[1], [0], [0], [1], [0, 0, 1, 1], [], []>} : vector<136x264xbf16>, vector<264x256xbf16>, vector<136x256xf32> -> vector<136x256xf32>
    %17 = tpu.concatenate %4, %7, %10, %13, %16 in 1 : vector<136x256xf32>, vector<136x256xf32>, vector<136x256xf32>, vector<136x256xf32>, vector<136x256xf32> -> vector<136x1280xf32>
    %18 = arith.truncf %17 : vector<136x1280xf32> to vector<136x1280xbf16>
    %c0_16 = arith.constant 0 : index
    %c0_17 = arith.constant 0 : index
    %19 = vector.load %arg4[%c0_16, %c0_17] : memref<1280x128xbf16, #tpu.memory_space<vmem>>, vector<1280x128xbf16>
    %cst_18 = arith.constant dense<0.000000e+00> : vector<136x128xf32>
    %20 = tpu.matmul %18, %19, %cst_18 {dimension_numbers = #tpu.dot_dimension_numbers<[1], [0], [0], [1], [0, 0, 1, 1], [], []>} : vector<136x1280xbf16>, vector<1280x128xbf16>, vector<136x128xf32> -> vector<136x128xf32>
    %c0_19 = arith.constant 0 : index
    %c0_20 = arith.constant 0 : index
    %21 = vector.load %arg5[%c0_19, %c0_20] : memref<1x128xf32, #tpu.memory_space<vmem>>, vector<1x128xf32>
    %22 = vector.broadcast %21 : vector<1x128xf32> to vector<136x128xf32>
    %23 = arith.addf %20, %22 : vector<136x128xf32>
    %cst_21 = arith.constant 0.000000e+00 : f32
    %24 = vector.broadcast %cst_21 : f32 to vector<136x128xf32>
    %25 = arith.maximumf %23, %24 : vector<136x128xf32>
    %26 = arith.truncf %25 : vector<136x128xf32> to vector<136x128xbf16>
    %c0_22 = arith.constant 0 : index
    %c0_23 = arith.constant 0 : index
    %c0_24 = arith.constant 0 : index
    %27 = vector.load %arg6[%c0_22, %c0_23, %c0_24] : memref<5x72x136xbf16, #tpu.memory_space<vmem>>, vector<1x72x136xbf16>
    %28 = vector.shape_cast %27 : vector<1x72x136xbf16> to vector<72x136xbf16>
    %cst_25 = arith.constant dense<0.000000e+00> : vector<72x128xf32>
    %29 = tpu.matmul %28, %26, %cst_25 {dimension_numbers = #tpu.dot_dimension_numbers<[1], [0], [0], [1], [0, 0, 1, 1], [], []>} : vector<72x136xbf16>, vector<136x128xbf16>, vector<72x128xf32> -> vector<72x128xf32>
    %c1_26 = arith.constant 1 : index
    %c0_27 = arith.constant 0 : index
    %c0_28 = arith.constant 0 : index
    %30 = vector.load %arg6[%c1_26, %c0_27, %c0_28] : memref<5x72x136xbf16, #tpu.memory_space<vmem>>, vector<1x72x136xbf16>
    %31 = vector.shape_cast %30 : vector<1x72x136xbf16> to vector<72x136xbf16>
    %cst_29 = arith.constant dense<0.000000e+00> : vector<72x128xf32>
    %32 = tpu.matmul %31, %26, %cst_29 {dimension_numbers = #tpu.dot_dimension_numbers<[1], [0], [0], [1], [0, 0, 1, 1], [], []>} : vector<72x136xbf16>, vector<136x128xbf16>, vector<72x128xf32> -> vector<72x128xf32>
    %c2_30 = arith.constant 2 : index
    %c0_31 = arith.constant 0 : index
    %c0_32 = arith.constant 0 : index
    %33 = vector.load %arg6[%c2_30, %c0_31, %c0_32] : memref<5x72x136xbf16, #tpu.memory_space<vmem>>, vector<1x72x136xbf16>
    %34 = vector.shape_cast %33 : vector<1x72x136xbf16> to vector<72x136xbf16>
    %cst_33 = arith.constant dense<0.000000e+00> : vector<72x128xf32>
    %35 = tpu.matmul %34, %26, %cst_33 {dimension_numbers = #tpu.dot_dimension_numbers<[1], [0], [0], [1], [0, 0, 1, 1], [], []>} : vector<72x136xbf16>, vector<136x128xbf16>, vector<72x128xf32> -> vector<72x128xf32>
    %c3_34 = arith.constant 3 : index
    %c0_35 = arith.constant 0 : index
    %c0_36 = arith.constant 0 : index
    %36 = vector.load %arg6[%c3_34, %c0_35, %c0_36] : memref<5x72x136xbf16, #tpu.memory_space<vmem>>, vector<1x72x136xbf16>
    %37 = vector.shape_cast %36 : vector<1x72x136xbf16> to vector<72x136xbf16>
    %cst_37 = arith.constant dense<0.000000e+00> : vector<72x128xf32>
    %38 = tpu.matmul %37, %26, %cst_37 {dimension_numbers = #tpu.dot_dimension_numbers<[1], [0], [0], [1], [0, 0, 1, 1], [], []>} : vector<72x136xbf16>, vector<136x128xbf16>, vector<72x128xf32> -> vector<72x128xf32>
    %c4_38 = arith.constant 4 : index
    %c0_39 = arith.constant 0 : index
    %c0_40 = arith.constant 0 : index
    %39 = vector.load %arg6[%c4_38, %c0_39, %c0_40] : memref<5x72x136xbf16, #tpu.memory_space<vmem>>, vector<1x72x136xbf16>
    %40 = vector.shape_cast %39 : vector<1x72x136xbf16> to vector<72x136xbf16>
    %cst_41 = arith.constant dense<0.000000e+00> : vector<72x128xf32>
    %41 = tpu.matmul %40, %26, %cst_41 {dimension_numbers = #tpu.dot_dimension_numbers<[1], [0], [0], [1], [0, 0, 1, 1], [], []>} : vector<72x136xbf16>, vector<136x128xbf16>, vector<72x128xf32> -> vector<72x128xf32>
    %42 = tpu.concatenate %29, %32, %35, %38, %41 in 1 : vector<72x128xf32>, vector<72x128xf32>, vector<72x128xf32>, vector<72x128xf32>, vector<72x128xf32> -> vector<72x640xf32>
    %43 = arith.truncf %42 : vector<72x640xf32> to vector<72x640xbf16>
    %c0_42 = arith.constant 0 : index
    %c0_43 = arith.constant 0 : index
    %44 = vector.load %arg7[%c0_42, %c0_43] : memref<640x128xbf16, #tpu.memory_space<vmem>>, vector<640x128xbf16>
    %cst_44 = arith.constant dense<0.000000e+00> : vector<72x128xf32>
    %45 = tpu.matmul %43, %44, %cst_44 {dimension_numbers = #tpu.dot_dimension_numbers<[1], [0], [0], [1], [0, 0, 1, 1], [], []>} : vector<72x640xbf16>, vector<640x128xbf16>, vector<72x128xf32> -> vector<72x128xf32>
    %c0_45 = arith.constant 0 : index
    %c0_46 = arith.constant 0 : index
    %46 = vector.load %arg8[%c0_45, %c0_46] : memref<1x128xf32, #tpu.memory_space<vmem>>, vector<1x128xf32>
    %47 = vector.broadcast %46 : vector<1x128xf32> to vector<72x128xf32>
    %48 = arith.addf %45, %47 : vector<72x128xf32>
    %cst_47 = arith.constant 0.000000e+00 : f32
    %49 = vector.broadcast %cst_47 : f32 to vector<72x128xf32>
    %50 = arith.maximumf %48, %49 : vector<72x128xf32>
    %51 = arith.truncf %50 : vector<72x128xf32> to vector<72x128xbf16>
    %c0_48 = arith.constant 0 : index
    %c0_49 = arith.constant 0 : index
    %c0_50 = arith.constant 0 : index
    %52 = vector.load %arg9[%c0_48, %c0_49, %c0_50] : memref<3x48x72xbf16, #tpu.memory_space<vmem>>, vector<1x48x72xbf16>
    %53 = vector.shape_cast %52 : vector<1x48x72xbf16> to vector<48x72xbf16>
    %cst_51 = arith.constant dense<0.000000e+00> : vector<48x128xf32>
    %54 = tpu.matmul %53, %51, %cst_51 {dimension_numbers = #tpu.dot_dimension_numbers<[1], [0], [0], [1], [0, 0, 1, 1], [], []>} : vector<48x72xbf16>, vector<72x128xbf16>, vector<48x128xf32> -> vector<48x128xf32>
    %c1_52 = arith.constant 1 : index
    %c0_53 = arith.constant 0 : index
    %c0_54 = arith.constant 0 : index
    %55 = vector.load %arg9[%c1_52, %c0_53, %c0_54] : memref<3x48x72xbf16, #tpu.memory_space<vmem>>, vector<1x48x72xbf16>
    %56 = vector.shape_cast %55 : vector<1x48x72xbf16> to vector<48x72xbf16>
    %cst_55 = arith.constant dense<0.000000e+00> : vector<48x128xf32>
    %57 = tpu.matmul %56, %51, %cst_55 {dimension_numbers = #tpu.dot_dimension_numbers<[1], [0], [0], [1], [0, 0, 1, 1], [], []>} : vector<48x72xbf16>, vector<72x128xbf16>, vector<48x128xf32> -> vector<48x128xf32>
    %c2_56 = arith.constant 2 : index
    %c0_57 = arith.constant 0 : index
    %c0_58 = arith.constant 0 : index
    %58 = vector.load %arg9[%c2_56, %c0_57, %c0_58] : memref<3x48x72xbf16, #tpu.memory_space<vmem>>, vector<1x48x72xbf16>
    %59 = vector.shape_cast %58 : vector<1x48x72xbf16> to vector<48x72xbf16>
    %cst_59 = arith.constant dense<0.000000e+00> : vector<48x128xf32>
    %60 = tpu.matmul %59, %51, %cst_59 {dimension_numbers = #tpu.dot_dimension_numbers<[1], [0], [0], [1], [0, 0, 1, 1], [], []>} : vector<48x72xbf16>, vector<72x128xbf16>, vector<48x128xf32> -> vector<48x128xf32>
    %61 = tpu.concatenate %54, %57, %60 in 1 : vector<48x128xf32>, vector<48x128xf32>, vector<48x128xf32> -> vector<48x384xf32>
    %62 = arith.truncf %61 : vector<48x384xf32> to vector<48x384xbf16>
    %c0_60 = arith.constant 0 : index
    %c0_61 = arith.constant 0 : index
    %63 = vector.load %arg10[%c0_60, %c0_61] : memref<384x128xbf16, #tpu.memory_space<vmem>>, vector<384x128xbf16>
    %cst_62 = arith.constant dense<0.000000e+00> : vector<48x128xf32>
    %64 = tpu.matmul %62, %63, %cst_62 {dimension_numbers = #tpu.dot_dimension_numbers<[1], [0], [0], [1], [0, 0, 1, 1], [], []>} : vector<48x384xbf16>, vector<384x128xbf16>, vector<48x128xf32> -> vector<48x128xf32>
    %c0_63 = arith.constant 0 : index
    %c0_64 = arith.constant 0 : index
    %65 = vector.load %arg11[%c0_63, %c0_64] : memref<1x128xf32, #tpu.memory_space<vmem>>, vector<1x128xf32>
    %66 = vector.broadcast %65 : vector<1x128xf32> to vector<48x128xf32>
    %67 = arith.addf %64, %66 : vector<48x128xf32>
    %cst_65 = arith.constant 0.000000e+00 : f32
    %68 = vector.broadcast %cst_65 : f32 to vector<48x128xf32>
    %69 = arith.maximumf %67, %68 : vector<48x128xf32>
    %70 = arith.truncf %69 : vector<48x128xf32> to vector<48x128xbf16>
    %c0_66 = arith.constant 0 : index
    %c0_67 = arith.constant 0 : index
    %c0_68 = arith.constant 0 : index
    %71 = vector.load %arg12[%c0_66, %c0_67, %c0_68] : memref<6x8x48xbf16, #tpu.memory_space<vmem>>, vector<1x8x48xbf16>
    %72 = vector.shape_cast %71 : vector<1x8x48xbf16> to vector<8x48xbf16>
    %cst_69 = arith.constant dense<0.000000e+00> : vector<8x128xf32>
    %73 = tpu.matmul %72, %70, %cst_69 {dimension_numbers = #tpu.dot_dimension_numbers<[1], [0], [0], [1], [0, 0, 1, 1], [], []>} : vector<8x48xbf16>, vector<48x128xbf16>, vector<8x128xf32> -> vector<8x128xf32>
    %c1_70 = arith.constant 1 : index
    %c0_71 = arith.constant 0 : index
    %c0_72 = arith.constant 0 : index
    %74 = vector.load %arg12[%c1_70, %c0_71, %c0_72] : memref<6x8x48xbf16, #tpu.memory_space<vmem>>, vector<1x8x48xbf16>
    %75 = vector.shape_cast %74 : vector<1x8x48xbf16> to vector<8x48xbf16>
    %cst_73 = arith.constant dense<0.000000e+00> : vector<8x128xf32>
    %76 = tpu.matmul %75, %70, %cst_73 {dimension_numbers = #tpu.dot_dimension_numbers<[1], [0], [0], [1], [0, 0, 1, 1], [], []>} : vector<8x48xbf16>, vector<48x128xbf16>, vector<8x128xf32> -> vector<8x128xf32>
    %c2_74 = arith.constant 2 : index
    %c0_75 = arith.constant 0 : index
    %c0_76 = arith.constant 0 : index
    %77 = vector.load %arg12[%c2_74, %c0_75, %c0_76] : memref<6x8x48xbf16, #tpu.memory_space<vmem>>, vector<1x8x48xbf16>
    %78 = vector.shape_cast %77 : vector<1x8x48xbf16> to vector<8x48xbf16>
    %cst_77 = arith.constant dense<0.000000e+00> : vector<8x128xf32>
    %79 = tpu.matmul %78, %70, %cst_77 {dimension_numbers = #tpu.dot_dimension_numbers<[1], [0], [0], [1], [0, 0, 1, 1], [], []>} : vector<8x48xbf16>, vector<48x128xbf16>, vector<8x128xf32> -> vector<8x128xf32>
    %c3_78 = arith.constant 3 : index
    %c0_79 = arith.constant 0 : index
    %c0_80 = arith.constant 0 : index
    %80 = vector.load %arg12[%c3_78, %c0_79, %c0_80] : memref<6x8x48xbf16, #tpu.memory_space<vmem>>, vector<1x8x48xbf16>
    %81 = vector.shape_cast %80 : vector<1x8x48xbf16> to vector<8x48xbf16>
    %cst_81 = arith.constant dense<0.000000e+00> : vector<8x128xf32>
    %82 = tpu.matmul %81, %70, %cst_81 {dimension_numbers = #tpu.dot_dimension_numbers<[1], [0], [0], [1], [0, 0, 1, 1], [], []>} : vector<8x48xbf16>, vector<48x128xbf16>, vector<8x128xf32> -> vector<8x128xf32>
    %c4_82 = arith.constant 4 : index
    %c0_83 = arith.constant 0 : index
    %c0_84 = arith.constant 0 : index
    %83 = vector.load %arg12[%c4_82, %c0_83, %c0_84] : memref<6x8x48xbf16, #tpu.memory_space<vmem>>, vector<1x8x48xbf16>
    %84 = vector.shape_cast %83 : vector<1x8x48xbf16> to vector<8x48xbf16>
    %cst_85 = arith.constant dense<0.000000e+00> : vector<8x128xf32>
    %85 = tpu.matmul %84, %70, %cst_85 {dimension_numbers = #tpu.dot_dimension_numbers<[1], [0], [0], [1], [0, 0, 1, 1], [], []>} : vector<8x48xbf16>, vector<48x128xbf16>, vector<8x128xf32> -> vector<8x128xf32>
    %c5 = arith.constant 5 : index
    %c0_86 = arith.constant 0 : index
    %c0_87 = arith.constant 0 : index
    %86 = vector.load %arg12[%c5, %c0_86, %c0_87] : memref<6x8x48xbf16, #tpu.memory_space<vmem>>, vector<1x8x48xbf16>
    %87 = vector.shape_cast %86 : vector<1x8x48xbf16> to vector<8x48xbf16>
    %cst_88 = arith.constant dense<0.000000e+00> : vector<8x128xf32>
    %88 = tpu.matmul %87, %70, %cst_88 {dimension_numbers = #tpu.dot_dimension_numbers<[1], [0], [0], [1], [0, 0, 1, 1], [], []>} : vector<8x48xbf16>, vector<48x128xbf16>, vector<8x128xf32> -> vector<8x128xf32>
    %89 = tpu.concatenate %73, %76, %79, %82, %85, %88 in 1 : vector<8x128xf32>, vector<8x128xf32>, vector<8x128xf32>, vector<8x128xf32>, vector<8x128xf32>, vector<8x128xf32> -> vector<8x768xf32>
    %90 = arith.truncf %89 : vector<8x768xf32> to vector<8x768xbf16>
    %c0_89 = arith.constant 0 : index
    %c0_90 = arith.constant 0 : index
    %91 = vector.load %arg13[%c0_89, %c0_90] : memref<768x256xbf16, #tpu.memory_space<vmem>>, vector<768x256xbf16>
    %cst_91 = arith.constant dense<0.000000e+00> : vector<8x256xf32>
    %92 = tpu.matmul %90, %91, %cst_91 {dimension_numbers = #tpu.dot_dimension_numbers<[1], [0], [0], [1], [0, 0, 1, 1], [], []>} : vector<8x768xbf16>, vector<768x256xbf16>, vector<8x256xf32> -> vector<8x256xf32>
    %c0_92 = arith.constant 0 : index
    %c0_93 = arith.constant 0 : index
    %93 = vector.load %arg14[%c0_92, %c0_93] : memref<1x256xf32, #tpu.memory_space<vmem>>, vector<1x256xf32>
    %94 = vector.broadcast %93 : vector<1x256xf32> to vector<8x256xf32>
    %95 = arith.addf %92, %94 : vector<8x256xf32>
    %cst_94 = arith.constant 0.000000e+00 : f32
    %96 = vector.broadcast %cst_94 : f32 to vector<8x256xf32>
    %97 = arith.maximumf %95, %96 : vector<8x256xf32>
    %98 = arith.truncf %97 : vector<8x256xf32> to vector<8x256xbf16>
    %c0_95 = arith.constant 0 : index
    %c0_96 = arith.constant 0 : index
    %99 = vector.load %arg15[%c0_95, %c0_96] : memref<256x128xbf16, #tpu.memory_space<vmem>>, vector<256x128xbf16>
    %cst_97 = arith.constant dense<0.000000e+00> : vector<8x128xf32>
    %100 = tpu.matmul %98, %99, %cst_97 {dimension_numbers = #tpu.dot_dimension_numbers<[1], [0], [0], [1], [0, 0, 1, 1], [], []>} : vector<8x256xbf16>, vector<256x128xbf16>, vector<8x128xf32> -> vector<8x128xf32>
    %c0_98 = arith.constant 0 : index
    %c0_99 = arith.constant 0 : index
    %101 = vector.load %arg16[%c0_98, %c0_99] : memref<1x128xf32, #tpu.memory_space<vmem>>, vector<1x128xf32>
    %102 = vector.broadcast %101 : vector<1x128xf32> to vector<8x128xf32>
    %103 = arith.addf %100, %102 : vector<8x128xf32>
    %104 = vector.extract_strided_slice %103 {offsets = [0, 0], sizes = [8, 32], strides = [1, 1]} : vector<8x128xf32> to vector<8x32xf32>
    %105 = vector.extract_strided_slice %103 {offsets = [0, 32], sizes = [8, 32], strides = [1, 1]} : vector<8x128xf32> to vector<8x32xf32>
    %c0_100 = arith.constant 0 : index
    %c0_101 = arith.constant 0 : index
    %106 = vector.load %arg2[%c0_100, %c0_101] : memref<8x128xf32, #tpu.memory_space<vmem>>, vector<8x128xf32>
    %107 = vector.extract_strided_slice %106 {offsets = [0, 0], sizes = [8, 32], strides = [1, 1]} : vector<8x128xf32> to vector<8x32xf32>
    %cst_102 = arith.constant 5.000000e-01 : f32
    %108 = vector.broadcast %cst_102 : f32 to vector<8x32xf32>
    %109 = arith.mulf %108, %105 : vector<8x32xf32>
    %110 = math.exp %109 : vector<8x32xf32>
    %111 = arith.mulf %107, %110 : vector<8x32xf32>
    %112 = arith.addf %104, %111 : vector<8x32xf32>
    %cst_103 = arith.constant 0.000000e+00 : f32
    %113 = vector.broadcast %cst_103 : f32 to vector<8x32xf32>
    %114 = tpu.concatenate %104, %105, %112, %113 in 1 : vector<8x32xf32>, vector<8x32xf32>, vector<8x32xf32>, vector<8x32xf32> -> vector<8x128xf32>
    %c0_104 = arith.constant 0 : index
    %c0_105 = arith.constant 0 : index
    %115 = vector.load %arg32[%c0_104, %c0_105] : memref<8x128xf32, #tpu.memory_space<vmem>>, vector<8x128xf32>
    tpu.vector_store %arg32[%c0_104, %c0_105], %114 {strides = array<i32>} : memref<8x128xf32, #tpu.memory_space<vmem>>, vector<8x128xf32>,
    %116 = arith.truncf %112 : vector<8x32xf32> to vector<8x32xbf16>
    %c0_106 = arith.constant 0 : index
    %c0_107 = arith.constant 0 : index
    %117 = vector.load %arg17[%c0_106, %c0_107] : memref<32x256xbf16, #tpu.memory_space<vmem>>, vector<32x256xbf16>
    %cst_108 = arith.constant dense<0.000000e+00> : vector<8x256xf32>
    %118 = tpu.matmul %116, %117, %cst_108 {dimension_numbers = #tpu.dot_dimension_numbers<[1], [0], [0], [1], [0, 0, 1, 1], [], []>} : vector<8x32xbf16>, vector<32x256xbf16>, vector<8x256xf32> -> vector<8x256xf32>
    %c0_109 = arith.constant 0 : index
    %c0_110 = arith.constant 0 : index
    %119 = vector.load %arg18[%c0_109, %c0_110] : memref<1x256xf32, #tpu.memory_space<vmem>>, vector<1x256xf32>
    %120 = vector.broadcast %119 : vector<1x256xf32> to vector<8x256xf32>
    %121 = arith.addf %118, %120 : vector<8x256xf32>
    %cst_111 = arith.constant 0.000000e+00 : f32
    %122 = vector.broadcast %cst_111 : f32 to vector<8x256xf32>
    %123 = arith.maximumf %121, %122 : vector<8x256xf32>
    %124 = arith.truncf %123 : vector<8x256xf32> to vector<8x256xbf16>
    %c0_112 = arith.constant 0 : index
    %c0_113 = arith.constant 0 : index
    %125 = vector.load %arg19[%c0_112, %c0_113] : memref<256x768xbf16, #tpu.memory_space<vmem>>, vector<256x768xbf16>
    %cst_114 = arith.constant dense<0.000000e+00> : vector<8x768xf32>
    %126 = tpu.matmul %124, %125, %cst_114 {dimension_numbers = #tpu.dot_dimension_numbers<[1], [0], [0], [1], [0, 0, 1, 1], [], []>} : vector<8x256xbf16>, vector<256x768xbf16>, vector<8x768xf32> -> vector<8x768xf32>
    %c0_115 = arith.constant 0 : index
    %c0_116 = arith.constant 0 : index
    %127 = vector.load %arg20[%c0_115, %c0_116] : memref<1x768xf32, #tpu.memory_space<vmem>>, vector<1x768xf32>
    %128 = vector.broadcast %127 : vector<1x768xf32> to vector<8x768xf32>
    %129 = arith.addf %126, %128 : vector<8x768xf32>
    %cst_117 = arith.constant 0.000000e+00 : f32
    %130 = vector.broadcast %cst_117 : f32 to vector<8x768xf32>
    %131 = arith.maximumf %129, %130 : vector<8x768xf32>
    %132 = arith.truncf %131 : vector<8x768xf32> to vector<8x768xbf16>
    %cst_118 = arith.constant 0.000000e+00 : f32
    %133 = vector.broadcast %cst_118 : f32 to vector<48x128xf32>
    %c0_119 = arith.constant 0 : index
    %c0_120 = arith.constant 0 : index
    %c0_121 = arith.constant 0 : index
    %134 = vector.load %arg21[%c0_119, %c0_120, %c0_121] : memref<6x48x8xbf16, #tpu.memory_space<vmem>>, vector<1x48x8xbf16>
    %135 = vector.shape_cast %134 : vector<1x48x8xbf16> to vector<48x8xbf16>
    %136 = vector.extract_strided_slice %132 {offsets = [0, 0], sizes = [8, 128], strides = [1, 1]} : vector<8x768xbf16> to vector<8x128xbf16>
    %cst_122 = arith.constant dense<0.000000e+00> : vector<48x128xf32>
    %137 = tpu.matmul %135, %136, %cst_122 {dimension_numbers = #tpu.dot_dimension_numbers<[1], [0], [0], [1], [0, 0, 1, 1], [], []>} : vector<48x8xbf16>, vector<8x128xbf16>, vector<48x128xf32> -> vector<48x128xf32>
    %138 = arith.addf %133, %137 : vector<48x128xf32>
    %c1_123 = arith.constant 1 : index
    %c0_124 = arith.constant 0 : index
    %c0_125 = arith.constant 0 : index
    %139 = vector.load %arg21[%c1_123, %c0_124, %c0_125] : memref<6x48x8xbf16, #tpu.memory_space<vmem>>, vector<1x48x8xbf16>
    %140 = vector.shape_cast %139 : vector<1x48x8xbf16> to vector<48x8xbf16>
    %141 = vector.extract_strided_slice %132 {offsets = [0, 128], sizes = [8, 128], strides = [1, 1]} : vector<8x768xbf16> to vector<8x128xbf16>
    %cst_126 = arith.constant dense<0.000000e+00> : vector<48x128xf32>
    %142 = tpu.matmul %140, %141, %cst_126 {dimension_numbers = #tpu.dot_dimension_numbers<[1], [0], [0], [1], [0, 0, 1, 1], [], []>} : vector<48x8xbf16>, vector<8x128xbf16>, vector<48x128xf32> -> vector<48x128xf32>
    %143 = arith.addf %138, %142 : vector<48x128xf32>
    %c2_127 = arith.constant 2 : index
    %c0_128 = arith.constant 0 : index
    %c0_129 = arith.constant 0 : index
    %144 = vector.load %arg21[%c2_127, %c0_128, %c0_129] : memref<6x48x8xbf16, #tpu.memory_space<vmem>>, vector<1x48x8xbf16>
    %145 = vector.shape_cast %144 : vector<1x48x8xbf16> to vector<48x8xbf16>
    %146 = vector.extract_strided_slice %132 {offsets = [0, 256], sizes = [8, 128], strides = [1, 1]} : vector<8x768xbf16> to vector<8x128xbf16>
    %cst_130 = arith.constant dense<0.000000e+00> : vector<48x128xf32>
    %147 = tpu.matmul %145, %146, %cst_130 {dimension_numbers = #tpu.dot_dimension_numbers<[1], [0], [0], [1], [0, 0, 1, 1], [], []>} : vector<48x8xbf16>, vector<8x128xbf16>, vector<48x128xf32> -> vector<48x128xf32>
    %148 = arith.addf %143, %147 : vector<48x128xf32>
    %c3_131 = arith.constant 3 : index
    %c0_132 = arith.constant 0 : index
    %c0_133 = arith.constant 0 : index
    %149 = vector.load %arg21[%c3_131, %c0_132, %c0_133] : memref<6x48x8xbf16, #tpu.memory_space<vmem>>, vector<1x48x8xbf16>
    %150 = vector.shape_cast %149 : vector<1x48x8xbf16> to vector<48x8xbf16>
    %151 = vector.extract_strided_slice %132 {offsets = [0, 384], sizes = [8, 128], strides = [1, 1]} : vector<8x768xbf16> to vector<8x128xbf16>
    %cst_134 = arith.constant dense<0.000000e+00> : vector<48x128xf32>
    %152 = tpu.matmul %150, %151, %cst_134 {dimension_numbers = #tpu.dot_dimension_numbers<[1], [0], [0], [1], [0, 0, 1, 1], [], []>} : vector<48x8xbf16>, vector<8x128xbf16>, vector<48x128xf32> -> vector<48x128xf32>
    %153 = arith.addf %148, %152 : vector<48x128xf32>
    %c4_135 = arith.constant 4 : index
    %c0_136 = arith.constant 0 : index
    %c0_137 = arith.constant 0 : index
    %154 = vector.load %arg21[%c4_135, %c0_136, %c0_137] : memref<6x48x8xbf16, #tpu.memory_space<vmem>>, vector<1x48x8xbf16>
    %155 = vector.shape_cast %154 : vector<1x48x8xbf16> to vector<48x8xbf16>
    %156 = vector.extract_strided_slice %132 {offsets = [0, 512], sizes = [8, 128], strides = [1, 1]} : vector<8x768xbf16> to vector<8x128xbf16>
    %cst_138 = arith.constant dense<0.000000e+00> : vector<48x128xf32>
    %157 = tpu.matmul %155, %156, %cst_138 {dimension_numbers = #tpu.dot_dimension_numbers<[1], [0], [0], [1], [0, 0, 1, 1], [], []>} : vector<48x8xbf16>, vector<8x128xbf16>, vector<48x128xf32> -> vector<48x128xf32>
    %158 = arith.addf %153, %157 : vector<48x128xf32>
    %c5_139 = arith.constant 5 : index
    %c0_140 = arith.constant 0 : index
    %c0_141 = arith.constant 0 : index
    %159 = vector.load %arg21[%c5_139, %c0_140, %c0_141] : memref<6x48x8xbf16, #tpu.memory_space<vmem>>, vector<1x48x8xbf16>
    %160 = vector.shape_cast %159 : vector<1x48x8xbf16> to vector<48x8xbf16>
    %161 = vector.extract_strided_slice %132 {offsets = [0, 640], sizes = [8, 128], strides = [1, 1]} : vector<8x768xbf16> to vector<8x128xbf16>
    %cst_142 = arith.constant dense<0.000000e+00> : vector<48x128xf32>
    %162 = tpu.matmul %160, %161, %cst_142 {dimension_numbers = #tpu.dot_dimension_numbers<[1], [0], [0], [1], [0, 0, 1, 1], [], []>} : vector<48x8xbf16>, vector<8x128xbf16>, vector<48x128xf32> -> vector<48x128xf32>
    %163 = arith.addf %158, %162 : vector<48x128xf32>
    %164 = arith.truncf %163 : vector<48x128xf32> to vector<48x128xbf16>
    %c0_143 = arith.constant 0 : index
    %c0_144 = arith.constant 0 : index
    %c0_145 = arith.constant 0 : index
    %165 = vector.load %arg22[%c0_143, %c0_144, %c0_145] : memref<3x72x48xbf16, #tpu.memory_space<vmem>>, vector<1x72x48xbf16>
    %166 = vector.shape_cast %165 : vector<1x72x48xbf16> to vector<72x48xbf16>
    %cst_146 = arith.constant dense<0.000000e+00> : vector<72x128xf32>
    %167 = tpu.matmul %166, %164, %cst_146 {dimension_numbers = #tpu.dot_dimension_numbers<[1], [0], [0], [1], [0, 0, 1, 1], [], []>} : vector<72x48xbf16>, vector<48x128xbf16>, vector<72x128xf32> -> vector<72x128xf32>
    %c1_147 = arith.constant 1 : index
    %c0_148 = arith.constant 0 : index
    %c0_149 = arith.constant 0 : index
    %168 = vector.load %arg22[%c1_147, %c0_148, %c0_149] : memref<3x72x48xbf16, #tpu.memory_space<vmem>>, vector<1x72x48xbf16>
    %169 = vector.shape_cast %168 : vector<1x72x48xbf16> to vector<72x48xbf16>
    %cst_150 = arith.constant dense<0.000000e+00> : vector<72x128xf32>
    %170 = tpu.matmul %169, %164, %cst_150 {dimension_numbers = #tpu.dot_dimension_numbers<[1], [0], [0], [1], [0, 0, 1, 1], [], []>} : vector<72x48xbf16>, vector<48x128xbf16>, vector<72x128xf32> -> vector<72x128xf32>
    %c2_151 = arith.constant 2 : index
    %c0_152 = arith.constant 0 : index
    %c0_153 = arith.constant 0 : index
    %171 = vector.load %arg22[%c2_151, %c0_152, %c0_153] : memref<3x72x48xbf16, #tpu.memory_space<vmem>>, vector<1x72x48xbf16>
    %172 = vector.shape_cast %171 : vector<1x72x48xbf16> to vector<72x48xbf16>
    %cst_154 = arith.constant dense<0.000000e+00> : vector<72x128xf32>
    %173 = tpu.matmul %172, %164, %cst_154 {dimension_numbers = #tpu.dot_dimension_numbers<[1], [0], [0], [1], [0, 0, 1, 1], [], []>} : vector<72x48xbf16>, vector<48x128xbf16>, vector<72x128xf32> -> vector<72x128xf32>
    %174 = tpu.concatenate %167, %170, %173 in 1 : vector<72x128xf32>, vector<72x128xf32>, vector<72x128xf32> -> vector<72x384xf32>
    %175 = arith.truncf %174 : vector<72x384xf32> to vector<72x384xbf16>
    %c0_155 = arith.constant 0 : index
    %c0_156 = arith.constant 0 : index
    %176 = vector.load %arg23[%c0_155, %c0_156] : memref<384x128xbf16, #tpu.memory_space<vmem>>, vector<384x128xbf16>
    %cst_157 = arith.constant dense<0.000000e+00> : vector<72x128xf32>
    %177 = tpu.matmul %175, %176, %cst_157 {dimension_numbers = #tpu.dot_dimension_numbers<[1], [0], [0], [1], [0, 0, 1, 1], [], []>} : vector<72x384xbf16>, vector<384x128xbf16>, vector<72x128xf32> -> vector<72x128xf32>
    %c0_158 = arith.constant 0 : index
    %c0_159 = arith.constant 0 : index
    %178 = vector.load %arg24[%c0_158, %c0_159] : memref<1x128xf32, #tpu.memory_space<vmem>>, vector<1x128xf32>
    %179 = vector.broadcast %178 : vector<1x128xf32> to vector<72x128xf32>
    %180 = arith.addf %177, %179 : vector<72x128xf32>
    %cst_160 = arith.constant 0.000000e+00 : f32
    %181 = vector.broadcast %cst_160 : f32 to vector<72x128xf32>
    %182 = arith.maximumf %180, %181 : vector<72x128xf32>
    %183 = arith.truncf %182 : vector<72x128xf32> to vector<72x128xbf16>
    %c0_161 = arith.constant 0 : index
    %c0_162 = arith.constant 0 : index
    %c0_163 = arith.constant 0 : index
    %184 = vector.load %arg25[%c0_161, %c0_162, %c0_163] : memref<5x136x72xbf16, #tpu.memory_space<vmem>>, vector<1x136x72xbf16>
    %185 = vector.shape_cast %184 : vector<1x136x72xbf16> to vector<136x72xbf16>
    %cst_164 = arith.constant dense<0.000000e+00> : vector<136x128xf32>
    %186 = tpu.matmul %185, %183, %cst_164 {dimension_numbers = #tpu.dot_dimension_numbers<[1], [0], [0], [1], [0, 0, 1, 1], [], []>} : vector<136x72xbf16>, vector<72x128xbf16>, vector<136x128xf32> -> vector<136x128xf32>
    %c1_165 = arith.constant 1 : index
    %c0_166 = arith.constant 0 : index
    %c0_167 = arith.constant 0 : index
    %187 = vector.load %arg25[%c1_165, %c0_166, %c0_167] : memref<5x136x72xbf16, #tpu.memory_space<vmem>>, vector<1x136x72xbf16>
    %188 = vector.shape_cast %187 : vector<1x136x72xbf16> to vector<136x72xbf16>
    %cst_168 = arith.constant dense<0.000000e+00> : vector<136x128xf32>
    %189 = tpu.matmul %188, %183, %cst_168 {dimension_numbers = #tpu.dot_dimension_numbers<[1], [0], [0], [1], [0, 0, 1, 1], [], []>} : vector<136x72xbf16>, vector<72x128xbf16>, vector<136x128xf32> -> vector<136x128xf32>
    %c2_169 = arith.constant 2 : index
    %c0_170 = arith.constant 0 : index
    %c0_171 = arith.constant 0 : index
    %190 = vector.load %arg25[%c2_169, %c0_170, %c0_171] : memref<5x136x72xbf16, #tpu.memory_space<vmem>>, vector<1x136x72xbf16>
    %191 = vector.shape_cast %190 : vector<1x136x72xbf16> to vector<136x72xbf16>
    %cst_172 = arith.constant dense<0.000000e+00> : vector<136x128xf32>
    %192 = tpu.matmul %191, %183, %cst_172 {dimension_numbers = #tpu.dot_dimension_numbers<[1], [0], [0], [1], [0, 0, 1, 1], [], []>} : vector<136x72xbf16>, vector<72x128xbf16>, vector<136x128xf32> -> vector<136x128xf32>
    %c3_173 = arith.constant 3 : index
    %c0_174 = arith.constant 0 : index
    %c0_175 = arith.constant 0 : index
    %193 = vector.load %arg25[%c3_173, %c0_174, %c0_175] : memref<5x136x72xbf16, #tpu.memory_space<vmem>>, vector<1x136x72xbf16>
    %194 = vector.shape_cast %193 : vector<1x136x72xbf16> to vector<136x72xbf16>
    %cst_176 = arith.constant dense<0.000000e+00> : vector<136x128xf32>
    %195 = tpu.matmul %194, %183, %cst_176 {dimension_numbers = #tpu.dot_dimension_numbers<[1], [0], [0], [1], [0, 0, 1, 1], [], []>} : vector<136x72xbf16>, vector<72x128xbf16>, vector<136x128xf32> -> vector<136x128xf32>
    %c4_177 = arith.constant 4 : index
    %c0_178 = arith.constant 0 : index
    %c0_179 = arith.constant 0 : index
    %196 = vector.load %arg25[%c4_177, %c0_178, %c0_179] : memref<5x136x72xbf16, #tpu.memory_space<vmem>>, vector<1x136x72xbf16>
    %197 = vector.shape_cast %196 : vector<1x136x72xbf16> to vector<136x72xbf16>
    %cst_180 = arith.constant dense<0.000000e+00> : vector<136x128xf32>
    %198 = tpu.matmul %197, %183, %cst_180 {dimension_numbers = #tpu.dot_dimension_numbers<[1], [0], [0], [1], [0, 0, 1, 1], [], []>} : vector<136x72xbf16>, vector<72x128xbf16>, vector<136x128xf32> -> vector<136x128xf32>
    %199 = tpu.concatenate %186, %189, %192, %195, %198 in 1 : vector<136x128xf32>, vector<136x128xf32>, vector<136x128xf32>, vector<136x128xf32>, vector<136x128xf32> -> vector<136x640xf32>
    %200 = arith.truncf %199 : vector<136x640xf32> to vector<136x640xbf16>
    %c0_181 = arith.constant 0 : index
    %c0_182 = arith.constant 0 : index
    %201 = vector.load %arg26[%c0_181, %c0_182] : memref<640x128xbf16, #tpu.memory_space<vmem>>, vector<640x128xbf16>
    %cst_183 = arith.constant dense<0.000000e+00> : vector<136x128xf32>
    %202 = tpu.matmul %200, %201, %cst_183 {dimension_numbers = #tpu.dot_dimension_numbers<[1], [0], [0], [1], [0, 0, 1, 1], [], []>} : vector<136x640xbf16>, vector<640x128xbf16>, vector<136x128xf32> -> vector<136x128xf32>
    %c0_184 = arith.constant 0 : index
    %c0_185 = arith.constant 0 : index
    %203 = vector.load %arg27[%c0_184, %c0_185] : memref<1x128xf32, #tpu.memory_space<vmem>>, vector<1x128xf32>
    %204 = vector.broadcast %203 : vector<1x128xf32> to vector<136x128xf32>
    %205 = arith.addf %202, %204 : vector<136x128xf32>
    %cst_186 = arith.constant 0.000000e+00 : f32
    %206 = vector.broadcast %cst_186 : f32 to vector<136x128xf32>
    %207 = arith.maximumf %205, %206 : vector<136x128xf32>
    %208 = arith.truncf %207 : vector<136x128xf32> to vector<136x128xbf16>
    %c0_187 = arith.constant 0 : index
    %c0_188 = arith.constant 0 : index
    %c0_189 = arith.constant 0 : index
    %209 = vector.load %arg28[%c0_187, %c0_188, %c0_189] : memref<5x264x136xbf16, #tpu.memory_space<vmem>>, vector<1x264x136xbf16>
    %210 = vector.shape_cast %209 : vector<1x264x136xbf16> to vector<264x136xbf16>
    %cst_190 = arith.constant dense<0.000000e+00> : vector<264x128xf32>
    %211 = tpu.matmul %210, %208, %cst_190 {dimension_numbers = #tpu.dot_dimension_numbers<[1], [0], [0], [1], [0, 0, 1, 1], [], []>} : vector<264x136xbf16>, vector<136x128xbf16>, vector<264x128xf32> -> vector<264x128xf32>
    %c1_191 = arith.constant 1 : index
    %c0_192 = arith.constant 0 : index
    %c0_193 = arith.constant 0 : index
    %212 = vector.load %arg28[%c1_191, %c0_192, %c0_193] : memref<5x264x136xbf16, #tpu.memory_space<vmem>>, vector<1x264x136xbf16>
    %213 = vector.shape_cast %212 : vector<1x264x136xbf16> to vector<264x136xbf16>
    %cst_194 = arith.constant dense<0.000000e+00> : vector<264x128xf32>
    %214 = tpu.matmul %213, %208, %cst_194 {dimension_numbers = #tpu.dot_dimension_numbers<[1], [0], [0], [1], [0, 0, 1, 1], [], []>} : vector<264x136xbf16>, vector<136x128xbf16>, vector<264x128xf32> -> vector<264x128xf32>
    %c2_195 = arith.constant 2 : index
    %c0_196 = arith.constant 0 : index
    %c0_197 = arith.constant 0 : index
    %215 = vector.load %arg28[%c2_195, %c0_196, %c0_197] : memref<5x264x136xbf16, #tpu.memory_space<vmem>>, vector<1x264x136xbf16>
    %216 = vector.shape_cast %215 : vector<1x264x136xbf16> to vector<264x136xbf16>
    %cst_198 = arith.constant dense<0.000000e+00> : vector<264x128xf32>
    %217 = tpu.matmul %216, %208, %cst_198 {dimension_numbers = #tpu.dot_dimension_numbers<[1], [0], [0], [1], [0, 0, 1, 1], [], []>} : vector<264x136xbf16>, vector<136x128xbf16>, vector<264x128xf32> -> vector<264x128xf32>
    %c3_199 = arith.constant 3 : index
    %c0_200 = arith.constant 0 : index
    %c0_201 = arith.constant 0 : index
    %218 = vector.load %arg28[%c3_199, %c0_200, %c0_201] : memref<5x264x136xbf16, #tpu.memory_space<vmem>>, vector<1x264x136xbf16>
    %219 = vector.shape_cast %218 : vector<1x264x136xbf16> to vector<264x136xbf16>
    %cst_202 = arith.constant dense<0.000000e+00> : vector<264x128xf32>
    %220 = tpu.matmul %219, %208, %cst_202 {dimension_numbers = #tpu.dot_dimension_numbers<[1], [0], [0], [1], [0, 0, 1, 1], [], []>} : vector<264x136xbf16>, vector<136x128xbf16>, vector<264x128xf32> -> vector<264x128xf32>
    %c4_203 = arith.constant 4 : index
    %c0_204 = arith.constant 0 : index
    %c0_205 = arith.constant 0 : index
    %221 = vector.load %arg28[%c4_203, %c0_204, %c0_205] : memref<5x264x136xbf16, #tpu.memory_space<vmem>>, vector<1x264x136xbf16>
    %222 = vector.shape_cast %221 : vector<1x264x136xbf16> to vector<264x136xbf16>
    %cst_206 = arith.constant dense<0.000000e+00> : vector<264x128xf32>
    %223 = tpu.matmul %222, %208, %cst_206 {dimension_numbers = #tpu.dot_dimension_numbers<[1], [0], [0], [1], [0, 0, 1, 1], [], []>} : vector<264x136xbf16>, vector<136x128xbf16>, vector<264x128xf32> -> vector<264x128xf32>
    %224 = tpu.concatenate %211, %214, %217, %220, %223 in 1 : vector<264x128xf32>, vector<264x128xf32>, vector<264x128xf32>, vector<264x128xf32>, vector<264x128xf32> -> vector<264x640xf32>
    %225 = arith.truncf %224 : vector<264x640xf32> to vector<264x640xbf16>
    %c0_207 = arith.constant 0 : index
    %c0_208 = arith.constant 0 : index
    %226 = vector.load %arg29[%c0_207, %c0_208] : memref<640x256xbf16, #tpu.memory_space<vmem>>, vector<640x256xbf16>
    %cst_209 = arith.constant dense<0.000000e+00> : vector<264x256xf32>
    %227 = tpu.matmul %225, %226, %cst_209 {dimension_numbers = #tpu.dot_dimension_numbers<[1], [0], [0], [1], [0, 0, 1, 1], [], []>} : vector<264x640xbf16>, vector<640x256xbf16>, vector<264x256xf32> -> vector<264x256xf32>
    %c0_210 = arith.constant 0 : index
    %c0_211 = arith.constant 0 : index
    %228 = vector.load %arg30[%c0_210, %c0_211] : memref<1x256xf32, #tpu.memory_space<vmem>>, vector<1x256xf32>
    %229 = vector.broadcast %228 : vector<1x256xf32> to vector<264x256xf32>
    %230 = arith.addf %227, %229 : vector<264x256xf32>
    %c0_212 = arith.constant 0 : index
    %c0_213 = arith.constant 0 : index
    %231 = vector.load %arg31[%c0_212, %c0_213] : memref<264x256xf32, #tpu.memory_space<vmem>>, vector<264x256xf32>
    tpu.vector_store %arg31[%c0_212, %c0_213], %230 {strides = array<i32>} : memref<264x256xf32, #tpu.memory_space<vmem>>, vector<264x256xf32>,
    return
  }
  func.func @transform_0(%arg0: i32) -> (i32, i32) {
    %c0_i32 = arith.constant 0 : i32
    %c0_i32_0 = arith.constant 0 : i32
    return %arg0, %c0_i32 : i32, i32
  }
  func.func @transform_1(%arg0: i32) -> (i32, i32) {
    %c0_i32 = arith.constant 0 : i32
    %c0_i32_0 = arith.constant 0 : i32
    return %arg0, %c0_i32 : i32, i32
  }
  func.func @transform_2(%arg0: i32) -> (i32, i32, i32) {
    %c0_i32 = arith.constant 0 : i32
    %c0_i32_0 = arith.constant 0 : i32
    %c0_i32_1 = arith.constant 0 : i32
    %c0_i32_2 = arith.constant 0 : i32
    return %c0_i32, %c0_i32_0, %c0_i32_1 : i32, i32, i32
  }
  func.func @transform_3(%arg0: i32) -> (i32, i32) {
    %c0_i32 = arith.constant 0 : i32
    %c0_i32_0 = arith.constant 0 : i32
    %c0_i32_1 = arith.constant 0 : i32
    return %c0_i32, %c0_i32_0 : i32, i32
  }
  func.func @transform_4(%arg0: i32) -> (i32, i32) {
    %c0_i32 = arith.constant 0 : i32
    %c0_i32_0 = arith.constant 0 : i32
    %c0_i32_1 = arith.constant 0 : i32
    return %c0_i32, %c0_i32_0 : i32, i32
  }
  func.func @transform_5(%arg0: i32) -> (i32, i32, i32) {
    %c0_i32 = arith.constant 0 : i32
    %c0_i32_0 = arith.constant 0 : i32
    %c0_i32_1 = arith.constant 0 : i32
    %c0_i32_2 = arith.constant 0 : i32
    return %c0_i32, %c0_i32_0, %c0_i32_1 : i32, i32, i32
  }
  func.func @transform_6(%arg0: i32) -> (i32, i32) {
    %c0_i32 = arith.constant 0 : i32
    %c0_i32_0 = arith.constant 0 : i32
    %c0_i32_1 = arith.constant 0 : i32
    return %c0_i32, %c0_i32_0 : i32, i32
  }
  func.func @transform_7(%arg0: i32) -> (i32, i32) {
    %c0_i32 = arith.constant 0 : i32
    %c0_i32_0 = arith.constant 0 : i32
    %c0_i32_1 = arith.constant 0 : i32
    return %c0_i32, %c0_i32_0 : i32, i32
  }
  func.func @transform_8(%arg0: i32) -> (i32, i32, i32) {
    %c0_i32 = arith.constant 0 : i32
    %c0_i32_0 = arith.constant 0 : i32
    %c0_i32_1 = arith.constant 0 : i32
    %c0_i32_2 = arith.constant 0 : i32
    return %c0_i32, %c0_i32_0, %c0_i32_1 : i32, i32, i32
  }
  func.func @transform_9(%arg0: i32) -> (i32, i32) {
    %c0_i32 = arith.constant 0 : i32
    %c0_i32_0 = arith.constant 0 : i32
    %c0_i32_1 = arith.constant 0 : i32
    return %c0_i32, %c0_i32_0 : i32, i32
  }
  func.func @transform_10(%arg0: i32) -> (i32, i32) {
    %c0_i32 = arith.constant 0 : i32
    %c0_i32_0 = arith.constant 0 : i32
    %c0_i32_1 = arith.constant 0 : i32
    return %c0_i32, %c0_i32_0 : i32, i32
  }
  func.func @transform_11(%arg0: i32) -> (i32, i32, i32) {
    %c0_i32 = arith.constant 0 : i32
    %c0_i32_0 = arith.constant 0 : i32
    %c0_i32_1 = arith.constant 0 : i32
    %c0_i32_2 = arith.constant 0 : i32
    return %c0_i32, %c0_i32_0, %c0_i32_1 : i32, i32, i32
  }
  func.func @transform_12(%arg0: i32) -> (i32, i32) {
    %c0_i32 = arith.constant 0 : i32
    %c0_i32_0 = arith.constant 0 : i32
    %c0_i32_1 = arith.constant 0 : i32
    return %c0_i32, %c0_i32_0 : i32, i32
  }
  func.func @transform_13(%arg0: i32) -> (i32, i32) {
    %c0_i32 = arith.constant 0 : i32
    %c0_i32_0 = arith.constant 0 : i32
    %c0_i32_1 = arith.constant 0 : i32
    return %c0_i32, %c0_i32_0 : i32, i32
  }
  func.func @transform_14(%arg0: i32) -> (i32, i32) {
    %c0_i32 = arith.constant 0 : i32
    %c0_i32_0 = arith.constant 0 : i32
    %c0_i32_1 = arith.constant 0 : i32
    return %c0_i32, %c0_i32_0 : i32, i32
  }
  func.func @transform_15(%arg0: i32) -> (i32, i32) {
    %c0_i32 = arith.constant 0 : i32
    %c0_i32_0 = arith.constant 0 : i32
    %c0_i32_1 = arith.constant 0 : i32
    return %c0_i32, %c0_i32_0 : i32, i32
  }
  func.func @transform_16(%arg0: i32) -> (i32, i32) {
    %c0_i32 = arith.constant 0 : i32
    %c0_i32_0 = arith.constant 0 : i32
    %c0_i32_1 = arith.constant 0 : i32
    return %c0_i32, %c0_i32_0 : i32, i32
  }
  func.func @transform_17(%arg0: i32) -> (i32, i32) {
    %c0_i32 = arith.constant 0 : i32
    %c0_i32_0 = arith.constant 0 : i32
    %c0_i32_1 = arith.constant 0 : i32
    return %c0_i32, %c0_i32_0 : i32, i32
  }
  func.func @transform_18(%arg0: i32) -> (i32, i32) {
    %c0_i32 = arith.constant 0 : i32
    %c0_i32_0 = arith.constant 0 : i32
    %c0_i32_1 = arith.constant 0 : i32
    return %c0_i32, %c0_i32_0 : i32, i32
  }
  func.func @transform_19(%arg0: i32) -> (i32, i32) {
    %c0_i32 = arith.constant 0 : i32
    %c0_i32_0 = arith.constant 0 : i32
    %c0_i32_1 = arith.constant 0 : i32
    return %c0_i32, %c0_i32_0 : i32, i32
  }
  func.func @transform_20(%arg0: i32) -> (i32, i32, i32) {
    %c0_i32 = arith.constant 0 : i32
    %c0_i32_0 = arith.constant 0 : i32
    %c0_i32_1 = arith.constant 0 : i32
    %c0_i32_2 = arith.constant 0 : i32
    return %c0_i32, %c0_i32_0, %c0_i32_1 : i32, i32, i32
  }
  func.func @transform_21(%arg0: i32) -> (i32, i32, i32) {
    %c0_i32 = arith.constant 0 : i32
    %c0_i32_0 = arith.constant 0 : i32
    %c0_i32_1 = arith.constant 0 : i32
    %c0_i32_2 = arith.constant 0 : i32
    return %c0_i32, %c0_i32_0, %c0_i32_1 : i32, i32, i32
  }
  func.func @transform_22(%arg0: i32) -> (i32, i32) {
    %c0_i32 = arith.constant 0 : i32
    %c0_i32_0 = arith.constant 0 : i32
    %c0_i32_1 = arith.constant 0 : i32
    return %c0_i32, %c0_i32_0 : i32, i32
  }
  func.func @transform_23(%arg0: i32) -> (i32, i32) {
    %c0_i32 = arith.constant 0 : i32
    %c0_i32_0 = arith.constant 0 : i32
    %c0_i32_1 = arith.constant 0 : i32
    return %c0_i32, %c0_i32_0 : i32, i32
  }
  func.func @transform_24(%arg0: i32) -> (i32, i32, i32) {
    %c0_i32 = arith.constant 0 : i32
    %c0_i32_0 = arith.constant 0 : i32
    %c0_i32_1 = arith.constant 0 : i32
    %c0_i32_2 = arith.constant 0 : i32
    return %c0_i32, %c0_i32_0, %c0_i32_1 : i32, i32, i32
  }
  func.func @transform_25(%arg0: i32) -> (i32, i32) {
    %c0_i32 = arith.constant 0 : i32
    %c0_i32_0 = arith.constant 0 : i32
    %c0_i32_1 = arith.constant 0 : i32
    return %c0_i32, %c0_i32_0 : i32, i32
  }
  func.func @transform_26(%arg0: i32) -> (i32, i32) {
    %c0_i32 = arith.constant 0 : i32
    %c0_i32_0 = arith.constant 0 : i32
    %c0_i32_1 = arith.constant 0 : i32
    return %c0_i32, %c0_i32_0 : i32, i32
  }
  func.func @transform_27(%arg0: i32) -> (i32, i32, i32) {
    %c0_i32 = arith.constant 0 : i32
    %c0_i32_0 = arith.constant 0 : i32
    %c0_i32_1 = arith.constant 0 : i32
    %c0_i32_2 = arith.constant 0 : i32
    return %c0_i32, %c0_i32_0, %c0_i32_1 : i32, i32, i32
  }
  func.func @transform_28(%arg0: i32) -> (i32, i32) {
    %c0_i32 = arith.constant 0 : i32
    %c0_i32_0 = arith.constant 0 : i32
    %c0_i32_1 = arith.constant 0 : i32
    return %c0_i32, %c0_i32_0 : i32, i32
  }
  func.func @transform_29(%arg0: i32) -> (i32, i32) {
    %c0_i32 = arith.constant 0 : i32
    %c0_i32_0 = arith.constant 0 : i32
    %c0_i32_1 = arith.constant 0 : i32
    return %c0_i32, %c0_i32_0 : i32, i32
  }
  func.func @transform_30(%arg0: i32) -> (i32, i32) {
    %c0_i32 = arith.constant 0 : i32
    %c0_i32_0 = arith.constant 0 : i32
    return %arg0, %c0_i32 : i32, i32
  }
  func.func @transform_31(%arg0: i32) -> (i32, i32) {
    %c0_i32 = arith.constant 0 : i32
    %c0_i32_0 = arith.constant 0 : i32
    return %arg0, %c0_i32 : i32, i32
  }
}

</mosaic_0001>

<bundles_post_ra>
// kernel: vae_forward.1
= control target key start
LH: loop header
LB: loop body
LE: loop exit
PB: predicated region body
PF: predicated region fallthrough
CT: control target
= control target key end

     0   :  { %s19393_s6 = smov 1   ;;  %s19394_s10 = smov 2   ;;  %s22739_s0 = inlined_call_operand.smem [shape: u32[32], index: -1, kind: input, shape index: {}] }
   0x1   :  { %s19455_s5 = sld [smem:[%s22739_s0]]   ;;  %s19395_s14 = smov 3  }
   0x2   :  { %s19460_s9 = sld [smem:[%s22739_s0 + %s19393_s6]]   ;;  %s19396_s18 = smov 4  }
   0x3   :  { %s19465_s13 = sld [smem:[%s22739_s0 + %s19394_s10]]   ;;  %s19397_s22 = smov 5  }
   0x4   :  { %s19470_s17 = sld [smem:[%s22739_s0 + %s19395_s14]]   ;;  %s19398_s26 = smov 6  }
   0x5   :  { %s19475_s21 = sld [smem:[%s22739_s0 + %s19396_s18]]   ;;  %s19399_s30 = smov 7  }
   0x6   :  { %s19480_s25 = sld [smem:[%s22739_s0 + %s19397_s22]]   ;;  %s19400_s4 = smov 8  }
   0x7   :  { %22755 = sst [smem:[#allocation37_spill]] %s19455_s5  ;;  %s19401_s10 = smov 9  }
   0x8   :  { %22756 = sst [smem:[#allocation38_spill]] %s19460_s9  ;;  %s19402_s15 = smov 10  }
   0x9   :  { %22757 = sst [smem:[#allocation39_spill]] %s19465_s13  ;;  %s19403_s20 = smov 11  }
   0xa   :  { %22758 = sst [smem:[#allocation40_spill]] %s19470_s17  ;;  %s19405_s1 = smov 13  }
   0xb   :  { %s19485_s29 = sld [smem:[%s22739_s0 + %s19398_s26]]   ;;  %s19404_s26 = smov 12  }
   0xc   :  { %22759 = sst [smem:[#allocation41_spill]] %s19480_s25  ;;  %s19406_s7 = smov 14  }
   0xd   :  { %s19490_s3 = sld [smem:[%s22739_s0 + %s19399_s30]]   ;;  %s19408_s22 = smov 16  }
   0xe   :  { %s19495_s8 = sld [smem:[%s22739_s0 + %s19400_s4]]   ;;  %s19409_s28 = smov 17  }
   0xf   :  { %s19500_s14 = sld [smem:[%s22739_s0 + %s19401_s10]]  }
  0x10   :  { %s19505_s19 = sld [smem:[%s22739_s0 + %s19402_s15]]   ;;  %s19407_s15 = smov 15  }
  0x11   :  { %s19510_s24 = sld [smem:[%s22739_s0 + %s19403_s20]]  }
  0x12   :  { %s19515_s30 = sld [smem:[%s22739_s0 + %s19404_s26]]  }
  0x13   :  { %s19520_s6 = sld [smem:[%s22739_s0 + %s19405_s1]]  }
  0x14   :  { %s19525_s12 = sld [smem:[%s22739_s0 + %s19406_s7]]   ;;  %s19410_s7 = smov 18  }
  0x15   :  { %s19530_s20 = sld [smem:[%s22739_s0 + %s19407_s15]]   ;;  %s19411_s15 = smov 19  }
  0x16   :  { %s19535_s27 = sld [smem:[%s22739_s0 + %s19408_s22]]   ;;  %s19412_s22 = smov 20  }
  0x17   :  { %s19540_s4 = sld [smem:[%s22739_s0 + %s19409_s28]]   ;;  %s19413_s28 = smov 21  }
  0x18   :  { %22760 = sst [smem:[#allocation42_spill]] %s19515_s30 }
  0x19   :  { %s19545_s9 = sld [smem:[%s22739_s0 + %s19410_s7]]   ;;  %s19414_s7 = smov 22  }
  0x1a   :  { %s19550_s30 = sld [smem:[%s22739_s0 + %s19411_s15]]   ;;  %s19415_s15 = smov 23  }
  0x1b   :  { %s19560_s25 = sld [smem:[%s22739_s0 + %s19413_s28]]   ;;  %s19417_s28 = smov 25  }
  0x1c   :  { %22761 = sst [smem:[#allocation43_spill]] %s19535_s27 }
  0x1d   :  { %s19555_s27 = sld [smem:[%s22739_s0 + %s19412_s22]]   ;;  %s19416_s22 = smov 24  }
  0x1e   :  { %s19570_s17 = sld [smem:[%s22739_s0 + %s19415_s15]]   ;;  %s19419_s15 = smov 27  }
  0x1f   :  { %22762 = sst [smem:[#allocation44_spill]] %s19545_s9 }
  0x20   :  { %s19565_s9 = sld [smem:[%s22739_s0 + %s19414_s7]]   ;;  %s19418_s7 = smov 26  }
  0x21   :  { %22764 = sst [smem:[#allocation46_spill]] %s19560_s25 }
  0x22   :  { %s19580_s25 = sld [smem:[%s22739_s0 + %s19417_s28]]   ;;  %s19421_s28 = smov 29  }
  0x23   :  { %22763 = sst [smem:[#allocation45_spill]] %s19555_s27 }
  0x24   :  { %s19575_s27 = sld [smem:[%s22739_s0 + %s19416_s22]]   ;;  %s19420_s22 = smov 28  }
  0x25   :  { %s19585_s13 = sld [smem:[%s22739_s0 + %s19418_s7]]   ;;  %s19422_s7 = smov 30  }
  0x26   :  { %22765 = sst [smem:[#allocation47_spill]] %s19565_s9 }
  0x27   :  { %s19590_s5 = sld [smem:[%s22739_s0 + %s19419_s15]]   ;;  %s19423_s15 = smov 31  }
  0x28   :  { %22767 = sst [smem:[#allocation49_spill]] %s19580_s25 }
  0x29   :  { %s19600_s25 = sld [smem:[%s22739_s0 + %s19421_s28]]  }
  0x2a   :  { %22766 = sst [smem:[#allocation48_spill]] %s19575_s27 }
  0x2b   :  { %s19595_s27 = sld [smem:[%s22739_s0 + %s19420_s22]]  }
  0x2c   :  { %s19605_s9 = sld [smem:[%s22739_s0 + %s19422_s7]]  }
  0x2d   :  { %22768 = sst [smem:[#allocation50_spill]] %s19590_s5 }
  0x2e   :  { %s19610_s5 = sld [smem:[%s22739_s0 + %s19423_s15]]  }
  0x2f   :  { %69 = vsyncpa [#allocation3], 0 }
  0x30   :  { %70 = vsyncpa [#allocation5], 0 }
  0x31   :  { %71 = vsyncpa [#allocation8], 0 }
  0x32   :  { %72 = vsyncpa [#allocation11], 0 }
  0x33   :  { %73 = vsyncpa [#allocation14], 0 }
  0x34   :  { %74 = vsyncpa [#allocation17], 0 }
  0x35   :  { %75 = vsyncpa [#allocation20], 0 }
  0x36   :  { %76 = vsyncpa [#allocation23], 0 }
  0x37   :  { %77 = vsyncpa [#allocation26], 0  ;;  %s19424_s22 = smov [#allocation4]   ;;  %s19001_s26 = scalar_lea.hbm %s19485_s29, 5120 }
  0x38   :  { %s103_s23 = sshll.u32 %s19424_s22, 4  ;;  %p19002_p0 = scmp.ne.s32.totalorder %s19485_s29, %s19001_s26  ;;  %s104_s23 = int_to_ptr.vmem [resolvable:$true] %s103_s23 }
  0x39   :  { %p19005_p1 = scmp.lt.u32.totalorder %s19001_s26, %s19485_s29 }
  0x3b   :  { %p19007_p2 = pnand %p19005_p1, %p19002_p0 }
  0x3d   :  { %19010 = shalt.err (!%p19007_p2)
}
  0x3e   :  { %s19011_s0 = scalar_lea.vmem %s104_s23, 5120  ;;  %p19016_p4 = scmp.lt.s32.totalorder %s104_s23, %s104_s23 }
  0x3f   :  { %p19012_p3 = scmp.ne.s32.totalorder %s104_s23, %s19011_s0  ;;  %p19017_p5 = scmp.lt.s32.totalorder %s19011_s0, %s19011_s0 }
  0x41   :  { %p19018_p6 = por %p19017_p5, %p19016_p4 }
  0x43   :  { %p19019_p7 = pnand %p19018_p6, %p19012_p3 }
  0x45   :  { %19022 = shalt.err (!%p19019_p7)
}
  0x46   :  { %s19425_s28 = smov 64   ;;  %s19426_s1 = smov 4  }
  0x47   :  { %109 = dma.hbm_to_vmem [thread:$0]  %s19485_s29, 5120, %s104_s23, [#allocation5], %s19425_s28, %s19425_s28, %s19426_s1  }
  0x48   :  { %s19427_s2 = smov [#allocation7]   ;;  %s19428_s10 = smov [#allocation10]  }
  0x49   :  { %s125_s7 = sshll.u32 %s19427_s2, 4  ;;  %s150_s11 = sshll.u32 %s19428_s10, 4  ;;  %s126_s7 = int_to_ptr.vmem [resolvable:$true] %s125_s7  ;;  %s151_s11 = int_to_ptr.vmem [resolvable:$true] %s150_s11 }
  0x4a   :  { %s19023_s15 = scalar_lea.hbm %s19495_s8, 1152 }
  0x4b   :  { %p19024_p8 = scmp.ne.s32.totalorder %s19495_s8, %s19023_s15  ;;  %p19027_p9 = scmp.lt.u32.totalorder %s19023_s15, %s19495_s8 }
  0x4d   :  { %p19029_p10 = pnand %p19027_p9, %p19024_p8 }
  0x4f   :  { %19032 = shalt.err (!%p19029_p10)
}
  0x50   :  { %s19033_s16 = scalar_lea.vmem %s126_s7, 1152  ;;  %p19038_p12 = scmp.lt.s32.totalorder %s126_s7, %s126_s7 }
  0x51   :  { %p19034_p11 = scmp.ne.s32.totalorder %s126_s7, %s19033_s16  ;;  %p19039_p13 = scmp.lt.s32.totalorder %s19033_s16, %s19033_s16 }
  0x53   :  { %p19040_p0 = por %p19039_p13, %p19038_p12 }
  0x55   :  { %p19041_p1 = pnand %p19040_p0, %p19034_p11 }
  0x57   :  { %19044 = shalt.err (!%p19041_p1)
}
  0x58   :  { %131 = dma.hbm_to_vmem [thread:$0]  %s19495_s8, 1152, %s126_s7, [#allocation8], %s19425_s28, %s19425_s28, %s19426_s1  }
  0x59   :  { %s19045_s29 = scalar_lea.hbm %s19505_s19, 16 }
  0x5a   :  { %p19046_p2 = scmp.ne.s32.totalorder %s19505_s19, %s19045_s29  ;;  %p19049_p3 = scmp.lt.u32.totalorder %s19045_s29, %s19505_s19 }
  0x5c   :  { %p19051_p4 = pnand %p19049_p3, %p19046_p2 }
  0x5e   :  { %19054 = shalt.err (!%p19051_p4)
}
  0x5f   :  { %s19055_s18 = scalar_lea.vmem %s151_s11, 16  ;;  %s19059_s22 = scalar_lea.vmem %s151_s11, 32 }
  0x60   :  { %p19056_p5 = scmp.ne.s32.totalorder %s151_s11, %s19055_s18  ;;  %p19060_p6 = scmp.lt.s32.totalorder %s151_s11, %s151_s11 }
  0x61   :  { %p19061_p7 = scmp.lt.s32.totalorder %s19059_s22, %s19055_s18 }
  0x63   :  { %p19062_p8 = por %p19061_p7, %p19060_p6 }
  0x65   :  { %p19063_p9 = pnand %p19062_p8, %p19056_p5 }
  0x67   :  { %19066 = shalt.err (!%p19063_p9)
}
  0x68   :  { %153 = dma.hbm_to_vmem [thread:$0]  %s19505_s19, 16, %s151_s11, [#allocation11]  }
  0x69   :  { %s19429_s8 = smov [#allocation13]   ;;  %s19430_s26 = smov [#allocation16]  }
  0x6a   :  { %s174_s23 = sshll.u32 %s19429_s8, 4  ;;  %s196_s0 = sshll.u32 %s19430_s26, 4  ;;  %s175_s23 = int_to_ptr.vmem [resolvable:$true] %s174_s23  ;;  %s197_s0 = int_to_ptr.vmem [resolvable:$true] %s196_s0 }
  0x6b   :  { %s19067_s2 = scalar_lea.hbm %s19520_s6, 32 }
  0x6c   :  { %p19068_p10 = scmp.ne.s32.totalorder %s19520_s6, %s19067_s2  ;;  %p19071_p11 = scmp.lt.u32.totalorder %s19067_s2, %s19520_s6 }
  0x6e   :  { %p19073_p12 = pnand %p19071_p11, %p19068_p10 }
  0x70   :  { %19076 = shalt.err (!%p19073_p12)
}
  0x71   :  { %s19077_s7 = scalar_lea.vmem %s175_s23, 32  ;;  %p19082_p0 = scmp.lt.s32.totalorder %s175_s23, %s175_s23 }
  0x72   :  { %p19078_p13 = scmp.ne.s32.totalorder %s175_s23, %s19077_s7  ;;  %p19083_p1 = scmp.lt.s32.totalorder %s19077_s7, %s19077_s7 }
  0x74   :  { %p19084_p2 = por %p19083_p1, %p19082_p0 }
  0x76   :  { %p19085_p3 = pnand %p19084_p2, %p19078_p13 }
  0x78   :  { %19088 = shalt.err (!%p19085_p3)
}
  0x79   :  { %177 = dma.hbm_to_vmem [thread:$0]  %s19520_s6, 32, %s175_s23, [#allocation14]  }
  0x7a   :  { %s19089_s19 = scalar_lea.hbm %s19530_s20, 16 }
  0x7b   :  { %p19090_p4 = scmp.ne.s32.totalorder %s19530_s20, %s19089_s19  ;;  %p19093_p5 = scmp.lt.u32.totalorder %s19089_s19, %s19530_s20 }
  0x7d   :  { %p19095_p6 = pnand %p19093_p5, %p19090_p4 }
  0x7f   :  { %19098 = shalt.err (!%p19095_p6)
}
  0x80   :  { %s19099_s10 = scalar_lea.vmem %s197_s0, 16  ;;  %s19103_s11 = scalar_lea.vmem %s197_s0, 32 }
  0x81   :  { %p19100_p7 = scmp.ne.s32.totalorder %s197_s0, %s19099_s10  ;;  %p19104_p8 = scmp.lt.s32.totalorder %s197_s0, %s197_s0 }
  0x82   :  { %p19105_p9 = scmp.lt.s32.totalorder %s19103_s11, %s19099_s10 }
  0x84   :  { %p19106_p10 = por %p19105_p9, %p19104_p8 }
  0x86   :  { %p19107_p11 = pnand %p19106_p10, %p19100_p7 }
  0x88   :  { %19110 = shalt.err (!%p19107_p11)
}
  0x89   :  { %199 = dma.hbm_to_vmem [thread:$0]  %s19530_s20, 16, %s197_s0, [#allocation17]  }
  0x8a   :  { %s19431_s6 = smov [#allocation19]   ;;  %s19432_s16 = smov [#allocation22]  }
  0x8b   :  { %s220_s15 = sshll.u32 %s19431_s6, 4  ;;  %s246_s29 = sshll.u32 %s19432_s16, 4  ;;  %s221_s15 = int_to_ptr.vmem [resolvable:$true] %s220_s15  ;;  %s247_s29 = int_to_ptr.vmem [resolvable:$true] %s246_s29 }
  0x8c   :  { %s19111_s18 = scalar_lea.hbm %s19550_s30, 96 }
  0x8d   :  { %p19112_p12 = scmp.ne.s32.totalorder %s19550_s30, %s19111_s18  ;;  %p19115_p13 = scmp.lt.u32.totalorder %s19111_s18, %s19550_s30 }
  0x8f   :  { %p19117_p0 = pnand %p19115_p13, %p19112_p12 }
  0x91   :  { %19120 = shalt.err (!%p19117_p0)
}
  0x92   :  { %s19121_s22 = scalar_lea.vmem %s221_s15, 96  ;;  %p19126_p2 = scmp.lt.s32.totalorder %s221_s15, %s221_s15 }
  0x93   :  { %p19122_p1 = scmp.ne.s32.totalorder %s221_s15, %s19121_s22  ;;  %p19127_p3 = scmp.lt.s32.totalorder %s19121_s22, %s19121_s22 }
  0x95   :  { %p19128_p4 = por %p19127_p3, %p19126_p2 }
  0x97   :  { %p19129_p5 = pnand %p19128_p4, %p19122_p1 }
  0x99   :  { %19132 = shalt.err (!%p19129_p5)
}
  0x9a   :  { %223 = dma.hbm_to_vmem [thread:$0]  %s19550_s30, 96, %s221_s15, [#allocation20]  }
  0x9b   :  { %s19133_s20 = scalar_lea.hbm %s19570_s17, 16 }
  0x9c   :  { %p19134_p6 = scmp.ne.s32.totalorder %s19570_s17, %s19133_s20  ;;  %p19137_p7 = scmp.lt.u32.totalorder %s19133_s20, %s19570_s17 }
  0x9e   :  { %p19139_p8 = pnand %p19137_p7, %p19134_p6 }
  0xa0   :  { %19142 = shalt.err (!%p19139_p8)
}
  0xa1   :  { %s19143_s8 = scalar_lea.vmem %s247_s29, 16  ;;  %s19147_s23 = scalar_lea.vmem %s247_s29, 32 }
  0xa2   :  { %p19144_p9 = scmp.ne.s32.totalorder %s247_s29, %s19143_s8  ;;  %p19148_p10 = scmp.lt.s32.totalorder %s247_s29, %s247_s29 }
  0xa3   :  { %p19149_p11 = scmp.lt.s32.totalorder %s19147_s23, %s19143_s8 }
  0xa5   :  { %p19150_p12 = por %p19149_p11, %p19148_p10 }
  0xa7   :  { %p19151_p13 = pnand %p19150_p12, %p19144_p9 }
  0xa9   :  { %19154 = shalt.err (!%p19151_p13)
}
  0xaa   :  { %249 = dma.hbm_to_vmem [thread:$0]  %s19570_s17, 16, %s247_s29, [#allocation23]  }
  0xab   :  { %s19433_s30 = smov [#allocation25]   ;;  %s19434_s0 = smov [#allocation2]  }
  0xac   :  { %s270_s26 = sshll.u32 %s19433_s30, 4  ;;  %s92_s2 = sshll.u32 %s19434_s0, 4  ;;  %s271_s26 = int_to_ptr.vmem [resolvable:$true] %s270_s26  ;;  %s93_s2 = int_to_ptr.vmem [resolvable:$true] %s92_s2 }
  0xad   :  { %s19155_s7 = scalar_lea.hbm %s19585_s13, 16 }
  0xae   :  { %p19156_p0 = scmp.ne.s32.totalorder %s19585_s13, %s19155_s7  ;;  %p19159_p1 = scmp.lt.u32.totalorder %s19155_s7, %s19585_s13 }
  0xb0   :  { %p19161_p2 = pnand %p19159_p1, %p19156_p0 }
  0xb2   :  { %19164 = shalt.err (!%p19161_p2)
}
  0xb3   :  { %s19165_s19 = scalar_lea.vmem %s271_s26, 16  ;;  %s19169_s10 = scalar_lea.vmem %s271_s26, 32 }
  0xb4   :  { %p19166_p3 = scmp.ne.s32.totalorder %s271_s26, %s19165_s19  ;;  %p19170_p4 = scmp.lt.s32.totalorder %s271_s26, %s271_s26 }
  0xb5   :  { %p19171_p5 = scmp.lt.s32.totalorder %s19169_s10, %s19165_s19 }
  0xb7   :  { %p19172_p6 = por %p19171_p5, %p19170_p4 }
  0xb9   :  { %p19173_p7 = pnand %p19172_p6, %p19166_p3 }
  0xbb   :  { %19176 = shalt.err (!%p19173_p7)
}
  0xbc   :  { %273 = dma.hbm_to_vmem [thread:$0]  %s19585_s13, 16, %s271_s26, [#allocation26]  }
  0xbd   :  { %s19177_s17 = scalar_lea.hbm %s19475_s21, 16 }
  0xbe   :  { %p19178_p8 = scmp.ne.s32.totalorder %s19475_s21, %s19177_s17  ;;  %p19181_p9 = scmp.lt.u32.totalorder %s19177_s17, %s19475_s21 }
  0xc0   :  { %p19183_p10 = pnand %p19181_p9, %p19178_p8 }
  0xc2   :  { %19186 = shalt.err (!%p19183_p10)
}
  0xc3   :  { %s19187_s11 = scalar_lea.vmem %s93_s2, 16  ;;  %s19191_s6 = scalar_lea.vmem %s93_s2, 32 }
  0xc4   :  { %p19188_p11 = scmp.ne.s32.totalorder %s93_s2, %s19187_s11  ;;  %p19192_p12 = scmp.lt.s32.totalorder %s93_s2, %s93_s2 }
  0xc5   :  { %p19193_p13 = scmp.lt.s32.totalorder %s19191_s6, %s19187_s11 }
  0xc7   :  { %p19194_p0 = por %p19193_p13, %p19192_p12 }
  0xc9   :  { %p19195_p1 = pnand %p19194_p0, %p19188_p11 }
  0xcb   :  { %19198 = shalt.err (!%p19195_p1)
}
  0xcc   :  { %95 = dma.hbm_to_vmem [thread:$0]  %s19475_s21, 16, %s93_s2, [#allocation3]  }
  0xcd   :  { %s19435_s13 = smov [#allocation6]   ;;  %s19436_s16 = smov [#allocation9]  }
  0xce   :  { %s116_s15 = sshll.u32 %s19435_s13, 4  ;;  %s137_s29 = sshll.u32 %s19436_s16, 4  ;;  %s117_s15 = int_to_ptr.vmem [resolvable:$true] %s116_s15  ;;  %s138_s29 = int_to_ptr.vmem [resolvable:$true] %s137_s29 }
  0xcf   :  { %s19199_s18 = scalar_lea.hbm %s19490_s3, 16 }
  0xd0   :  { %p19200_p2 = scmp.ne.s32.totalorder %s19490_s3, %s19199_s18  ;;  %p19203_p3 = scmp.lt.u32.totalorder %s19199_s18, %s19490_s3 }
  0xd2   :  { %p19205_p4 = pnand %p19203_p3, %p19200_p2 }
  0xd4   :  { %19208 = shalt.err (!%p19205_p4)
}
  0xd5   :  { %s19209_s22 = scalar_lea.vmem %s117_s15, 16  ;;  %s19213_s20 = scalar_lea.vmem %s117_s15, 32 }
  0xd6   :  { %p19210_p5 = scmp.ne.s32.totalorder %s117_s15, %s19209_s22  ;;  %p19214_p6 = scmp.lt.s32.totalorder %s117_s15, %s117_s15 }
  0xd7   :  { %p19215_p7 = scmp.lt.s32.totalorder %s19213_s20, %s19209_s22 }
  0xd9   :  { %p19216_p8 = por %p19215_p7, %p19214_p6 }
  0xdb   :  { %p19217_p9 = pnand %p19216_p8, %p19210_p5 }
  0xdd   :  { %19220 = shalt.err (!%p19217_p9)
}
  0xde   :  { %119 = dma.hbm_to_vmem [thread:$0]  %s19490_s3, 16, %s117_s15, [#allocation5]  }
  0xdf   :  { %s19221_s21 = scalar_lea.hbm %s19500_s14, 3072 }
  0xe0   :  { %p19222_p10 = scmp.ne.s32.totalorder %s19500_s14, %s19221_s21  ;;  %p19225_p11 = scmp.lt.u32.totalorder %s19221_s21, %s19500_s14 }
  0xe2   :  { %p19227_p12 = pnand %p19225_p11, %p19222_p10 }
  0xe4   :  { %19230 = shalt.err (!%p19227_p12)
}
  0xe5   :  { %s19231_s8 = scalar_lea.vmem %s138_s29, 3072  ;;  %p19236_p0 = scmp.lt.s32.totalorder %s138_s29, %s138_s29 }
  0xe6   :  { %p19232_p13 = scmp.ne.s32.totalorder %s138_s29, %s19231_s8  ;;  %p19237_p1 = scmp.lt.s32.totalorder %s19231_s8, %s19231_s8 }
  0xe8   :  { %p19238_p2 = por %p19237_p1, %p19236_p0 }
  0xea   :  { %p19239_p3 = pnand %p19238_p2, %p19232_p13 }
  0xec   :  { %19242 = shalt.err (!%p19239_p3)
}
  0xed   :  { %143 = dma.hbm_to_vmem [thread:$0]  %s19500_s14, 3072, %s138_s29, [#allocation8], %s19425_s28, %s19425_s28, %s19426_s1  }
  0xee   :  { %s19437_s3 = smov [#allocation12]   ;;  %s19438_s30 = smov [#allocation15]  }
  0xef   :  { %s159_s23 = sshll.u32 %s19437_s3, 4  ;;  %s183_s26 = sshll.u32 %s19438_s30, 4  ;;  %s160_s23 = int_to_ptr.vmem [resolvable:$true] %s159_s23  ;;  %s184_s26 = int_to_ptr.vmem [resolvable:$true] %s183_s26 }
  0xf0   :  { %s19243_s0 = scalar_lea.hbm %s19510_s24, 384 }
  0xf1   :  { %p19244_p4 = scmp.ne.s32.totalorder %s19510_s24, %s19243_s0  ;;  %p19247_p5 = scmp.lt.u32.totalorder %s19243_s0, %s19510_s24 }
  0xf3   :  { %p19249_p6 = pnand %p19247_p5, %p19244_p4 }
  0xf5   :  { %19252 = shalt.err (!%p19249_p6)
}
  0xf6   :  { %s19253_s2 = scalar_lea.vmem %s160_s23, 384  ;;  %p19258_p8 = scmp.lt.s32.totalorder %s160_s23, %s160_s23 }
  0xf7   :  { %p19254_p7 = scmp.ne.s32.totalorder %s160_s23, %s19253_s2  ;;  %p19259_p9 = scmp.lt.s32.totalorder %s19253_s2, %s19253_s2 }
  0xf9   :  { %p19260_p10 = por %p19259_p9, %p19258_p8 }
  0xfb   :  { %p19261_p11 = pnand %p19260_p10, %p19254_p7 }
  0xfd   :  { %19264 = shalt.err (!%p19261_p11)
}
  0xfe   :  { %165 = dma.hbm_to_vmem [thread:$0]  %s19510_s24, 384, %s160_s23, [#allocation11], %s19425_s28, %s19425_s28, %s19426_s1  }
  0xff   :  { %s19265_s14 = scalar_lea.hbm %s19525_s12, 2048 }
 0x100   :  { %p19266_p12 = scmp.ne.s32.totalorder %s19525_s12, %s19265_s14  ;;  %p19269_p13 = scmp.lt.u32.totalorder %s19265_s14, %s19525_s12 }
 0x102   :  { %p19271_p0 = pnand %p19269_p13, %p19266_p12 }
 0x104   :  { %19274 = shalt.err (!%p19271_p0)
}
 0x105   :  { %s19275_s7 = scalar_lea.vmem %s184_s26, 2048  ;;  %p19280_p2 = scmp.lt.s32.totalorder %s184_s26, %s184_s26 }
 0x106   :  { %p19276_p1 = scmp.ne.s32.totalorder %s184_s26, %s19275_s7  ;;  %p19281_p3 = scmp.lt.s32.totalorder %s19275_s7, %s19275_s7 }
 0x108   :  { %p19282_p4 = por %p19281_p3, %p19280_p2 }
 0x10a   :  { %p19283_p5 = pnand %p19282_p4, %p19276_p1 }
 0x10c   :  { %19286 = shalt.err (!%p19283_p5)
}
 0x10d   :  { %189 = dma.hbm_to_vmem [thread:$0]  %s19525_s12, 2048, %s184_s26, [#allocation14], %s19425_s28, %s19425_s28, %s19426_s1  }
 0x10e   :  { %s19439_s24 = smov [#allocation18]   ;;  %s19440_s10 = smov [#allocation21]  }
 0x10f   :  { %s208_s19 = sshll.u32 %s19439_s24, 4  ;;  %s233_s17 = sshll.u32 %s19440_s10, 4  ;;  %s209_s19 = int_to_ptr.vmem [resolvable:$true] %s208_s19  ;;  %s234_s17 = int_to_ptr.vmem [resolvable:$true] %s233_s17 }
 0x110   :  { %s19287_s11 = scalar_lea.hbm %s19540_s4, 32 }
 0x111   :  { %p19288_p6 = scmp.ne.s32.totalorder %s19540_s4, %s19287_s11  ;;  %p19291_p7 = scmp.lt.u32.totalorder %s19287_s11, %s19540_s4 }
 0x113   :  { %p19293_p8 = pnand %p19291_p7, %p19288_p6 }
 0x115   :  { %19296 = shalt.err (!%p19293_p8)
}
 0x116   :  { %s19297_s6 = scalar_lea.vmem %s209_s19, 32  ;;  %p19302_p10 = scmp.lt.s32.totalorder %s209_s19, %s209_s19 }
 0x117   :  { %p19298_p9 = scmp.ne.s32.totalorder %s209_s19, %s19297_s6  ;;  %p19303_p11 = scmp.lt.s32.totalorder %s19297_s6, %s19297_s6 }
 0x119   :  { %p19304_p12 = por %p19303_p11, %p19302_p10 }
 0x11b   :  { %p19305_p13 = pnand %p19304_p12, %p19298_p9 }
 0x11d   :  { %19308 = shalt.err (!%p19305_p13)
}
 0x11e   :  { %s22769_s13 = sld [smem:[#allocation47_spill]] }
 0x11f   :  { %211 = dma.hbm_to_vmem [thread:$0]  %s19540_s4, 32, %s209_s19, [#allocation17]  }
 0x124   :  { %s19309_s12 = scalar_lea.hbm %s22769_s13, 3072 }
 0x125   :  { %p19310_p0 = scmp.ne.s32.totalorder %s22769_s13, %s19309_s12  ;;  %p19313_p1 = scmp.lt.u32.totalorder %s19309_s12, %s22769_s13 }
 0x127   :  { %p19315_p2 = pnand %p19313_p1, %p19310_p0 }
 0x129   :  { %19318 = shalt.err (!%p19315_p2)
}
 0x12a   :  { %s19319_s15 = scalar_lea.vmem %s234_s17, 3072  ;;  %p19324_p4 = scmp.lt.s32.totalorder %s234_s17, %s234_s17 }
 0x12b   :  { %p19320_p3 = scmp.ne.s32.totalorder %s234_s17, %s19319_s15  ;;  %p19325_p5 = scmp.lt.s32.totalorder %s19319_s15, %s19319_s15 }
 0x12d   :  { %p19326_p6 = por %p19325_p5, %p19324_p4 }
 0x12f   :  { %p19327_p7 = pnand %p19326_p6, %p19320_p3 }
 0x131   :  { %19330 = shalt.err (!%p19327_p7)
}
 0x132   :  { %s22770_s16 = sld [smem:[#allocation49_spill]]  ;;  %s19441_s4 = smov [#allocation24]  }
 0x133   :  { %239 = dma.hbm_to_vmem [thread:$0]  %s22769_s13, 3072, %s234_s17, [#allocation20], %s19425_s28, %s19425_s28, %s19426_s1  }
 0x134   :  { %s257_s29 = sshll.u32 %s19441_s4, 4  ;;  %s19442_s18 = smov [#allocation27]   ;;  %s258_s29 = int_to_ptr.vmem [resolvable:$true] %s257_s29 }
 0x135   :  { %s284_s22 = sshll.u32 %s19442_s18, 4  ;;  %s285_s22 = int_to_ptr.vmem [resolvable:$true] %s284_s22 }
 0x138   :  { %s19331_s20 = scalar_lea.hbm %s22770_s16, 5120 }
 0x139   :  { %p19332_p8 = scmp.ne.s32.totalorder %s22770_s16, %s19331_s20  ;;  %p19335_p9 = scmp.lt.u32.totalorder %s19331_s20, %s22770_s16 }
 0x13b   :  { %p19337_p10 = pnand %p19335_p9, %p19332_p8 }
 0x13d   :  { %19340 = shalt.err (!%p19337_p10)
}
 0x13e   :  { %s19341_s21 = scalar_lea.vmem %s258_s29, 5120  ;;  %p19346_p12 = scmp.lt.s32.totalorder %s258_s29, %s258_s29 }
 0x13f   :  { %p19342_p11 = scmp.ne.s32.totalorder %s258_s29, %s19341_s21  ;;  %p19347_p13 = scmp.lt.s32.totalorder %s19341_s21, %s19341_s21 }
 0x141   :  { %p19348_p0 = por %p19347_p13, %p19346_p12 }
 0x143   :  { %p19349_p1 = pnand %p19348_p0, %p19342_p11 }
 0x145   :  { %19352 = shalt.err (!%p19349_p1)
}
 0x146   :  { %263 = dma.hbm_to_vmem [thread:$0]  %s22770_s16, 5120, %s258_s29, [#allocation23], %s19425_s28, %s19425_s28, %s19426_s1  }
 0x147   :  { %s19353_s8 = scalar_lea.hbm %s19600_s25, 32 }
 0x148   :  { %p19354_p2 = scmp.ne.s32.totalorder %s19600_s25, %s19353_s8  ;;  %p19357_p3 = scmp.lt.u32.totalorder %s19353_s8, %s19600_s25 }
 0x14a   :  { %p19359_p4 = pnand %p19357_p3, %p19354_p2 }
 0x14c   :  { %19362 = shalt.err (!%p19359_p4)
}
 0x14d   :  { %s19363_s3 = scalar_lea.vmem %s285_s22, 32  ;;  %p19368_p6 = scmp.lt.s32.totalorder %s285_s22, %s285_s22 }
 0x14e   :  { %p19364_p5 = scmp.ne.s32.totalorder %s285_s22, %s19363_s3  ;;  %p19369_p7 = scmp.lt.s32.totalorder %s19363_s3, %s19363_s3 }
 0x150   :  { %p19370_p8 = por %p19369_p7, %p19368_p6 }
 0x152   :  { %p19371_p9 = pnand %p19370_p8, %p19364_p5 }
 0x154   :  { %19374 = shalt.err (!%p19371_p9)
}
 0x155   :  { %287 = dma.hbm_to_vmem [thread:$0]  %s19600_s25, 32, %s285_s22, [#allocation26]  }
 0x156   :  { %19375 = dma.done.wait [#allocation3], 16  }
 0x157   :  { %19376 = vsyncadd [#allocation3], 4294967280 }
 0x158   :  { %19377 = dma.done.wait [#allocation5], 5136  }
 0x159   :  { %19378 = vsyncadd [#allocation5], 4294962160 }
 0x15a   :  { %19379 = dma.done.wait [#allocation8], 4224  }
 0x15b   :  { %19380 = vsyncadd [#allocation8], 4294963072 }
 0x15c   :  { %19381 = dma.done.wait [#allocation11], 400  }
 0x15d   :  { %19382 = vsyncadd [#allocation11], 4294966896 }
 0x15e   :  { %19383 = dma.done.wait [#allocation14], 2080  }
 0x15f   :  { %19384 = vsyncadd [#allocation14], 4294965216 }
 0x160   :  { %19385 = dma.done.wait [#allocation17], 48  }
 0x161   :  { %19386 = vsyncadd [#allocation17], 4294967248 }
 0x162   :  { %19387 = dma.done.wait [#allocation20], 3168  }
 0x163   :  { %19388 = vsyncadd [#allocation20], 4294964128 }
 0x164   :  { %19389 = dma.done.wait [#allocation23], 5136  }
 0x165   :  { %19390 = vsyncadd [#allocation23], 4294962160 }
 0x166   :  { %19391 = dma.done.wait [#allocation26], 48  }
 0x167   :  { %19392 = vsyncadd [#allocation26], 4294967248  ;;  %s22771_s1 = sld [smem:[#allocation37_spill]]  ;;  %s22772_s25 = sld [smem:[#allocation39_spill]]  ;;  %vm632_vm0 = vcmask 1043456   ;;  %vm604_vm1 = vcmask 64512  }
 0x168   :  { %s22773_s23 = sld [smem:[#allocation40_spill]]  ;;  %s22774_s30 = sld [smem:[#allocation41_spill]]  ;;  %vm19445_vm2 = vmmov 0   ;;  %vm5200_vm3 = vcmask 588800   ;;  %vm5778_vm4 = vcmask 392192   ;;  %vm6999_vm5 = vcmask 261120  }
 0x169   :  { %s22775_s26 = sld [smem:[#allocation42_spill]]  ;;  %s22776_s0 = sld [smem:[#allocation43_spill]]  ;;  %vm6957_vm6 = vcmask 523264   ;;  %vm6959_vm7 = vcmask 785408  }
 0x16a   :  { %s22777_s2 = sld [smem:[#allocation44_spill]]  ;;  %s22778_s14 = sld [smem:[#allocation38_spill]] }
 0x16b   :  { %s19446_s7 = smov 96   ;;  %s22781_s24 = sld [smem:[#allocation48_spill]] }
 0x16c   :  { %s22782_s19 = sld [smem:[#allocation50_spill]] }
 0x16d   :  { %v341_v0 = vld [vmem:[%s22771_s1 + $0x8] sm:$0xff]  ;;  %v343_v1 = vld [vmem:[%s22771_s1 + $0x18] sm:$0xff]  ;;  %v340_v2 = vld [vmem:[%s22771_s1] sm:$0xff] }
 0x16e   :  { %v19704_v3 = vpack.c.bf16 %v343_v1, %v341_v0  ;;  %v342_v4 = vld [vmem:[%s22771_s1 + $0x10] sm:$0xff]  ;;  %v345_v5 = vld [vmem:[%s22771_s1 + $0x28] sm:$0xff]  ;;  %v347_v6 = vld [vmem:[%s22771_s1 + $0x38] sm:$0xff] }
 0x16f   :  { %v19709_v7 = vpack.c.bf16 %v342_v4, %v340_v2  ;;  %v19711_v8 = vpack.c.bf16 %v347_v6, %v345_v5  ;;  %v344_v9 = vld [vmem:[%s22771_s1 + $0x20] sm:$0xff]  ;;  %v346_v10 = vld [vmem:[%s22771_s1 + $0x30] sm:$0xff]  ;;  %v349_v11 = vld [vmem:[%s22771_s1 + $0x48] sm:$0xff] }
 0x170   :  { %639 = vmatprep.subr.bf16.mxu0 %v19704_v3  ;;  %1073 = vmatprep.subr.bf16.mxu1 %v19704_v3  ;;  %v351_v12 = vld [vmem:[%s22771_s1 + $0x58] sm:$0xff]  ;;  %v19721_v13 = vpack.c.bf16 %v346_v10, %v344_v9  ;;  %v348_v15 = vld [vmem:[%s22771_s1 + $0x40] sm:$0xff]  ;;  %v350_v16 = vld [vmem:[%s22771_s1 + $0x50] sm:$0xff] }
 0x171   :  { %640 = vmatpush1.bf16.msra.mxu0 %v19709_v7  ;;  %1074 = vmatpush1.bf16.msra.mxu1 %v19709_v7  ;;  %v19725_v14 = vpack.c.bf16 %v351_v12, %v349_v11  ;;  %v353_v17 = vld [vmem:[%s22771_s1 + $0x68] sm:$0xff]  ;;  %v355_v18 = vld [vmem:[%s22771_s1 + $0x78] sm:$0xff]  ;;  %v19733_v19 = vpack.c.bf16 %v350_v16, %v348_v15  ;;  %v352_v21 = vld [vmem:[%s22771_s1 + $0x60] sm:$0xff] }
 0x172   :  { %641 = vmatprep.subr.bf16.mxu0 %v19711_v8  ;;  %1075 = vmatprep.subr.bf16.mxu1 %v19711_v8  ;;  %v19737_v20 = vpack.c.bf16 %v355_v18, %v353_v17  ;;  %v354_v22 = vld [vmem:[%s22771_s1 + $0x70] sm:$0xff]  ;;  %v357_v23 = vld [vmem:[%s22771_s1 + $0x88] sm:$0xff]  ;;  %v359_v24 = vld [vmem:[%s22771_s1 + $0x98] sm:$0xff] }
 0x173   :  { %v19745_v25 = vpack.c.bf16 %v354_v22, %v352_v21  ;;  %v19749_v26 = vpack.c.bf16 %v359_v24, %v357_v23  ;;  %v356_v27 = vld [vmem:[%s22771_s1 + $0x80] sm:$0xff]  ;;  %v358_v28 = vld [vmem:[%s22771_s1 + $0x90] sm:$0xff]  ;;  %v361_v29 = vld [vmem:[%s22771_s1 + $0xa8] sm:$0xff] }
 0x174   :  { %v363_v30 = vld [vmem:[%s22771_s1 + $0xb8] sm:$0xff]  ;;  %v19757_v31 = vpack.c.bf16 %v358_v28, %v356_v27  ;;  %v360_v33 = vld [vmem:[%s22771_s1 + $0xa0] sm:$0xff]  ;;  %v362_v34 = vld [vmem:[%s22771_s1 + $0xb0] sm:$0xff] }
 0x175   :  { %642 = vmatpush1.bf16.msra.mxu0 %v19721_v13  ;;  %1076 = vmatpush1.bf16.msra.mxu1 %v19721_v13  ;;  %v19761_v32 = vpack.c.bf16 %v363_v30, %v361_v29  ;;  %v365_v35 = vld [vmem:[%s22771_s1 + $0xc8] sm:$0xff]  ;;  %v367_v36 = vld [vmem:[%s22771_s1 + $0xd8] sm:$0xff]  ;;  %v19769_v37 = vpack.c.bf16 %v362_v34, %v360_v33  ;;  %v364_v38 = vld [vmem:[%s22771_s1 + $0xc0] sm:$0xff] }
 0x176   :  { %643 = vmatprep.subr.bf16.mxu0 %v19725_v14  ;;  %1077 = vmatprep.subr.bf16.mxu1 %v19725_v14  ;;  %v366_v39 = vld [vmem:[%s22771_s1 + $0xd0] sm:$0xff]  ;;  %v19775_v40 = vpack.c.bf16 %v367_v36, %v365_v35  ;;  %v369_v41 = vld [vmem:[%s22771_s1 + $0xe8] sm:$0xff]  ;;  %v371_v42 = vld [vmem:[%s22771_s1 + $0xf8] sm:$0xff] }
 0x177   :  { %v17781_v43 = vld [vmem:[%s22772_s25 + $0x4] ss:$12 sps:$4 sm:$0xff]   ;;  %v19783_v45 = vpack.c.bf16 %v366_v39, %v364_v38  ;;  %v19788_v47 = vpack.c.bf16 %v371_v42, %v369_v41  ;;  %v373_v49 = vld [vmem:[%s22771_s1 + $0x108] sm:$0xff]  ;;  %v375_v50 = vld [vmem:[%s22771_s1 + $0x118] sm:$0xff] }
 0x178   :  { %v17784_v44 = vld [vmem:[%s22772_s25 + $0xd0] ss:$12 sps:$4 sm:$0xff]   ;;  %v368_v46 = vld [vmem:[%s22771_s1 + $0xe0] sm:$0xff]  ;;  %671 = vmatprep.mubr.bf16.mxu0 %v17781_v43  ;;  %v19799_v52 = vpack.c.bf16 %v375_v50, %v373_v49  ;;  %v377_v55 = vld [vmem:[%s22771_s1 + $0x128] sm:$0xff] }
 0x179   :  { %644 = vmatpush1.bf16.msra.mxu0 %v19733_v19  ;;  %1078 = vmatpush1.bf16.msra.mxu1 %v19733_v19  ;;  %v370_v48 = vld [vmem:[%s22771_s1 + $0xf0] sm:$0xff]  ;;  %v372_v53 = vld [vmem:[%s22771_s1 + $0x100] sm:$0xff]  ;;  %v379_v56 = vld [vmem:[%s22771_s1 + $0x138] sm:$0xff] }
 0x17a   :  { %645 = vmatprep.subr.bf16.mxu0 %v19737_v20  ;;  %1079 = vmatprep.subr.bf16.mxu1 %v19737_v20  ;;  %v19795_v51 = vpack.c.bf16 %v370_v48, %v368_v46  ;;  %v374_v54 = vld [vmem:[%s22771_s1 + $0x110] sm:$0xff]  ;;  %v376_v58 = vld [vmem:[%s22771_s1 + $0x120] sm:$0xff]  ;;  %v19812_v59 = vpack.c.bf16 %v379_v56, %v377_v55  ;;  %v381_v61 = vld [vmem:[%s22771_s1 + $0x148] sm:$0xff] }
 0x17b   :  { %1105 = vmatprep.mubr.bf16.mxu1 %v17784_v44  ;;  %v19807_v57 = vpack.c.bf16 %v374_v54, %v372_v53  ;;  %v378_v60 = vld [vmem:[%s22771_s1 + $0x130] sm:$0xff]  ;;  %v383_v62 = vld [vmem:[%s22771_s1 + $0x158] sm:$0xff]  ;;  %v380_v0 = vld [vmem:[%s22771_s1 + $0x140] sm:$0xff] }
 0x17c   :  { %v19819_v63 = vpack.c.bf16 %v378_v60, %v376_v58  ;;  %v19824_v1 = vpack.c.bf16 %v383_v62, %v381_v61  ;;  %v382_v2 = vld [vmem:[%s22771_s1 + $0x150] sm:$0xff]  ;;  %v385_v4 = vld [vmem:[%s22771_s1 + $0x168] sm:$0xff]  ;;  %v387_v5 = vld [vmem:[%s22771_s1 + $0x178] sm:$0xff] }
 0x17d   :  { %646 = vmatpush1.bf16.msra.mxu0 %v19745_v25  ;;  %1080 = vmatpush1.bf16.msra.mxu1 %v19745_v25  ;;  %v19831_v6 = vpack.c.bf16 %v382_v2, %v380_v0  ;;  %v384_v9 = vld [vmem:[%s22771_s1 + $0x160] sm:$0xff]  ;;  %v19836_v10 = vpack.c.bf16 %v387_v5, %v385_v4  ;;  %v386_v11 = vld [vmem:[%s22771_s1 + $0x170] sm:$0xff]  ;;  %v389_v12 = vld [vmem:[%s22771_s1 + $0x188] sm:$0xff] }
 0x17e   :  { %647 = vmatprep.subr.bf16.mxu0 %v19749_v26  ;;  %1081 = vmatprep.subr.bf16.mxu1 %v19749_v26  ;;  %v391_v15 = vld [vmem:[%s22771_s1 + $0x198] sm:$0xff]  ;;  %v388_v16 = vld [vmem:[%s22771_s1 + $0x180] sm:$0xff]  ;;  %v19844_v17 = vpack.c.bf16 %v386_v11, %v384_v9  ;;  %v390_v18 = vld [vmem:[%s22771_s1 + $0x190] sm:$0xff] }
 0x17f   :  { %v19849_v21 = vpack.c.bf16 %v391_v15, %v389_v12  ;;  %v393_v22 = vld [vmem:[%s22771_s1 + $0x1a8] sm:$0xff]  ;;  %v395_v23 = vld [vmem:[%s22771_s1 + $0x1b8] sm:$0xff]  ;;  %v392_v24 = vld [vmem:[%s22771_s1 + $0x1a0] sm:$0xff]  ;;  %v19856_v27 = vpack.c.bf16 %v390_v18, %v388_v16 }
 0x180   :  { %v394_v28 = vld [vmem:[%s22771_s1 + $0x1b0] sm:$0xff]  ;;  %v19861_v29 = vpack.c.bf16 %v395_v23, %v393_v22  ;;  %v397_v30 = vld [vmem:[%s22771_s1 + $0x1c8] sm:$0xff]  ;;  %v399_v33 = vld [vmem:[%s22771_s1 + $0x1d8] sm:$0xff] }
 0x181   :  { %648 = vmatpush1.bf16.msra.mxu0 %v19757_v31  ;;  %1082 = vmatpush1.bf16.msra.mxu1 %v19757_v31  ;;  %v396_v34 = vld [vmem:[%s22771_s1 + $0x1c0] sm:$0xff]  ;;  %v19868_v35 = vpack.c.bf16 %v394_v28, %v392_v24  ;;  %v398_v36 = vld [vmem:[%s22771_s1 + $0x1d0] sm:$0xff]  ;;  %v19873_v38 = vpack.c.bf16 %v399_v33, %v397_v30  ;;  %v401_v39 = vld [vmem:[%s22771_s1 + $0x1e8] sm:$0xff] }
 0x182   :  { %649 = vmatprep.subr.bf16.mxu0 %v19761_v32  ;;  %1083 = vmatprep.subr.bf16.mxu1 %v19761_v32  ;;  %v403_v41 = vld [vmem:[%s22771_s1 + $0x1f8] sm:$0xff]  ;;  %v400_v42 = vld [vmem:[%s22771_s1 + $0x1e0] sm:$0xff]  ;;  %v402_v43 = vld [vmem:[%s22771_s1 + $0x1f0] sm:$0xff]  ;;  %v19881_v44 = vpack.c.bf16 %v398_v36, %v396_v34 }
 0x183   :  { %v405_v46 = vld [vmem:[%s22771_s1 + $0x208] sm:$0xff]  ;;  %v19886_v48 = vpack.c.bf16 %v403_v41, %v401_v39  ;;  %v404_v49 = vld [vmem:[%s22771_s1 + $0x200] sm:$0xff]  ;;  %v19891_v50 = vpack.c.bf16 %v402_v43, %v400_v42  ;;  %v17793_v5 = vld [vmem:[%s22772_s25 + $0x30] ss:$12 sps:$4 sm:$0xff]  }
 0x184   :  { %v17779_v53 = vld [vmem:[%s22772_s25] ss:$12 sps:$4 sm:$0xff]   ;;  %v19897_v55 = vpack.c.bf16 %v405_v46, %v405_v46  ;;  %v17785_v56 = vld [vmem:[%s22772_s25 + $0x1c] ss:$12 sps:$4 sm:$0xff]   ;;  %v438_v60 = vpack.c.bf16 %v404_v49, %v404_v49  ;;  %v17787_v62 = vld [vmem:[%s22772_s25 + $0x18] ss:$12 sps:$4 sm:$0xff]  }
 0x185   :  { %650 = vmatpush1.bf16.msra.mxu0 %v19769_v37  ;;  %1084 = vmatpush1.bf16.msra.mxu1 %v19769_v37  ;;  %v17782_v54 = vld [vmem:[%s22772_s25 + $0xcc] ss:$12 sps:$4 sm:$0xff]   ;;  %v17788_v58 = vld [vmem:[%s22772_s25 + $0xe8] ss:$12 sps:$4 sm:$0xff]   ;;  %v17790_v0 = vld [vmem:[%s22772_s25 + $0xe4] ss:$12 sps:$4 sm:$0xff]  }
 0x186   :  { %651 = vmatprep.subr.bf16.mxu0 %v19775_v40  ;;  %1085 = vmatprep.subr.bf16.mxu1 %v19775_v40  ;;  %v19908_v61 = vsel %vm632_vm0, %v438_v60, 0  ;;  %v17791_v2 = vld [vmem:[%s22772_s25 + $0x34] ss:$12 sps:$4 sm:$0xff]   ;;  %v17796_v9 = vld [vmem:[%s22772_s25 + $0xfc] ss:$12 sps:$4 sm:$0xff]  }
 0x187   :  { %v17794_v4 = vld [vmem:[%s22772_s25 + $0x100] ss:$12 sps:$4 sm:$0xff]   ;;  %v17800_v12 = vld [vmem:[%s22772_s25 + $0x118] ss:$12 sps:$4 sm:$0xff]   ;;  %v17799_v15 = vld [vmem:[%s22772_s25 + $0x48] ss:$12 sps:$4 sm:$0xff]  }
 0x188   :  { %v17797_v11 = vld [vmem:[%s22772_s25 + $0x4c] ss:$12 sps:$4 sm:$0xff]   ;;  %v17802_v16 = vld [vmem:[%s22772_s25 + $0x114] ss:$12 sps:$4 sm:$0xff]   ;;  %v17803_v18 = vld [vmem:[%s22772_s25 + $0x64] ss:$12 sps:$4 sm:$0xff]  }
 0x189   :  { %652 = vmatpush1.bf16.msra.mxu0 %v19783_v45  ;;  %1086 = vmatpush1.bf16.msra.mxu1 %v19783_v45  ;;  %v17806_v22 = vld [vmem:[%s22772_s25 + $0x130] ss:$12 sps:$4 sm:$0xff]   ;;  %v17805_v23 = vld [vmem:[%s22772_s25 + $0x60] ss:$12 sps:$4 sm:$0xff]   ;;  %v17812_v30 = vld [vmem:[%s22772_s25 + $0x148] ss:$12 sps:$4 sm:$0xff]  }
 0x18a   :  { %653 = vmatprep.subr.bf16.mxu0 %v19788_v47  ;;  %1087 = vmatprep.subr.bf16.mxu1 %v19788_v47  ;;  %v17808_v24 = vld [vmem:[%s22772_s25 + $0x12c] ss:$12 sps:$4 sm:$0xff]   ;;  %v17809_v28 = vld [vmem:[%s22772_s25 + $0x7c] ss:$12 sps:$4 sm:$0xff]   ;;  %v17814_v34 = vld [vmem:[%s22772_s25 + $0x144] ss:$12 sps:$4 sm:$0xff]  }
 0x18b   :  { %v17811_v33 = vld [vmem:[%s22772_s25 + $0x78] ss:$12 sps:$4 sm:$0xff]   ;;  %v17815_v36 = vld [vmem:[%s22772_s25 + $0x94] ss:$12 sps:$4 sm:$0xff]   ;;  %v17817_v41 = vld [vmem:[%s22772_s25 + $0x90] ss:$12 sps:$4 sm:$0xff]  }
 0x18c   :  { %v17818_v39 = vld [vmem:[%s22772_s25 + $0x160] ss:$12 sps:$4 sm:$0xff]   ;;  %v17820_v42 = vld [vmem:[%s22772_s25 + $0x15c] ss:$12 sps:$4 sm:$0xff]   ;;  %v17824_v46 = vld [vmem:[%s22772_s25 + $0x178] ss:$12 sps:$4 sm:$0xff]  }
 0x18d   :  { %654 = vmatpush1.bf16.msra.mxu0 %v19795_v51  ;;  %1088 = vmatpush1.bf16.msra.mxu1 %v19795_v51  ;;  %v17821_v43 = vld [vmem:[%s22772_s25 + $0xac] ss:$12 sps:$4 sm:$0xff]   ;;  %v472_v49 = vld [vmem:[%s22772_s25 + $0xc0] sm:$0xff] }
 0x18e   :  { %655 = vmatprep.subr.bf16.mxu0 %v19799_v52  ;;  %1089 = vmatprep.subr.bf16.mxu1 %v19799_v52 }
 0x191   :  { %656 = vmatpush1.bf16.msra.mxu0 %v19807_v57  ;;  %1090 = vmatpush1.bf16.msra.mxu1 %v19807_v57 }
 0x192   :  { %657 = vmatprep.subr.bf16.mxu0 %v19812_v59  ;;  %1091 = vmatprep.subr.bf16.mxu1 %v19812_v59 }
 0x195   :  { %658 = vmatpush1.bf16.msra.mxu0 %v19819_v63  ;;  %1092 = vmatpush1.bf16.msra.mxu1 %v19819_v63 }
 0x196   :  { %659 = vmatprep.subr.bf16.mxu0 %v19824_v1  ;;  %1093 = vmatprep.subr.bf16.mxu1 %v19824_v1 }
 0x199   :  { %660 = vmatpush1.bf16.msra.mxu0 %v19831_v6  ;;  %1094 = vmatpush1.bf16.msra.mxu1 %v19831_v6 }
 0x19a   :  { %661 = vmatprep.subr.bf16.mxu0 %v19836_v10  ;;  %1095 = vmatprep.subr.bf16.mxu1 %v19836_v10 }
 0x19d   :  { %662 = vmatpush1.bf16.msra.mxu0 %v19844_v17  ;;  %1096 = vmatpush1.bf16.msra.mxu1 %v19844_v17 }
 0x19e   :  { %663 = vmatprep.subr.bf16.mxu0 %v19849_v21  ;;  %1097 = vmatprep.subr.bf16.mxu1 %v19849_v21 }
 0x1a1   :  { %664 = vmatpush1.bf16.msra.mxu0 %v19856_v27  ;;  %1098 = vmatpush1.bf16.msra.mxu1 %v19856_v27 }
 0x1a2   :  { %665 = vmatprep.subr.bf16.mxu0 %v19861_v29  ;;  %1099 = vmatprep.subr.bf16.mxu1 %v19861_v29 }
 0x1a5   :  { %666 = vmatpush1.bf16.msra.mxu0 %v19868_v35  ;;  %1100 = vmatpush1.bf16.msra.mxu1 %v19868_v35 }
 0x1a6   :  { %667 = vmatprep.subr.bf16.mxu0 %v19873_v38  ;;  %1101 = vmatprep.subr.bf16.mxu1 %v19873_v38 }
 0x1a9   :  { %668 = vmatpush1.bf16.msra.mxu0 %v19881_v44  ;;  %1102 = vmatpush1.bf16.msra.mxu1 %v19881_v44 }
 0x1aa   :  { %669 = vmatprep.subr.bf16.mxu0 %v19886_v48  ;;  %1103 = vmatprep.subr.bf16.mxu1 %v19886_v48 }
 0x1ad   :  { %670 = vmatpush1.bf16.msra.mxu0 %v19891_v50  ;;  %1104 = vmatpush1.bf16.msra.mxu1 %v19891_v50 }
 0x1ae   :  { %14104 = vmatprep.subr.msk.bf16.mxu0 %vm632_vm0, %v19897_v55  ;;  %14175 = vmatprep.subr.msk.bf16.mxu1 %vm632_vm0, %v19897_v55 }
 0x1b0   :  { %672 = vmatmul.mubr.bf16.vlgmr.msra.gmra.mrb[0].mxu0 %v17779_v53  ;;  %1106 = vmatmul.mubr.bf16.vlgmr.msra.gmra.mrb[0].mxu1 %v17782_v54  ;;  %v14146_v53 = vld [vmem:[%s22772_s25 + $0x18c] sm:$0xff]  ;;  %v17823_v54 = vld [vmem:[%s22772_s25 + $0xa8] ss:$12 sps:$4 sm:$0xff]  }
 0x1b1   :  { %681 = vmatprep.mubr.bf16.mxu0 %v17785_v56  ;;  %1115 = vmatprep.mubr.bf16.mxu1 %v17788_v58  ;;  %v17826_v56 = vld [vmem:[%s22772_s25 + $0x174] ss:$12 sps:$4 sm:$0xff]   ;;  %v14102_v58 = vcombine.high %v472_v49, %v472_v49  ;;  %v14173_v60 = vcombine.high %v14146_v53, %v14146_v53 }
 0x1b2   :  { %761 = vmatpush1.bf16.msra.mxu0 %v19908_v61  ;;  %1195 = vmatpush1.bf16.msra.mxu1 %v19908_v61 }
 0x1b3   :  { %1507 = vmatprep.subr.bf16.mxu0 %v19704_v3  ;;  %1941 = vmatprep.subr.bf16.mxu1 %v19704_v3 }
 0x1b8   :  { %682 = vmatmul.mubr.bf16.gmra.mrb[4].mxu0 %v17787_v62  ;;  %1116 = vmatmul.mubr.bf16.gmra.mrb[4].mxu1 %v17790_v0  ;;  %v14101_v62 = vcombine.low %v472_v49, %v472_v49  ;;  %v14172_v0 = vcombine.low %v14146_v53, %v14146_v53  ;;  %v17852_v49 = vld [vmem:[%s22772_s25 + $0x264] ss:$12 sps:$4 sm:$0xff]   ;;  %v17855_v53 = vld [vmem:[%s22772_s25 + $0x1b4] ss:$12 sps:$4 sm:$0xff]  }
 0x1b9   :  { %691 = vmatprep.mubr.bf16.mxu0 %v17791_v2  ;;  %1125 = vmatprep.mubr.bf16.mxu1 %v17794_v4  ;;  %v22753_v2 = vmov 0   ;;  %v17831_v4 = vld [vmem:[%s22772_s25 + $0x8] ss:$12 sps:$4 sm:$0xff]  }
 0x1c0   :  { %692 = vmatmul.mubr.bf16.gmra.mrb[8].mxu0 %v17793_v5  ;;  %1126 = vmatmul.mubr.bf16.gmra.mrb[8].mxu1 %v17796_v9  ;;  %v17832_v5 = vld [vmem:[%s22772_s25 + $0xd4] ss:$12 sps:$4 sm:$0xff]  }
 0x1c1   :  { %701 = vmatprep.mubr.bf16.mxu0 %v17797_v11  ;;  %1135 = vmatprep.mubr.bf16.mxu1 %v17800_v12  ;;  %v17833_v9 = vld [vmem:[%s22772_s25 + $0x20] ss:$12 sps:$4 sm:$0xff]   ;;  %v17835_v12 = vld [vmem:[%s22772_s25 + $0x38] ss:$12 sps:$4 sm:$0xff]  }
 0x1c2   :  { %v17834_v11 = vld [vmem:[%s22772_s25 + $0xec] ss:$12 sps:$4 sm:$0xff]  }
 0x1c8   :  { %702 = vmatmul.mubr.bf16.gmra.mrb[12].mxu0 %v17799_v15  ;;  %1136 = vmatmul.mubr.bf16.gmra.mrb[12].mxu1 %v17802_v16  ;;  %v17836_v15 = vld [vmem:[%s22772_s25 + $0x104] ss:$12 sps:$4 sm:$0xff]  }
 0x1c9   :  { %711 = vmatprep.mubr.bf16.mxu0 %v17803_v18  ;;  %1145 = vmatprep.mubr.bf16.mxu1 %v17806_v22  ;;  %v17837_v16 = vld [vmem:[%s22772_s25 + $0x50] ss:$12 sps:$4 sm:$0xff]   ;;  %v17839_v22 = vld [vmem:[%s22772_s25 + $0x68] ss:$12 sps:$4 sm:$0xff]  }
 0x1ca   :  { %v17838_v18 = vld [vmem:[%s22772_s25 + $0x11c] ss:$12 sps:$4 sm:$0xff]  }
 0x1d0   :  { %712 = vmatmul.mubr.bf16.gmra.mrb[16].mxu0 %v17805_v23  ;;  %1146 = vmatmul.mubr.bf16.gmra.mrb[16].mxu1 %v17808_v24  ;;  %v17840_v23 = vld [vmem:[%s22772_s25 + $0x134] ss:$12 sps:$4 sm:$0xff]  }
 0x1d1   :  { %721 = vmatprep.mubr.bf16.mxu0 %v17809_v28  ;;  %1155 = vmatprep.mubr.bf16.mxu1 %v17812_v30  ;;  %v17841_v24 = vld [vmem:[%s22772_s25 + $0x80] ss:$12 sps:$4 sm:$0xff]   ;;  %v17843_v30 = vld [vmem:[%s22772_s25 + $0x98] ss:$12 sps:$4 sm:$0xff]  }
 0x1d2   :  { %v17842_v28 = vld [vmem:[%s22772_s25 + $0x14c] ss:$12 sps:$4 sm:$0xff]  }
 0x1d8   :  { %722 = vmatmul.mubr.bf16.gmra.mrb[20].mxu0 %v17811_v33  ;;  %1156 = vmatmul.mubr.bf16.gmra.mrb[20].mxu1 %v17814_v34  ;;  %v17844_v33 = vld [vmem:[%s22772_s25 + $0x164] ss:$12 sps:$4 sm:$0xff]  }
 0x1d9   :  { %731 = vmatprep.mubr.bf16.mxu0 %v17815_v36  ;;  %1165 = vmatprep.mubr.bf16.mxu1 %v17818_v39  ;;  %v17845_v34 = vld [vmem:[%s22772_s25 + $0xb0] ss:$12 sps:$4 sm:$0xff]   ;;  %v17847_v39 = vld [vmem:[%s22772_s25 + $0xc8] ss:$0 sps:$4 sm:$0xff]  }
 0x1da   :  { %v17846_v36 = vld [vmem:[%s22772_s25 + $0x17c] ss:$12 sps:$4 sm:$0xff]  }
 0x1e0   :  { %732 = vmatmul.mubr.bf16.gmra.mrb[24].mxu0 %v17817_v41  ;;  %1166 = vmatmul.mubr.bf16.gmra.mrb[24].mxu1 %v17820_v42  ;;  %v17848_v41 = vld [vmem:[%s22772_s25 + $0x194] ss:$0 sps:$4 sm:$0xff]   ;;  %v17851_v42 = vld [vmem:[%s22772_s25 + $0x19c] ss:$12 sps:$4 sm:$0xff]  }
 0x1e1   :  { %741 = vmatprep.mubr.bf16.mxu0 %v17821_v43  ;;  %1175 = vmatprep.mubr.bf16.mxu1 %v17824_v46  ;;  %v17854_v43 = vld [vmem:[%s22772_s25 + $0x268] ss:$12 sps:$4 sm:$0xff]   ;;  %v17849_v46 = vld [vmem:[%s22772_s25 + $0x198] ss:$12 sps:$4 sm:$0xff]  }
 0x1e8   :  { %742 = vmatmul.mubr.bf16.gmra.mrb[28].mxu0 %v17823_v54  ;;  %1176 = vmatmul.mubr.bf16.gmra.mrb[28].mxu1 %v17826_v56  ;;  %v17858_v54 = vld [vmem:[%s22772_s25 + $0x280] ss:$12 sps:$4 sm:$0xff]  }
 0x1e9   :  { %751 = vmatprep.mubr.bf16.mxu0 %v14102_v58  ;;  %1185 = vmatprep.mubr.bf16.mxu1 %v14173_v60  ;;  %v17913_v56 = vld [vmem:[%s22773_s23 + $0x40] sm:$0xff]   ;;  %v17857_v58 = vld [vmem:[%s22772_s25 + $0x1b0] ss:$12 sps:$4 sm:$0xff]  }
 0x1ea   :  { %v17860_v60 = vld [vmem:[%s22772_s25 + $0x27c] ss:$12 sps:$4 sm:$0xff]  }
 0x1f0   :  { %752 = vmatmul.mubr.bf16.gmra.mrb[32].mxu0 %v14101_v62  ;;  %1186 = vmatmul.mubr.bf16.gmra.mrb[32].mxu1 %v14172_v0  ;;  %v17861_v62 = vld [vmem:[%s22772_s25 + $0x1cc] ss:$12 sps:$4 sm:$0xff]  }
 0x1f1   :  { %792 = vmatprep.mubr.bf16.mxu0 %v22753_v2  ;;  %1226 = vmatprep.mubr.bf16.mxu1 %v22753_v2  ;;  %v17864_v0 = vld [vmem:[%s22772_s25 + $0x298] ss:$12 sps:$4 sm:$0xff]  }
 0x1f8   :  { %14105 = vmatmul.mubr.msk.bf16.vlgmr.msra.gmra.mrb[0].mxu0 %vm604_vm1, %v17831_v4  ;;  %14176 = vmatmul.mubr.msk.bf16.vlgmr.msra.gmra.mrb[0].mxu1 %vm604_vm1, %v17832_v5  ;;  %v17863_v4 = vld [vmem:[%s22772_s25 + $0x1c8] ss:$12 sps:$4 sm:$0xff]  }
 0x1f9   :  { %802 = vmatprep.mubr.bf16.mxu0 %v22753_v2  ;;  %1236 = vmatprep.mubr.bf16.mxu1 %v22753_v2  ;;  %v17866_v5 = vld [vmem:[%s22772_s25 + $0x294] ss:$12 sps:$4 sm:$0xff]  }
 0x1fa   :  { %1508 = vmatpush1.bf16.msra.mxu0 %v19709_v7  ;;  %1942 = vmatpush1.bf16.msra.mxu1 %v19709_v7 }
 0x1fb   :  { %1509 = vmatprep.subr.bf16.mxu0 %v19711_v8  ;;  %1943 = vmatprep.subr.bf16.mxu1 %v19711_v8 }
 0x1fe   :  { %1510 = vmatpush1.bf16.msra.mxu0 %v19721_v13  ;;  %1944 = vmatpush1.bf16.msra.mxu1 %v19721_v13 }
 0x1ff   :  { %1511 = vmatprep.subr.bf16.mxu0 %v19725_v14  ;;  %1945 = vmatprep.subr.bf16.mxu1 %v19725_v14 }
 0x200   :  { %14106 = vmatmul.mubr.msk.bf16.gmra.mrb[4].mxu0 %vm604_vm1, %v17833_v9  ;;  %14177 = vmatmul.mubr.msk.bf16.gmra.mrb[4].mxu1 %vm604_vm1, %v17834_v11  ;;  %v17867_v9 = vld [vmem:[%s22772_s25 + $0x1e4] ss:$12 sps:$4 sm:$0xff]  }
 0x201   :  { %812 = vmatprep.mubr.bf16.mxu0 %v22753_v2  ;;  %1246 = vmatprep.mubr.bf16.mxu1 %v22753_v2  ;;  %v17870_v11 = vld [vmem:[%s22772_s25 + $0x2b0] ss:$12 sps:$4 sm:$0xff]  }
 0x202   :  { %1512 = vmatpush1.bf16.msra.mxu0 %v19733_v19  ;;  %1946 = vmatpush1.bf16.msra.mxu1 %v19733_v19 }
 0x203   :  { %1513 = vmatprep.subr.bf16.mxu0 %v19737_v20  ;;  %1947 = vmatprep.subr.bf16.mxu1 %v19737_v20 }
 0x206   :  { %1514 = vmatpush1.bf16.msra.mxu0 %v19745_v25  ;;  %1948 = vmatpush1.bf16.msra.mxu1 %v19745_v25 }
 0x207   :  { %1515 = vmatprep.subr.bf16.mxu0 %v19749_v26  ;;  %1949 = vmatprep.subr.bf16.mxu1 %v19749_v26 }
 0x208   :  { %14107 = vmatmul.mubr.msk.bf16.gmra.mrb[8].mxu0 %vm604_vm1, %v17835_v12  ;;  %14178 = vmatmul.mubr.msk.bf16.gmra.mrb[8].mxu1 %vm604_vm1, %v17836_v15  ;;  %v17872_v12 = vld [vmem:[%s22772_s25 + $0x2ac] ss:$12 sps:$4 sm:$0xff]   ;;  %v17873_v15 = vld [vmem:[%s22772_s25 + $0x1fc] ss:$12 sps:$4 sm:$0xff]  }
 0x209   :  { %822 = vmatprep.mubr.bf16.mxu0 %v22753_v2  ;;  %1256 = vmatprep.mubr.bf16.mxu1 %v22753_v2 }
 0x20a   :  { %1516 = vmatpush1.bf16.msra.mxu0 %v19757_v31  ;;  %1950 = vmatpush1.bf16.msra.mxu1 %v19757_v31 }
 0x20b   :  { %1517 = vmatprep.subr.bf16.mxu0 %v19761_v32  ;;  %1951 = vmatprep.subr.bf16.mxu1 %v19761_v32 }
 0x20e   :  { %1518 = vmatpush1.bf16.msra.mxu0 %v19769_v37  ;;  %1952 = vmatpush1.bf16.msra.mxu1 %v19769_v37 }
 0x20f   :  { %1519 = vmatprep.subr.bf16.mxu0 %v19775_v40  ;;  %1953 = vmatprep.subr.bf16.mxu1 %v19775_v40 }
 0x210   :  { %14108 = vmatmul.mubr.msk.bf16.gmra.mrb[12].mxu0 %vm604_vm1, %v17837_v16  ;;  %14179 = vmatmul.mubr.msk.bf16.gmra.mrb[12].mxu1 %vm604_vm1, %v17838_v18  ;;  %v17876_v16 = vld [vmem:[%s22772_s25 + $0x2c8] ss:$12 sps:$4 sm:$0xff]   ;;  %v17875_v18 = vld [vmem:[%s22772_s25 + $0x1f8] ss:$12 sps:$4 sm:$0xff]  }
 0x211   :  { %832 = vmatprep.mubr.bf16.mxu0 %v22753_v2  ;;  %1266 = vmatprep.mubr.bf16.mxu1 %v22753_v2 }
 0x212   :  { %1520 = vmatpush1.bf16.msra.mxu0 %v19783_v45  ;;  %1954 = vmatpush1.bf16.msra.mxu1 %v19783_v45 }
 0x213   :  { %1521 = vmatprep.subr.bf16.mxu0 %v19788_v47  ;;  %1955 = vmatprep.subr.bf16.mxu1 %v19788_v47 }
 0x216   :  { %1522 = vmatpush1.bf16.msra.mxu0 %v19795_v51  ;;  %1956 = vmatpush1.bf16.msra.mxu1 %v19795_v51 }
 0x217   :  { %1523 = vmatprep.subr.bf16.mxu0 %v19799_v52  ;;  %1957 = vmatprep.subr.bf16.mxu1 %v19799_v52 }
 0x218   :  { %14109 = vmatmul.mubr.msk.bf16.gmra.mrb[16].mxu0 %vm604_vm1, %v17839_v22  ;;  %14180 = vmatmul.mubr.msk.bf16.gmra.mrb[16].mxu1 %vm604_vm1, %v17840_v23  ;;  %v17878_v22 = vld [vmem:[%s22772_s25 + $0x2c4] ss:$12 sps:$4 sm:$0xff]   ;;  %v17879_v23 = vld [vmem:[%s22772_s25 + $0x214] ss:$12 sps:$4 sm:$0xff]  }
 0x219   :  { %842 = vmatprep.mubr.bf16.mxu0 %v22753_v2  ;;  %1276 = vmatprep.mubr.bf16.mxu1 %v22753_v2 }
 0x21a   :  { %1524 = vmatpush1.bf16.msra.mxu0 %v19807_v57  ;;  %1958 = vmatpush1.bf16.msra.mxu1 %v19807_v57 }
 0x21b   :  { %1525 = vmatprep.subr.bf16.mxu0 %v19812_v59  ;;  %1959 = vmatprep.subr.bf16.mxu1 %v19812_v59 }
 0x21e   :  { %1526 = vmatpush1.bf16.msra.mxu0 %v19819_v63  ;;  %1960 = vmatpush1.bf16.msra.mxu1 %v19819_v63 }
 0x21f   :  { %1527 = vmatprep.subr.bf16.mxu0 %v19824_v1  ;;  %1961 = vmatprep.subr.bf16.mxu1 %v19824_v1 }
 0x220   :  { %14110 = vmatmul.mubr.msk.bf16.gmra.mrb[20].mxu0 %vm604_vm1, %v17841_v24  ;;  %14181 = vmatmul.mubr.msk.bf16.gmra.mrb[20].mxu1 %vm604_vm1, %v17842_v28  ;;  %v17882_v24 = vld [vmem:[%s22772_s25 + $0x2e0] ss:$12 sps:$4 sm:$0xff]   ;;  %v17881_v28 = vld [vmem:[%s22772_s25 + $0x210] ss:$12 sps:$4 sm:$0xff]  }
 0x221   :  { %852 = vmatprep.mubr.bf16.mxu0 %v22753_v2  ;;  %1286 = vmatprep.mubr.bf16.mxu1 %v22753_v2 }
 0x222   :  { %1528 = vmatpush1.bf16.msra.mxu0 %v19831_v6  ;;  %1962 = vmatpush1.bf16.msra.mxu1 %v19831_v6 }
 0x223   :  { %1529 = vmatprep.subr.bf16.mxu0 %v19836_v10  ;;  %1963 = vmatprep.subr.bf16.mxu1 %v19836_v10 }
 0x226   :  { %1530 = vmatpush1.bf16.msra.mxu0 %v19844_v17  ;;  %1964 = vmatpush1.bf16.msra.mxu1 %v19844_v17 }
 0x227   :  { %1531 = vmatprep.subr.bf16.mxu0 %v19849_v21  ;;  %1965 = vmatprep.subr.bf16.mxu1 %v19849_v21 }
 0x228   :  { %14111 = vmatmul.mubr.msk.bf16.gmra.mrb[24].mxu0 %vm604_vm1, %v17843_v30  ;;  %14182 = vmatmul.mubr.msk.bf16.gmra.mrb[24].mxu1 %vm604_vm1, %v17844_v33  ;;  %v17884_v30 = vld [vmem:[%s22772_s25 + $0x2dc] ss:$12 sps:$4 sm:$0xff]   ;;  %v17885_v33 = vld [vmem:[%s22772_s25 + $0x22c] ss:$12 sps:$4 sm:$0xff]  }
 0x229   :  { %862 = vmatprep.mubr.bf16.mxu0 %v22753_v2  ;;  %1296 = vmatprep.mubr.bf16.mxu1 %v22753_v2 }
 0x22a   :  { %1532 = vmatpush1.bf16.msra.mxu0 %v19856_v27  ;;  %1966 = vmatpush1.bf16.msra.mxu1 %v19856_v27 }
 0x22b   :  { %1533 = vmatprep.subr.bf16.mxu0 %v19861_v29  ;;  %1967 = vmatprep.subr.bf16.mxu1 %v19861_v29 }
 0x22e   :  { %1534 = vmatpush1.bf16.msra.mxu0 %v19868_v35  ;;  %1968 = vmatpush1.bf16.msra.mxu1 %v19868_v35 }
 0x22f   :  { %1535 = vmatprep.subr.bf16.mxu0 %v19873_v38  ;;  %1969 = vmatprep.subr.bf16.mxu1 %v19873_v38 }
 0x230   :  { %14112 = vmatmul.mubr.msk.bf16.gmra.mrb[28].mxu0 %vm604_vm1, %v17845_v34  ;;  %14183 = vmatmul.mubr.msk.bf16.gmra.mrb[28].mxu1 %vm604_vm1, %v17846_v36  ;;  %v17888_v34 = vld [vmem:[%s22772_s25 + $0x2f8] ss:$12 sps:$4 sm:$0xff]   ;;  %v17887_v36 = vld [vmem:[%s22772_s25 + $0x228] ss:$12 sps:$4 sm:$0xff]  }
 0x231   :  { %872 = vmatprep.mubr.bf16.mxu0 %v22753_v2  ;;  %1306 = vmatprep.mubr.bf16.mxu1 %v22753_v2 }
 0x232   :  { %1536 = vmatpush1.bf16.msra.mxu0 %v19881_v44  ;;  %1970 = vmatpush1.bf16.msra.mxu1 %v19881_v44 }
 0x233   :  { %1537 = vmatprep.subr.bf16.mxu0 %v19886_v48  ;;  %1971 = vmatprep.subr.bf16.mxu1 %v19886_v48 }
 0x236   :  { %1538 = vmatpush1.bf16.msra.mxu0 %v19891_v50  ;;  %1972 = vmatpush1.bf16.msra.mxu1 %v19891_v50 }
 0x237   :  { %14246 = vmatprep.subr.msk.bf16.mxu0 %vm632_vm0, %v19897_v55  ;;  %14317 = vmatprep.subr.msk.bf16.mxu1 %vm632_vm0, %v19897_v55 }
 0x238   :  { %14113 = vmatmul.mubr.msk.bf16.gmra.mrb[32].mxu0 %vm604_vm1, %v17847_v39  ;;  %14184 = vmatmul.mubr.msk.bf16.gmra.mrb[32].mxu1 %vm604_vm1, %v17848_v41  ;;  %v17890_v39 = vld [vmem:[%s22772_s25 + $0x2f4] ss:$12 sps:$4 sm:$0xff]   ;;  %v17891_v41 = vld [vmem:[%s22772_s25 + $0x244] ss:$12 sps:$4 sm:$0xff]  }
 0x239   :  { %1539 = vmatprep.mubr.bf16.mxu0 %v17851_v42  ;;  %1973 = vmatprep.mubr.bf16.mxu1 %v17854_v43  ;;  %v17894_v42 = vld [vmem:[%s22772_s25 + $0x310] ss:$12 sps:$4 sm:$0xff]  }
 0x23a   :  { %v14217_v43 = vld [vmem:[%s22772_s25 + $0x258] sm:$0xff] }
 0x240   :  { %1540 = vmatmul.mubr.bf16.vlgmr.msra.gmra.mrb[36].mxu0 %v17849_v46  ;;  %1974 = vmatmul.mubr.bf16.vlgmr.msra.gmra.mrb[36].mxu1 %v17852_v49  ;;  %v14288_v46 = vld [vmem:[%s22772_s25 + $0x324] sm:$0xff]  ;;  %v17893_v49 = vld [vmem:[%s22772_s25 + $0x240] ss:$12 sps:$4 sm:$0xff]  }
 0x241   :  { %1549 = vmatprep.mubr.bf16.mxu0 %v17855_v53  ;;  %1983 = vmatprep.mubr.bf16.mxu1 %v17858_v54  ;;  %v17896_v53 = vld [vmem:[%s22772_s25 + $0x30c] ss:$12 sps:$4 sm:$0xff]   ;;  %v14244_v54 = vcombine.high %v14217_v43, %v14217_v43 }
 0x242   :  { %1629 = vmatpush1.bf16.msra.mxu0 %v19908_v61  ;;  %2063 = vmatpush1.bf16.msra.mxu1 %v19908_v61 }
 0x243   :  { %2375 = vmatprep.subr.bf16.mxu0 %v19704_v3  ;;  %15699 = vmatprep.subr.bf16.mxu1 %v17913_v56  ;;  %v17869_v3 = vld [vmem:[%s22772_s25 + $0x1e0] ss:$12 sps:$4 sm:$0xff]   ;;  %v14315_v56 = vcombine.high %v14288_v46, %v14288_v46 }
 0x248   :  { %1550 = vmatmul.mubr.bf16.gmra.mrb[40].mxu0 %v17857_v58  ;;  %1984 = vmatmul.mubr.bf16.gmra.mrb[40].mxu1 %v17860_v60  ;;  %v14243_v58 = vcombine.low %v14217_v43, %v14217_v43  ;;  %v14314_v60 = vcombine.low %v14288_v46, %v14288_v46  ;;  %v17941_v43 = vld [vmem:[%s22772_s25 + $0x364] ss:$12 sps:$4 sm:$0xff]   ;;  %v17958_v46 = vld [vmem:[%s22773_s23 + $0x88] sm:$0xff]  }
 0x249   :  { %1559 = vmatprep.mubr.bf16.mxu0 %v17861_v62  ;;  %1993 = vmatprep.mubr.bf16.mxu1 %v17864_v0  ;;  %v17901_v62 = vld [vmem:[%s22772_s25 + $0x1a0] ss:$12 sps:$4 sm:$0xff]  }
 0x24a   :  { %v17902_v0 = vld [vmem:[%s22772_s25 + $0x26c] ss:$12 sps:$4 sm:$0xff]  }
 0x250   :  { %1560 = vmatmul.mubr.bf16.gmra.mrb[44].mxu0 %v17863_v4  ;;  %1994 = vmatmul.mubr.bf16.gmra.mrb[44].mxu1 %v17866_v5  ;;  %v17914_v4 = vld [vmem:[%s22773_s23] sm:$0xff]   ;;  %v17915_v5 = vld [vmem:[%s22773_s23 + $0x48] sm:$0xff]  }
 0x251   :  { %1569 = vmatprep.mubr.bf16.mxu0 %v17867_v9  ;;  %2003 = vmatprep.mubr.bf16.mxu1 %v17870_v11  ;;  %v17916_v9 = vld [vmem:[%s22773_s23 + $0x8] sm:$0xff]   ;;  %v17919_v11 = vld [vmem:[%s22773_s23 + $0x50] sm:$0xff]  }
 0x258   :  { %1570 = vmatmul.mubr.bf16.gmra.mrb[48].mxu0 %v17869_v3  ;;  %2004 = vmatmul.mubr.bf16.gmra.mrb[48].mxu1 %v17872_v12  ;;  %v17903_v3 = vld [vmem:[%s22772_s25 + $0x1b8] ss:$12 sps:$4 sm:$0xff]  }
 0x259   :  { %1579 = vmatprep.mubr.bf16.mxu0 %v17873_v15  ;;  %2013 = vmatprep.mubr.bf16.mxu1 %v17876_v16  ;;  %v17904_v12 = vld [vmem:[%s22772_s25 + $0x284] ss:$12 sps:$4 sm:$0xff]   ;;  %v17921_v16 = vld [vmem:[%s22773_s23 + $0x58] sm:$0xff]  }
 0x25a   :  { %v17920_v15 = vld [vmem:[%s22773_s23 + $0x10] sm:$0xff]  }
 0x260   :  { %1580 = vmatmul.mubr.bf16.gmra.mrb[52].mxu0 %v17875_v18  ;;  %2014 = vmatmul.mubr.bf16.gmra.mrb[52].mxu1 %v17878_v22  ;;  %v17926_v18 = vld [vmem:[%s22773_s23 + $0x20] sm:$0xff]   ;;  %v17927_v22 = vld [vmem:[%s22773_s23 + $0x68] sm:$0xff]  }
 0x261   :  { %1589 = vmatprep.mubr.bf16.mxu0 %v17879_v23  ;;  %2023 = vmatprep.mubr.bf16.mxu1 %v17882_v24  ;;  %v17932_v23 = vld [vmem:[%s22773_s23 + $0x30] sm:$0xff]   ;;  %v17933_v24 = vld [vmem:[%s22773_s23 + $0x78] sm:$0xff]  }
 0x268   :  { %1590 = vmatmul.mubr.bf16.gmra.mrb[56].mxu0 %v17881_v28  ;;  %2024 = vmatmul.mubr.bf16.gmra.mrb[56].mxu1 %v17884_v30  ;;  %v17910_v28 = vld [vmem:[%s22772_s25 + $0x2cc] ss:$12 sps:$4 sm:$0xff]  }
 0x269   :  { %1599 = vmatprep.mubr.bf16.mxu0 %v17885_v33  ;;  %2033 = vmatprep.mubr.bf16.mxu1 %v17888_v34 }
 0x270   :  { %1600 = vmatmul.mubr.bf16.gmra.mrb[60].mxu0 %v17887_v36  ;;  %2034 = vmatmul.mubr.bf16.gmra.mrb[60].mxu1 %v17890_v39  ;;  %v17983_v36 = vld [vmem:[%s22773_s23 + $0x140] sm:$0xff]   ;;  %v17955_v39 = vld [vmem:[%s22773_s23 + $0xc8] sm:$0xff]  }
 0x271   :  { %1609 = vmatprep.mubr.bf16.mxu0 %v17891_v41  ;;  %2043 = vmatprep.mubr.bf16.mxu1 %v17894_v42  ;;  %v17940_v41 = vld [vmem:[%s22772_s25 + $0x348] ss:$12 sps:$4 sm:$0xff]  }
 0x278   :  { %1610 = vmatmul.mubr.bf16.gmra.mrb[64].mxu0 %v17893_v49  ;;  %2044 = vmatmul.mubr.bf16.gmra.mrb[64].mxu1 %v17896_v53 }
 0x279   :  { %1619 = vmatprep.mubr.bf16.mxu0 %v14244_v54  ;;  %2053 = vmatprep.mubr.bf16.mxu1 %v14315_v56  ;;  %v17960_v54 = vld [vmem:[%s22773_s23 + $0xd0] sm:$0xff]  }
 0x280   :  { %1620 = vmatmul.mubr.bf16.gmra.mrb[68].mxu0 %v14243_v58  ;;  %2054 = vmatmul.mubr.bf16.gmra.mrb[68].mxu1 %v14314_v60 }
 0x281   :  { %1660 = vmatprep.mubr.bf16.mxu0 %v22753_v2  ;;  %2094 = vmatprep.mubr.bf16.mxu1 %v22753_v2 }
 0x288   :  { %14247 = vmatmul.mubr.msk.bf16.vlgmr.msra.gmra.mrb[36].mxu0 %vm604_vm1, %v17901_v62  ;;  %14318 = vmatmul.mubr.msk.bf16.vlgmr.msra.gmra.mrb[36].mxu1 %vm604_vm1, %v17902_v0 }
 0x289   :  { %1670 = vmatprep.mubr.bf16.mxu0 %v22753_v2  ;;  %2104 = vmatprep.mubr.bf16.mxu1 %v22753_v2 }
 0x28a   :  { %2376 = vmatpush1.bf16.msra.mxu0 %v19709_v7  ;;  %15700 = vmatpush3.bf16.msra.mxu1 %v17914_v4  ;;  %v17922_v7 = vld [vmem:[%s22773_s23 + $0x18] sm:$0xff]  }
 0x28b   :  { %2377 = vmatprep.subr.bf16.mxu0 %v19711_v8  ;;  %15701 = vmatprep.subr.bf16.mxu1 %v17915_v5  ;;  %v17905_v8 = vld [vmem:[%s22772_s25 + $0x1d0] ss:$12 sps:$4 sm:$0xff]  }
 0x28e   :  { %2378 = vmatpush1.bf16.msra.mxu0 %v19721_v13  ;;  %15702 = vmatpush3.bf16.msra.mxu1 %v17916_v9  ;;  %v17906_v13 = vld [vmem:[%s22772_s25 + $0x29c] ss:$12 sps:$4 sm:$0xff]   ;;  %v17961_v9 = vld [vmem:[%s22773_s23 + $0x90] sm:$0xff]  }
 0x28f   :  { %2379 = vmatprep.subr.bf16.mxu0 %v19725_v14  ;;  %15703 = vmatprep.subr.bf16.mxu1 %v17919_v11  ;;  %v17925_v14 = vld [vmem:[%s22773_s23 + $0x60] sm:$0xff]  }
 0x290   :  { %14248 = vmatmul.mubr.msk.bf16.gmra.mrb[40].mxu0 %vm604_vm1, %v17903_v3  ;;  %14319 = vmatmul.mubr.msk.bf16.gmra.mrb[40].mxu1 %vm604_vm1, %v17904_v12  ;;  %v17962_v3 = vld [vmem:[%s22773_s23 + $0xd8] sm:$0xff]   ;;  %v17943_v12 = vld [vmem:[%s22772_s25 + $0x360] ss:$12 sps:$4 sm:$0xff]  }
 0x291   :  { %1680 = vmatprep.mubr.bf16.mxu0 %v22753_v2  ;;  %2114 = vmatprep.mubr.bf16.mxu1 %v22753_v2 }
 0x292   :  { %2380 = vmatpush1.bf16.msra.mxu0 %v19733_v19  ;;  %15704 = vmatpush3.bf16.msra.mxu1 %v17920_v15  ;;  %v17928_v19 = vld [vmem:[%s22773_s23 + $0x28] sm:$0xff]  }
 0x293   :  { %2381 = vmatprep.subr.bf16.mxu0 %v19737_v20  ;;  %15705 = vmatprep.subr.bf16.mxu1 %v17921_v16  ;;  %v17907_v20 = vld [vmem:[%s22772_s25 + $0x1e8] ss:$12 sps:$4 sm:$0xff]  }
 0x294   :  { %v17944_v16 = vld [vmem:[%s22772_s25 + $0x37c] ss:$12 sps:$4 sm:$0xff]  }
 0x296   :  { %2382 = vmatpush1.bf16.msra.mxu0 %v19745_v25  ;;  %15706 = vmatpush3.bf16.msra.mxu1 %v17922_v7  ;;  %v17908_v25 = vld [vmem:[%s22772_s25 + $0x2b4] ss:$12 sps:$4 sm:$0xff]   ;;  %v17965_v7 = vld [vmem:[%s22773_s23 + $0x98] sm:$0xff]  }
 0x297   :  { %2383 = vmatprep.subr.bf16.mxu0 %v19749_v26  ;;  %15707 = vmatprep.subr.bf16.mxu1 %v17925_v14  ;;  %v17931_v26 = vld [vmem:[%s22773_s23 + $0x70] sm:$0xff]   ;;  %v17967_v14 = vld [vmem:[%s22773_s23 + $0xe0] sm:$0xff]  }
 0x298   :  { %14249 = vmatmul.mubr.msk.bf16.gmra.mrb[44].mxu0 %vm604_vm1, %v17905_v8  ;;  %14320 = vmatmul.mubr.msk.bf16.gmra.mrb[44].mxu1 %vm604_vm1, %v17906_v13 }
 0x299   :  { %1690 = vmatprep.mubr.bf16.mxu0 %v22753_v2  ;;  %2124 = vmatprep.mubr.bf16.mxu1 %v22753_v2 }
 0x29a   :  { %2384 = vmatpush1.bf16.msra.mxu0 %v19757_v31  ;;  %15708 = vmatpush3.bf16.msra.mxu1 %v17926_v18  ;;  %v17937_v31 = vld [vmem:[%s22773_s23 + $0x38] sm:$0xff]  }
 0x29b   :  { %2385 = vmatprep.subr.bf16.mxu0 %v19761_v32  ;;  %15709 = vmatprep.subr.bf16.mxu1 %v17927_v22  ;;  %v17909_v32 = vld [vmem:[%s22772_s25 + $0x200] ss:$12 sps:$4 sm:$0xff]  }
 0x29e   :  { %2386 = vmatpush1.bf16.msra.mxu0 %v19769_v37  ;;  %15710 = vmatpush3.bf16.msra.mxu1 %v17928_v19  ;;  %v17953_v37 = vld [vmem:[%s22773_s23 + $0xc0] sm:$0xff]  }
 0x29f   :  { %2387 = vmatprep.subr.bf16.mxu0 %v19775_v40  ;;  %15711 = vmatprep.subr.bf16.mxu1 %v17931_v26  ;;  %v17911_v40 = vld [vmem:[%s22772_s25 + $0x218] ss:$12 sps:$4 sm:$0xff]  }
 0x2a0   :  { %14250 = vmatmul.mubr.msk.bf16.gmra.mrb[48].mxu0 %vm604_vm1, %v17907_v20  ;;  %14321 = vmatmul.mubr.msk.bf16.gmra.mrb[48].mxu1 %vm604_vm1, %v17908_v25  ;;  %v17968_v26 = vld [vmem:[%s22773_s23 + $0xa0] sm:$0xff]  }
 0x2a1   :  { %1700 = vmatprep.mubr.bf16.mxu0 %v22753_v2  ;;  %2134 = vmatprep.mubr.bf16.mxu1 %v22753_v2 }
 0x2a2   :  { %2388 = vmatpush1.bf16.msra.mxu0 %v19783_v45  ;;  %15712 = vmatpush3.bf16.msra.mxu1 %v17932_v23  ;;  %v17912_v45 = vld [vmem:[%s22772_s25 + $0x2e4] ss:$12 sps:$4 sm:$0xff]  }
 0x2a3   :  { %2389 = vmatprep.subr.bf16.mxu0 %v19788_v47  ;;  %15713 = vmatprep.subr.bf16.mxu1 %v17933_v24  ;;  %v17917_v47 = vld [vmem:[%s22772_s25 + $0x230] ss:$12 sps:$4 sm:$0xff]  }
 0x2a6   :  { %2390 = vmatpush1.bf16.msra.mxu0 %v19795_v51  ;;  %15714 = vmatpush3.bf16.msra.mxu1 %v17937_v31  ;;  %v17918_v51 = vld [vmem:[%s22772_s25 + $0x2fc] ss:$12 sps:$4 sm:$0xff]  }
 0x2a7   :  { %2391 = vmatprep.subr.bf16.mxu0 %v19799_v52  ;;  %15769 = vmatprep.subr.bf16.mxu1 %v17953_v37  ;;  %v17923_v52 = vld [vmem:[%s22772_s25 + $0x248] ss:$12 sps:$4 sm:$0xff]  }
 0x2a8   :  { %14251 = vmatmul.mubr.msk.bf16.gmra.mrb[52].mxu0 %vm604_vm1, %v17909_v32  ;;  %14322 = vmatmul.mubr.msk.bf16.gmra.mrb[52].mxu1 %vm604_vm1, %v17910_v28  ;;  %v17969_v32 = vld [vmem:[%s22773_s23 + $0xe8] sm:$0xff]  }
 0x2a9   :  { %1710 = vmatprep.mubr.bf16.mxu0 %v22753_v2  ;;  %2144 = vmatprep.mubr.bf16.mxu1 %v22753_v2  ;;  %v17971_v37 = vld [vmem:[%s22773_s23 + $0xa8] sm:$0xff]  }
 0x2aa   :  { %2392 = vmatpush1.bf16.msra.mxu0 %v19807_v57  ;;  %v17924_v57 = vld [vmem:[%s22772_s25 + $0x314] ss:$12 sps:$4 sm:$0xff]  }
 0x2ab   :  { %2393 = vmatprep.subr.bf16.mxu0 %v19812_v59  ;;  %v17929_v59 = vld [vmem:[%s22772_s25 + $0x260] ss:$0 sps:$4 sm:$0xff]  }
 0x2ae   :  { %2394 = vmatpush1.bf16.msra.mxu0 %v19819_v63  ;;  %v17930_v63 = vld [vmem:[%s22772_s25 + $0x32c] ss:$0 sps:$4 sm:$0xff]  }
 0x2af   :  { %2395 = vmatprep.subr.bf16.mxu0 %v19824_v1  ;;  %v17936_v1 = vld [vmem:[%s22772_s25 + $0x334] ss:$12 sps:$4 sm:$0xff]  }
 0x2b0   :  { %14252 = vmatmul.mubr.msk.bf16.gmra.mrb[56].mxu0 %vm604_vm1, %v17911_v40  ;;  %14323 = vmatmul.mubr.msk.bf16.gmra.mrb[56].mxu1 %vm604_vm1, %v17912_v45  ;;  %v17946_v40 = vld [vmem:[%s22772_s25 + $0x378] ss:$12 sps:$4 sm:$0xff]   ;;  %v17973_v45 = vld [vmem:[%s22773_s23 + $0xf0] sm:$0xff]  }
 0x2b1   :  { %1720 = vmatprep.mubr.bf16.mxu0 %v22753_v2  ;;  %2154 = vmatprep.mubr.bf16.mxu1 %v22753_v2 }
 0x2b2   :  { %2396 = vmatpush1.bf16.msra.mxu0 %v19831_v6 }
 0x2b3   :  { %2397 = vmatprep.subr.bf16.mxu0 %v19836_v10  ;;  %v17934_v10 = vld [vmem:[%s22772_s25 + $0x330] ss:$12 sps:$4 sm:$0xff]  }
 0x2b6   :  { %2398 = vmatpush1.bf16.msra.mxu0 %v19844_v17 }
 0x2b7   :  { %2399 = vmatprep.subr.bf16.mxu0 %v19849_v21 }
 0x2b8   :  { %14253 = vmatmul.mubr.msk.bf16.gmra.mrb[60].mxu0 %vm604_vm1, %v17917_v47  ;;  %14324 = vmatmul.mubr.msk.bf16.gmra.mrb[60].mxu1 %vm604_vm1, %v17918_v51  ;;  %v17947_v51 = vld [vmem:[%s22772_s25 + $0x394] ss:$12 sps:$4 sm:$0xff]  }
 0x2b9   :  { %1730 = vmatprep.mubr.bf16.mxu0 %v22753_v2  ;;  %2164 = vmatprep.mubr.bf16.mxu1 %v22753_v2 }
 0x2ba   :  { %2400 = vmatpush1.bf16.msra.mxu0 %v19856_v27  ;;  %v17938_v27 = vld [vmem:[%s22772_s25 + $0x34c] ss:$12 sps:$4 sm:$0xff]  }
 0x2bb   :  { %2401 = vmatprep.subr.bf16.mxu0 %v19861_v29 }
 0x2be   :  { %2402 = vmatpush1.bf16.msra.mxu0 %v19868_v35 }
 0x2bf   :  { %2403 = vmatprep.subr.bf16.mxu0 %v19873_v38 }
 0x2c0   :  { %14254 = vmatmul.mubr.msk.bf16.gmra.mrb[64].mxu0 %vm604_vm1, %v17923_v52  ;;  %14325 = vmatmul.mubr.msk.bf16.gmra.mrb[64].mxu1 %vm604_vm1, %v17924_v57 }
 0x2c1   :  { %1740 = vmatprep.mubr.bf16.mxu0 %v22753_v2  ;;  %2174 = vmatprep.mubr.bf16.mxu1 %v22753_v2 }
 0x2c2   :  { %2404 = vmatpush1.bf16.msra.mxu0 %v19881_v44 }
 0x2c3   :  { %2405 = vmatprep.subr.bf16.mxu0 %v19886_v48 }
 0x2c6   :  { %2406 = vmatpush1.bf16.msra.mxu0 %v19891_v50  ;;  %v17954_v50 = vld [vmem:[%s22773_s23 + $0x80] sm:$0xff]  }
 0x2c7   :  { %14388 = vmatprep.subr.msk.bf16.mxu0 %vm632_vm0, %v19897_v55 }
 0x2c8   :  { %14255 = vmatmul.mubr.msk.bf16.gmra.mrb[68].mxu0 %vm604_vm1, %v17929_v59  ;;  %14326 = vmatmul.mubr.msk.bf16.gmra.mrb[68].mxu1 %vm604_vm1, %v17930_v63 }
 0x2c9   :  { %2407 = vmatprep.mubr.bf16.mxu0 %v17936_v1  ;;  %v17974_v1 = vld [vmem:[%s22773_s23 + $0xb0] sm:$0xff]  }
 0x2cb   :  { %v794_v6 = vpop.f32.mrb[0].mxu0  ;;  %v20205_v17 = vpop.f32.mrb[0].mxu1 }
 0x2cc   :  { %v796_v21 = vpop.f32.mrb[1].mxu0  ;;  %v20208_v29 = vpop.f32.mrb[1].mxu1 }
 0x2cd   :  { %v798_v35 = vpop.f32.mrb[2].mxu0  ;;  %v20210_v38 = vpop.f32.mrb[2].mxu1 }
 0x2ce   :  { %v2617_v44 = vpack.c.bf16 %v798_v35, %v794_v6  ;;  %v800_v48 = vpop.f32.mrb[3].mxu0  ;;  %v2619_v55 = vpack.c.bf16 %v20210_v38, %v20205_v17  ;;  %v20215_v30 = vpop.f32.mrb[3].mxu1  ;;  %v17999_v17 = vld [vmem:[%s22773_s23 + $0x1d8] sm:$0xff]  }
 0x2cf   :  { %v2618_v33 = vpack.c.bf16 %v800_v48, %v796_v21  ;;  %v2620_v34 = vpack.c.bf16 %v20215_v30, %v20208_v29  ;;  %v17978_v29 = vld [vmem:[%s22772_s25 + $0x350] ss:$12 sps:$4 sm:$0xff]  }
 0x2d0   :  { %2408 = vmatmul.mubr.bf16.vlgmr.msra.gmra.mrb[72].mxu0 %v17934_v10  ;;  %v17994_v30 = vld [vmem:[%s22773_s23 + $0x1d0] sm:$0xff]   ;;  %v17997_v38 = vld [vmem:[%s22773_s23 + $0x118] sm:$0xff]  }
 0x2d1   :  { %3386 = vmatprep.mubr.bf16.mxu1 %v2618_v33  ;;  %2417 = vmatprep.mubr.bf16.mxu0 %v17938_v27  ;;  %v17975_v27 = vld [vmem:[%s22773_s23 + $0xf8] sm:$0xff]  }
 0x2d2   :  { %3387 = vmatmul.mubr.bf16.vlgmr.msra.gmra.mrb[72].mxu1 %v2617_v44  ;;  %2497 = vmatpush1.bf16.msra.mxu0 %v19908_v61  ;;  %v17976_v33 = vld [vmem:[%s22773_s23 + $0xb8] sm:$0xff]  }
 0x2d3   :  { %v804_v42 = vpop.f32.mrb[4].mxu0  ;;  %15770 = vmatpush3.bf16.msra.mxu1 %v17954_v50  ;;  %v20225_v49 = vpop.f32.mrb[4].mxu1  ;;  %15839 = vmatprep.subr.bf16.mxu0 %v17983_v36  ;;  %v17949_v36 = vld [vmem:[%s22772_s25 + $0x390] ss:$12 sps:$4 sm:$0xff]  }
 0x2d4   :  { %v806_v53 = vpop.f32.mrb[5].mxu0  ;;  %15771 = vmatprep.subr.bf16.mxu1 %v17955_v39  ;;  %v20228_v56 = vpop.f32.mrb[5].mxu1  ;;  %v17985_v39 = vld [vmem:[%s22773_s23 + $0x1c0] sm:$0xff]  }
 0x2d5   :  { %v808_v58 = vpop.f32.mrb[6].mxu0  ;;  %v20230_v60 = vpop.f32.mrb[6].mxu1 }
 0x2d6   :  { %v2627_v62 = vpack.c.bf16 %v808_v58, %v804_v42  ;;  %v810_v61 = vpop.f32.mrb[7].mxu0  ;;  %v2629_v0 = vpack.c.bf16 %v20230_v60, %v20225_v49  ;;  %v20234_v4 = vpop.f32.mrb[7].mxu1  ;;  %v17950_v42 = vld [vmem:[%s22772_s25 + $0x3ac] ss:$12 sps:$4 sm:$0xff]  }
 0x2d7   :  { %v2628_v5 = vpack.c.bf16 %v810_v61, %v806_v53  ;;  %15772 = vmatpush3.bf16.msra.mxu1 %v17958_v46  ;;  %v2630_v11 = vpack.c.bf16 %v20234_v4, %v20228_v56  ;;  %v18000_v56 = vld [vmem:[%s22773_s23 + $0x198] sm:$0xff]   ;;  %v17979_v4 = vld [vmem:[%s22772_s25 + $0x368] ss:$12 sps:$4 sm:$0xff]  }
 0x2d8   :  { %2418 = vmatmul.mubr.bf16.gmra.mrb[76].mxu0 %v17940_v41  ;;  %15773 = vmatprep.subr.bf16.mxu1 %v17960_v54  ;;  %v18008_v49 = vld [vmem:[%s22773_s23 + $0x1e8] sm:$0xff]  }
 0x2d9   :  { %3394 = vmatprep.mubr.bf16.mxu1 %v2628_v5  ;;  %2427 = vmatprep.mubr.bf16.mxu0 %v17941_v43  ;;  %v18006_v60 = vld [vmem:[%s22773_s23 + $0x128] sm:$0xff]  }
 0x2da   :  { %3395 = vmatmul.mubr.bf16.gmra.mrb[76].mxu1 %v2627_v62 }
 0x2db   :  { %v814_v15 = vpop.f32.mrb[8].mxu0  ;;  %15774 = vmatpush3.bf16.msra.mxu1 %v17961_v9  ;;  %v20243_v8 = vpop.f32.mrb[8].mxu1 }
 0x2dc   :  { %v816_v13 = vpop.f32.mrb[9].mxu0  ;;  %15775 = vmatprep.subr.bf16.mxu1 %v17962_v3  ;;  %v20246_v18 = vpop.f32.mrb[9].mxu1 }
 0x2dd   :  { %v818_v22 = vpop.f32.mrb[10].mxu0  ;;  %v20248_v19 = vpop.f32.mrb[10].mxu1 }
 0x2de   :  { %v2637_v20 = vpack.c.bf16 %v818_v22, %v814_v15  ;;  %v820_v25 = vpop.f32.mrb[11].mxu0  ;;  %v2639_v23 = vpack.c.bf16 %v20248_v19, %v20243_v8  ;;  %v20253_v24 = vpop.f32.mrb[11].mxu1  ;;  %v17952_v15 = vld [vmem:[%s22772_s25 + $0x3a8] ss:$12 sps:$4 sm:$0xff]   ;;  %v18015_v8 = vld [vmem:[%s22773_s23 + $0x138] sm:$0xff]  }
 0x2df   :  { %v2638_v31 = vpack.c.bf16 %v820_v25, %v816_v13  ;;  %15776 = vmatpush3.bf16.msra.mxu1 %v17965_v7  ;;  %v2640_v28 = vpack.c.bf16 %v20253_v24, %v20246_v18  ;;  %v17956_v7 = vld [vmem:[%s22772_s25 + $0x3c4] ss:$12 sps:$4 sm:$0xff]   ;;  %v18009_v18 = vld [vmem:[%s22773_s23 + $0x1a8] sm:$0xff]   ;;  %v18017_v19 = vld [vmem:[%s22773_s23 + $0x1b8] sm:$0xff]  }
 0x2e0   :  { %2428 = vmatmul.mubr.bf16.gmra.mrb[80].mxu0 %v17943_v12  ;;  %15777 = vmatprep.subr.bf16.mxu1 %v17967_v14  ;;  %v17980_v24 = vld [vmem:[%s22772_s25 + $0x380] ss:$12 sps:$4 sm:$0xff]  }
 0x2e1   :  { %3402 = vmatprep.mubr.bf16.mxu1 %v2638_v31  ;;  %2437 = vmatprep.mubr.bf16.mxu0 %v17944_v16 }
 0x2e2   :  { %3403 = vmatmul.mubr.bf16.gmra.mrb[80].mxu1 %v2637_v20 }
 0x2e3   :  { %v824_v47 = vpop.f32.mrb[12].mxu0  ;;  %15778 = vmatpush3.bf16.msra.mxu1 %v17968_v26  ;;  %v20262_v52 = vpop.f32.mrb[12].mxu1 }
 0x2e4   :  { %v826_v57 = vpop.f32.mrb[13].mxu0  ;;  %15779 = vmatprep.subr.bf16.mxu1 %v17969_v32  ;;  %v20264_v59 = vpop.f32.mrb[13].mxu1 }
 0x2e5   :  { %v828_v63 = vpop.f32.mrb[14].mxu0  ;;  %v20267_v6 = vpop.f32.mrb[14].mxu1 }
 0x2e6   :  { %v2647_v10 = vpack.c.bf16 %v828_v63, %v824_v47  ;;  %v830_v21 = vpop.f32.mrb[15].mxu0  ;;  %v2649_v35 = vpack.c.bf16 %v20267_v6, %v20262_v52  ;;  %v20272_v44 = vpop.f32.mrb[15].mxu1  ;;  %v17959_v47 = vld [vmem:[%s22772_s25 + $0x3c0] ss:$12 sps:$4 sm:$0xff]   ;;  %v17982_v52 = vld [vmem:[%s22772_s25 + $0x3b0] ss:$12 sps:$4 sm:$0xff]  }
 0x2e7   :  { %v2648_v48 = vpack.c.bf16 %v830_v21, %v826_v57  ;;  %15780 = vmatpush3.bf16.msra.mxu1 %v17971_v37  ;;  %v2650_v50 = vpack.c.bf16 %v20272_v44, %v20264_v59  ;;  %v17963_v57 = vld [vmem:[%s22772_s25 + $0x3dc] ss:$12 sps:$4 sm:$0xff]   ;;  %v18018_v59 = vld [vmem:[%s22773_s23 + $0x240] sm:$0xff]  }
 0x2e8   :  { %2438 = vmatmul.mubr.bf16.gmra.mrb[84].mxu0 %v17946_v40  ;;  %15781 = vmatprep.subr.bf16.mxu1 %v17973_v45  ;;  %v17989_v6 = vld [vmem:[%s22772_s25 + $0x3c8] ss:$12 sps:$4 sm:$0xff]  }
 0x2e9   :  { %3410 = vmatprep.mubr.bf16.mxu1 %v2648_v48  ;;  %2447 = vmatprep.mubr.bf16.mxu0 %v17947_v51 }
 0x2ea   :  { %3411 = vmatmul.mubr.bf16.gmra.mrb[84].mxu1 %v2647_v10 }
 0x2eb   :  { %v834_v41 = vpop.f32.mrb[16].mxu0  ;;  %15782 = vmatpush3.bf16.msra.mxu1 %v17974_v1  ;;  %v20280_v43 = vpop.f32.mrb[16].mxu1 }
 0x2ec   :  { %v836_v46 = vpop.f32.mrb[17].mxu0  ;;  %15783 = vmatprep.subr.bf16.mxu1 %v17975_v27  ;;  %v20282_v53 = vpop.f32.mrb[17].mxu1 }
 0x2ed   :  { %v838_v54 = vpop.f32.mrb[18].mxu0  ;;  %v20284_v58 = vpop.f32.mrb[18].mxu1 }
 0x2ee   :  { %v2657_v62 = vpack.c.bf16 %v838_v54, %v834_v41  ;;  %v840_v61 = vpop.f32.mrb[19].mxu0  ;;  %v2659_v5 = vpack.c.bf16 %v20284_v58, %v20280_v43  ;;  %v20288_v9 = vpop.f32.mrb[19].mxu1  ;;  %v17966_v54 = vld [vmem:[%s22772_s25 + $0x3d8] ss:$12 sps:$4 sm:$0xff]  }
 0x2ef   :  { %v2658_v3 = vpack.c.bf16 %v840_v61, %v836_v46  ;;  %15784 = vmatpush3.bf16.msra.mxu1 %v17976_v33  ;;  %v2660_v12 = vpack.c.bf16 %v20288_v9, %v20282_v53  ;;  %v14359_v46 = vld [vmem:[%s22772_s25 + $0x3f0] sm:$0xff] }
 0x2f0   :  { %2448 = vmatmul.mubr.bf16.gmra.mrb[88].mxu0 %v17949_v36  ;;  %15909 = vmatprep.subr.bf16.mxu1 %v17985_v39 }
 0x2f1   :  { %3418 = vmatprep.mubr.bf16.mxu1 %v2658_v3  ;;  %2457 = vmatprep.mubr.bf16.mxu0 %v17950_v42 }
 0x2f2   :  { %3419 = vmatmul.mubr.bf16.gmra.mrb[88].mxu1 %v2657_v62 }
 0x2f3   :  { %v844_v16 = vpop.f32.mrb[20].mxu0  ;;  %v20294_v13 = vpop.f32.mrb[20].mxu1 }
 0x2f4   :  { %v846_v14 = vpop.f32.mrb[21].mxu0  ;;  %v20296_v22 = vpop.f32.mrb[21].mxu1 }
 0x2f5   :  { %v848_v20 = vpop.f32.mrb[22].mxu0  ;;  %v20298_v25 = vpop.f32.mrb[22].mxu1 }
 0x2f6   :  { %v2667_v26 = vpack.c.bf16 %v848_v20, %v844_v16  ;;  %v850_v31 = vpop.f32.mrb[23].mxu0  ;;  %v2669_v32 = vpack.c.bf16 %v20298_v25, %v20294_v13  ;;  %v20302_v37 = vpop.f32.mrb[23].mxu1 }
 0x2f7   :  { %v2668_v40 = vpack.c.bf16 %v850_v31, %v846_v14  ;;  %v2670_v45 = vpack.c.bf16 %v20302_v37, %v20296_v22  ;;  %v18019_v22 = vld [vmem:[%s22773_s23 + $0x200] sm:$0xff]  }
 0x2f8   :  { %2458 = vmatmul.mubr.bf16.gmra.mrb[92].mxu0 %v17952_v15 }
 0x2f9   :  { %3426 = vmatprep.mubr.bf16.mxu1 %v2668_v40  ;;  %2467 = vmatprep.mubr.bf16.mxu0 %v17956_v7  ;;  %v14386_v7 = vcombine.high %v14359_v46, %v14359_v46 }
 0x2fa   :  { %3427 = vmatmul.mubr.bf16.gmra.mrb[92].mxu1 %v2667_v26 }
 0x2fb   :  { %v854_v51 = vpop.f32.mrb[24].mxu0  ;;  %v20308_v63 = vpop.f32.mrb[24].mxu1 }
 0x2fc   :  { %v856_v1 = vpop.f32.mrb[25].mxu0  ;;  %v20310_v10 = vpop.f32.mrb[25].mxu1 }
 0x2fd   :  { %v858_v21 = vpop.f32.mrb[26].mxu0  ;;  %v20312_v27 = vpop.f32.mrb[26].mxu1 }
 0x2fe   :  { %v2677_v48 = vpack.c.bf16 %v858_v21, %v854_v51  ;;  %v860_v33 = vpop.f32.mrb[27].mxu0  ;;  %v2679_v36 = vpack.c.bf16 %v20312_v27, %v20308_v63  ;;  %v20316_v39 = vpop.f32.mrb[27].mxu1  ;;  %v18020_v27 = vld [vmem:[%s22773_s23 + $0x248] sm:$0xff]  }
 0x2ff   :  { %v2678_v41 = vpack.c.bf16 %v860_v33, %v856_v1  ;;  %v2680_v42 = vpack.c.bf16 %v20316_v39, %v20310_v10 }
 0x300   :  { %2468 = vmatmul.mubr.bf16.gmra.mrb[96].mxu0 %v17959_v47 }
 0x301   :  { %3434 = vmatprep.mubr.bf16.mxu1 %v2678_v41  ;;  %2477 = vmatprep.mubr.bf16.mxu0 %v17963_v57 }
 0x302   :  { %3435 = vmatmul.mubr.bf16.gmra.mrb[96].mxu1 %v2677_v48  ;;  %v14385_v48 = vcombine.low %v14359_v46, %v14359_v46  ;;  %v17977_v46 = vld [vmem:[%s22772_s25 + $0x338] ss:$12 sps:$4 sm:$0xff]  }
 0x303   :  { %v864_v62 = vpop.f32.mrb[28].mxu0  ;;  %v20322_v61 = vpop.f32.mrb[28].mxu1 }
 0x304   :  { %v866_v3 = vpop.f32.mrb[29].mxu0  ;;  %v20324_v15 = vpop.f32.mrb[29].mxu1 }
 0x305   :  { %v868_v16 = vpop.f32.mrb[30].mxu0  ;;  %v20326_v14 = vpop.f32.mrb[30].mxu1 }
 0x306   :  { %v2687_v20 = vpack.c.bf16 %v868_v16, %v864_v62  ;;  %v870_v26 = vpop.f32.mrb[31].mxu0  ;;  %v2689_v31 = vpack.c.bf16 %v20326_v14, %v20322_v61  ;;  %v20330_v40 = vpop.f32.mrb[31].mxu1  ;;  %v18022_v14 = vld [vmem:[%s22773_s23 + $0x250] sm:$0xff]  }
 0x307   :  { %v2688_v47 = vpack.c.bf16 %v870_v26, %v866_v3  ;;  %v2690_v51 = vpack.c.bf16 %v20330_v40, %v20324_v15  ;;  %v17987_v26 = vld [vmem:[%s22773_s23 + $0x148] sm:$0xff]  }
 0x308   :  { %2478 = vmatmul.mubr.bf16.gmra.mrb[100].mxu0 %v17966_v54 }
 0x309   :  { %3442 = vmatprep.mubr.bf16.mxu1 %v2688_v47  ;;  %2487 = vmatprep.mubr.bf16.mxu0 %v14386_v7  ;;  %v17986_v47 = vld [vmem:[%s22773_s23 + $0x180] sm:$0xff]  }
 0x30a   :  { %3443 = vmatmul.mubr.bf16.gmra.mrb[100].mxu1 %v2687_v20  ;;  %v17984_v20 = vld [vmem:[%s22773_s23 + $0x100] sm:$0xff]  }
 0x30b   :  { %v874_v57 = vpop.f32.mrb[32].mxu0  ;;  %v20334_v1 = vpop.f32.mrb[32].mxu1 }
 0x30c   :  { %v876_v21 = vpop.f32.mrb[33].mxu0  ;;  %v20336_v33 = vpop.f32.mrb[33].mxu1  ;;  %v2697_v7 = vpack.c.bf16 %v874_v57, %v874_v57  ;;  %v17992_v57 = vld [vmem:[%s22773_s23 + $0x150] sm:$0xff]   ;;  %v2699_v43 = vpack.c.bf16 %v20334_v1, %v20334_v1 }
 0x30d   :  { %v878_v41 = vpop.f32.mrb[34].mxu0  ;;  %v2698_v62 = vpack.c.bf16 %v876_v21, %v876_v21  ;;  %v1312_v3 = vpop.f32.mrb[34].mxu1  ;;  %v17990_v21 = vld [vmem:[%s22773_s23 + $0x1c8] sm:$0xff]   ;;  %v2700_v44 = vpack.c.bf16 %v20336_v33, %v20336_v33 }
 0x30e   :  { %v879_v54 = vpop.f32.mrb[35].mxu0  ;;  %v1313_v16 = vpop.f32.mrb[35].mxu1  ;;  %v17988_v41 = vld [vmem:[%s22773_s23 + $0x108] sm:$0xff]   ;;  %v17995_v3 = vld [vmem:[%s22773_s23 + $0x190] sm:$0xff]  }
 0x30f   :  { %3450 = vmatprep.mubr.bf16.mxu1 %v2698_v62  ;;  %v17996_v62 = vld [vmem:[%s22773_s23 + $0x158] sm:$0xff]   ;;  %v18002_v54 = vld [vmem:[%s22773_s23 + $0x120] sm:$0xff]  }
 0x310   :  { %2488 = vmatmul.mubr.bf16.gmra.mrb[104].mxu0 %v14385_v48  ;;  %v17991_v48 = vld [vmem:[%s22773_s23 + $0x188] sm:$0xff]   ;;  %v18004_v16 = vld [vmem:[%s22773_s23 + $0x1a0] sm:$0xff]  }
 0x311   :  { %2528 = vmatprep.mubr.bf16.mxu0 %v22753_v2 }
 0x312   :  { %3451 = vmatmul.mubr.bf16.gmra.mrb[104].mxu1 %v2697_v7  ;;  %v18005_v7 = vld [vmem:[%s22773_s23 + $0x168] sm:$0xff]  }
 0x313   :  { %3490 = vmatprep.mubr.bf16.mxu1 %v2620_v34  ;;  %v17993_v34 = vld [vmem:[%s22773_s23 + $0x110] sm:$0xff]  }
 0x318   :  { %14389 = vmatmul.mubr.msk.bf16.vlgmr.msra.gmra.mrb[72].mxu0 %vm604_vm1, %v17977_v46  ;;  %v18011_v46 = vld [vmem:[%s22773_s23 + $0x130] sm:$0xff]  }
 0x319   :  { %2538 = vmatprep.mubr.bf16.mxu0 %v22753_v2  ;;  %15840 = vmatpush3.bf16.msra.mxu0 %v17984_v20  ;;  %v18014_v20 = vld [vmem:[%s22773_s23 + $0x178] sm:$0xff]  }
 0x31a   :  { %3491 = vmatmul.mubr.bf16.vlgmr.msra.gmra.mrb[108].mxu1 %v2619_v55  ;;  %15841 = vmatprep.subr.bf16.mxu0 %v17987_v26  ;;  %v18001_v55 = vld [vmem:[%s22773_s23 + $0x160] sm:$0xff]   ;;  %v18013_v26 = vld [vmem:[%s22773_s23 + $0x1b0] sm:$0xff]  }
 0x31b   :  { %3498 = vmatprep.mubr.bf16.mxu1 %v2630_v11  ;;  %15910 = vmatpush3.bf16.msra.mxu1 %v17986_v47  ;;  %v18003_v11 = vld [vmem:[%s22773_s23 + $0x1e0] sm:$0xff]   ;;  %v18016_v47 = vld [vmem:[%s22773_s23 + $0x1f8] sm:$0xff]  }
 0x31c   :  { %15911 = vmatprep.subr.bf16.mxu1 %v17990_v21 }
 0x31d   :  { %15842 = vmatpush3.bf16.msra.mxu0 %v17988_v41 }
 0x31e   :  { %15843 = vmatprep.subr.bf16.mxu0 %v17992_v57 }
 0x31f   :  { %15912 = vmatpush3.bf16.msra.mxu1 %v17991_v48 }
 0x320   :  { %14390 = vmatmul.mubr.msk.bf16.gmra.mrb[76].mxu0 %vm604_vm1, %v17978_v29  ;;  %15913 = vmatprep.subr.bf16.mxu1 %v17994_v30  ;;  %v18024_v29 = vld [vmem:[%s22773_s23 + $0x258] sm:$0xff]  }
 0x321   :  { %2548 = vmatprep.mubr.bf16.mxu0 %v22753_v2  ;;  %15844 = vmatpush3.bf16.msra.mxu0 %v17993_v34  ;;  %v18025_v30 = vld [vmem:[%s22773_s23 + $0x218] sm:$0xff]  }
 0x322   :  { %3499 = vmatmul.mubr.bf16.gmra.mrb[112].mxu1 %v2629_v0  ;;  %15845 = vmatprep.subr.bf16.mxu0 %v17996_v62  ;;  %v18010_v0 = vld [vmem:[%s22773_s23 + $0x170] sm:$0xff]  }
 0x323   :  { %3506 = vmatprep.mubr.bf16.mxu1 %v2640_v28  ;;  %15914 = vmatpush3.bf16.msra.mxu1 %v17995_v3  ;;  %v18012_v28 = vld [vmem:[%s22773_s23 + $0x1f0] sm:$0xff]  }
 0x324   :  { %15915 = vmatprep.subr.bf16.mxu1 %v17999_v17 }
 0x325   :  { %15846 = vmatpush3.bf16.msra.mxu0 %v17997_v38  ;;  %v18026_v38 = vld [vmem:[%s22773_s23 + $0x260] sm:$0xff]  }
 0x326   :  { %15847 = vmatprep.subr.bf16.mxu0 %v18001_v55 }
 0x327   :  { %15916 = vmatpush3.bf16.msra.mxu1 %v18000_v56 }
 0x328   :  { %14391 = vmatmul.mubr.msk.bf16.gmra.mrb[80].mxu0 %vm604_vm1, %v17979_v4  ;;  %15917 = vmatprep.subr.bf16.mxu1 %v18003_v11  ;;  %v18027_v4 = vld [vmem:[%s22773_s23 + $0x220] sm:$0xff]  }
 0x329   :  { %2558 = vmatprep.mubr.bf16.mxu0 %v22753_v2  ;;  %15848 = vmatpush3.bf16.msra.mxu0 %v18002_v54 }
 0x32a   :  { %3507 = vmatmul.mubr.bf16.gmra.mrb[116].mxu1 %v2639_v23  ;;  %15849 = vmatprep.subr.bf16.mxu0 %v18005_v7  ;;  %v17981_v23 = vld [vmem:[%s22772_s25 + $0x398] ss:$12 sps:$4 sm:$0xff]  }
 0x32b   :  { %3514 = vmatprep.mubr.bf16.mxu1 %v2650_v50  ;;  %15918 = vmatpush3.bf16.msra.mxu1 %v18004_v16  ;;  %v18007_v50 = vld [vmem:[%s22772_s25 + $0x3f8] ss:$0 sps:$4 sm:$0xff]  }
 0x32c   :  { %15919 = vmatprep.subr.bf16.mxu1 %v18008_v49  ;;  %v18028_v49 = vld [vmem:[%s22773_s23 + $0x268] sm:$0xff]  }
 0x32d   :  { %15850 = vmatpush3.bf16.msra.mxu0 %v18006_v60 }
 0x32e   :  { %15851 = vmatprep.subr.bf16.mxu0 %v18010_v0 }
 0x32f   :  { %15920 = vmatpush3.bf16.msra.mxu1 %v18009_v18  ;;  %v18029_v18 = vld [vmem:[%s22773_s23 + $0x228] sm:$0xff]  }
 0x330   :  { %14392 = vmatmul.mubr.msk.bf16.gmra.mrb[84].mxu0 %vm604_vm1, %v17980_v24  ;;  %15921 = vmatprep.subr.bf16.mxu1 %v18012_v28  ;;  %v18030_v24 = vld [vmem:[%s22773_s23 + $0x270] sm:$0xff]  }
 0x331   :  { %2568 = vmatprep.mubr.bf16.mxu0 %v22753_v2  ;;  %15852 = vmatpush3.bf16.msra.mxu0 %v18011_v46 }
 0x332   :  { %3515 = vmatmul.mubr.bf16.gmra.mrb[120].mxu1 %v2649_v35  ;;  %15853 = vmatprep.subr.bf16.mxu0 %v18014_v20  ;;  %v17998_v35 = vld [vmem:[%s22772_s25 + $0x3e0] ss:$12 sps:$4 sm:$0xff]  }
 0x333   :  { %3522 = vmatprep.mubr.bf16.mxu1 %v2660_v12  ;;  %15922 = vmatpush3.bf16.msra.mxu1 %v18013_v26 }
 0x334   :  { %15923 = vmatprep.subr.bf16.mxu1 %v18016_v47 }
 0x335   :  { %15854 = vmatpush3.bf16.msra.mxu0 %v18015_v8 }
 0x336   :  { %15979 = vmatprep.subr.bf16.mxu0 %v18018_v59 }
 0x337   :  { %15924 = vmatpush3.bf16.msra.mxu1 %v18017_v19 }
 0x338   :  { %14393 = vmatmul.mubr.msk.bf16.gmra.mrb[88].mxu0 %vm604_vm1, %v17981_v23  ;;  %3969 = vmatprep.subr.bf16.mxu1 %v22753_v2 }
 0x339   :  { %2578 = vmatprep.mubr.bf16.mxu0 %v22753_v2 }
 0x33a   :  { %3523 = vmatmul.mubr.bf16.gmra.mrb[124].mxu1 %v2659_v5 }
 0x33b   :  { %3530 = vmatprep.mubr.bf16.mxu1 %v2670_v45 }
 0x340   :  { %14394 = vmatmul.mubr.msk.bf16.gmra.mrb[92].mxu0 %vm604_vm1, %v17982_v52 }
 0x341   :  { %2588 = vmatprep.mubr.bf16.mxu0 %v22753_v2 }
 0x342   :  { %3531 = vmatmul.mubr.bf16.gmra.mrb[128].mxu1 %v2669_v32 }
 0x343   :  { %3538 = vmatprep.mubr.bf16.mxu1 %v2680_v42 }
 0x348   :  { %14395 = vmatmul.mubr.msk.bf16.gmra.mrb[96].mxu0 %vm604_vm1, %v17989_v6 }
 0x349   :  { %2598 = vmatprep.mubr.bf16.mxu0 %v22753_v2 }
 0x34a   :  { %3539 = vmatmul.mubr.bf16.gmra.mrb[132].mxu1 %v2679_v36  ;;  %v18021_v36 = vld [vmem:[%s22773_s23 + $0x208] sm:$0xff]  }
 0x34b   :  { %3546 = vmatprep.mubr.bf16.mxu1 %v2690_v51  ;;  %v18023_v51 = vld [vmem:[%s22773_s23 + $0x210] sm:$0xff]  }
 0x350   :  { %14396 = vmatmul.mubr.msk.bf16.gmra.mrb[100].mxu0 %vm604_vm1, %v17998_v35 }
 0x351   :  { %2608 = vmatprep.mubr.bf16.mxu0 %v22753_v2 }
 0x352   :  { %3547 = vmatmul.mubr.bf16.gmra.mrb[136].mxu1 %v2689_v31 }
 0x353   :  { %3554 = vmatprep.mubr.bf16.mxu1 %v2700_v44  ;;  %v18031_v44 = vld [vmem:[%s22773_s23 + $0x230] sm:$0xff]  }
 0x358   :  { %14397 = vmatmul.mubr.msk.bf16.gmra.mrb[104].mxu0 %vm604_vm1, %v18007_v50  ;;  %v18032_v50 = vld [vmem:[%s22773_s23 + $0x278] sm:$0xff]  }
 0x35a   :  { %3555 = vmatmul.mubr.bf16.gmra.mrb[140].mxu1 %v2699_v43 }
 0x35b   :  { %v1662_v53 = vpop.f32.mrb[36].mxu0  ;;  %v2096_v58 = vpop.f32.mrb[36].mxu1 }
 0x35c   :  { %v1664_v5 = vpop.f32.mrb[37].mxu0  ;;  %v2098_v9 = vpop.f32.mrb[37].mxu1 }
 0x35d   :  { %v1666_v12 = vpop.f32.mrb[38].mxu0  ;;  %v2100_v13 = vpop.f32.mrb[38].mxu1 }
 0x35e   :  { %v1668_v25 = vpop.f32.mrb[39].mxu0  ;;  %v2623_v32 = vpack.c.bf16 %v2100_v13, %v2096_v58  ;;  %v2102_v37 = vpop.f32.mrb[39].mxu1  ;;  %v2621_v45 = vpack.c.bf16 %v1666_v12, %v1662_v53  ;;  %v18033_v58 = vld [vmem:[%s22773_s23 + $0x238] sm:$0xff]  }
 0x35f   :  { %v2624_v63 = vpack.c.bf16 %v2102_v37, %v2098_v9  ;;  %v2622_v10 = vpack.c.bf16 %v1668_v25, %v1664_v5 }
 0x361   :  { %3594 = vmatprep.mubr.bf16.mxu0 %v2622_v10  ;;  %3698 = vmatprep.mubr.bf16.mxu1 %v2624_v63 }
 0x362   :  { %3595 = vmatmul.mubr.bf16.vlgmr.msra.gmra.mrb[108].mxu0 %v2621_v45  ;;  %3699 = vmatmul.mubr.bf16.vlgmr.msra.gmra.mrb[144].mxu1 %v2623_v32 }
 0x363   :  { %v1672_v39 = vpop.f32.mrb[40].mxu0  ;;  %v2106_v42 = vpop.f32.mrb[40].mxu1  ;;  %15980 = vmatpush3.bf16.msra.mxu0 %v18019_v22 }
 0x364   :  { %v1674_v61 = vpop.f32.mrb[41].mxu0  ;;  %v2108_v15 = vpop.f32.mrb[41].mxu1  ;;  %15981 = vmatprep.subr.bf16.mxu0 %v18020_v27 }
 0x365   :  { %v1676_v31 = vpop.f32.mrb[42].mxu0  ;;  %v2110_v40 = vpop.f32.mrb[42].mxu1 }
 0x366   :  { %v1678_v1 = vpop.f32.mrb[43].mxu0  ;;  %v2633_v33 = vpack.c.bf16 %v2110_v40, %v2106_v42  ;;  %v2112_v21 = vpop.f32.mrb[43].mxu1  ;;  %v2631_v41 = vpack.c.bf16 %v1676_v31, %v1672_v39 }
 0x367   :  { %v2634_v57 = vpack.c.bf16 %v2112_v21, %v2108_v15  ;;  %v2632_v48 = vpack.c.bf16 %v1678_v1, %v1674_v61  ;;  %15982 = vmatpush3.bf16.msra.mxu0 %v18021_v36 }
 0x368   :  { %15983 = vmatprep.subr.bf16.mxu0 %v18022_v14 }
 0x369   :  { %3602 = vmatprep.mubr.bf16.mxu0 %v2632_v48  ;;  %3706 = vmatprep.mubr.bf16.mxu1 %v2634_v57 }
 0x36a   :  { %3603 = vmatmul.mubr.bf16.gmra.mrb[112].mxu0 %v2631_v41  ;;  %3707 = vmatmul.mubr.bf16.gmra.mrb[148].mxu1 %v2633_v33 }
 0x36b   :  { %v1682_v34 = vpop.f32.mrb[44].mxu0  ;;  %v2116_v62 = vpop.f32.mrb[44].mxu1  ;;  %15984 = vmatpush3.bf16.msra.mxu0 %v18023_v51 }
 0x36c   :  { %v1684_v3 = vpop.f32.mrb[45].mxu0  ;;  %v2118_v17 = vpop.f32.mrb[45].mxu1  ;;  %15985 = vmatprep.subr.bf16.mxu0 %v18024_v29 }
 0x36d   :  { %v1686_v55 = vpop.f32.mrb[46].mxu0  ;;  %v2120_v56 = vpop.f32.mrb[46].mxu1 }
 0x36e   :  { %v1688_v11 = vpop.f32.mrb[47].mxu0  ;;  %v2643_v54 = vpack.c.bf16 %v2120_v56, %v2116_v62  ;;  %v2122_v16 = vpop.f32.mrb[47].mxu1  ;;  %v2641_v7 = vpack.c.bf16 %v1686_v55, %v1682_v34 }
 0x36f   :  { %v2644_v60 = vpack.c.bf16 %v2122_v16, %v2118_v17  ;;  %v2642_v0 = vpack.c.bf16 %v1688_v11, %v1684_v3  ;;  %15986 = vmatpush3.bf16.msra.mxu0 %v18025_v30 }
 0x370   :  { %15987 = vmatprep.subr.bf16.mxu0 %v18026_v38 }
 0x371   :  { %3610 = vmatprep.mubr.bf16.mxu0 %v2642_v0  ;;  %3714 = vmatprep.mubr.bf16.mxu1 %v2644_v60 }
 0x372   :  { %3611 = vmatmul.mubr.bf16.gmra.mrb[116].mxu0 %v2641_v7  ;;  %3715 = vmatmul.mubr.bf16.gmra.mrb[152].mxu1 %v2643_v54 }
 0x373   :  { %v1692_v28 = vpop.f32.mrb[48].mxu0  ;;  %v2126_v46 = vpop.f32.mrb[48].mxu1  ;;  %15988 = vmatpush3.bf16.msra.mxu0 %v18027_v4 }
 0x374   :  { %v1694_v20 = vpop.f32.mrb[49].mxu0  ;;  %v2128_v26 = vpop.f32.mrb[49].mxu1  ;;  %15989 = vmatprep.subr.bf16.mxu0 %v18028_v49 }
 0x375   :  { %v1696_v47 = vpop.f32.mrb[50].mxu0  ;;  %v2130_v8 = vpop.f32.mrb[50].mxu1 }
 0x376   :  { %v2651_v19 = vpack.c.bf16 %v1696_v47, %v1692_v28  ;;  %v1698_v23 = vpop.f32.mrb[51].mxu0  ;;  %v2653_v52 = vpack.c.bf16 %v2130_v8, %v2126_v46  ;;  %v2132_v59 = vpop.f32.mrb[51].mxu1 }
 0x377   :  { %v2652_v6 = vpack.c.bf16 %v1698_v23, %v1694_v20  ;;  %v2654_v35 = vpack.c.bf16 %v2132_v59, %v2128_v26  ;;  %15990 = vmatpush3.bf16.msra.mxu0 %v18029_v18 }
 0x378   :  { %15991 = vmatprep.subr.bf16.mxu0 %v18030_v24 }
 0x379   :  { %3618 = vmatprep.mubr.bf16.mxu0 %v2652_v6  ;;  %3722 = vmatprep.mubr.bf16.mxu1 %v2654_v35 }
 0x37a   :  { %3619 = vmatmul.mubr.bf16.gmra.mrb[120].mxu0 %v2651_v19  ;;  %3723 = vmatmul.mubr.bf16.gmra.mrb[156].mxu1 %v2653_v52 }
 0x37b   :  { %v1702_v43 = vpop.f32.mrb[52].mxu0  ;;  %v2136_v53 = vpop.f32.mrb[52].mxu1  ;;  %15992 = vmatpush3.bf16.msra.mxu0 %v18031_v44 }
 0x37c   :  { %v1704_v5 = vpop.f32.mrb[53].mxu0  ;;  %v2138_v9 = vpop.f32.mrb[53].mxu1  ;;  %15993 = vmatprep.subr.bf16.mxu0 %v18032_v50 }
 0x37d   :  { %v1706_v12 = vpop.f32.mrb[54].mxu0  ;;  %v2140_v13 = vpop.f32.mrb[54].mxu1 }
 0x37e   :  { %v2661_v22 = vpack.c.bf16 %v1706_v12, %v1702_v43  ;;  %v1708_v25 = vpop.f32.mrb[55].mxu0  ;;  %v2663_v32 = vpack.c.bf16 %v2140_v13, %v2136_v53  ;;  %v2142_v37 = vpop.f32.mrb[55].mxu1 }
 0x37f   :  { %v2662_v45 = vpack.c.bf16 %v1708_v25, %v1704_v5  ;;  %v2664_v63 = vpack.c.bf16 %v2142_v37, %v2138_v9  ;;  %15994 = vmatpush3.bf16.msra.mxu0 %v18033_v58 }
 0x380   :  { %4247 = vmatprep.subr.bf16.mxu0 %v22753_v2 }
 0x381   :  { %3626 = vmatprep.mubr.bf16.mxu0 %v2662_v45  ;;  %3730 = vmatprep.mubr.bf16.mxu1 %v2664_v63 }
 0x382   :  { %3627 = vmatmul.mubr.bf16.gmra.mrb[124].mxu0 %v2661_v22  ;;  %3731 = vmatmul.mubr.bf16.gmra.mrb[160].mxu1 %v2663_v32 }
 0x383   :  { %v1712_v10 = vpop.f32.mrb[56].mxu0  ;;  %v2146_v27 = vpop.f32.mrb[56].mxu1 }
 0x384   :  { %v1714_v36 = vpop.f32.mrb[57].mxu0  ;;  %v2148_v39 = vpop.f32.mrb[57].mxu1 }
 0x385   :  { %v1716_v42 = vpop.f32.mrb[58].mxu0  ;;  %v2150_v61 = vpop.f32.mrb[58].mxu1 }
 0x386   :  { %v2671_v15 = vpack.c.bf16 %v1716_v42, %v1712_v10  ;;  %v1718_v14 = vpop.f32.mrb[59].mxu0  ;;  %v2673_v31 = vpack.c.bf16 %v2150_v61, %v2146_v27  ;;  %v2152_v40 = vpop.f32.mrb[59].mxu1 }
 0x387   :  { %v2672_v51 = vpack.c.bf16 %v1718_v14, %v1714_v36  ;;  %v2674_v1 = vpack.c.bf16 %v2152_v40, %v2148_v39 }
 0x389   :  { %3634 = vmatprep.mubr.bf16.mxu0 %v2672_v51  ;;  %3738 = vmatprep.mubr.bf16.mxu1 %v2674_v1 }
 0x38a   :  { %3635 = vmatmul.mubr.bf16.gmra.mrb[128].mxu0 %v2671_v15  ;;  %3739 = vmatmul.mubr.bf16.gmra.mrb[164].mxu1 %v2673_v31 }
 0x38b   :  { %v1722_v33 = vpop.f32.mrb[60].mxu0  ;;  %v2156_v21 = vpop.f32.mrb[60].mxu1 }
 0x38c   :  { %v1724_v41 = vpop.f32.mrb[61].mxu0  ;;  %v2158_v57 = vpop.f32.mrb[61].mxu1 }
 0x38d   :  { %v1726_v48 = vpop.f32.mrb[62].mxu0  ;;  %v2160_v29 = vpop.f32.mrb[62].mxu1 }
 0x38e   :  { %v2681_v30 = vpack.c.bf16 %v1726_v48, %v1722_v33  ;;  %v1728_v34 = vpop.f32.mrb[63].mxu0  ;;  %v2683_v62 = vpack.c.bf16 %v2160_v29, %v2156_v21  ;;  %v2162_v3 = vpop.f32.mrb[63].mxu1 }
 0x38f   :  { %v2682_v17 = vpack.c.bf16 %v1728_v34, %v1724_v41  ;;  %v2684_v38 = vpack.c.bf16 %v2162_v3, %v2158_v57 }
 0x391   :  { %3642 = vmatprep.mubr.bf16.mxu0 %v2682_v17  ;;  %3746 = vmatprep.mubr.bf16.mxu1 %v2684_v38 }
 0x392   :  { %3643 = vmatmul.mubr.bf16.gmra.mrb[132].mxu0 %v2681_v30  ;;  %3747 = vmatmul.mubr.bf16.gmra.mrb[168].mxu1 %v2683_v62 }
 0x393   :  { %v1732_v55 = vpop.f32.mrb[64].mxu0  ;;  %v2166_v56 = vpop.f32.mrb[64].mxu1 }
 0x394   :  { %v1734_v4 = vpop.f32.mrb[65].mxu0  ;;  %v2168_v11 = vpop.f32.mrb[65].mxu1 }
 0x395   :  { %v1736_v54 = vpop.f32.mrb[66].mxu0  ;;  %v2170_v16 = vpop.f32.mrb[66].mxu1 }
 0x396   :  { %v2691_v7 = vpack.c.bf16 %v1736_v54, %v1732_v55  ;;  %v1738_v49 = vpop.f32.mrb[67].mxu0  ;;  %v2693_v60 = vpack.c.bf16 %v2170_v16, %v2166_v56  ;;  %v2172_v0 = vpop.f32.mrb[67].mxu1 }
 0x397   :  { %v2692_v18 = vpack.c.bf16 %v1738_v49, %v1734_v4  ;;  %v2694_v24 = vpack.c.bf16 %v2172_v0, %v2168_v11 }
 0x399   :  { %3650 = vmatprep.mubr.bf16.mxu0 %v2692_v18  ;;  %3754 = vmatprep.mubr.bf16.mxu1 %v2694_v24 }
 0x39a   :  { %3651 = vmatmul.mubr.bf16.gmra.mrb[136].mxu0 %v2691_v7  ;;  %3755 = vmatmul.mubr.bf16.gmra.mrb[172].mxu1 %v2693_v60 }
 0x39b   :  { %v1742_v28 = vpop.f32.mrb[68].mxu0  ;;  %v2176_v46 = vpop.f32.mrb[68].mxu1 }
 0x39c   :  { %v1744_v20 = vpop.f32.mrb[69].mxu0  ;;  %v2178_v26 = vpop.f32.mrb[69].mxu1  ;;  %v2703_v59 = vpack.c.bf16 %v2176_v46, %v2176_v46  ;;  %v2701_v35 = vpack.c.bf16 %v1742_v28, %v1742_v28 }
 0x39d   :  { %v2702_v47 = vpack.c.bf16 %v1744_v20, %v1744_v20  ;;  %v1746_v8 = vpop.f32.mrb[70].mxu0  ;;  %v2704_v19 = vpack.c.bf16 %v2178_v26, %v2178_v26  ;;  %v2180_v23 = vpop.f32.mrb[70].mxu1  ;;  %v20495_v26 = vld [vmem:[#allocation2] ss:$0 sm:$0xff] }
 0x39e   :  { %v1747_v52 = vpop.f32.mrb[71].mxu0  ;;  %v2181_v6 = vpop.f32.mrb[71].mxu1 }
 0x39f   :  { %3658 = vmatprep.mubr.bf16.mxu0 %v2702_v47  ;;  %3762 = vmatprep.mubr.bf16.mxu1 %v2704_v19 }
 0x3a2   :  { %3659 = vmatmul.mubr.bf16.gmra.mrb[140].mxu0 %v2701_v35  ;;  %3763 = vmatmul.mubr.bf16.gmra.mrb[176].mxu1 %v2703_v59 }
 0x3a5   :  { %v15715_v44 = vpop.f32.mrb[72].mxu1 }
 0x3a6   :  { %v15716_v50 = vpop.f32.mrb[73].mxu1 }
 0x3a7   :  { %v15717_v43 = vadd.f32 %v15716_v50, %v15715_v44  ;;  %v15718_v53 = vpop.f32.mrb[74].mxu1 }
 0x3a8   :  { %v15719_v58 = vpop.f32.mrb[75].mxu1 }
 0x3a9   :  { %v15720_v5 = vadd.f32 %v15719_v58, %v15718_v53  ;;  %v3389_v6 = vadd.f32 %v15717_v43, %v20495_v26 }
 0x3ab   :  { %v3392_v58 = vadd.f32 %v15720_v5, %v20495_v26 }
 0x3ad   :  { %v15721_v9 = vpop.f32.mrb[76].mxu1 }
 0x3ae   :  { %v15722_v12 = vpop.f32.mrb[77].mxu1 }
 0x3af   :  { %v20465_v13 = vadd.f32 %v15722_v12, %v15721_v9  ;;  %v15724_v22 = vpop.f32.mrb[78].mxu1 }
 0x3b0   :  { %v15725_v25 = vpop.f32.mrb[79].mxu1 }
 0x3b1   :  { %v20467_v32 = vadd.f32 %v15725_v25, %v15724_v22 }
 0x3b5   :  { %v15727_v37 = vpop.f32.mrb[80].mxu1 }
 0x3b6   :  { %v15728_v45 = vpop.f32.mrb[81].mxu1 }
 0x3b7   :  { %v20469_v63 = vadd.f32 %v15728_v45, %v15727_v37  ;;  %v15730_v10 = vpop.f32.mrb[82].mxu1 }
 0x3b8   :  { %v15731_v27 = vpop.f32.mrb[83].mxu1 }
 0x3b9   :  { %v20471_v36 = vadd.f32 %v15731_v27, %v15730_v10 }
 0x3bd   :  { %v15733_v39 = vpop.f32.mrb[84].mxu1 }
 0x3be   :  { %v15734_v42 = vpop.f32.mrb[85].mxu1 }
 0x3bf   :  { %v20473_v61 = vadd.f32 %v15734_v42, %v15733_v39  ;;  %v15736_v15 = vpop.f32.mrb[86].mxu1  ;;  %v3397_v42 = vadd.f32 %v20465_v13, %v20495_v26 }
 0x3c0   :  { %v15737_v14 = vpop.f32.mrb[87].mxu1 }
 0x3c1   :  { %v20475_v31 = vadd.f32 %v15737_v14, %v15736_v15 }
 0x3c5   :  { %v15739_v40 = vpop.f32.mrb[88].mxu1 }
 0x3c6   :  { %v15740_v51 = vpop.f32.mrb[89].mxu1 }
 0x3c7   :  { %v20477_v1 = vadd.f32 %v15740_v51, %v15739_v40  ;;  %v15742_v33 = vpop.f32.mrb[90].mxu1  ;;  %v3400_v51 = vadd.f32 %v20467_v32, %v20495_v26 }
 0x3c8   :  { %v15743_v21 = vpop.f32.mrb[91].mxu1 }
 0x3c9   :  { %v20479_v41 = vadd.f32 %v15743_v21, %v15742_v33 }
 0x3cd   :  { %v15745_v57 = vpop.f32.mrb[92].mxu1 }
 0x3ce   :  { %v15746_v48 = vpop.f32.mrb[93].mxu1 }
 0x3cf   :  { %v20481_v29 = vadd.f32 %v15746_v48, %v15745_v57  ;;  %v15748_v30 = vpop.f32.mrb[94].mxu1 }
 0x3d0   :  { %v15749_v34 = vpop.f32.mrb[95].mxu1 }
 0x3d1   :  { %v20483_v62 = vadd.f32 %v15749_v34, %v15748_v30 }
 0x3d5   :  { %v15751_v3 = vpop.f32.mrb[96].mxu1 }
 0x3d6   :  { %v15752_v17 = vpop.f32.mrb[97].mxu1 }
 0x3d7   :  { %v20485_v38 = vadd.f32 %v15752_v17, %v15751_v3  ;;  %v15754_v55 = vpop.f32.mrb[98].mxu1 }
 0x3d8   :  { %v15755_v56 = vpop.f32.mrb[99].mxu1 }
 0x3d9   :  { %v20487_v4 = vadd.f32 %v15755_v56, %v15754_v55  ;;  %v3405_v56 = vadd.f32 %v20469_v63, %v20495_v26 }
 0x3dd   :  { %v15757_v11 = vpop.f32.mrb[100].mxu1 }
 0x3de   :  { %v15758_v54 = vpop.f32.mrb[101].mxu1 }
 0x3df   :  { %v20489_v16 = vadd.f32 %v15758_v54, %v15757_v11  ;;  %v15760_v7 = vpop.f32.mrb[102].mxu1 }
 0x3e0   :  { %v15761_v49 = vpop.f32.mrb[103].mxu1 }
 0x3e1   :  { %v20491_v60 = vadd.f32 %v15761_v49, %v15760_v7  ;;  %v3408_v49 = vadd.f32 %v20471_v36, %v20495_v26 }
 0x3e5   :  { %v15763_v0 = vpop.f32.mrb[104].mxu1 }
 0x3e6   :  { %v15764_v18 = vpop.f32.mrb[105].mxu1 }
 0x3e7   :  { %v20493_v24 = vadd.f32 %v15764_v18, %v15763_v0  ;;  %v15766_v28 = vpop.f32.mrb[106].mxu1 }
 0x3e8   :  { %v15767_v46 = vpop.f32.mrb[107].mxu1 }
 0x3eb   :  { %v2530_v20 = vpop.f32.mrb[72].mxu0 }
 0x3ec   :  { %v2532_v47 = vpop.f32.mrb[73].mxu0 }
 0x3ed   :  { %v2534_v8 = vpop.f32.mrb[74].mxu0  ;;  %v15785_v19 = vpop.f32.mrb[108].mxu1 }
 0x3ee   :  { %v2625_v23 = vpack.c.bf16 %v2534_v8, %v2530_v20  ;;  %v2536_v52 = vpop.f32.mrb[75].mxu0  ;;  %v15786_v59 = vpop.f32.mrb[109].mxu1 }
 0x3ef   :  { %v2626_v35 = vpack.c.bf16 %v2536_v52, %v2532_v47  ;;  %v15787_v44 = vadd.f32 %v15786_v59, %v15785_v19  ;;  %v15788_v50 = vpop.f32.mrb[110].mxu1  ;;  %v3413_v52 = vadd.f32 %v20473_v61, %v20495_v26 }
 0x3f0   :  { %v15789_v53 = vpop.f32.mrb[111].mxu1 }
 0x3f1   :  { %v20499_v9 = vadd.f32 %v15787_v44, %v3389_v6  ;;  %v15790_v12 = vadd.f32 %v15789_v53, %v15788_v50  ;;  %3802 = vmatprep.mubr.bf16.mxu0 %v2626_v35  ;;  %v3416_v44 = vadd.f32 %v20475_v31, %v20495_v26 }
 0x3f2   :  { %3803 = vmatmul.mubr.bf16.vlgmr.msra.gmra.mrb[144].mxu0 %v2625_v23 }
 0x3f3   :  { %v20501_v22 = vadd.f32 %v15790_v12, %v3392_v58  ;;  %v2540_v25 = vpop.f32.mrb[76].mxu0 }
 0x3f4   :  { %v2542_v37 = vpop.f32.mrb[77].mxu0 }
 0x3f5   :  { %v2544_v45 = vpop.f32.mrb[78].mxu0  ;;  %v15791_v10 = vpop.f32.mrb[112].mxu1 }
 0x3f6   :  { %v2635_v27 = vpack.c.bf16 %v2544_v45, %v2540_v25  ;;  %v2546_v39 = vpop.f32.mrb[79].mxu0  ;;  %v15792_v43 = vpop.f32.mrb[113].mxu1 }
 0x3f7   :  { %v2636_v15 = vpack.c.bf16 %v2546_v39, %v2542_v37  ;;  %v15793_v14 = vadd.f32 %v15792_v43, %v15791_v10  ;;  %v15794_v5 = vpop.f32.mrb[114].mxu1  ;;  %v3421_v39 = vadd.f32 %v20477_v1, %v20495_v26 }
 0x3f8   :  { %v15795_v40 = vpop.f32.mrb[115].mxu1 }
 0x3f9   :  { %v20507_v33 = vadd.f32 %v15793_v14, %v3397_v42  ;;  %v15796_v21 = vadd.f32 %v15795_v40, %v15794_v5  ;;  %3810 = vmatprep.mubr.bf16.mxu0 %v2636_v15  ;;  %v3424_v14 = vadd.f32 %v20479_v41, %v20495_v26 }
 0x3fa   :  { %3811 = vmatmul.mubr.bf16.gmra.mrb[148].mxu0 %v2635_v27 }
 0x3fb   :  { %v20509_v57 = vadd.f32 %v15796_v21, %v3400_v51  ;;  %v2550_v48 = vpop.f32.mrb[80].mxu0 }
 0x3fc   :  { %v2552_v30 = vpop.f32.mrb[81].mxu0 }
 0x3fd   :  { %v2554_v34 = vpop.f32.mrb[82].mxu0  ;;  %v15797_v3 = vpop.f32.mrb[116].mxu1 }
 0x3fe   :  { %v2645_v17 = vpack.c.bf16 %v2554_v34, %v2550_v48  ;;  %v2556_v13 = vpop.f32.mrb[83].mxu0  ;;  %v15798_v55 = vpop.f32.mrb[117].mxu1 }
 0x3ff   :  { %v2646_v11 = vpack.c.bf16 %v2556_v13, %v2552_v30  ;;  %v15799_v54 = vadd.f32 %v15798_v55, %v15797_v3  ;;  %v15800_v32 = vpop.f32.mrb[118].mxu1  ;;  %v3429_v13 = vadd.f32 %v20481_v29, %v20495_v26 }
 0x400   :  { %v15801_v7 = vpop.f32.mrb[119].mxu1 }
 0x401   :  { %v20515_v0 = vadd.f32 %v15799_v54, %v3405_v56  ;;  %v15802_v18 = vadd.f32 %v15801_v7, %v15800_v32  ;;  %3818 = vmatprep.mubr.bf16.mxu0 %v2646_v11  ;;  %v3432_v54 = vadd.f32 %v20483_v62, %v20495_v26 }
 0x402   :  { %3819 = vmatmul.mubr.bf16.gmra.mrb[152].mxu0 %v2645_v17 }
 0x403   :  { %v20517_v28 = vadd.f32 %v15802_v18, %v3408_v49  ;;  %v2560_v46 = vpop.f32.mrb[84].mxu0 }
 0x404   :  { %v2562_v20 = vpop.f32.mrb[85].mxu0 }
 0x405   :  { %v2564_v47 = vpop.f32.mrb[86].mxu0  ;;  %v15803_v8 = vpop.f32.mrb[120].mxu1 }
 0x406   :  { %v2655_v19 = vpack.c.bf16 %v2564_v47, %v2560_v46  ;;  %v2566_v63 = vpop.f32.mrb[87].mxu0  ;;  %v15804_v23 = vpop.f32.mrb[121].mxu1 }
 0x407   :  { %v2656_v59 = vpack.c.bf16 %v2566_v63, %v2562_v20  ;;  %v15805_v6 = vadd.f32 %v15804_v23, %v15803_v8  ;;  %v15806_v36 = vpop.f32.mrb[122].mxu1  ;;  %v3437_v63 = vadd.f32 %v20485_v38, %v20495_v26 }
 0x408   :  { %v15807_v35 = vpop.f32.mrb[123].mxu1 }
 0x409   :  { %v20523_v50 = vadd.f32 %v15805_v6, %v3413_v52  ;;  %v15808_v53 = vadd.f32 %v15807_v35, %v15806_v36  ;;  %3826 = vmatprep.mubr.bf16.mxu0 %v2656_v59  ;;  %v3440_v6 = vadd.f32 %v20487_v4, %v20495_v26 }
 0x40a   :  { %3827 = vmatmul.mubr.bf16.gmra.mrb[156].mxu0 %v2655_v19 }
 0x40b   :  { %v20525_v58 = vadd.f32 %v15808_v53, %v3416_v44  ;;  %v2570_v12 = vpop.f32.mrb[88].mxu0 }
 0x40c   :  { %v2572_v25 = vpop.f32.mrb[89].mxu0 }
 0x40d   :  { %v2574_v37 = vpop.f32.mrb[90].mxu0  ;;  %v15809_v45 = vpop.f32.mrb[124].mxu1 }
 0x40e   :  { %v2665_v10 = vpack.c.bf16 %v2574_v37, %v2570_v12  ;;  %v2576_v61 = vpop.f32.mrb[91].mxu0  ;;  %v15810_v27 = vpop.f32.mrb[125].mxu1 }
 0x40f   :  { %v2666_v43 = vpack.c.bf16 %v2576_v61, %v2572_v25  ;;  %v15811_v42 = vadd.f32 %v15810_v27, %v15809_v45  ;;  %v15812_v31 = vpop.f32.mrb[126].mxu1  ;;  %v3445_v61 = vadd.f32 %v20489_v16, %v20495_v26 }
 0x410   :  { %v15813_v15 = vpop.f32.mrb[127].mxu1 }
 0x411   :  { %v20531_v5 = vadd.f32 %v15811_v42, %v3421_v39  ;;  %v15814_v40 = vadd.f32 %v15813_v15, %v15812_v31  ;;  %3834 = vmatprep.mubr.bf16.mxu0 %v2666_v43  ;;  %v3448_v42 = vadd.f32 %v20491_v60, %v20495_v26 }
 0x412   :  { %3835 = vmatmul.mubr.bf16.gmra.mrb[160].mxu0 %v2665_v10 }
 0x413   :  { %v20533_v51 = vadd.f32 %v15814_v40, %v3424_v14  ;;  %v2580_v21 = vpop.f32.mrb[92].mxu0 }
 0x414   :  { %v2582_v48 = vpop.f32.mrb[93].mxu0 }
 0x415   :  { %v2584_v30 = vpop.f32.mrb[94].mxu0  ;;  %v15815_v34 = vpop.f32.mrb[128].mxu1 }
 0x416   :  { %v2675_v3 = vpack.c.bf16 %v2584_v30, %v2580_v21  ;;  %v2586_v1 = vpop.f32.mrb[95].mxu0  ;;  %v15816_v17 = vpop.f32.mrb[129].mxu1 }
 0x417   :  { %v2676_v55 = vpack.c.bf16 %v2586_v1, %v2582_v48  ;;  %v15817_v56 = vadd.f32 %v15816_v17, %v15815_v34  ;;  %v15818_v41 = vpop.f32.mrb[130].mxu1  ;;  %v3453_v1 = vadd.f32 %v20493_v24, %v20495_v26 }
 0x418   :  { %v15819_v11 = vpop.f32.mrb[131].mxu1 }
 0x419   :  { %v20539_v32 = vadd.f32 %v15817_v56, %v3429_v13  ;;  %v15820_v7 = vadd.f32 %v15819_v11, %v15818_v41  ;;  %3842 = vmatprep.mubr.bf16.mxu0 %v2676_v55 }
 0x41a   :  { %3843 = vmatmul.mubr.bf16.gmra.mrb[164].mxu0 %v2675_v3 }
 0x41b   :  { %v20541_v49 = vadd.f32 %v15820_v7, %v3432_v54  ;;  %v2590_v18 = vpop.f32.mrb[96].mxu0 }
 0x41c   :  { %v2592_v46 = vpop.f32.mrb[97].mxu0 }
 0x41d   :  { %v2594_v20 = vpop.f32.mrb[98].mxu0  ;;  %v15821_v47 = vpop.f32.mrb[132].mxu1 }
 0x41e   :  { %v2685_v8 = vpack.c.bf16 %v2594_v20, %v2590_v18  ;;  %v2596_v29 = vpop.f32.mrb[99].mxu0  ;;  %v15822_v19 = vpop.f32.mrb[133].mxu1 }
 0x41f   :  { %v2686_v23 = vpack.c.bf16 %v2596_v29, %v2592_v46  ;;  %v15823_v52 = vadd.f32 %v15822_v19, %v15821_v47  ;;  %v15824_v62 = vpop.f32.mrb[134].mxu1 }
 0x420   :  { %v15825_v59 = vpop.f32.mrb[135].mxu1 }
 0x421   :  { %v20547_v36 = vadd.f32 %v15823_v52, %v3437_v63  ;;  %v15826_v35 = vadd.f32 %v15825_v59, %v15824_v62  ;;  %3850 = vmatprep.mubr.bf16.mxu0 %v2686_v23 }
 0x422   :  { %3851 = vmatmul.mubr.bf16.gmra.mrb[168].mxu0 %v2685_v8 }
 0x423   :  { %v20549_v44 = vadd.f32 %v15826_v35, %v3440_v6  ;;  %v2600_v53 = vpop.f32.mrb[100].mxu0 }
 0x424   :  { %v2602_v12 = vpop.f32.mrb[101].mxu0 }
 0x425   :  { %v2604_v25 = vpop.f32.mrb[102].mxu0  ;;  %v15827_v37 = vpop.f32.mrb[136].mxu1 }
 0x426   :  { %v2695_v45 = vpack.c.bf16 %v2604_v25, %v2600_v53  ;;  %v2606_v38 = vpop.f32.mrb[103].mxu0  ;;  %v15828_v10 = vpop.f32.mrb[137].mxu1 }
 0x427   :  { %v2696_v27 = vpack.c.bf16 %v2606_v38, %v2602_v12  ;;  %v15829_v39 = vadd.f32 %v15828_v10, %v15827_v37  ;;  %v15830_v4 = vpop.f32.mrb[138].mxu1 }
 0x428   :  { %v15831_v43 = vpop.f32.mrb[139].mxu1 }
 0x429   :  { %v20555_v31 = vadd.f32 %v15829_v39, %v3445_v61  ;;  %v15832_v15 = vadd.f32 %v15831_v43, %v15830_v4  ;;  %3858 = vmatprep.mubr.bf16.mxu0 %v2696_v27 }
 0x42a   :  { %3859 = vmatmul.mubr.bf16.gmra.mrb[172].mxu0 %v2695_v45 }
 0x42b   :  { %v20557_v14 = vadd.f32 %v15832_v15, %v3448_v42  ;;  %v2610_v40 = vpop.f32.mrb[104].mxu0 }
 0x42c   :  { %v2612_v21 = vpop.f32.mrb[105].mxu0  ;;  %v2705_v60 = vpack.c.bf16 %v2610_v40, %v2610_v40 }
 0x42d   :  { %v2706_v48 = vpack.c.bf16 %v2612_v21, %v2612_v21  ;;  %v2614_v30 = vpop.f32.mrb[106].mxu0  ;;  %v15833_v34 = vpop.f32.mrb[140].mxu1 }
 0x42e   :  { %v2615_v16 = vpop.f32.mrb[107].mxu0  ;;  %v15834_v3 = vpop.f32.mrb[141].mxu1 }
 0x42f   :  { %v15835_v17 = vadd.f32 %v15834_v3, %v15833_v34  ;;  %v15836_v13 = vpop.f32.mrb[142].mxu1  ;;  %3866 = vmatprep.mubr.bf16.mxu0 %v2706_v48 }
 0x430   :  { %v15837_v55 = vpop.f32.mrb[143].mxu1 }
 0x431   :  { %v20561_v56 = vadd.f32 %v15835_v17, %v3453_v1 }
 0x432   :  { %3867 = vmatmul.mubr.bf16.gmra.mrb[176].mxu0 %v2705_v60 }
 0x435   :  { %v15855_v41 = vpop.f32.mrb[108].mxu0  ;;  %v15925_v11 = vpop.f32.mrb[144].mxu1 }
 0x436   :  { %v15856_v54 = vpop.f32.mrb[109].mxu0  ;;  %v15926_v7 = vpop.f32.mrb[145].mxu1 }
 0x437   :  { %v15857_v18 = vadd.f32 %v15856_v54, %v15855_v41  ;;  %v15858_v46 = vpop.f32.mrb[110].mxu0  ;;  %v15927_v20 = vadd.f32 %v15926_v7, %v15925_v11  ;;  %v15928_v47 = vpop.f32.mrb[146].mxu1 }
 0x438   :  { %v15859_v8 = vpop.f32.mrb[111].mxu0  ;;  %v15929_v29 = vpop.f32.mrb[147].mxu1 }
 0x439   :  { %v3597_v24 = vadd.f32 %v15857_v18, %v20499_v9  ;;  %v15860_v26 = vadd.f32 %v15859_v8, %v15858_v46  ;;  %v15930_v19 = vadd.f32 %v15929_v29, %v15928_v47 }
 0x43b   :  { %v3600_v63 = vadd.f32 %v15860_v26, %v20501_v22  ;;  %v20565_v23 = vadd.f32 %v15927_v20, %v3597_v24 }
 0x43d   :  { %v20567_v52 = vadd.f32 %v15930_v19, %v3600_v63  ;;  %v15861_v62 = vpop.f32.mrb[112].mxu0  ;;  %v15931_v59 = vpop.f32.mrb[148].mxu1 }
 0x43e   :  { %v15862_v6 = vpop.f32.mrb[113].mxu0  ;;  %v15932_v35 = vpop.f32.mrb[149].mxu1 }
 0x43f   :  { %v15863_v53 = vadd.f32 %v15862_v6, %v15861_v62  ;;  %v15864_v12 = vpop.f32.mrb[114].mxu0  ;;  %v15933_v25 = vadd.f32 %v15932_v35, %v15931_v59  ;;  %v15934_v37 = vpop.f32.mrb[150].mxu1 }
 0x440   :  { %v15865_v45 = vpop.f32.mrb[115].mxu0  ;;  %v15935_v38 = vpop.f32.mrb[151].mxu1 }
 0x441   :  { %v3605_v9 = vadd.f32 %v15863_v53, %v20507_v33  ;;  %v15866_v10 = vadd.f32 %v15865_v45, %v15864_v12  ;;  %v15936_v61 = vadd.f32 %v15935_v38, %v15934_v37 }
 0x443   :  { %v3608_v22 = vadd.f32 %v15866_v10, %v20509_v57  ;;  %v20571_v27 = vadd.f32 %v15933_v25, %v3605_v9 }
 0x445   :  { %v20573_v39 = vadd.f32 %v15936_v61, %v3608_v22  ;;  %v15867_v4 = vpop.f32.mrb[116].mxu0  ;;  %v15937_v43 = vpop.f32.mrb[152].mxu1 }
 0x446   :  { %v15868_v42 = vpop.f32.mrb[117].mxu0  ;;  %v15938_v15 = vpop.f32.mrb[153].mxu1 }
 0x447   :  { %v15869_v40 = vadd.f32 %v15868_v42, %v15867_v4  ;;  %v15870_v21 = vpop.f32.mrb[118].mxu0  ;;  %v15939_v48 = vadd.f32 %v15938_v15, %v15937_v43  ;;  %v15940_v30 = vpop.f32.mrb[154].mxu1 }
 0x448   :  { %v15871_v34 = vpop.f32.mrb[119].mxu0  ;;  %v15941_v16 = vpop.f32.mrb[155].mxu1 }
 0x449   :  { %v3613_v33 = vadd.f32 %v15869_v40, %v20515_v0  ;;  %v15872_v3 = vadd.f32 %v15871_v34, %v15870_v21  ;;  %v15942_v1 = vadd.f32 %v15941_v16, %v15940_v30 }
 0x44b   :  { %v3616_v57 = vadd.f32 %v15872_v3, %v20517_v28  ;;  %v20577_v17 = vadd.f32 %v15939_v48, %v3613_v33 }
 0x44d   :  { %v20579_v13 = vadd.f32 %v15942_v1, %v3616_v57  ;;  %v15873_v60 = vpop.f32.mrb[120].mxu0  ;;  %v15943_v55 = vpop.f32.mrb[156].mxu1 }
 0x44e   :  { %v15874_v41 = vpop.f32.mrb[121].mxu0  ;;  %v15944_v11 = vpop.f32.mrb[157].mxu1 }
 0x44f   :  { %v15875_v54 = vadd.f32 %v15874_v41, %v15873_v60  ;;  %v15876_v7 = vpop.f32.mrb[122].mxu0  ;;  %v15945_v18 = vadd.f32 %v15944_v11, %v15943_v55  ;;  %v15946_v46 = vpop.f32.mrb[158].mxu1 }
 0x450   :  { %v15877_v20 = vpop.f32.mrb[123].mxu0  ;;  %v15947_v47 = vpop.f32.mrb[159].mxu1 }
 0x451   :  { %v3621_v0 = vadd.f32 %v15875_v54, %v20523_v50  ;;  %v15878_v8 = vadd.f32 %v15877_v20, %v15876_v7  ;;  %v15948_v29 = vadd.f32 %v15947_v47, %v15946_v46 }
 0x453   :  { %v3624_v28 = vadd.f32 %v15878_v8, %v20525_v58  ;;  %v20583_v24 = vadd.f32 %v15945_v18, %v3621_v0 }
 0x455   :  { %v20585_v26 = vadd.f32 %v15948_v29, %v3624_v28  ;;  %v15879_v19 = vpop.f32.mrb[124].mxu0  ;;  %v15949_v63 = vpop.f32.mrb[160].mxu1 }
 0x456   :  { %v15880_v62 = vpop.f32.mrb[125].mxu0  ;;  %v15950_v59 = vpop.f32.mrb[161].mxu1 }
 0x457   :  { %v15881_v6 = vadd.f32 %v15880_v62, %v15879_v19  ;;  %v15882_v35 = vpop.f32.mrb[126].mxu0  ;;  %v15951_v53 = vadd.f32 %v15950_v59, %v15949_v63  ;;  %v15952_v12 = vpop.f32.mrb[162].mxu1 }
 0x458   :  { %v15883_v25 = vpop.f32.mrb[127].mxu0  ;;  %v15953_v37 = vpop.f32.mrb[163].mxu1 }
 0x459   :  { %v3629_v50 = vadd.f32 %v15881_v6, %v20531_v5  ;;  %v15884_v45 = vadd.f32 %v15883_v25, %v15882_v35  ;;  %v15954_v38 = vadd.f32 %v15953_v37, %v15952_v12 }
 0x45b   :  { %v3632_v58 = vadd.f32 %v15884_v45, %v20533_v51  ;;  %v20589_v9 = vadd.f32 %v15951_v53, %v3629_v50 }
 0x45d   :  { %v20591_v10 = vadd.f32 %v15954_v38, %v3632_v58  ;;  %v15885_v61 = vpop.f32.mrb[128].mxu0  ;;  %v15955_v22 = vpop.f32.mrb[164].mxu1 }
 0x45e   :  { %v15886_v4 = vpop.f32.mrb[129].mxu0  ;;  %v15956_v43 = vpop.f32.mrb[165].mxu1 }
 0x45f   :  { %v15887_v42 = vadd.f32 %v15886_v4, %v15885_v61  ;;  %v15888_v15 = vpop.f32.mrb[130].mxu0  ;;  %v15957_v40 = vadd.f32 %v15956_v43, %v15955_v22  ;;  %v15958_v21 = vpop.f32.mrb[166].mxu1 }
 0x460   :  { %v15889_v48 = vpop.f32.mrb[131].mxu0  ;;  %v15959_v30 = vpop.f32.mrb[167].mxu1 }
 0x461   :  { %v3637_v5 = vadd.f32 %v15887_v42, %v20539_v32  ;;  %v15890_v34 = vadd.f32 %v15889_v48, %v15888_v15  ;;  %v15960_v16 = vadd.f32 %v15959_v30, %v15958_v21  ;;  %v18039_v30 = vld [vmem:[%s22774_s30 + $0x94] ss:$8 sps:$4 sm:$0xff]  }
 0x462   :  { %14537 = vmatprep.mubr.msk.bf16.mxu0 %vm604_vm1, %v18039_v30 }
 0x463   :  { %v3640_v51 = vadd.f32 %v15890_v34, %v20541_v49  ;;  %v20595_v33 = vadd.f32 %v15957_v40, %v3637_v5 }
 0x465   :  { %v20597_v3 = vadd.f32 %v15960_v16, %v3640_v51  ;;  %v15891_v1 = vpop.f32.mrb[132].mxu0  ;;  %v15961_v57 = vpop.f32.mrb[168].mxu1 }
 0x466   :  { %v15892_v60 = vpop.f32.mrb[133].mxu0  ;;  %v15962_v55 = vpop.f32.mrb[169].mxu1 }
 0x467   :  { %v15893_v41 = vadd.f32 %v15892_v60, %v15891_v1  ;;  %v15894_v11 = vpop.f32.mrb[134].mxu0  ;;  %v15963_v54 = vadd.f32 %v15962_v55, %v15961_v57  ;;  %v15964_v7 = vpop.f32.mrb[170].mxu1 }
 0x468   :  { %v15895_v18 = vpop.f32.mrb[135].mxu0  ;;  %v15965_v46 = vpop.f32.mrb[171].mxu1 }
 0x469   :  { %v3645_v32 = vadd.f32 %v15893_v41, %v20547_v36  ;;  %v15896_v20 = vadd.f32 %v15895_v18, %v15894_v11  ;;  %v15966_v47 = vadd.f32 %v15965_v46, %v15964_v7 }
 0x46b   :  { %v3648_v49 = vadd.f32 %v15896_v20, %v20549_v44  ;;  %v20601_v0 = vadd.f32 %v15963_v54, %v3645_v32 }
 0x46d   :  { %v20603_v8 = vadd.f32 %v15966_v47, %v3648_v49  ;;  %v15897_v29 = vpop.f32.mrb[136].mxu0  ;;  %v15967_v28 = vpop.f32.mrb[172].mxu1 }
 0x46e   :  { %v15898_v19 = vpop.f32.mrb[137].mxu0  ;;  %v15968_v63 = vpop.f32.mrb[173].mxu1 }
 0x46f   :  { %v15899_v62 = vadd.f32 %v15898_v19, %v15897_v29  ;;  %v15900_v59 = vpop.f32.mrb[138].mxu0  ;;  %v15969_v6 = vadd.f32 %v15968_v63, %v15967_v28  ;;  %v15970_v35 = vpop.f32.mrb[174].mxu1 }
 0x470   :  { %v15901_v53 = vpop.f32.mrb[139].mxu0  ;;  %v15971_v12 = vpop.f32.mrb[175].mxu1 }
 0x471   :  { %v3653_v36 = vadd.f32 %v15899_v62, %v20555_v31  ;;  %v15902_v25 = vadd.f32 %v15901_v53, %v15900_v59  ;;  %v15972_v37 = vadd.f32 %v15971_v12, %v15970_v35 }
 0x473   :  { %v3656_v44 = vadd.f32 %v15902_v25, %v20557_v14  ;;  %v20607_v50 = vadd.f32 %v15969_v6, %v3653_v36  ;;  %v18036_v14 = vld [vmem:[%s22774_s30 + $0x4] ss:$8 sps:$4 sm:$0xff]  }
 0x474   :  { %14489 = vmatprep.mubr.msk.bf16.mxu1 %vm604_vm1, %v18036_v14 }
 0x475   :  { %v20609_v45 = vadd.f32 %v15972_v37, %v3656_v44  ;;  %v15903_v38 = vpop.f32.mrb[140].mxu0  ;;  %v15973_v58 = vpop.f32.mrb[176].mxu1 }
 0x476   :  { %v15904_v61 = vpop.f32.mrb[141].mxu0  ;;  %v15974_v22 = vpop.f32.mrb[177].mxu1 }
 0x477   :  { %v15905_v4 = vadd.f32 %v15904_v61, %v15903_v38  ;;  %v15906_v43 = vpop.f32.mrb[142].mxu0  ;;  %v15975_v42 = vadd.f32 %v15974_v22, %v15973_v58  ;;  %v15976_v15 = vpop.f32.mrb[178].mxu1 }
 0x478   :  { %v15907_v40 = vpop.f32.mrb[143].mxu0  ;;  %v15977_v31 = vpop.f32.mrb[179].mxu1 }
 0x479   :  { %v3661_v21 = vadd.f32 %v15905_v4, %v20561_v56 }
 0x47b   :  { %v20612_v48 = vadd.f32 %v15975_v42, %v3661_v21 }
 0x4c5   :  { %v15995_v5 = vpop.f32.mrb[144].mxu0 }
 0x4c6   :  { %v15996_v34 = vpop.f32.mrb[145].mxu0 }
 0x4c7   :  { %v15997_v16 = vadd.f32 %v15996_v34, %v15995_v5  ;;  %v15998_v51 = vpop.f32.mrb[146].mxu0 }
 0x4c8   :  { %v15999_v1 = vpop.f32.mrb[147].mxu0 }
 0x4c9   :  { %v3805_v57 = vadd.f32 %v15997_v16, %v20565_v23  ;;  %v16000_v60 = vadd.f32 %v15999_v1, %v15998_v51 }
 0x4cb   :  { %v3808_v55 = vadd.f32 %v16000_v60, %v20567_v52  ;;  %v3874_v41 = vmax.f32 %v3805_v57, 0.0 }
 0x4cd   :  { %v3875_v56 = vmax.f32 %v3808_v55, 0.0  ;;  %v16001_v11 = vpop.f32.mrb[148].mxu0 }
 0x4ce   :  { %v16002_v54 = vpop.f32.mrb[149].mxu0 }
 0x4cf   :  { %v20620_v7 = vpack.c.bf16 %v3875_v56, %v3874_v41  ;;  %v16003_v18 = vadd.f32 %v16002_v54, %v16001_v11  ;;  %v16004_v46 = vpop.f32.mrb[150].mxu0 }
 0x4d0   :  { %v16005_v32 = vpop.f32.mrb[151].mxu0 }
 0x4d1   :  { %v3813_v20 = vadd.f32 %v16003_v18, %v20571_v27  ;;  %v16006_v47 = vadd.f32 %v16005_v32, %v16004_v46  ;;  %3970 = vmatpush1.bf16.msra.mxu1 %v20620_v7  ;;  %4248 = vmatpush1.bf16.msra.mxu0 %v20620_v7 }
 0x4d2   :  { %3971 = vmatprep.subr.bf16.mxu1 %v22753_v2  ;;  %4249 = vmatprep.subr.bf16.mxu0 %v22753_v2 }
 0x4d3   :  { %v3816_v23 = vadd.f32 %v16006_v47, %v20573_v39  ;;  %v3876_v52 = vmax.f32 %v3813_v20, 0.0 }
 0x4d5   :  { %v3877_v49 = vmax.f32 %v3816_v23, 0.0  ;;  %v16007_v29 = vpop.f32.mrb[152].mxu0 }
 0x4d6   :  { %v16008_v28 = vpop.f32.mrb[153].mxu0 }
 0x4d7   :  { %v20628_v19 = vpack.c.bf16 %v3877_v49, %v3876_v52  ;;  %v16009_v63 = vadd.f32 %v16008_v28, %v16007_v29  ;;  %v16010_v62 = vpop.f32.mrb[154].mxu0 }
 0x4d8   :  { %v16011_v27 = vpop.f32.mrb[155].mxu0 }
 0x4d9   :  { %v3821_v59 = vadd.f32 %v16009_v63, %v20577_v17  ;;  %v16012_v6 = vadd.f32 %v16011_v27, %v16010_v62  ;;  %3972 = vmatpush1.bf16.msra.mxu1 %v20628_v19  ;;  %4250 = vmatpush1.bf16.msra.mxu0 %v20628_v19 }
 0x4da   :  { %3973 = vmatprep.subr.bf16.mxu1 %v22753_v2  ;;  %4251 = vmatprep.subr.bf16.mxu0 %v22753_v2 }
 0x4db   :  { %v3824_v39 = vadd.f32 %v16012_v6, %v20579_v13  ;;  %v3878_v35 = vmax.f32 %v3821_v59, 0.0 }
 0x4dd   :  { %v3879_v53 = vmax.f32 %v3824_v39, 0.0  ;;  %v16013_v12 = vpop.f32.mrb[156].mxu0 }
 0x4de   :  { %v16014_v36 = vpop.f32.mrb[157].mxu0 }
 0x4df   :  { %v20636_v25 = vpack.c.bf16 %v3879_v53, %v3878_v35  ;;  %v16015_v37 = vadd.f32 %v16014_v36, %v16013_v12  ;;  %v16016_v44 = vpop.f32.mrb[158].mxu0 }
 0x4e0   :  { %v16017_v17 = vpop.f32.mrb[159].mxu0 }
 0x4e1   :  { %v3829_v38 = vadd.f32 %v16015_v37, %v20583_v24  ;;  %v16018_v58 = vadd.f32 %v16017_v17, %v16016_v44  ;;  %3974 = vmatpush1.bf16.msra.mxu1 %v20636_v25  ;;  %4252 = vmatpush1.bf16.msra.mxu0 %v20636_v25 }
 0x4e2   :  { %3975 = vmatprep.subr.bf16.mxu1 %v22753_v2  ;;  %4253 = vmatprep.subr.bf16.mxu0 %v22753_v2 }
 0x4e3   :  { %v3832_v13 = vadd.f32 %v16018_v58, %v20585_v26  ;;  %v3880_v61 = vmax.f32 %v3829_v38, 0.0  ;;  %v18034_v38 = vld [vmem:[%s22774_s30] ss:$8 sps:$4 sm:$0xff]   ;;  %v18037_v58 = vld [vmem:[%s22774_s30 + $0x90] ss:$8 sps:$4 sm:$0xff]  }
 0x4e5   :  { %v3881_v22 = vmax.f32 %v3832_v13, 0.0  ;;  %v16019_v4 = vpop.f32.mrb[160].mxu0  ;;  %v18057_v13 = vld [vmem:[%s22774_s30 + $0xa4] ss:$8 sps:$4 sm:$0xff]  }
 0x4e6   :  { %v16020_v43 = vpop.f32.mrb[161].mxu0 }
 0x4e7   :  { %v20644_v42 = vpack.c.bf16 %v3881_v22, %v3880_v61  ;;  %v16021_v15 = vadd.f32 %v16020_v43, %v16019_v4  ;;  %v16022_v40 = vpop.f32.mrb[162].mxu0  ;;  %v18042_v61 = vld [vmem:[%s22774_s30 + $0x10] ss:$8 sps:$4 sm:$0xff]   ;;  %v18059_v22 = vld [vmem:[%s22774_s30 + $0xa0] ss:$8 sps:$4 sm:$0xff]  }
 0x4e8   :  { %v16023_v24 = vpop.f32.mrb[163].mxu0  ;;  %v18043_v4 = vld [vmem:[%s22774_s30 + $0x24] ss:$8 sps:$4 sm:$0xff]   ;;  %v18063_v43 = vld [vmem:[%s22774_s30 + $0xb4] ss:$8 sps:$4 sm:$0xff]  }
 0x4e9   :  { %v3837_v31 = vadd.f32 %v16021_v15, %v20589_v9  ;;  %v16024_v21 = vadd.f32 %v16023_v24, %v16022_v40  ;;  %3976 = vmatpush1.bf16.msra.mxu1 %v20644_v42  ;;  %4254 = vmatpush1.bf16.msra.mxu0 %v20644_v42  ;;  %v18045_v15 = vld [vmem:[%s22774_s30 + $0x20] ss:$8 sps:$4 sm:$0xff]   ;;  %v18065_v40 = vld [vmem:[%s22774_s30 + $0xb0] ss:$8 sps:$4 sm:$0xff]   ;;  %v18046_v24 = vld [vmem:[%s22774_s30 + $0x34] ss:$8 sps:$4 sm:$0xff]  }
 0x4ea   :  { %3977 = vmatprep.subr.bf16.mxu1 %v22753_v2  ;;  %4255 = vmatprep.subr.bf16.mxu0 %v22753_v2 }
 0x4eb   :  { %v3840_v26 = vadd.f32 %v16024_v21, %v20591_v10  ;;  %v3882_v14 = vmax.f32 %v3837_v31, 0.0  ;;  %v18069_v31 = vld [vmem:[%s22774_s30 + $0xc4] ss:$8 sps:$4 sm:$0xff]   ;;  %v18048_v21 = vld [vmem:[%s22774_s30 + $0x30] ss:$8 sps:$4 sm:$0xff]  }
 0x4ed   :  { %v3883_v30 = vmax.f32 %v3840_v26, 0.0  ;;  %v16025_v5 = vpop.f32.mrb[164].mxu0  ;;  %v3908_v26 = vld [vmem:[%s22774_s30 + $0x40] sm:$0xff] }
 0x4ee   :  { %v16026_v34 = vpop.f32.mrb[165].mxu0 }
 0x4ef   :  { %v20652_v16 = vpack.c.bf16 %v3883_v30, %v3882_v14  ;;  %v16027_v51 = vadd.f32 %v16026_v34, %v16025_v5  ;;  %v16028_v1 = vpop.f32.mrb[166].mxu0  ;;  %v18071_v14 = vld [vmem:[%s22774_s30 + $0xc0] ss:$8 sps:$4 sm:$0xff]   ;;  %v14526_v30 = vld [vmem:[%s22774_s30 + $0xd0] sm:$0xff]  ;;  %v14488_v5 = vcombine.high %v3908_v26, %v3908_v26 }
 0x4f0   :  { %v16029_v9 = vpop.f32.mrb[167].mxu0  ;;  %v14536_v34 = vcombine.high %v14526_v30, %v14526_v30 }
 0x4f1   :  { %v3845_v57 = vadd.f32 %v16027_v51, %v20595_v33  ;;  %v16030_v60 = vadd.f32 %v16029_v9, %v16028_v1  ;;  %3978 = vmatpush1.bf16.msra.mxu1 %v20652_v16  ;;  %4256 = vmatpush1.bf16.msra.mxu0 %v20652_v16  ;;  %v14487_v51 = vcombine.low %v3908_v26, %v3908_v26  ;;  %v18053_v9 = vld [vmem:[%s22774_s30 + $0x4c] ss:$8 sps:$4 sm:$0xff]   ;;  %v18129_v26 = vld [vmem:[#allocation4 + $0xd8] sm:$0xff]  }
 0x4f2   :  { %3979 = vmatprep.subr.bf16.mxu1 %v22753_v2  ;;  %4257 = vmatprep.subr.bf16.mxu0 %v22753_v2  ;;  %v14535_v1 = vcombine.low %v14526_v30, %v14526_v30  ;;  %v18132_v30 = vld [vmem:[#allocation4 + $0xe0] sm:$0xff]  }
 0x4f3   :  { %v3848_v10 = vadd.f32 %v16030_v60, %v20597_v3  ;;  %v3884_v55 = vmax.f32 %v3845_v57, 0.0  ;;  %v18081_v57 = vld [vmem:[%s22774_s30 + $0x124] ss:$8 sps:$4 sm:$0xff]   ;;  %v18051_v60 = vld [vmem:[%s22774_s30 + $0x48] ss:$8 sps:$4 sm:$0xff]  }
 0x4f5   :  { %v3885_v41 = vmax.f32 %v3848_v10, 0.0  ;;  %v16031_v56 = vpop.f32.mrb[168].mxu0  ;;  %v18079_v10 = vld [vmem:[%s22774_s30 + $0x120] ss:$8 sps:$4 sm:$0xff]  }
 0x4f6   :  { %v16032_v11 = vpop.f32.mrb[169].mxu0 }
 0x4f7   :  { %v20660_v54 = vpack.c.bf16 %v3885_v41, %v3884_v55  ;;  %v16033_v18 = vadd.f32 %v16032_v11, %v16031_v56  ;;  %v16034_v46 = vpop.f32.mrb[170].mxu0  ;;  %v18054_v55 = vld [vmem:[%s22774_s30 + $0x5c] ss:$8 sps:$4 sm:$0xff]   ;;  %v18056_v56 = vld [vmem:[%s22774_s30 + $0x58] ss:$8 sps:$4 sm:$0xff]  }
 0x4f8   :  { %v16035_v33 = vpop.f32.mrb[171].mxu0  ;;  %v18085_v41 = vld [vmem:[%s22774_s30 + $0x134] ss:$8 sps:$4 sm:$0xff]   ;;  %v18087_v11 = vld [vmem:[%s22774_s30 + $0x130] ss:$8 sps:$4 sm:$0xff]  }
 0x4f9   :  { %v3853_v32 = vadd.f32 %v16033_v18, %v20601_v0  ;;  %v16036_v20 = vadd.f32 %v16035_v33, %v16034_v46  ;;  %3980 = vmatpush1.bf16.msra.mxu1 %v20660_v54  ;;  %4258 = vmatpush1.bf16.msra.mxu0 %v20660_v54  ;;  %v18060_v18 = vld [vmem:[%s22774_s30 + $0x6c] ss:$8 sps:$4 sm:$0xff]   ;;  %v18066_v33 = vld [vmem:[%s22774_s30 + $0x7c] ss:$8 sps:$4 sm:$0xff]  }
 0x4fa   :  { %3981 = vmatprep.subr.bf16.mxu1 %v22753_v2  ;;  %4259 = vmatprep.subr.bf16.mxu0 %v22753_v2  ;;  %v18091_v46 = vld [vmem:[%s22774_s30 + $0x144] ss:$8 sps:$4 sm:$0xff]  }
 0x4fb   :  { %v3856_v3 = vadd.f32 %v16036_v20, %v20603_v8  ;;  %v3886_v47 = vmax.f32 %v3853_v32, 0.0  ;;  %v18097_v32 = vld [vmem:[%s22774_s30 + $0x154] ss:$8 sps:$4 sm:$0xff]   ;;  %v14574_v20 = vld [vmem:[%s22774_s30 + $0x160] sm:$0xff] }
 0x4fd   :  { %v3887_v23 = vmax.f32 %v3856_v3, 0.0  ;;  %v16037_v52 = vpop.f32.mrb[172].mxu0  ;;  %v18068_v3 = vld [vmem:[%s22774_s30 + $0x78] ss:$8 sps:$4 sm:$0xff]  }
 0x4fe   :  { %v16038_v49 = vpop.f32.mrb[173].mxu0 }
 0x4ff   :  { %v20668_v29 = vpack.c.bf16 %v3887_v23, %v3886_v47  ;;  %v16039_v28 = vadd.f32 %v16038_v49, %v16037_v52  ;;  %v16040_v63 = vpop.f32.mrb[174].mxu0  ;;  %v18099_v47 = vld [vmem:[%s22774_s30 + $0x150] ss:$8 sps:$4 sm:$0xff]   ;;  %v14584_v23 = vcombine.high %v14574_v20, %v14574_v20  ;;  %v18078_v52 = vld [vmem:[%s22774_s30 + $0xdc] ss:$8 sps:$4 sm:$0xff]  }
 0x500   :  { %v16041_v0 = vpop.f32.mrb[175].mxu0  ;;  %v18076_v49 = vld [vmem:[%s22774_s30 + $0xd8] ss:$8 sps:$4 sm:$0xff]  }
 0x501   :  { %v3861_v62 = vadd.f32 %v16039_v28, %v20607_v50  ;;  %v16042_v27 = vadd.f32 %v16041_v0, %v16040_v63  ;;  %3982 = vmatpush1.bf16.msra.mxu1 %v20668_v29  ;;  %4260 = vmatpush1.bf16.msra.mxu0 %v20668_v29  ;;  %v18084_v28 = vld [vmem:[%s22774_s30 + $0xe8] ss:$8 sps:$4 sm:$0xff]   ;;  %v18088_v63 = vld [vmem:[%s22774_s30 + $0xfc] ss:$8 sps:$4 sm:$0xff]   ;;  %v18090_v0 = vld [vmem:[%s22774_s30 + $0xf8] ss:$8 sps:$4 sm:$0xff]  }
 0x502   :  { %3983 = vmatprep.subr.bf16.mxu1 %v22753_v2  ;;  %4261 = vmatprep.subr.bf16.mxu0 %v22753_v2 }
 0x503   :  { %v3864_v8 = vadd.f32 %v16042_v27, %v20609_v45  ;;  %v3888_v59 = vmax.f32 %v3861_v62, 0.0  ;;  %v18094_v62 = vld [vmem:[%s22774_s30 + $0x10c] ss:$8 sps:$4 sm:$0xff]   ;;  %v18104_v27 = vld [vmem:[#allocation4 + $0x40] sm:$0xff]  }
 0x505   :  { %v3889_v6 = vmax.f32 %v3864_v8, 0.0  ;;  %v16043_v39 = vpop.f32.mrb[176].mxu0  ;;  %v18105_v8 = vld [vmem:[#allocation4] sm:$0xff]  }
 0x506   :  { %v16044_v35 = vpop.f32.mrb[177].mxu0 }
 0x507   :  { %v20676_v53 = vpack.c.bf16 %v3889_v6, %v3888_v59  ;;  %v16045_v50 = vadd.f32 %v16044_v35, %v16043_v39  ;;  %v16046_v12 = vpop.f32.mrb[178].mxu0  ;;  %v14550_v59 = vld [vmem:[%s22774_s30 + $0x118] sm:$0xff]  ;;  %v18096_v6 = vld [vmem:[%s22774_s30 + $0x108] ss:$8 sps:$4 sm:$0xff]  }
 0x508   :  { %v16047_v36 = vpop.f32.mrb[179].mxu0  ;;  %v18106_v39 = vld [vmem:[#allocation4 + $0x48] sm:$0xff]   ;;  %v14560_v35 = vcombine.high %v14550_v59, %v14550_v59  ;;  %v18109_v12 = vld [vmem:[#allocation4 + $0x10] sm:$0xff]  }
 0x509   :  { %v3869_v37 = vadd.f32 %v16045_v50, %v20612_v48  ;;  %3984 = vmatpush1.bf16.msra.mxu1 %v20676_v53  ;;  %4262 = vmatpush1.bf16.msra.mxu0 %v20676_v53  ;;  %v18040_v48 = vld [vmem:[%s22774_s30 + $0x14] ss:$8 sps:$4 sm:$0xff]   ;;  %v14559_v36 = vcombine.low %v14550_v59, %v14550_v59 }
 0x50a   :  { %3985 = vmatprep.subr.bf16.mxu1 %v22753_v2  ;;  %4263 = vmatprep.subr.bf16.mxu0 %v22753_v2  ;;  %v18108_v50 = vld [vmem:[#allocation4 + $0x50] sm:$0xff]  }
 0x50b   :  { %v3890_v45 = vmax.f32 %v3869_v37, 0.0  ;;  %v18110_v37 = vld [vmem:[#allocation4 + $0x58] sm:$0xff]  }
 0x50d   :  { %v3899_v44 = vpack.c.bf16 %v3890_v45, %v3890_v45  ;;  %v18111_v45 = vld [vmem:[#allocation4 + $0x18] sm:$0xff]  }
 0x50f   :  { %v20684_v17 = vsel %vm632_vm0, %v3899_v44, 0  ;;  %v18112_v44 = vld [vmem:[#allocation4 + $0x60] sm:$0xff]  }
 0x510   :  { %3986 = vmatpush1.bf16.msra.mxu1 %v20684_v17  ;;  %4264 = vmatpush1.bf16.msra.mxu0 %v20684_v17 }
 0x511   :  { %4108 = vmatprep.subr.bf16.mxu1 %v22753_v2  ;;  %4525 = vmatprep.subr.bf16.mxu0 %v22753_v2 }
 0x513   :  { %4002 = vmatmul.mubr.bf16.vlgmr.msra.gmra.mrb[180].mxu1 %v18034_v38  ;;  %4280 = vmatmul.mubr.bf16.vlgmr.msra.gmra.mrb[180].mxu0 %v18037_v58  ;;  %v18114_v38 = vld [vmem:[#allocation4 + $0x68] sm:$0xff]  }
 0x514   :  { %4109 = vmatpush1.bf16.msra.mxu1 %v20620_v7  ;;  %4526 = vmatpush1.bf16.msra.mxu0 %v20620_v7  ;;  %v18115_v58 = vld [vmem:[#allocation4 + $0x28] sm:$0xff]  }
 0x515   :  { %4110 = vmatprep.subr.bf16.mxu1 %v22753_v2  ;;  %4527 = vmatprep.subr.bf16.mxu0 %v22753_v2 }
 0x516   :  { %14490 = vmatprep.mubr.msk.bf16.mxu1 %vm604_vm1, %v18040_v48  ;;  %14538 = vmatprep.mubr.msk.bf16.mxu0 %vm604_vm1, %v18057_v13  ;;  %v18116_v48 = vld [vmem:[#allocation4 + $0x70] sm:$0xff]  }
 0x517   :  { %v18117_v13 = vld [vmem:[#allocation4 + $0x30] sm:$0xff]  }
 0x518   :  { %4111 = vmatpush1.bf16.msra.mxu1 %v20628_v19  ;;  %4528 = vmatpush1.bf16.msra.mxu0 %v20628_v19 }
 0x519   :  { %4112 = vmatprep.subr.bf16.mxu1 %v22753_v2  ;;  %4529 = vmatprep.subr.bf16.mxu0 %v22753_v2 }
 0x51b   :  { %4010 = vmatmul.mubr.bf16.gmra.mrb[184].mxu1 %v18042_v61  ;;  %4288 = vmatmul.mubr.bf16.gmra.mrb[184].mxu0 %v18059_v22  ;;  %v18118_v61 = vld [vmem:[#allocation4 + $0x78] sm:$0xff]  }
 0x51c   :  { %4113 = vmatpush1.bf16.msra.mxu1 %v20636_v25  ;;  %4530 = vmatpush1.bf16.msra.mxu0 %v20636_v25  ;;  %v18119_v22 = vld [vmem:[#allocation4 + $0x38] sm:$0xff]  }
 0x51d   :  { %4114 = vmatprep.subr.bf16.mxu1 %v22753_v2  ;;  %4531 = vmatprep.subr.bf16.mxu0 %v22753_v2 }
 0x51e   :  { %14491 = vmatprep.mubr.msk.bf16.mxu1 %vm604_vm1, %v18043_v4  ;;  %14539 = vmatprep.mubr.msk.bf16.mxu0 %vm604_vm1, %v18063_v43  ;;  %v18120_v4 = vld [vmem:[#allocation4 + $0xc0] sm:$0xff]  }
 0x51f   :  { %v18121_v43 = vld [vmem:[#allocation4 + $0x80] sm:$0xff]  }
 0x520   :  { %4115 = vmatpush1.bf16.msra.mxu1 %v20644_v42  ;;  %4532 = vmatpush1.bf16.msra.mxu0 %v20644_v42 }
 0x521   :  { %4116 = vmatprep.subr.bf16.mxu1 %v22753_v2  ;;  %4533 = vmatprep.subr.bf16.mxu0 %v22753_v2 }
 0x523   :  { %4018 = vmatmul.mubr.bf16.gmra.mrb[188].mxu1 %v18045_v15  ;;  %4296 = vmatmul.mubr.bf16.gmra.mrb[188].mxu0 %v18065_v40  ;;  %v19444_v15 = vmov 0.0   ;;  %v18123_v40 = vld [vmem:[#allocation4 + $0xc8] sm:$0xff]  }
 0x524   :  { %4117 = vmatpush1.bf16.msra.mxu1 %v20652_v16  ;;  %4534 = vmatpush1.bf16.msra.mxu0 %v20652_v16 }
 0x525   :  { %4118 = vmatprep.subr.bf16.mxu1 %v22753_v2  ;;  %4535 = vmatprep.subr.bf16.mxu0 %v22753_v2 }
 0x526   :  { %14492 = vmatprep.mubr.msk.bf16.mxu1 %vm604_vm1, %v18046_v24  ;;  %14540 = vmatprep.mubr.msk.bf16.mxu0 %vm604_vm1, %v18069_v31  ;;  %v18124_v24 = vld [vmem:[#allocation4 + $0x88] sm:$0xff]   ;;  %v18126_v31 = vld [vmem:[#allocation4 + $0xd0] sm:$0xff]  }
 0x528   :  { %4119 = vmatpush1.bf16.msra.mxu1 %v20660_v54  ;;  %4536 = vmatpush1.bf16.msra.mxu0 %v20660_v54 }
 0x529   :  { %4120 = vmatprep.subr.bf16.mxu1 %v22753_v2  ;;  %4537 = vmatprep.subr.bf16.mxu0 %v22753_v2 }
 0x52b   :  { %4026 = vmatmul.mubr.bf16.gmra.mrb[192].mxu1 %v18048_v21  ;;  %4304 = vmatmul.mubr.bf16.gmra.mrb[192].mxu0 %v18071_v14  ;;  %v18127_v21 = vld [vmem:[#allocation4 + $0x90] sm:$0xff]   ;;  %v18130_v14 = vld [vmem:[#allocation4 + $0x98] sm:$0xff]  }
 0x52c   :  { %4121 = vmatpush1.bf16.msra.mxu1 %v20668_v29  ;;  %4538 = vmatpush1.bf16.msra.mxu0 %v20668_v29 }
 0x52d   :  { %4122 = vmatprep.subr.bf16.mxu1 %v22753_v2  ;;  %4539 = vmatprep.subr.bf16.mxu0 %v22753_v2 }
 0x52e   :  { %14493 = vmatprep.mubr.msk.bf16.mxu1 %vm604_vm1, %v14488_v5  ;;  %14541 = vmatprep.mubr.msk.bf16.mxu0 %vm604_vm1, %v14536_v34  ;;  %v18133_v5 = vld [vmem:[#allocation4 + $0xa0] sm:$0xff]   ;;  %v18135_v34 = vld [vmem:[#allocation4 + $0xe8] sm:$0xff]  }
 0x530   :  { %4123 = vmatpush1.bf16.msra.mxu1 %v20676_v53  ;;  %4540 = vmatpush1.bf16.msra.mxu0 %v20676_v53 }
 0x531   :  { %4124 = vmatprep.subr.bf16.mxu1 %v22753_v2  ;;  %4541 = vmatprep.subr.bf16.mxu0 %v22753_v2 }
 0x533   :  { %4034 = vmatmul.mubr.bf16.gmra.mrb[196].mxu1 %v14487_v51  ;;  %4312 = vmatmul.mubr.bf16.gmra.mrb[196].mxu0 %v14535_v1  ;;  %v18136_v51 = vld [vmem:[#allocation4 + $0xa8] sm:$0xff]   ;;  %v18138_v1 = vld [vmem:[#allocation4 + $0xf0] sm:$0xff]  }
 0x534   :  { %4125 = vmatpush1.bf16.msra.mxu1 %v20684_v17  ;;  %4542 = vmatpush1.bf16.msra.mxu0 %v20684_v17 }
 0x535   :  { %14513 = vmatprep.mubr.msk.bf16.mxu1 %vm604_vm1, %v18053_v9  ;;  %4386 = vmatprep.subr.bf16.mxu1 %v22753_v2  ;;  %v18139_v9 = vld [vmem:[#allocation4 + $0xb0] sm:$0xff]  }
 0x536   :  { %14585 = vmatprep.mubr.msk.bf16.mxu0 %vm604_vm1, %v18081_v57  ;;  %16095 = vmatprep.subr.bf16.mxu0 %v18120_v4  ;;  %v18141_v57 = vld [vmem:[#allocation4 + $0xf8] sm:$0xff]  }
 0x53b   :  { %4141 = vmatmul.mubr.bf16.vlgmr.msra.gmra.mrb[200].mxu1 %v18051_v60  ;;  %4558 = vmatmul.mubr.bf16.vlgmr.msra.gmra.mrb[200].mxu0 %v18079_v10  ;;  %v18142_v60 = vld [vmem:[#allocation4 + $0xb8] sm:$0xff]  }
 0x53c   :  { %4387 = vmatpush1.bf16.msra.mxu1 %v20620_v7  ;;  %14514 = vmatprep.mubr.msk.bf16.mxu1 %vm604_vm1, %v18054_v55  ;;  %v18062_v7 = vld [vmem:[%s22774_s30 + $0x68] ss:$8 sps:$4 sm:$0xff]  }
 0x53d   :  { %4388 = vmatprep.subr.bf16.mxu1 %v22753_v2  ;;  %14586 = vmatprep.mubr.msk.bf16.mxu0 %vm604_vm1, %v18085_v41 }
 0x53e   :  { %16096 = vmatpush3.bf16.msra.mxu0 %v18121_v43 }
 0x53f   :  { %16097 = vmatprep.subr.bf16.mxu0 %v18123_v40 }
 0x540   :  { %4389 = vmatpush1.bf16.msra.mxu1 %v20628_v19  ;;  %v18093_v19 = vld [vmem:[%s22774_s30 + $0x140] ss:$8 sps:$4 sm:$0xff]  }
 0x541   :  { %4390 = vmatprep.subr.bf16.mxu1 %v22753_v2 }
 0x542   :  { %16098 = vmatpush3.bf16.msra.mxu0 %v18124_v24 }
 0x543   :  { %4149 = vmatmul.mubr.bf16.gmra.mrb[204].mxu1 %v18056_v56  ;;  %4566 = vmatmul.mubr.bf16.gmra.mrb[204].mxu0 %v18087_v11 }
 0x544   :  { %4391 = vmatpush1.bf16.msra.mxu1 %v20636_v25  ;;  %14515 = vmatprep.mubr.msk.bf16.mxu1 %vm604_vm1, %v18060_v18  ;;  %v14502_v25 = vld [vmem:[%s22774_s30 + $0x88] sm:$0xff] }
 0x545   :  { %4392 = vmatprep.subr.bf16.mxu1 %v22753_v2  ;;  %14587 = vmatprep.mubr.msk.bf16.mxu0 %vm604_vm1, %v18091_v46 }
 0x546   :  { %16099 = vmatprep.subr.bf16.mxu0 %v18126_v31 }
 0x547   :  { %16100 = vmatpush3.bf16.msra.mxu0 %v18127_v21 }
 0x548   :  { %4393 = vmatpush1.bf16.msra.mxu1 %v20644_v42  ;;  %v14512_v42 = vcombine.high %v14502_v25, %v14502_v25  ;;  %16101 = vmatprep.subr.bf16.mxu0 %v18129_v26 }
 0x549   :  { %4394 = vmatprep.subr.bf16.mxu1 %v22753_v2 }
 0x54b   :  { %4157 = vmatmul.mubr.bf16.gmra.mrb[208].mxu1 %v18062_v7  ;;  %4574 = vmatmul.mubr.bf16.gmra.mrb[208].mxu0 %v18093_v19 }
 0x54c   :  { %4395 = vmatpush1.bf16.msra.mxu1 %v20652_v16  ;;  %14516 = vmatprep.mubr.msk.bf16.mxu1 %vm604_vm1, %v18066_v33  ;;  %v14511_v16 = vcombine.low %v14502_v25, %v14502_v25 }
 0x54d   :  { %4396 = vmatprep.subr.bf16.mxu1 %v22753_v2  ;;  %14588 = vmatprep.mubr.msk.bf16.mxu0 %vm604_vm1, %v18097_v32 }
 0x54e   :  { %16102 = vmatpush3.bf16.msra.mxu0 %v18130_v14 }
 0x54f   :  { %16103 = vmatprep.subr.bf16.mxu0 %v18132_v30 }
 0x550   :  { %4397 = vmatpush1.bf16.msra.mxu1 %v20660_v54  ;;  %v14583_v54 = vcombine.low %v14574_v20, %v14574_v20 }
 0x551   :  { %4398 = vmatprep.subr.bf16.mxu1 %v22753_v2 }
 0x552   :  { %16104 = vmatpush3.bf16.msra.mxu0 %v18133_v5 }
 0x553   :  { %4165 = vmatmul.mubr.bf16.gmra.mrb[212].mxu1 %v18068_v3  ;;  %4582 = vmatmul.mubr.bf16.gmra.mrb[212].mxu0 %v18099_v47 }
 0x554   :  { %4399 = vmatpush1.bf16.msra.mxu1 %v20668_v29  ;;  %14517 = vmatprep.mubr.msk.bf16.mxu1 %vm604_vm1, %v14512_v42  ;;  %v18082_v29 = vld [vmem:[%s22774_s30 + $0xec] ss:$8 sps:$4 sm:$0xff]  }
 0x555   :  { %4400 = vmatprep.subr.bf16.mxu1 %v22753_v2  ;;  %14589 = vmatprep.mubr.msk.bf16.mxu0 %vm604_vm1, %v14584_v23 }
 0x556   :  { %16105 = vmatprep.subr.bf16.mxu0 %v18135_v34  ;;  %v18122_v34 = vld [vmem:[#allocation4 + $0x100] sm:$0xff]  }
 0x557   :  { %16106 = vmatpush3.bf16.msra.mxu0 %v18136_v51 }
 0x558   :  { %4401 = vmatpush1.bf16.msra.mxu1 %v20676_v53  ;;  %v18107_v53 = vld [vmem:[#allocation4 + $0x8] sm:$0xff]   ;;  %16107 = vmatprep.subr.bf16.mxu0 %v18138_v1 }
 0x559   :  { %4402 = vmatprep.subr.bf16.mxu1 %v22753_v2 }
 0x55b   :  { %4173 = vmatmul.mubr.bf16.gmra.mrb[216].mxu1 %v14511_v16  ;;  %4590 = vmatmul.mubr.bf16.gmra.mrb[216].mxu0 %v14583_v54 }
 0x55c   :  { %4403 = vmatpush1.bf16.msra.mxu1 %v20684_v17  ;;  %14561 = vmatprep.mubr.msk.bf16.mxu1 %vm604_vm1, %v18078_v52  ;;  %v18113_v17 = vld [vmem:[#allocation4 + $0x20] sm:$0xff]  }
 0x55d   :  { %16049 = vmatprep.subr.bf16.mxu1 %v18104_v27  ;;  %16108 = vmatpush3.bf16.msra.mxu0 %v18139_v9  ;;  %v18125_v9 = vld [vmem:[#allocation4 + $0x108] sm:$0xff]  }
 0x55e   :  { %16109 = vmatprep.subr.bf16.mxu0 %v18141_v57 }
 0x561   :  { %16110 = vmatpush3.bf16.msra.mxu0 %v18142_v60 }
 0x562   :  { %16639 = vmatprep.subr.bf16.mxu0 %v19444_v15 }
 0x563   :  { %4419 = vmatmul.mubr.bf16.vlgmr.msra.gmra.mrb[220].mxu1 %v18076_v49 }
 0x564   :  { %14562 = vmatprep.mubr.msk.bf16.mxu1 %vm604_vm1, %v18082_v29  ;;  %16050 = vmatpush3.bf16.msra.mxu1 %v18105_v8 }
 0x565   :  { %16051 = vmatprep.subr.bf16.mxu1 %v18106_v39 }
 0x568   :  { %16052 = vmatpush3.bf16.msra.mxu1 %v18107_v53 }
 0x569   :  { %16053 = vmatprep.subr.bf16.mxu1 %v18108_v50 }
 0x56b   :  { %4427 = vmatmul.mubr.bf16.gmra.mrb[224].mxu1 %v18084_v28 }
 0x56c   :  { %14563 = vmatprep.mubr.msk.bf16.mxu1 %vm604_vm1, %v18088_v63  ;;  %16054 = vmatpush3.bf16.msra.mxu1 %v18109_v12 }
 0x56d   :  { %16055 = vmatprep.subr.bf16.mxu1 %v18110_v37 }
 0x570   :  { %16056 = vmatpush3.bf16.msra.mxu1 %v18111_v45 }
 0x571   :  { %16057 = vmatprep.subr.bf16.mxu1 %v18112_v44 }
 0x573   :  { %4435 = vmatmul.mubr.bf16.gmra.mrb[228].mxu1 %v18090_v0 }
 0x574   :  { %14564 = vmatprep.mubr.msk.bf16.mxu1 %vm604_vm1, %v18094_v62  ;;  %16058 = vmatpush3.bf16.msra.mxu1 %v18113_v17 }
 0x575   :  { %16059 = vmatprep.subr.bf16.mxu1 %v18114_v38 }
 0x578   :  { %16060 = vmatpush3.bf16.msra.mxu1 %v18115_v58 }
 0x579   :  { %16061 = vmatprep.subr.bf16.mxu1 %v18116_v48 }
 0x57b   :  { %4443 = vmatmul.mubr.bf16.gmra.mrb[232].mxu1 %v18096_v6 }
 0x57c   :  { %14565 = vmatprep.mubr.msk.bf16.mxu1 %vm604_vm1, %v14560_v35  ;;  %16062 = vmatpush3.bf16.msra.mxu1 %v18117_v13 }
 0x57d   :  { %16063 = vmatprep.subr.bf16.mxu1 %v18118_v61 }
 0x580   :  { %16064 = vmatpush3.bf16.msra.mxu1 %v18119_v22 }
 0x581   :  { %16603 = vmatprep.subr.bf16.mxu1 %v19444_v15 }
 0x583   :  { %4451 = vmatmul.mubr.bf16.gmra.mrb[236].mxu1 %v14559_v36 }
 0x5e6   :  { %v4003_v10 = vpop.f32.mrb[180].mxu1  ;;  %v20810_v55 = vpop.f32.mrb[180].mxu0 }
 0x5e7   :  { %v4005_v41 = vpop.f32.mrb[181].mxu1  ;;  %v4283_v56 = vpop.f32.mrb[181].mxu0 }
 0x5e8   :  { %v4006_v11 = vpop.f32.mrb[182].mxu1  ;;  %v20812_v18 = vpop.f32.mrb[182].mxu0 }
 0x5e9   :  { %v4597_v46 = vpack.c.bf16 %v4006_v11, %v4003_v10  ;;  %v4008_v7 = vpop.f32.mrb[183].mxu1  ;;  %v4599_v19 = vpack.c.bf16 %v20812_v18, %v20810_v55  ;;  %v4286_v33 = vpop.f32.mrb[183].mxu0 }
 0x5ee   :  { %v20816_v32 = vpop.f32.mrb[184].mxu1  ;;  %v20818_v25 = vpop.f32.mrb[184].mxu0 }
 0x5ef   :  { %v4013_v20 = vpop.f32.mrb[185].mxu1  ;;  %v4291_v3 = vpop.f32.mrb[185].mxu0 }
 0x5f0   :  { %v20820_v47 = vpop.f32.mrb[186].mxu1  ;;  %v20822_v42 = vpop.f32.mrb[186].mxu0  ;;  %v18131_v3 = vld [vmem:[#allocation4 + $0x118] sm:$0xff]  }
 0x5f1   :  { %v4602_v23 = vpack.c.bf16 %v20820_v47, %v20816_v32  ;;  %v4016_v16 = vpop.f32.mrb[187].mxu1  ;;  %v4604_v54 = vpack.c.bf16 %v20822_v42, %v20818_v25  ;;  %v4294_v52 = vpop.f32.mrb[187].mxu0  ;;  %v18128_v32 = vld [vmem:[#allocation4 + $0x110] sm:$0xff]  }
 0x5f6   :  { %v20828_v49 = vpop.f32.mrb[188].mxu1  ;;  %v20830_v29 = vpop.f32.mrb[188].mxu0 }
 0x5f7   :  { %v4021_v28 = vpop.f32.mrb[189].mxu1  ;;  %v4299_v63 = vpop.f32.mrb[189].mxu0 }
 0x5f8   :  { %v20832_v0 = vpop.f32.mrb[190].mxu1  ;;  %v20834_v62 = vpop.f32.mrb[190].mxu0 }
 0x5f9   :  { %v4607_v27 = vpack.c.bf16 %v20832_v0, %v20828_v49  ;;  %v4024_v8 = vpop.f32.mrb[191].mxu1  ;;  %v4609_v59 = vpack.c.bf16 %v20834_v62, %v20830_v29  ;;  %v4302_v6 = vpop.f32.mrb[191].mxu0 }
 0x5fe   :  { %v20840_v39 = vpop.f32.mrb[192].mxu1  ;;  %v20842_v35 = vpop.f32.mrb[192].mxu0 }
 0x5ff   :  { %v4029_v53 = vpop.f32.mrb[193].mxu1  ;;  %v4307_v50 = vpop.f32.mrb[193].mxu0 }
 0x600   :  { %v20844_v12 = vpop.f32.mrb[194].mxu1  ;;  %v20846_v36 = vpop.f32.mrb[194].mxu0  ;;  %v18134_v50 = vld [vmem:[#allocation4 + $0x120] sm:$0xff]  }
 0x601   :  { %v4612_v37 = vpack.c.bf16 %v20844_v12, %v20840_v39  ;;  %v4032_v45 = vpop.f32.mrb[195].mxu1  ;;  %v4614_v44 = vpack.c.bf16 %v20846_v36, %v20842_v35  ;;  %v4310_v17 = vpop.f32.mrb[195].mxu0 }
 0x602   :  { %v18137_v17 = vld [vmem:[#allocation4 + $0x128] sm:$0xff]  }
 0x606   :  { %v20852_v38 = vpop.f32.mrb[196].mxu1  ;;  %v20854_v58 = vpop.f32.mrb[196].mxu0 }
 0x607   :  { %v4037_v48 = vpop.f32.mrb[197].mxu1  ;;  %v4315_v13 = vpop.f32.mrb[197].mxu0 }
 0x608   :  { %v4038_v61 = vpop.f32.mrb[198].mxu1  ;;  %v4316_v22 = vpop.f32.mrb[198].mxu0 }
 0x609   :  { %v4039_v4 = vpop.f32.mrb[199].mxu1  ;;  %v4317_v43 = vpop.f32.mrb[199].mxu0 }
 0x60e   :  { %v4142_v40 = vpop.f32.mrb[200].mxu1  ;;  %v20856_v24 = vpop.f32.mrb[200].mxu0 }
 0x60f   :  { %v4144_v31 = vpop.f32.mrb[201].mxu1  ;;  %v4561_v21 = vpop.f32.mrb[201].mxu0 }
 0x610   :  { %v4145_v26 = vpop.f32.mrb[202].mxu1  ;;  %v20858_v14 = vpop.f32.mrb[202].mxu0  ;;  %v18140_v21 = vld [vmem:[#allocation4 + $0x130] sm:$0xff]  }
 0x611   :  { %v4598_v30 = vpack.c.bf16 %v4145_v26, %v4142_v40  ;;  %v4147_v5 = vpop.f32.mrb[203].mxu1  ;;  %v4601_v51 = vpack.c.bf16 %v20858_v14, %v20856_v24  ;;  %v4564_v1 = vpop.f32.mrb[203].mxu0 }
 0x613   :  { %4981 = vmatprep.mubr.bf16.mxu1 %v4598_v30 }
 0x614   :  { %4982 = vmatmul.mubr.bf16.vlgmr.msra.gmra.mrb[240].mxu1 %v4597_v46 }
 0x615   :  { %16604 = vmatpush3.bf16.msra.mxu1 %v18122_v34 }
 0x616   :  { %v4150_v57 = vpop.f32.mrb[204].mxu1  ;;  %16605 = vmatprep.subr.bf16.mxu1 %v19444_v15  ;;  %v20863_v60 = vpop.f32.mrb[204].mxu0 }
 0x617   :  { %v4152_v10 = vpop.f32.mrb[205].mxu1  ;;  %v4569_v41 = vpop.f32.mrb[205].mxu0 }
 0x618   :  { %v4153_v56 = vpop.f32.mrb[206].mxu1  ;;  %v20865_v11 = vpop.f32.mrb[206].mxu0 }
 0x619   :  { %v4603_v7 = vpack.c.bf16 %v4153_v56, %v4150_v57  ;;  %v4155_v33 = vpop.f32.mrb[207].mxu1  ;;  %16606 = vmatpush3.bf16.msra.mxu1 %v18125_v9  ;;  %v4606_v20 = vpack.c.bf16 %v20865_v11, %v20863_v60  ;;  %v4572_v46 = vpop.f32.mrb[207].mxu0  ;;  %v4617_v56 = vpack.c.bf16 %v20852_v38, %v20852_v38 }
 0x61a   :  { %16607 = vmatprep.subr.bf16.mxu1 %v19444_v15 }
 0x61b   :  { %4989 = vmatprep.mubr.bf16.mxu1 %v4603_v7 }
 0x61c   :  { %4990 = vmatmul.mubr.bf16.gmra.mrb[244].mxu1 %v4602_v23 }
 0x61d   :  { %16608 = vmatpush3.bf16.msra.mxu1 %v18128_v32 }
 0x61e   :  { %v4158_v47 = vpop.f32.mrb[208].mxu1  ;;  %16609 = vmatprep.subr.bf16.mxu1 %v19444_v15  ;;  %v20871_v16 = vpop.f32.mrb[208].mxu0 }
 0x61f   :  { %v4160_v52 = vpop.f32.mrb[209].mxu1  ;;  %v4577_v28 = vpop.f32.mrb[209].mxu0 }
 0x620   :  { %v4161_v63 = vpop.f32.mrb[210].mxu1  ;;  %v20873_v8 = vpop.f32.mrb[210].mxu0  ;;  %v4619_v52 = vpack.c.bf16 %v20854_v58, %v20854_v58 }
 0x621   :  { %v4608_v6 = vpack.c.bf16 %v4161_v63, %v4158_v47  ;;  %v4163_v53 = vpop.f32.mrb[211].mxu1  ;;  %16610 = vmatpush3.bf16.msra.mxu1 %v18131_v3  ;;  %v4611_v45 = vpack.c.bf16 %v20873_v8, %v20871_v16  ;;  %v4580_v23 = vpop.f32.mrb[211].mxu0 }
 0x622   :  { %16611 = vmatprep.subr.bf16.mxu1 %v19444_v15 }
 0x623   :  { %4997 = vmatprep.mubr.bf16.mxu1 %v4608_v6 }
 0x624   :  { %4998 = vmatmul.mubr.bf16.gmra.mrb[248].mxu1 %v4607_v27  ;;  %v18143_v27 = vld [vmem:[#allocation4 + $0x138] sm:$0xff]  }
 0x625   :  { %16612 = vmatpush3.bf16.msra.mxu1 %v18134_v50 }
 0x626   :  { %v4166_v48 = vpop.f32.mrb[212].mxu1  ;;  %16613 = vmatprep.subr.bf16.mxu1 %v19444_v15  ;;  %v20882_v13 = vpop.f32.mrb[212].mxu0 }
 0x627   :  { %v4168_v61 = vpop.f32.mrb[213].mxu1  ;;  %v4585_v22 = vpop.f32.mrb[213].mxu0 }
 0x628   :  { %v4169_v4 = vpop.f32.mrb[214].mxu1  ;;  %v20884_v43 = vpop.f32.mrb[214].mxu0 }
 0x629   :  { %v4613_v40 = vpack.c.bf16 %v4169_v4, %v4166_v48  ;;  %v4171_v31 = vpop.f32.mrb[215].mxu1  ;;  %16614 = vmatpush3.bf16.msra.mxu1 %v18137_v17  ;;  %v4616_v49 = vpack.c.bf16 %v20884_v43, %v20882_v13  ;;  %v4588_v0 = vpop.f32.mrb[215].mxu0 }
 0x62a   :  { %16615 = vmatprep.subr.bf16.mxu1 %v19444_v15 }
 0x62b   :  { %5005 = vmatprep.mubr.bf16.mxu1 %v4613_v40 }
 0x62c   :  { %5006 = vmatmul.mubr.bf16.gmra.mrb[252].mxu1 %v4612_v37 }
 0x62d   :  { %16616 = vmatpush3.bf16.msra.mxu1 %v18140_v21 }
 0x62e   :  { %v4174_v26 = vpop.f32.mrb[216].mxu1  ;;  %16617 = vmatprep.subr.bf16.mxu1 %v19444_v15  ;;  %v4591_v30 = vpop.f32.mrb[216].mxu0 }
 0x62f   :  { %v4618_v5 = vpack.c.bf16 %v4174_v26, %v4174_v26  ;;  %v4176_v34 = vpop.f32.mrb[217].mxu1  ;;  %v4593_v1 = vpop.f32.mrb[217].mxu0 }
 0x630   :  { %v4177_v9 = vpop.f32.mrb[218].mxu1  ;;  %v4594_v57 = vpop.f32.mrb[218].mxu0  ;;  %v20941_v1 = vld [vmem:[#allocation6] ss:$0 sm:$0xff] }
 0x631   :  { %v4178_v10 = vpop.f32.mrb[219].mxu1  ;;  %5013 = vmatprep.mubr.bf16.mxu1 %v4618_v5  ;;  %16618 = vmatpush3.bf16.msra.mxu1 %v18143_v27  ;;  %v4595_v41 = vpop.f32.mrb[219].mxu0 }
 0x632   :  { %16661 = vmatprep.subr.bf16.mxu1 %v19444_v15 }
 0x634   :  { %5014 = vmatmul.mubr.bf16.gmra.mrb[0].mxu1 %v4617_v56 }
 0x635   :  { %16619 = vmatprep.mubr.msk.bf16.mxu1 %vm19445_vm2, %v19444_v15 }
 0x636   :  { %v4420_v39 = vpop.f32.mrb[220].mxu1 }
 0x637   :  { %v4422_v12 = vpop.f32.mrb[221].mxu1 }
 0x638   :  { %v4423_v37 = vpop.f32.mrb[222].mxu1 }
 0x639   :  { %v4600_v7 = vpack.c.bf16 %v4423_v37, %v4420_v39  ;;  %v4425_v33 = vpop.f32.mrb[223].mxu1 }
 0x63b   :  { %5053 = vmatprep.mubr.bf16.mxu0 %v4600_v7 }
 0x63c   :  { %5054 = vmatmul.mubr.bf16.vlgmr.msra.gmra.mrb[220].mxu0 %v4599_v19  ;;  %16620 = vmatmul.mubr.bf16.vlgmr.msra.gmra.mrb[4].mxu1 %v4601_v51 }
 0x63d   :  { %16623 = vmatprep.mubr.msk.bf16.mxu1 %vm19445_vm2, %v19444_v15 }
 0x63e   :  { %v4428_v38 = vpop.f32.mrb[224].mxu1 }
 0x63f   :  { %v4430_v32 = vpop.f32.mrb[225].mxu1 }
 0x640   :  { %v4431_v46 = vpop.f32.mrb[226].mxu1 }
 0x641   :  { %v4605_v3 = vpack.c.bf16 %v4431_v46, %v4428_v38  ;;  %v4433_v47 = vpop.f32.mrb[227].mxu1 }
 0x643   :  { %5061 = vmatprep.mubr.bf16.mxu0 %v4605_v3 }
 0x644   :  { %5062 = vmatmul.mubr.bf16.gmra.mrb[224].mxu0 %v4604_v54  ;;  %16624 = vmatmul.mubr.bf16.gmra.mrb[8].mxu1 %v4606_v20  ;;  %v4621_v20 = vpack.c.bf16 %v4591_v30, %v4591_v30 }
 0x645   :  { %16627 = vmatprep.mubr.msk.bf16.mxu1 %vm19445_vm2, %v19444_v15 }
 0x646   :  { %v4436_v55 = vpop.f32.mrb[228].mxu1 }
 0x647   :  { %v4438_v18 = vpop.f32.mrb[229].mxu1 }
 0x648   :  { %v4439_v19 = vpop.f32.mrb[230].mxu1 }
 0x649   :  { %v4610_v24 = vpack.c.bf16 %v4439_v19, %v4436_v55  ;;  %v4441_v14 = vpop.f32.mrb[231].mxu1 }
 0x64b   :  { %5069 = vmatprep.mubr.bf16.mxu0 %v4610_v24 }
 0x64c   :  { %5070 = vmatmul.mubr.bf16.gmra.mrb[228].mxu0 %v4609_v59  ;;  %16628 = vmatmul.mubr.bf16.gmra.mrb[12].mxu1 %v4611_v45 }
 0x64d   :  { %16631 = vmatprep.mubr.msk.bf16.mxu1 %vm19445_vm2, %v19444_v15 }
 0x64e   :  { %v4444_v25 = vpop.f32.mrb[232].mxu1 }
 0x64f   :  { %v4446_v42 = vpop.f32.mrb[233].mxu1 }
 0x650   :  { %v4447_v54 = vpop.f32.mrb[234].mxu1 }
 0x651   :  { %v4615_v51 = vpack.c.bf16 %v4447_v54, %v4444_v25  ;;  %v4449_v60 = vpop.f32.mrb[235].mxu1 }
 0x653   :  { %5077 = vmatprep.mubr.bf16.mxu0 %v4615_v51 }
 0x654   :  { %5078 = vmatmul.mubr.bf16.gmra.mrb[232].mxu0 %v4614_v44  ;;  %16632 = vmatmul.mubr.bf16.gmra.mrb[16].mxu1 %v4616_v49 }
 0x655   :  { %16635 = vmatprep.mubr.msk.bf16.mxu1 %vm19445_vm2, %v19444_v15 }
 0x656   :  { %v4452_v29 = vpop.f32.mrb[236].mxu1 }
 0x657   :  { %v4620_v62 = vpack.c.bf16 %v4452_v29, %v4452_v29  ;;  %v4454_v59 = vpop.f32.mrb[237].mxu1 }
 0x658   :  { %v4455_v11 = vpop.f32.mrb[238].mxu1 }
 0x659   :  { %v4456_v16 = vpop.f32.mrb[239].mxu1  ;;  %5085 = vmatprep.mubr.bf16.mxu0 %v4620_v62 }
 0x65c   :  { %5086 = vmatmul.mubr.bf16.gmra.mrb[236].mxu0 %v4619_v52  ;;  %16636 = vmatmul.mubr.bf16.gmra.mrb[20].mxu1 %v4621_v20 }
 0x65d   :  { %16649 = vmatprep.mubr.msk.bf16.mxu0 %vm19445_vm2, %v19444_v15  ;;  %16671 = vmatprep.mubr.msk.bf16.mxu1 %vm19445_vm2, %v19444_v15 }
 0x6e7   :  { %v16065_v35 = vpop.f32.mrb[240].mxu1 }
 0x6e8   :  { %v16066_v36 = vpop.f32.mrb[241].mxu1 }
 0x6e9   :  { %v16067_v44 = vadd.f32 %v16066_v36, %v16065_v35  ;;  %v16068_v28 = vpop.f32.mrb[242].mxu1 }
 0x6ea   :  { %v16069_v63 = vpop.f32.mrb[243].mxu1 }
 0x6eb   :  { %v16070_v8 = vadd.f32 %v16069_v63, %v16068_v28  ;;  %v4984_v56 = vadd.f32 %v16067_v44, %v20941_v1 }
 0x6ed   :  { %v4987_v38 = vadd.f32 %v16070_v8, %v20941_v1 }
 0x6ef   :  { %v16071_v6 = vpop.f32.mrb[244].mxu1 }
 0x6f0   :  { %v16072_v53 = vpop.f32.mrb[245].mxu1 }
 0x6f1   :  { %v16073_v50 = vadd.f32 %v16072_v53, %v16071_v6  ;;  %v16074_v45 = vpop.f32.mrb[246].mxu1 }
 0x6f2   :  { %v16075_v23 = vpop.f32.mrb[247].mxu1 }
 0x6f3   :  { %v16076_v58 = vadd.f32 %v16075_v23, %v16074_v45  ;;  %v4992_v25 = vadd.f32 %v16073_v50, %v20941_v1 }
 0x6f5   :  { %v4995_v11 = vadd.f32 %v16076_v58, %v20941_v1 }
 0x6f7   :  { %v16077_v17 = vpop.f32.mrb[248].mxu1 }
 0x6f8   :  { %v16078_v48 = vpop.f32.mrb[249].mxu1 }
 0x6f9   :  { %v16079_v13 = vadd.f32 %v16078_v48, %v16077_v17  ;;  %v16080_v61 = vpop.f32.mrb[250].mxu1 }
 0x6fa   :  { %v16081_v22 = vpop.f32.mrb[251].mxu1 }
 0x6fb   :  { %v20933_v4 = vadd.f32 %v16081_v22, %v16080_v61  ;;  %v5000_v53 = vadd.f32 %v16079_v13, %v20941_v1 }
 0x6fd   :  { %v5003_v22 = vadd.f32 %v20933_v4, %v20941_v1 }
 0x6ff   :  { %v16083_v43 = vpop.f32.mrb[252].mxu1 }
 0x700   :  { %v16084_v40 = vpop.f32.mrb[253].mxu1 }
 0x701   :  { %v20935_v31 = vadd.f32 %v16084_v40, %v16083_v43  ;;  %v16086_v21 = vpop.f32.mrb[254].mxu1 }
 0x702   :  { %v16087_v49 = vpop.f32.mrb[255].mxu1 }
 0x703   :  { %v20937_v0 = vadd.f32 %v16087_v49, %v16086_v21  ;;  %v5008_v4 = vadd.f32 %v20935_v31, %v20941_v1 }
 0x707   :  { %v16089_v27 = vpop.f32.mrb[0].mxu1 }
 0x708   :  { %v16090_v26 = vpop.f32.mrb[1].mxu1 }
 0x709   :  { %v20939_v30 = vadd.f32 %v16090_v26, %v16089_v27  ;;  %v16092_v5 = vpop.f32.mrb[2].mxu1 }
 0x70a   :  { %v16093_v34 = vpop.f32.mrb[3].mxu1 }
 0x70f   :  { %v16111_v9 = vpop.f32.mrb[220].mxu0  ;;  %v5127_v57 = vpop.f32.mrb[4].mxu1 }
 0x710   :  { %v16112_v10 = vpop.f32.mrb[221].mxu0  ;;  %v16621_v41 = vpop.f32.mrb[5].mxu1 }
 0x711   :  { %v16113_v39 = vadd.f32 %v16112_v10, %v16111_v9  ;;  %v16114_v12 = vpop.f32.mrb[222].mxu0  ;;  %v5130_v37 = vpop.f32.mrb[6].mxu1 }
 0x712   :  { %v16115_v7 = vpop.f32.mrb[223].mxu0  ;;  %v16622_v33 = vpop.f32.mrb[7].mxu1 }
 0x713   :  { %v5056_v32 = vadd.f32 %v16113_v39, %v4984_v56  ;;  %v16116_v46 = vadd.f32 %v16115_v7, %v16114_v12  ;;  %v5011_v7 = vadd.f32 %v20937_v0, %v20941_v1 }
 0x715   :  { %v5128_v3 = vadd.f32 %v5127_v57, %v5056_v32  ;;  %v5059_v47 = vadd.f32 %v16116_v46, %v4987_v38 }
 0x717   :  { %v5131_v55 = vadd.f32 %v5130_v37, %v5059_v47  ;;  %v16117_v18 = vpop.f32.mrb[224].mxu0  ;;  %v5135_v19 = vpop.f32.mrb[8].mxu1  ;;  %v5165_v42 = vmax.f32 %v5128_v3, 0.0 }
 0x718   :  { %v16118_v24 = vpop.f32.mrb[225].mxu0  ;;  %v16625_v14 = vpop.f32.mrb[9].mxu1 }
 0x719   :  { %v5166_v54 = vmax.f32 %v5131_v55, 0.0  ;;  %v16119_v51 = vadd.f32 %v16118_v24, %v16117_v18  ;;  %v16120_v60 = vpop.f32.mrb[226].mxu0  ;;  %v5138_v29 = vpop.f32.mrb[10].mxu1  ;;  %v5016_v24 = vadd.f32 %v20939_v30, %v20941_v1  ;;  %v18144_v1 = vld [vmem:[#allocation7] sm:$0xff]  }
 0x71a   :  { %v16121_v62 = vpop.f32.mrb[227].mxu0  ;;  %v16626_v59 = vpop.f32.mrb[11].mxu1 }
 0x71b   :  { %v5064_v20 = vadd.f32 %v16119_v51, %v4992_v25  ;;  %v16122_v16 = vadd.f32 %v16121_v62, %v16120_v60  ;;  %v20947_v52 = vpack.c.bf16 %v5166_v54, %v5165_v42 }
 0x71d   :  { %v5136_v35 = vadd.f32 %v5135_v19, %v5064_v20  ;;  %v5067_v36 = vadd.f32 %v16122_v16, %v4995_v11  ;;  %16640 = vmatpush3.bf16.msra.mxu0 %v20947_v52  ;;  %16662 = vmatpush3.bf16.msra.mxu1 %v20947_v52  ;;  %v18153_v16 = vld [vmem:[#allocation9 + $0x40] sm:$0xff]  }
 0x71e   :  { %16641 = vmatprep.subr.bf16.mxu0 %v19444_v15  ;;  %16663 = vmatprep.subr.bf16.mxu1 %v19444_v15 }
 0x71f   :  { %v5139_v44 = vadd.f32 %v5138_v29, %v5067_v36  ;;  %v16123_v28 = vpop.f32.mrb[228].mxu0  ;;  %v5143_v63 = vpop.f32.mrb[12].mxu1  ;;  %v5167_v50 = vmax.f32 %v5136_v35, 0.0  ;;  %v18145_v35 = vld [vmem:[#allocation7 + $0x18] sm:$0xff]   ;;  %v18154_v36 = vld [vmem:[#allocation9] sm:$0xff]  }
 0x720   :  { %v16124_v8 = vpop.f32.mrb[229].mxu0  ;;  %v16629_v6 = vpop.f32.mrb[13].mxu1 }
 0x721   :  { %v5168_v45 = vmax.f32 %v5139_v44, 0.0  ;;  %v16125_v23 = vadd.f32 %v16124_v8, %v16123_v28  ;;  %v16126_v58 = vpop.f32.mrb[230].mxu0  ;;  %v5146_v17 = vpop.f32.mrb[14].mxu1  ;;  %v18155_v44 = vld [vmem:[#allocation9 + $0x48] sm:$0xff]   ;;  %v18147_v8 = vld [vmem:[#allocation7 + $0x20] sm:$0xff]   ;;  %v18157_v6 = vld [vmem:[#allocation9 + $0x50] sm:$0xff]  }
 0x722   :  { %v16127_v48 = vpop.f32.mrb[231].mxu0  ;;  %v16630_v61 = vpop.f32.mrb[15].mxu1  ;;  %v18156_v28 = vld [vmem:[#allocation9 + $0x8] sm:$0xff]  }
 0x723   :  { %v5072_v43 = vadd.f32 %v16125_v23, %v5000_v53  ;;  %v16128_v40 = vadd.f32 %v16127_v48, %v16126_v58  ;;  %v20956_v21 = vpack.c.bf16 %v5168_v45, %v5167_v50  ;;  %v18159_v53 = vld [vmem:[#allocation9 + $0x58] sm:$0xff]   ;;  %v18148_v50 = vld [vmem:[#allocation7 + $0x10] sm:$0xff]   ;;  %v18149_v45 = vld [vmem:[#allocation7 + $0x28] sm:$0xff]  }
 0x724   :  { %v18160_v23 = vld [vmem:[#allocation9 + $0x18] sm:$0xff]   ;;  %v18161_v58 = vld [vmem:[#allocation9 + $0x60] sm:$0xff]   ;;  %v18163_v48 = vld [vmem:[#allocation9 + $0x68] sm:$0xff]  }
 0x725   :  { %v5144_v49 = vadd.f32 %v5143_v63, %v5072_v43  ;;  %v5075_v27 = vadd.f32 %v16128_v40, %v5003_v22  ;;  %16642 = vmatpush3.bf16.msra.mxu0 %v20956_v21  ;;  %16664 = vmatpush3.bf16.msra.mxu1 %v20956_v21  ;;  %v18146_v63 = vld [vmem:[#allocation7 + $0x8] sm:$0xff]   ;;  %v18150_v61 = vld [vmem:[#allocation7 + $0x30] sm:$0xff]   ;;  %v18165_v40 = vld [vmem:[#allocation9 + $0x70] sm:$0xff]  }
 0x726   :  { %16643 = vmatprep.subr.bf16.mxu0 %v19444_v15  ;;  %16665 = vmatprep.subr.bf16.mxu1 %v19444_v15  ;;  %v18166_v22 = vld [vmem:[#allocation9 + $0x80] sm:$0xff]   ;;  %v18164_v43 = vld [vmem:[#allocation9 + $0x28] sm:$0xff]  }
 0x727   :  { %v5147_v13 = vadd.f32 %v5146_v17, %v5075_v27  ;;  %v16129_v26 = vpop.f32.mrb[232].mxu0  ;;  %v5151_v5 = vpop.f32.mrb[16].mxu1  ;;  %v5169_v57 = vmax.f32 %v5144_v49, 0.0  ;;  %v18162_v17 = vld [vmem:[#allocation9 + $0x20] sm:$0xff]   ;;  %v18151_v49 = vld [vmem:[#allocation7 + $0x38] sm:$0xff]   ;;  %v18152_v27 = vld [vmem:[#allocation7 + $0x40] sm:$0xff]  }
 0x728   :  { %v16130_v34 = vpop.f32.mrb[233].mxu0  ;;  %v16633_v9 = vpop.f32.mrb[17].mxu1 }
 0x729   :  { %v5170_v10 = vmax.f32 %v5147_v13, 0.0  ;;  %v16131_v41 = vadd.f32 %v16130_v34, %v16129_v26  ;;  %v16132_v56 = vpop.f32.mrb[234].mxu0  ;;  %v5154_v39 = vpop.f32.mrb[18].mxu1  ;;  %v18168_v13 = vld [vmem:[#allocation9 + $0x78] sm:$0xff]   ;;  %v18169_v26 = vld [vmem:[#allocation9 + $0x88] sm:$0xff]   ;;  %v18171_v34 = vld [vmem:[#allocation9 + $0x90] sm:$0xff]  }
 0x72a   :  { %v16133_v12 = vpop.f32.mrb[235].mxu0  ;;  %v16634_v37 = vpop.f32.mrb[19].mxu1  ;;  %v18172_v9 = vld [vmem:[#allocation9 + $0x98] sm:$0xff]  }
 0x72b   :  { %v5080_v33 = vadd.f32 %v16131_v41, %v5008_v4  ;;  %v16134_v38 = vadd.f32 %v16133_v12, %v16132_v56  ;;  %v5176_v32 = vpack.c.bf16 %v5170_v10, %v5169_v57  ;;  %v18173_v4 = vld [vmem:[#allocation9 + $0xa0] sm:$0xff]   ;;  %v18174_v57 = vld [vmem:[#allocation9 + $0xa8] sm:$0xff]   ;;  %v18175_v10 = vld [vmem:[#allocation9 + $0xb0] sm:$0xff]  }
 0x72c   :  { %v18176_v41 = vld [vmem:[#allocation9 + $0xb8] sm:$0xff]  }
 0x72d   :  { %v5152_v46 = vadd.f32 %v5151_v5, %v5080_v33  ;;  %v5083_v3 = vadd.f32 %v16134_v38, %v5011_v7  ;;  %16644 = vmatpush3.bf16.msra.mxu0 %v5176_v32  ;;  %16666 = vmatpush3.bf16.msra.mxu1 %v5176_v32  ;;  %v18170_v5 = vld [vmem:[#allocation9 + $0x38] sm:$0xff]  }
 0x72e   :  { %16645 = vmatprep.subr.bf16.mxu0 %v19444_v15  ;;  %16667 = vmatprep.subr.bf16.mxu1 %v19444_v15 }
 0x72f   :  { %v5155_v31 = vadd.f32 %v5154_v39, %v5083_v3  ;;  %v16135_v47 = vpop.f32.mrb[236].mxu0  ;;  %v5159_v55 = vpop.f32.mrb[20].mxu1  ;;  %v5171_v0 = vmax.f32 %v5152_v46, 0.0 }
 0x730   :  { %v16136_v18 = vpop.f32.mrb[237].mxu0  ;;  %v16637_v19 = vpop.f32.mrb[21].mxu1 }
 0x731   :  { %v5172_v14 = vmax.f32 %v5155_v31, 0.0  ;;  %v16137_v25 = vadd.f32 %v16136_v18, %v16135_v47  ;;  %v16138_v42 = vpop.f32.mrb[238].mxu0  ;;  %v5162_v54 = vpop.f32.mrb[22].mxu1 }
 0x732   :  { %v16139_v51 = vpop.f32.mrb[239].mxu0  ;;  %v16638_v60 = vpop.f32.mrb[23].mxu1 }
 0x733   :  { %v5088_v29 = vadd.f32 %v16137_v25, %v5016_v24  ;;  %v5177_v62 = vpack.c.bf16 %v5172_v14, %v5171_v0 }
 0x735   :  { %v5160_v59 = vadd.f32 %v5159_v55, %v5088_v29  ;;  %16646 = vmatpush3.bf16.msra.mxu0 %v5177_v62  ;;  %16668 = vmatpush3.bf16.msra.mxu1 %v5177_v62 }
 0x736   :  { %16647 = vmatprep.subr.bf16.mxu0 %v19444_v15  ;;  %16669 = vmatprep.subr.bf16.mxu1 %v19444_v15 }
 0x737   :  { %v5173_v11 = vmax.f32 %v5160_v59, 0.0 }
 0x739   :  { %v5178_v20 = vpack.c.bf16 %v5173_v11, %v5173_v11 }
 0x73b   :  { %v5211_v30 = vsel %vm632_vm0, %v5178_v20, 0 }
 0x73c   :  { %16648 = vmatpush3.bf16.msra.mxu0 %v5211_v30  ;;  %16670 = vmatpush3.bf16.msra.mxu1 %v5211_v30 }
 0x73d   :  { %16683 = vmatprep.subr.bf16.mxu0 %v19444_v15  ;;  %16178 = vmatprep.subr.bf16.mxu1 %v18153_v16 }
 0x73f   :  { %16650 = vmatmul.mubr.msk.bf16.vlgmr.msra.gmra.mrb[240].mxu0 %vm5200_vm3, %v18144_v1  ;;  %16672 = vmatmul.mubr.msk.bf16.vlgmr.msra.gmra.mrb[24].mxu1 %vm5200_vm3, %v18145_v35 }
 0x740   :  { %16684 = vmatpush3.bf16.msra.mxu0 %v20947_v52  ;;  %16653 = vmatprep.mubr.msk.bf16.mxu0 %vm19445_vm2, %v19444_v15  ;;  %v18158_v52 = vld [vmem:[#allocation9 + $0x10] sm:$0xff]  }
 0x741   :  { %16685 = vmatprep.subr.bf16.mxu0 %v19444_v15  ;;  %16675 = vmatprep.mubr.msk.bf16.mxu1 %vm19445_vm2, %v19444_v15 }
 0x742   :  { %16179 = vmatpush3.bf16.msra.mxu1 %v18154_v36 }
 0x743   :  { %16180 = vmatprep.subr.bf16.mxu1 %v18155_v44 }
 0x744   :  { %16686 = vmatpush3.bf16.msra.mxu0 %v20956_v21  ;;  %v18167_v21 = vld [vmem:[#allocation9 + $0x30] sm:$0xff]  }
 0x745   :  { %16687 = vmatprep.subr.bf16.mxu0 %v19444_v15 }
 0x746   :  { %16181 = vmatpush3.bf16.msra.mxu1 %v18156_v28 }
 0x747   :  { %16654 = vmatmul.mubr.msk.bf16.gmra.mrb[244].mxu0 %vm5200_vm3, %v18146_v63  ;;  %16676 = vmatmul.mubr.msk.bf16.gmra.mrb[28].mxu1 %vm5200_vm3, %v18147_v8 }
 0x748   :  { %16688 = vmatpush3.bf16.msra.mxu0 %v5176_v32  ;;  %16657 = vmatprep.mubr.msk.bf16.mxu0 %vm19445_vm2, %v19444_v15 }
 0x749   :  { %16689 = vmatprep.subr.bf16.mxu0 %v19444_v15  ;;  %16679 = vmatprep.mubr.msk.bf16.mxu1 %vm19445_vm2, %v19444_v15 }
 0x74a   :  { %16182 = vmatprep.subr.bf16.mxu1 %v18157_v6 }
 0x74b   :  { %16183 = vmatpush3.bf16.msra.mxu1 %v18158_v52 }
 0x74c   :  { %16690 = vmatpush3.bf16.msra.mxu0 %v5177_v62  ;;  %16184 = vmatprep.subr.bf16.mxu1 %v18159_v53 }
 0x74d   :  { %16691 = vmatprep.subr.bf16.mxu0 %v19444_v15 }
 0x74f   :  { %16658 = vmatmul.mubr.msk.bf16.gmra.mrb[248].mxu0 %vm5200_vm3, %v18148_v50  ;;  %16680 = vmatmul.mubr.msk.bf16.gmra.mrb[32].mxu1 %vm5200_vm3, %v18149_v45 }
 0x750   :  { %16692 = vmatpush3.bf16.msra.mxu0 %v5211_v30  ;;  %16693 = vmatprep.mubr.msk.bf16.mxu0 %vm19445_vm2, %v19444_v15 }
 0x751   :  { %16185 = vmatpush3.bf16.msra.mxu1 %v18160_v23  ;;  %16705 = vmatprep.subr.bf16.mxu0 %v19444_v15 }
 0x752   :  { %16186 = vmatprep.subr.bf16.mxu1 %v18161_v58 }
 0x755   :  { %16187 = vmatpush3.bf16.msra.mxu1 %v18162_v17 }
 0x756   :  { %16188 = vmatprep.subr.bf16.mxu1 %v18163_v48 }
 0x757   :  { %16694 = vmatmul.mubr.msk.bf16.vlgmr.msra.gmra.mrb[252].mxu0 %vm5200_vm3, %v18150_v61 }
 0x758   :  { %16697 = vmatprep.mubr.msk.bf16.mxu0 %vm19445_vm2, %v19444_v15  ;;  %16706 = vmatpush3.bf16.msra.mxu0 %v18166_v22 }
 0x759   :  { %16189 = vmatpush3.bf16.msra.mxu1 %v18164_v43  ;;  %16707 = vmatprep.subr.bf16.mxu0 %v19444_v15 }
 0x75a   :  { %16190 = vmatprep.subr.bf16.mxu1 %v18165_v40 }
 0x75c   :  { %16708 = vmatpush3.bf16.msra.mxu0 %v18169_v26 }
 0x75d   :  { %16191 = vmatpush3.bf16.msra.mxu1 %v18167_v21  ;;  %16709 = vmatprep.subr.bf16.mxu0 %v19444_v15 }
 0x75e   :  { %16192 = vmatprep.subr.bf16.mxu1 %v18168_v13 }
 0x75f   :  { %16698 = vmatmul.mubr.msk.bf16.gmra.mrb[0].mxu0 %vm5200_vm3, %v18151_v49 }
 0x760   :  { %16701 = vmatprep.mubr.msk.bf16.mxu0 %vm19445_vm2, %v19444_v15  ;;  %16710 = vmatpush3.bf16.msra.mxu0 %v18171_v34 }
 0x761   :  { %16193 = vmatpush3.bf16.msra.mxu1 %v18170_v5  ;;  %16711 = vmatprep.subr.bf16.mxu0 %v19444_v15 }
 0x762   :  { %16743 = vmatprep.subr.bf16.mxu1 %v19444_v15 }
 0x764   :  { %16712 = vmatpush3.bf16.msra.mxu0 %v18172_v9 }
 0x765   :  { %16713 = vmatprep.subr.bf16.mxu0 %v19444_v15 }
 0x767   :  { %16702 = vmatmul.mubr.msk.bf16.gmra.mrb[4].mxu0 %vm5200_vm3, %v18152_v27 }
 0x768   :  { %16721 = vmatprep.mubr.msk.bf16.mxu0 %vm19445_vm2, %v19444_v15  ;;  %16714 = vmatpush3.bf16.msra.mxu0 %v18173_v4 }
 0x769   :  { %16715 = vmatprep.subr.bf16.mxu0 %v19444_v15 }
 0x76c   :  { %16716 = vmatpush3.bf16.msra.mxu0 %v18174_v57 }
 0x76d   :  { %16717 = vmatprep.subr.bf16.mxu0 %v19444_v15 }
 0x770   :  { %16718 = vmatpush3.bf16.msra.mxu0 %v18175_v10 }
 0x771   :  { %16719 = vmatprep.subr.bf16.mxu0 %v19444_v15 }
 0x774   :  { %16720 = vmatpush3.bf16.msra.mxu0 %v18176_v41 }
 0x775   :  { %16733 = vmatprep.subr.bf16.mxu0 %v19444_v15 }
 0x812   :  { %v5247_v56 = vpop.f32.mrb[240].mxu0  ;;  %v5335_v39 = vpop.f32.mrb[24].mxu1 }
 0x813   :  { %v16651_v12 = vpop.f32.mrb[241].mxu0  ;;  %v16673_v37 = vpop.f32.mrb[25].mxu1 }
 0x814   :  { %v5250_v7 = vpop.f32.mrb[242].mxu0  ;;  %v5338_v33 = vpop.f32.mrb[26].mxu1 }
 0x815   :  { %v5446_v38 = vpack.c.bf16 %v5250_v7, %v5247_v56  ;;  %v5447_v32 = vpack.c.bf16 %v5338_v33, %v5335_v39  ;;  %v16652_v46 = vpop.f32.mrb[243].mxu0  ;;  %v16674_v3 = vpop.f32.mrb[27].mxu1  ;;  %v14649_v56 = vld [vmem:[#allocation10] ss:$0 sm:$0xff] }
 0x817   :  { %5686 = vmatprep.mubr.bf16.mxu1 %v5447_v32 }
 0x818   :  { %5687 = vmatmul.mubr.bf16.vlgmr.msra.gmra.mrb[36].mxu1 %v5446_v38 }
 0x81a   :  { %v5255_v31 = vpop.f32.mrb[244].mxu0  ;;  %v5343_v47 = vpop.f32.mrb[28].mxu1 }
 0x81b   :  { %v16655_v55 = vpop.f32.mrb[245].mxu0  ;;  %v16677_v18 = vpop.f32.mrb[29].mxu1 }
 0x81c   :  { %v5258_v19 = vpop.f32.mrb[246].mxu0  ;;  %v5346_v24 = vpop.f32.mrb[30].mxu1 }
 0x81d   :  { %v5449_v0 = vpack.c.bf16 %v5258_v19, %v5255_v31  ;;  %v5450_v14 = vpack.c.bf16 %v5346_v24, %v5343_v47  ;;  %v16656_v25 = vpop.f32.mrb[247].mxu0  ;;  %v16678_v42 = vpop.f32.mrb[31].mxu1 }
 0x81f   :  { %5694 = vmatprep.mubr.bf16.mxu1 %v5450_v14 }
 0x820   :  { %5695 = vmatmul.mubr.bf16.gmra.mrb[40].mxu1 %v5449_v0 }
 0x822   :  { %v5263_v54 = vpop.f32.mrb[248].mxu0  ;;  %v5351_v51 = vpop.f32.mrb[32].mxu1 }
 0x823   :  { %v16659_v60 = vpop.f32.mrb[249].mxu0  ;;  %v16681_v29 = vpop.f32.mrb[33].mxu1 }
 0x824   :  { %v5266_v62 = vpop.f32.mrb[250].mxu0  ;;  %v5354_v59 = vpop.f32.mrb[34].mxu1 }
 0x825   :  { %v5452_v11 = vpack.c.bf16 %v5266_v62, %v5263_v54  ;;  %v5453_v20 = vpack.c.bf16 %v5354_v59, %v5351_v51  ;;  %v16660_v16 = vpop.f32.mrb[251].mxu0  ;;  %v16682_v30 = vpop.f32.mrb[35].mxu1 }
 0x827   :  { %5702 = vmatprep.mubr.bf16.mxu1 %v5453_v20 }
 0x828   :  { %5703 = vmatmul.mubr.bf16.gmra.mrb[44].mxu1 %v5452_v11 }
 0x829   :  { %16749 = vmatprep.mubr.msk.bf16.mxu1 %vm19445_vm2, %v19444_v15 }
 0x82a   :  { %v5423_v1 = vpop.f32.mrb[252].mxu0 }
 0x82b   :  { %v16695_v35 = vpop.f32.mrb[253].mxu0 }
 0x82c   :  { %v5426_v36 = vpop.f32.mrb[254].mxu0 }
 0x82d   :  { %v5448_v44 = vpack.c.bf16 %v5426_v36, %v5423_v1  ;;  %v16696_v28 = vpop.f32.mrb[255].mxu0 }
 0x82f   :  { %16722 = vmatmul.mubr.bf16.vlgmr.msra.gmra.mrb[8].mxu0 %v5448_v44 }
 0x830   :  { %16725 = vmatprep.mubr.msk.bf16.mxu0 %vm19445_vm2, %v19444_v15 }
 0x832   :  { %v5431_v63 = vpop.f32.mrb[0].mxu0 }
 0x833   :  { %v16699_v8 = vpop.f32.mrb[1].mxu0 }
 0x834   :  { %v5434_v6 = vpop.f32.mrb[2].mxu0  ;;  %v5823_v8 = vld [vmem:[#allocation12 + $0x4] sm:$0xf] }
 0x835   :  { %v5451_v52 = vpack.c.bf16 %v5434_v6, %v5431_v63  ;;  %v16700_v53 = vpop.f32.mrb[3].mxu0  ;;  %v5777_v63 = vld [vmem:[#allocation12] sm:$0xf]  ;;  %v5868_v6 = vld [vmem:[#allocation12 + $0x8] sm:$0xf] }
 0x836   :  { %v18179_v53 = vld [vmem:[%s22775_s26 + $0x4] ss:$8 sps:$4 sm:$0xff]  }
 0x837   :  { %16726 = vmatmul.mubr.bf16.gmra.mrb[12].mxu0 %v5451_v52  ;;  %v5913_v52 = vld [vmem:[#allocation12 + $0xc] sm:$0xf] }
 0x838   :  { %16729 = vmatprep.mubr.msk.bf16.mxu0 %vm19445_vm2, %v19444_v15 }
 0x83a   :  { %v5439_v50 = vpop.f32.mrb[4].mxu0 }
 0x83b   :  { %v16703_v45 = vpop.f32.mrb[5].mxu0 }
 0x83c   :  { %v5442_v23 = vpop.f32.mrb[6].mxu0  ;;  %v5958_v45 = vld [vmem:[#allocation12 + $0x10] sm:$0xf] }
 0x83d   :  { %v5454_v58 = vpack.c.bf16 %v5442_v23, %v5439_v50  ;;  %v16704_v17 = vpop.f32.mrb[7].mxu0  ;;  %v6003_v50 = vld [vmem:[#allocation12 + $0x14] sm:$0xf] }
 0x83e   :  { %v18177_v23 = vld [vmem:[%s22775_s26] ss:$8 sps:$4 sm:$0xff]   ;;  %v18180_v17 = vld [vmem:[%s22775_s26 + $0x10] ss:$8 sps:$4 sm:$0xff]  }
 0x83f   :  { %16730 = vmatmul.mubr.bf16.gmra.mrb[16].mxu0 %v5454_v58  ;;  %v18182_v58 = vld [vmem:[%s22775_s26 + $0x14] ss:$8 sps:$4 sm:$0xff]  }
 0x840   :  { %16739 = vmatprep.mubr.msk.bf16.mxu0 %vm19445_vm2, %v19444_v15 }
 0x8eb   :  { %v16194_v48 = vpop.f32.mrb[36].mxu1 }
 0x8ec   :  { %v16195_v61 = vpop.f32.mrb[37].mxu1 }
 0x8ed   :  { %v16196_v22 = vadd.f32 %v16195_v61, %v16194_v48  ;;  %v16197_v43 = vpop.f32.mrb[38].mxu1  ;;  %v18185_v48 = vld [vmem:[%s22775_s26 + $0x24] ss:$8 sps:$4 sm:$0xff]   ;;  %v18183_v61 = vld [vmem:[%s22775_s26 + $0x20] ss:$8 sps:$4 sm:$0xff]  }
 0x8ee   :  { %v16198_v40 = vpop.f32.mrb[39].mxu1 }
 0x8ef   :  { %v16199_v21 = vadd.f32 %v16198_v40, %v16197_v43  ;;  %v5689_v12 = vadd.f32 %v16196_v22, %v14649_v56  ;;  %v18188_v22 = vld [vmem:[%s22775_s26 + $0x34] ss:$8 sps:$4 sm:$0xff]   ;;  %v18186_v43 = vld [vmem:[%s22775_s26 + $0x30] ss:$8 sps:$4 sm:$0xff]   ;;  %v18191_v40 = vld [vmem:[%s22775_s26 + $0x44] ss:$8 sps:$4 sm:$0xff]  }
 0x8f1   :  { %v5692_v38 = vadd.f32 %v16199_v21, %v14649_v56  ;;  %v18189_v21 = vld [vmem:[%s22775_s26 + $0x40] ss:$8 sps:$4 sm:$0xff]  }
 0x8f3   :  { %v16200_v49 = vpop.f32.mrb[40].mxu1 }
 0x8f4   :  { %v16201_v27 = vpop.f32.mrb[41].mxu1 }
 0x8f5   :  { %v16202_v13 = vadd.f32 %v16201_v27, %v16200_v49  ;;  %v16203_v26 = vpop.f32.mrb[42].mxu1  ;;  %v18194_v49 = vld [vmem:[%s22775_s26 + $0x54] ss:$8 sps:$4 sm:$0xff]   ;;  %v18192_v27 = vld [vmem:[%s22775_s26 + $0x50] ss:$8 sps:$4 sm:$0xff]  }
 0x8f6   :  { %v16204_v5 = vpop.f32.mrb[43].mxu1 }
 0x8f7   :  { %v16205_v34 = vadd.f32 %v16204_v5, %v16203_v26  ;;  %v5697_v18 = vadd.f32 %v16202_v13, %v14649_v56  ;;  %v18197_v13 = vld [vmem:[%s22775_s26 + $0x64] ss:$8 sps:$4 sm:$0xff]   ;;  %v18195_v26 = vld [vmem:[%s22775_s26 + $0x60] ss:$8 sps:$4 sm:$0xff]   ;;  %v18200_v5 = vld [vmem:[%s22775_s26 + $0x74] ss:$8 sps:$4 sm:$0xff]  }
 0x8f9   :  { %v5700_v14 = vadd.f32 %v16205_v34, %v14649_v56  ;;  %v18198_v34 = vld [vmem:[%s22775_s26 + $0x70] ss:$8 sps:$4 sm:$0xff]  }
 0x8fb   :  { %v16206_v9 = vpop.f32.mrb[44].mxu1 }
 0x8fc   :  { %v16207_v4 = vpop.f32.mrb[45].mxu1 }
 0x8fd   :  { %v16208_v57 = vadd.f32 %v16207_v4, %v16206_v9  ;;  %v16209_v10 = vpop.f32.mrb[46].mxu1  ;;  %v18203_v9 = vld [vmem:[%s22775_s26 + $0x84] ss:$8 sps:$4 sm:$0xff]   ;;  %v18201_v4 = vld [vmem:[%s22775_s26 + $0x80] ss:$8 sps:$4 sm:$0xff]  }
 0x8fe   :  { %v16210_v41 = vpop.f32.mrb[47].mxu1 }
 0x8ff   :  { %v16211_v39 = vadd.f32 %v16210_v41, %v16209_v10  ;;  %v5705_v62 = vadd.f32 %v16208_v57, %v14649_v56  ;;  %v18206_v57 = vld [vmem:[%s22775_s26 + $0x94] ss:$8 sps:$4 sm:$0xff]   ;;  %v18204_v10 = vld [vmem:[%s22775_s26 + $0x90] ss:$8 sps:$4 sm:$0xff]   ;;  %v18209_v41 = vld [vmem:[%s22775_s26 + $0xa4] ss:$8 sps:$4 sm:$0xff]  }
 0x901   :  { %v5708_v16 = vadd.f32 %v16211_v39, %v14649_v56  ;;  %v18207_v56 = vld [vmem:[%s22775_s26 + $0xa0] ss:$8 sps:$4 sm:$0xff]   ;;  %v18212_v39 = vld [vmem:[%s22775_s26 + $0xb4] ss:$8 sps:$4 sm:$0xff]  }
 0x902   :  { %v5745_v37 = vpop.f32.mrb[8].mxu0 }
 0x903   :  { %v5746_v7 = vadd.f32 %v5745_v37, %v5689_v12  ;;  %v16723_v33 = vpop.f32.mrb[9].mxu0  ;;  %v18210_v12 = vld [vmem:[%s22775_s26 + $0xb0] ss:$8 sps:$4 sm:$0xff]   ;;  %v18215_v37 = vld [vmem:[%s22775_s26 + $0xc4] ss:$8 sps:$4 sm:$0xff]  }
 0x904   :  { %v5748_v32 = vpop.f32.mrb[10].mxu0  ;;  %v18218_v33 = vld [vmem:[%s22775_s26 + $0xd4] ss:$8 sps:$4 sm:$0xff]  }
 0x905   :  { %v5749_v46 = vadd.f32 %v5748_v32, %v5692_v38  ;;  %v16724_v3 = vpop.f32.mrb[11].mxu0  ;;  %v5768_v31 = vmax.f32 %v5746_v7, 0.0  ;;  %v18213_v7 = vld [vmem:[%s22775_s26 + $0xc0] ss:$8 sps:$4 sm:$0xff]   ;;  %v18216_v38 = vld [vmem:[%s22775_s26 + $0xd0] ss:$8 sps:$4 sm:$0xff]  }
 0x906   :  { %v18221_v32 = vld [vmem:[%s22775_s26 + $0xe4] ss:$8 sps:$4 sm:$0xff]   ;;  %v18224_v3 = vld [vmem:[%s22775_s26 + $0xf4] ss:$8 sps:$4 sm:$0xff]  }
 0x907   :  { %v5769_v47 = vmax.f32 %v5749_v46, 0.0  ;;  %v18219_v46 = vld [vmem:[%s22775_s26 + $0xe0] ss:$8 sps:$4 sm:$0xff]  }
 0x909   :  { %v5774_v55 = vpack.c.bf16 %v5769_v47, %v5768_v31  ;;  %v18222_v31 = vld [vmem:[%s22775_s26 + $0xf0] ss:$8 sps:$4 sm:$0xff]   ;;  %v18227_v47 = vld [vmem:[%s22775_s26 + $0x104] ss:$8 sps:$4 sm:$0xff]  }
 0x90a   :  { %v5753_v19 = vpop.f32.mrb[12].mxu0 }
 0x90b   :  { %v5754_v24 = vadd.f32 %v5753_v19, %v5697_v18  ;;  %v16727_v0 = vpop.f32.mrb[13].mxu0  ;;  %16734 = vmatpush3.bf16.msra.mxu0 %v5774_v55  ;;  %16744 = vmatpush3.bf16.msra.mxu1 %v5774_v55 }
 0x90c   :  { %v5756_v25 = vpop.f32.mrb[14].mxu0  ;;  %16735 = vmatprep.subr.bf16.mxu0 %v19444_v15  ;;  %16745 = vmatprep.subr.bf16.mxu1 %v19444_v15 }
 0x90d   :  { %v5757_v42 = vadd.f32 %v5756_v25, %v5700_v14  ;;  %v16728_v54 = vpop.f32.mrb[15].mxu0  ;;  %v5770_v51 = vmax.f32 %v5754_v24, 0.0  ;;  %v18225_v25 = vld [vmem:[%s22775_s26 + $0x100] ss:$8 sps:$4 sm:$0xff]  }
 0x90f   :  { %v5771_v60 = vmax.f32 %v5757_v42, 0.0 }
 0x911   :  { %v5775_v29 = vpack.c.bf16 %v5771_v60, %v5770_v51  ;;  %v18230_v51 = vld [vmem:[%s22775_s26 + $0x114] ss:$8 sps:$4 sm:$0xff]  }
 0x912   :  { %v5761_v59 = vpop.f32.mrb[16].mxu0 }
 0x913   :  { %v5762_v11 = vadd.f32 %v5761_v59, %v5705_v62  ;;  %v16731_v20 = vpop.f32.mrb[17].mxu0  ;;  %16736 = vmatpush3.bf16.msra.mxu0 %v5775_v29  ;;  %16746 = vmatpush3.bf16.msra.mxu1 %v5775_v29  ;;  %v18321_v62 = vld [vmem:[#allocation15 + $0x40] sm:$0xff]  }
 0x914   :  { %v5764_v30 = vpop.f32.mrb[18].mxu0  ;;  %16737 = vmatprep.subr.bf16.mxu0 %v19444_v15  ;;  %16747 = vmatprep.subr.bf16.mxu1 %v19444_v15  ;;  %v18322_v59 = vld [vmem:[#allocation15] sm:$0xff]   ;;  %v18228_v20 = vld [vmem:[%s22775_s26 + $0x110] ss:$8 sps:$4 sm:$0xff]  }
 0x915   :  { %v5765_v1 = vadd.f32 %v5764_v30, %v5708_v16  ;;  %v16732_v35 = vpop.f32.mrb[19].mxu0  ;;  %v5772_v36 = vmax.f32 %v5762_v11, 0.0  ;;  %v18323_v11 = vld [vmem:[#allocation15 + $0x48] sm:$0xff]   ;;  %v18233_v16 = vld [vmem:[%s22775_s26 + $0x124] ss:$8 sps:$4 sm:$0xff]  }
 0x916   :  { %v18324_v30 = vld [vmem:[#allocation15 + $0x8] sm:$0xff]   ;;  %v18231_v35 = vld [vmem:[%s22775_s26 + $0x120] ss:$8 sps:$4 sm:$0xff]  }
 0x917   :  { %v5773_v44 = vmax.f32 %v5765_v1, 0.0  ;;  %v18325_v1 = vld [vmem:[#allocation15 + $0x50] sm:$0xff]  }
 0x919   :  { %v5776_v28 = vpack.c.bf16 %v5773_v44, %v5772_v36  ;;  %v18236_v36 = vld [vmem:[%s22775_s26 + $0x134] ss:$8 sps:$4 sm:$0xff]  }
 0x91a   :  { %v18326_v44 = vld [vmem:[#allocation15 + $0x10] sm:$0xff]  }
 0x91b   :  { %16738 = vmatpush3.bf16.msra.mxu0 %v5776_v28  ;;  %16748 = vmatpush3.bf16.msra.mxu1 %v5776_v28 }
 0x91c   :  { %16753 = vmatprep.subr.bf16.mxu0 %v19444_v15  ;;  %16763 = vmatprep.subr.bf16.mxu1 %v19444_v15 }
 0x91e   :  { %16740 = vmatmul.mubr.msk.bf16.vlgmr.msra.gmra.mrb[20].mxu0 %vm5778_vm4, %v5777_v63  ;;  %16750 = vmatmul.mubr.msk.bf16.vlgmr.msra.gmra.mrb[48].mxu1 %vm5778_vm4, %v5823_v8  ;;  %v18327_v8 = vld [vmem:[#allocation15 + $0x58] sm:$0xff]  }
 0x91f   :  { %16754 = vmatpush3.bf16.msra.mxu0 %v5774_v55  ;;  %16764 = vmatpush3.bf16.msra.mxu1 %v5774_v55 }
 0x920   :  { %16755 = vmatprep.subr.bf16.mxu0 %v19444_v15  ;;  %16765 = vmatprep.subr.bf16.mxu1 %v19444_v15 }
 0x921   :  { %16759 = vmatprep.mubr.msk.bf16.mxu0 %vm19445_vm2, %v19444_v15  ;;  %16769 = vmatprep.mubr.msk.bf16.mxu1 %vm19445_vm2, %v19444_v15 }
 0x923   :  { %16756 = vmatpush3.bf16.msra.mxu0 %v5775_v29  ;;  %16766 = vmatpush3.bf16.msra.mxu1 %v5775_v29 }
 0x924   :  { %16757 = vmatprep.subr.bf16.mxu0 %v19444_v15  ;;  %16767 = vmatprep.subr.bf16.mxu1 %v19444_v15 }
 0x927   :  { %16758 = vmatpush3.bf16.msra.mxu0 %v5776_v28  ;;  %16768 = vmatpush3.bf16.msra.mxu1 %v5776_v28 }
 0x928   :  { %16773 = vmatprep.subr.bf16.mxu0 %v19444_v15  ;;  %16783 = vmatprep.subr.bf16.mxu1 %v19444_v15 }
 0x92a   :  { %16760 = vmatmul.mubr.msk.bf16.vlgmr.msra.gmra.mrb[24].mxu0 %vm5778_vm4, %v5868_v6  ;;  %16770 = vmatmul.mubr.msk.bf16.vlgmr.msra.gmra.mrb[52].mxu1 %vm5778_vm4, %v5913_v52  ;;  %v18234_v6 = vld [vmem:[%s22775_s26 + $0x130] ss:$8 sps:$4 sm:$0xff]  }
 0x92b   :  { %16774 = vmatpush3.bf16.msra.mxu0 %v5774_v55  ;;  %16784 = vmatpush3.bf16.msra.mxu1 %v5774_v55 }
 0x92c   :  { %16775 = vmatprep.subr.bf16.mxu0 %v19444_v15  ;;  %16785 = vmatprep.subr.bf16.mxu1 %v19444_v15 }
 0x92d   :  { %16789 = vmatprep.mubr.msk.bf16.mxu1 %vm19445_vm2, %v19444_v15  ;;  %16779 = vmatprep.mubr.msk.bf16.mxu0 %vm19445_vm2, %v19444_v15 }
 0x92f   :  { %16776 = vmatpush3.bf16.msra.mxu0 %v5775_v29  ;;  %16786 = vmatpush3.bf16.msra.mxu1 %v5775_v29 }
 0x930   :  { %16777 = vmatprep.subr.bf16.mxu0 %v19444_v15  ;;  %16787 = vmatprep.subr.bf16.mxu1 %v19444_v15 }
 0x933   :  { %16778 = vmatpush3.bf16.msra.mxu0 %v5776_v28  ;;  %16788 = vmatpush3.bf16.msra.mxu1 %v5776_v28 }
 0x934   :  { %6641 = vmatprep.subr.bf16.mxu0 %v18179_v53  ;;  %16247 = vmatprep.subr.bf16.mxu1 %v18321_v62  ;;  %v18278_v62 = vld [vmem:[%s22775_s26 + $0x214] ss:$8 sps:$4 sm:$0xff]  }
 0x936   :  { %16790 = vmatmul.mubr.msk.bf16.vlgmr.msra.gmra.mrb[56].mxu1 %vm5778_vm4, %v6003_v50  ;;  %16780 = vmatmul.mubr.msk.bf16.vlgmr.msra.gmra.mrb[28].mxu0 %vm5778_vm4, %v5958_v45  ;;  %v18239_v45 = vld [vmem:[%s22775_s26 + $0x144] ss:$8 sps:$4 sm:$0xff]  }
 0x937   :  { %6642 = vmatpush1.bf16.msra.mxu0 %v18177_v23  ;;  %16248 = vmatpush3.bf16.msra.mxu1 %v18322_v59  ;;  %v18276_v59 = vld [vmem:[%s22775_s26 + $0x210] ss:$8 sps:$4 sm:$0xff]  }
 0x938   :  { %6643 = vmatprep.subr.bf16.mxu0 %v18182_v58  ;;  %16249 = vmatprep.subr.bf16.mxu1 %v18323_v11  ;;  %v18281_v11 = vld [vmem:[%s22775_s26 + $0x224] ss:$8 sps:$4 sm:$0xff]  }
 0x93b   :  { %6644 = vmatpush1.bf16.msra.mxu0 %v18180_v17  ;;  %16250 = vmatpush3.bf16.msra.mxu1 %v18324_v30  ;;  %v18282_v30 = vld [vmem:[%s22775_s26 + $0x230] ss:$8 sps:$4 sm:$0xff]  }
 0x93c   :  { %6645 = vmatprep.subr.bf16.mxu0 %v18185_v48  ;;  %16251 = vmatprep.subr.bf16.mxu1 %v18325_v1  ;;  %v18287_v1 = vld [vmem:[%s22775_s26 + $0x244] ss:$8 sps:$4 sm:$0xff]  }
 0x93f   :  { %6646 = vmatpush1.bf16.msra.mxu0 %v18183_v61  ;;  %16252 = vmatpush3.bf16.msra.mxu1 %v18326_v44  ;;  %v18328_v61 = vld [vmem:[#allocation15 + $0x18] sm:$0xff]   ;;  %v18288_v44 = vld [vmem:[%s22775_s26 + $0x250] ss:$8 sps:$4 sm:$0xff]  }
 0x940   :  { %6647 = vmatprep.subr.bf16.mxu0 %v18188_v22  ;;  %16253 = vmatprep.subr.bf16.mxu1 %v18327_v8  ;;  %v18329_v22 = vld [vmem:[#allocation15 + $0x60] sm:$0xff]   ;;  %v18296_v8 = vld [vmem:[%s22775_s26 + $0x274] ss:$8 sps:$4 sm:$0xff]  }
 0x943   :  { %6648 = vmatpush1.bf16.msra.mxu0 %v18186_v43  ;;  %v18237_v43 = vld [vmem:[%s22775_s26 + $0x140] ss:$8 sps:$4 sm:$0xff]   ;;  %16254 = vmatpush3.bf16.msra.mxu1 %v18328_v61  ;;  %v18311_v61 = vld [vmem:[%s22775_s26 + $0x2c4] ss:$8 sps:$4 sm:$0xff]  }
 0x944   :  { %6649 = vmatprep.subr.bf16.mxu0 %v18191_v40  ;;  %v18242_v40 = vld [vmem:[%s22775_s26 + $0x154] ss:$8 sps:$4 sm:$0xff]   ;;  %16255 = vmatprep.subr.bf16.mxu1 %v18329_v22  ;;  %v18309_v22 = vld [vmem:[%s22775_s26 + $0x2c0] ss:$8 sps:$4 sm:$0xff]  }
 0x947   :  { %6650 = vmatpush1.bf16.msra.mxu0 %v18189_v21  ;;  %v18330_v21 = vld [vmem:[#allocation15 + $0x20] sm:$0xff]  }
 0x948   :  { %6651 = vmatprep.subr.bf16.mxu0 %v18194_v49  ;;  %v18331_v49 = vld [vmem:[#allocation15 + $0x68] sm:$0xff]   ;;  %16256 = vmatpush3.bf16.msra.mxu1 %v18330_v21  ;;  %v18317_v21 = vld [vmem:[%s22775_s26 + $0x2e4] ss:$8 sps:$4 sm:$0xff]  }
 0x949   :  { %16257 = vmatprep.subr.bf16.mxu1 %v18331_v49  ;;  %v18315_v49 = vld [vmem:[%s22775_s26 + $0x2e0] ss:$8 sps:$4 sm:$0xff]  }
 0x94b   :  { %6652 = vmatpush1.bf16.msra.mxu0 %v18192_v27  ;;  %v18240_v27 = vld [vmem:[%s22775_s26 + $0x150] ss:$8 sps:$4 sm:$0xff]  }
 0x94c   :  { %6653 = vmatprep.subr.bf16.mxu0 %v18197_v13  ;;  %v18245_v13 = vld [vmem:[%s22775_s26 + $0x164] ss:$8 sps:$4 sm:$0xff]  }
 0x94f   :  { %6654 = vmatpush1.bf16.msra.mxu0 %v18195_v26  ;;  %v18332_v26 = vld [vmem:[#allocation15 + $0x28] sm:$0xff]  }
 0x950   :  { %6655 = vmatprep.subr.bf16.mxu0 %v18200_v5  ;;  %16258 = vmatpush3.bf16.msra.mxu1 %v18332_v26 }
 0x953   :  { %6656 = vmatpush1.bf16.msra.mxu0 %v18198_v34 }
 0x954   :  { %6657 = vmatprep.subr.bf16.mxu0 %v18203_v9  ;;  %v18243_v9 = vld [vmem:[%s22775_s26 + $0x160] ss:$8 sps:$4 sm:$0xff]  }
 0x957   :  { %6658 = vmatpush1.bf16.msra.mxu0 %v18201_v4 }
 0x958   :  { %6659 = vmatprep.subr.bf16.mxu0 %v18206_v57 }
 0x95b   :  { %6660 = vmatpush1.bf16.msra.mxu0 %v18204_v10  ;;  %v18248_v10 = vld [vmem:[%s22775_s26 + $0x174] ss:$8 sps:$4 sm:$0xff]  }
 0x95c   :  { %6661 = vmatprep.subr.bf16.mxu0 %v18209_v41 }
 0x95f   :  { %6662 = vmatpush1.bf16.msra.mxu0 %v18207_v56 }
 0x960   :  { %6663 = vmatprep.subr.bf16.mxu0 %v18212_v39 }
 0x963   :  { %6664 = vmatpush1.bf16.msra.mxu0 %v18210_v12 }
 0x964   :  { %6665 = vmatprep.subr.bf16.mxu0 %v18215_v37  ;;  %v18246_v37 = vld [vmem:[%s22775_s26 + $0x170] ss:$8 sps:$4 sm:$0xff]  }
 0x967   :  { %6666 = vmatpush1.bf16.msra.mxu0 %v18213_v7  ;;  %v18251_v7 = vld [vmem:[%s22775_s26 + $0x184] ss:$8 sps:$4 sm:$0xff]  }
 0x968   :  { %6667 = vmatprep.subr.bf16.mxu0 %v18218_v33  ;;  %v18249_v33 = vld [vmem:[%s22775_s26 + $0x180] ss:$8 sps:$4 sm:$0xff]  }
 0x96b   :  { %6668 = vmatpush1.bf16.msra.mxu0 %v18216_v38  ;;  %v18254_v38 = vld [vmem:[%s22775_s26 + $0x194] ss:$8 sps:$4 sm:$0xff]  }
 0x96c   :  { %6669 = vmatprep.subr.bf16.mxu0 %v18221_v32  ;;  %v18252_v32 = vld [vmem:[%s22775_s26 + $0x190] ss:$8 sps:$4 sm:$0xff]  }
 0x96f   :  { %6670 = vmatpush1.bf16.msra.mxu0 %v18219_v46  ;;  %v18257_v46 = vld [vmem:[%s22775_s26 + $0x1a4] ss:$8 sps:$4 sm:$0xff]  }
 0x970   :  { %6671 = vmatprep.subr.bf16.mxu0 %v18224_v3  ;;  %v18255_v3 = vld [vmem:[%s22775_s26 + $0x1a0] ss:$8 sps:$4 sm:$0xff]  }
 0x973   :  { %6672 = vmatpush1.bf16.msra.mxu0 %v18222_v31  ;;  %v18260_v31 = vld [vmem:[%s22775_s26 + $0x1b4] ss:$8 sps:$4 sm:$0xff]  }
 0x974   :  { %6682 = vmatprep.subr.bf16.mxu0 %v18227_v47  ;;  %v18258_v47 = vld [vmem:[%s22775_s26 + $0x1b0] ss:$8 sps:$4 sm:$0xff]  }
 0x9f1   :  { %v5816_v55 = vpop.f32.mrb[20].mxu0  ;;  %v5861_v18 = vpop.f32.mrb[48].mxu1 }
 0x9f2   :  { %v6047_v19 = vpack.c.bf16 %v5816_v55, %v5816_v55  ;;  %v6048_v24 = vpack.c.bf16 %v5861_v18, %v5861_v18  ;;  %v16741_v0 = vpop.f32.mrb[21].mxu0  ;;  %v16751_v14 = vpop.f32.mrb[49].mxu1  ;;  %v18263_v55 = vld [vmem:[%s22775_s26 + $0x1c4] ss:$8 sps:$4 sm:$0xff]   ;;  %v18261_v18 = vld [vmem:[%s22775_s26 + $0x1c0] ss:$8 sps:$4 sm:$0xff]  }
 0x9f3   :  { %v5819_v42 = vpop.f32.mrb[22].mxu0  ;;  %v5864_v54 = vpop.f32.mrb[50].mxu1  ;;  %v18269_v0 = vld [vmem:[%s22775_s26 + $0x1e4] ss:$8 sps:$4 sm:$0xff]   ;;  %v18267_v14 = vld [vmem:[%s22775_s26 + $0x1e0] ss:$8 sps:$4 sm:$0xff]  }
 0x9f4   :  { %v16742_v60 = vpop.f32.mrb[23].mxu0  ;;  %v16752_v29 = vpop.f32.mrb[51].mxu1  ;;  %6673 = vmatprep.mubr.bf16.mxu0 %v6048_v24  ;;  %v18264_v24 = vld [vmem:[%s22775_s26 + $0x1d0] ss:$8 sps:$4 sm:$0xff]   ;;  %v18275_v54 = vld [vmem:[%s22775_s26 + $0x204] ss:$8 sps:$4 sm:$0xff]  }
 0x9f5   :  { %6674 = vmatmul.mubr.bf16.vlgmr.msra.gmra.mrb[32].mxu0 %v6047_v19  ;;  %v18266_v19 = vld [vmem:[%s22775_s26 + $0x1d4] ss:$8 sps:$4 sm:$0xff]   ;;  %v18270_v42 = vld [vmem:[%s22775_s26 + $0x1f0] ss:$8 sps:$4 sm:$0xff]   ;;  %v18273_v60 = vld [vmem:[%s22775_s26 + $0x200] ss:$8 sps:$4 sm:$0xff]  }
 0x9f6   :  { %6683 = vmatpush1.bf16.msra.mxu0 %v18225_v25  ;;  %v18272_v25 = vld [vmem:[%s22775_s26 + $0x1f4] ss:$8 sps:$4 sm:$0xff]  }
 0x9f7   :  { %6684 = vmatprep.subr.bf16.mxu0 %v18230_v51 }
 0x9fa   :  { %6685 = vmatpush1.bf16.msra.mxu0 %v18228_v20  ;;  %v18279_v20 = vld [vmem:[%s22775_s26 + $0x220] ss:$8 sps:$4 sm:$0xff]  }
 0x9fb   :  { %6686 = vmatprep.subr.bf16.mxu0 %v18233_v16  ;;  %v18284_v16 = vld [vmem:[%s22775_s26 + $0x234] ss:$8 sps:$4 sm:$0xff]  }
 0x9fd   :  { %v5951_v28 = vpop.f32.mrb[52].mxu1  ;;  %v21092_v63 = vpop.f32.mrb[24].mxu0 }
 0x9fe   :  { %6687 = vmatpush1.bf16.msra.mxu0 %v18231_v35  ;;  %v6050_v52 = vpack.c.bf16 %v5951_v28, %v5951_v28  ;;  %v16771_v53 = vpop.f32.mrb[53].mxu1  ;;  %v16761_v50 = vpop.f32.mrb[25].mxu0  ;;  %v6049_v51 = vpack.c.bf16 %v21092_v63, %v21092_v63  ;;  %v18285_v35 = vld [vmem:[%s22775_s26 + $0x240] ss:$8 sps:$4 sm:$0xff]   ;;  %v18293_v28 = vld [vmem:[%s22775_s26 + $0x264] ss:$8 sps:$4 sm:$0xff]  }
 0x9ff   :  { %6688 = vmatprep.subr.bf16.mxu0 %v18236_v36  ;;  %v5954_v23 = vpop.f32.mrb[54].mxu1  ;;  %v5909_v58 = vpop.f32.mrb[26].mxu0  ;;  %v18290_v36 = vld [vmem:[%s22775_s26 + $0x254] ss:$8 sps:$4 sm:$0xff]   ;;  %v18291_v63 = vld [vmem:[%s22775_s26 + $0x260] ss:$8 sps:$4 sm:$0xff]  }
 0xa00   :  { %v16772_v17 = vpop.f32.mrb[55].mxu1  ;;  %v16762_v48 = vpop.f32.mrb[27].mxu0  ;;  %6714 = vmatprep.mubr.bf16.mxu0 %v6050_v52  ;;  %v18299_v52 = vld [vmem:[%s22775_s26 + $0x284] ss:$8 sps:$4 sm:$0xff]   ;;  %v18297_v53 = vld [vmem:[%s22775_s26 + $0x280] ss:$8 sps:$4 sm:$0xff]  }
 0xa01   :  { %v18302_v50 = vld [vmem:[%s22775_s26 + $0x294] ss:$8 sps:$4 sm:$0xff]   ;;  %v18305_v23 = vld [vmem:[%s22775_s26 + $0x2a4] ss:$8 sps:$4 sm:$0xff]   ;;  %v18303_v58 = vld [vmem:[%s22775_s26 + $0x2a0] ss:$8 sps:$4 sm:$0xff]  }
 0xa02   :  { %6689 = vmatpush1.bf16.msra.mxu0 %v18234_v6  ;;  %v18294_v6 = vld [vmem:[%s22775_s26 + $0x270] ss:$8 sps:$4 sm:$0xff]   ;;  %v18308_v17 = vld [vmem:[%s22775_s26 + $0x2b4] ss:$8 sps:$4 sm:$0xff]  }
 0xa03   :  { %6690 = vmatprep.subr.bf16.mxu0 %v18239_v45  ;;  %v18300_v45 = vld [vmem:[%s22775_s26 + $0x290] ss:$8 sps:$4 sm:$0xff]  }
 0xa04   :  { %v18306_v48 = vld [vmem:[%s22775_s26 + $0x2b0] ss:$8 sps:$4 sm:$0xff]  }
 0xa06   :  { %6691 = vmatpush1.bf16.msra.mxu0 %v18237_v43  ;;  %v18314_v43 = vld [vmem:[%s22775_s26 + $0x2d4] ss:$8 sps:$4 sm:$0xff]  }
 0xa07   :  { %6692 = vmatprep.subr.bf16.mxu0 %v18242_v40  ;;  %v18312_v40 = vld [vmem:[%s22775_s26 + $0x2d0] ss:$8 sps:$4 sm:$0xff]  }
 0xa09   :  { %v6041_v5 = vpop.f32.mrb[56].mxu1  ;;  %v21100_v34 = vpop.f32.mrb[28].mxu0 }
 0xa0a   :  { %6693 = vmatpush1.bf16.msra.mxu0 %v18240_v27  ;;  %v16791_v4 = vpop.f32.mrb[57].mxu1  ;;  %v16781_v57 = vpop.f32.mrb[29].mxu0  ;;  %v6052_v29 = vpack.c.bf16 %v6041_v5, %v6041_v5  ;;  %v18320_v27 = vld [vmem:[%s22775_s26 + $0x2f4] ss:$8 sps:$4 sm:$0xff]   ;;  %v6051_v26 = vpack.c.bf16 %v21100_v34, %v21100_v34 }
 0xa0b   :  { %6694 = vmatprep.subr.bf16.mxu0 %v18245_v13  ;;  %v6044_v41 = vpop.f32.mrb[58].mxu1  ;;  %v5999_v56 = vpop.f32.mrb[30].mxu0  ;;  %v18318_v13 = vld [vmem:[%s22775_s26 + $0x2f0] ss:$8 sps:$4 sm:$0xff]   ;;  %v18335_v4 = vld [vmem:[#allocation15 + $0x78] sm:$0xff]  }
 0xa0c   :  { %v16792_v39 = vpop.f32.mrb[59].mxu1  ;;  %v16782_v12 = vpop.f32.mrb[31].mxu0  ;;  %v18333_v5 = vld [vmem:[#allocation15 + $0x70] sm:$0xff]   ;;  %v18336_v57 = vld [vmem:[#allocation15 + $0x38] sm:$0xff]  }
 0xa0d   :  { %16259 = vmatprep.subr.bf16.mxu1 %v18333_v5  ;;  %v6149_v56 = vld [vmem:[#allocation13] sm:$0x3]  ;;  %v18378_v5 = vld [vmem:[%s22777_s2 + $0x214] ss:$24 sps:$4 sm:$0xff]  }
 0xa0e   :  { %6695 = vmatpush1.bf16.msra.mxu0 %v18243_v9  ;;  %v18334_v9 = vld [vmem:[#allocation15 + $0x30] sm:$0xff]  }
 0xa0f   :  { %6696 = vmatprep.subr.bf16.mxu0 %v18248_v10  ;;  %16260 = vmatpush3.bf16.msra.mxu1 %v18334_v9  ;;  %v6151_v10 = vlaneseq  ;;  %v18376_v9 = vld [vmem:[%s22777_s2 + $0x210] ss:$24 sps:$4 sm:$0xff]  }
 0xa10   :  { %16261 = vmatprep.subr.bf16.mxu1 %v18335_v4  ;;  %v18381_v4 = vld [vmem:[%s22777_s2 + $0x244] ss:$24 sps:$4 sm:$0xff]  }
 0xa11   :  { %v21160_v41 = vshrl.u32 %v6151_v10, 7  ;;  %v18384_v10 = vld [vmem:[%s22777_s2 + $0x274] ss:$24 sps:$4 sm:$0xff]  }
 0xa12   :  { %6697 = vmatpush1.bf16.msra.mxu0 %v18246_v37 }
 0xa13   :  { %6698 = vmatprep.subr.bf16.mxu0 %v18251_v7  ;;  %16262 = vmatpush3.bf16.msra.mxu1 %v18336_v57  ;;  %v21163_v34 = vsub.s32 0, %v21160_v41  ;;  %v21166_v39 = vsub.s32 1, %v21160_v41  ;;  %v18379_v57 = vld [vmem:[%s22777_s2 + $0x240] ss:$24 sps:$4 sm:$0xff]  }
 0xa15   :  { %v6154_v12 = vrot.slane %v6149_v56, %v21163_v34  ;;  %v6158_v37 = vrot.slane %v6149_v56, %v21166_v39  ;;  %v18382_v56 = vld [vmem:[%s22777_s2 + $0x270] ss:$24 sps:$4 sm:$0xff]  }
 0xa16   :  { %6699 = vmatpush1.bf16.msra.mxu0 %v18249_v33 }
 0xa17   :  { %6700 = vmatprep.subr.bf16.mxu0 %v18254_v38 }
 0xa1a   :  { %6701 = vmatpush1.bf16.msra.mxu0 %v18252_v32 }
 0xa1b   :  { %6702 = vmatprep.subr.bf16.mxu0 %v18257_v46 }
 0xa1e   :  { %6703 = vmatpush1.bf16.msra.mxu0 %v18255_v3 }
 0xa1f   :  { %6704 = vmatprep.subr.bf16.mxu0 %v18260_v31 }
 0xa22   :  { %6705 = vmatpush1.bf16.msra.mxu0 %v18258_v47 }
 0xa23   :  { %6706 = vmatprep.subr.bf16.mxu0 %v18263_v55 }
 0xa26   :  { %6707 = vmatpush1.bf16.msra.mxu0 %v18261_v18 }
 0xa27   :  { %6708 = vmatprep.subr.bf16.mxu0 %v18266_v19  ;;  %v18337_v19 = vld [vmem:[%s22776_s0] ss:$8 sps:$4 sm:$0xff]  }
 0xa2a   :  { %6709 = vmatpush1.bf16.msra.mxu0 %v18264_v24  ;;  %v18339_v24 = vld [vmem:[%s22776_s0 + $0x4] ss:$8 sps:$4 sm:$0xff]  }
 0xa2b   :  { %6710 = vmatprep.subr.bf16.mxu0 %v18269_v0  ;;  %7003 = vmatprep.subr.bf16.mxu1 %v18339_v24 }
 0xa2e   :  { %6711 = vmatpush1.bf16.msra.mxu0 %v18267_v14  ;;  %v14776_v14 = vld [vmem:[#allocation16] ss:$0 sm:$0xff] }
 0xa2f   :  { %6712 = vmatprep.subr.bf16.mxu0 %v18272_v25 }
 0xa32   :  { %6713 = vmatpush1.bf16.msra.mxu0 %v18270_v42 }
 0xa33   :  { %6723 = vmatprep.subr.bf16.mxu0 %v18275_v54 }
 0xa35   :  { %6715 = vmatmul.mubr.bf16.vlgmr.msra.gmra.mrb[32].mxu0 %v6049_v51 }
 0xa36   :  { %6724 = vmatpush1.bf16.msra.mxu0 %v18273_v60  ;;  %6755 = vmatprep.mubr.bf16.mxu0 %v6052_v29 }
 0xa37   :  { %6725 = vmatprep.subr.bf16.mxu0 %v18278_v62 }
 0xa3a   :  { %6726 = vmatpush1.bf16.msra.mxu0 %v18276_v59  ;;  %v18340_v59 = vld [vmem:[%s22776_s0 + $0x10] ss:$8 sps:$4 sm:$0xff]  }
 0xa3b   :  { %6727 = vmatprep.subr.bf16.mxu0 %v18281_v11  ;;  %v18342_v11 = vld [vmem:[%s22776_s0 + $0x14] ss:$8 sps:$4 sm:$0xff]  }
 0xa3e   :  { %6728 = vmatpush1.bf16.msra.mxu0 %v18279_v20 }
 0xa3f   :  { %6729 = vmatprep.subr.bf16.mxu0 %v18284_v16  ;;  %v18345_v16 = vld [vmem:[%s22777_s2 + $0x4] ss:$24 sps:$4 sm:$0xff]  }
 0xa42   :  { %6730 = vmatpush1.bf16.msra.mxu0 %v18282_v30  ;;  %v6943_v30 = vld [vmem:[%s22778_s14] sm:$0xff] }
 0xa43   :  { %6731 = vmatprep.subr.bf16.mxu0 %v18287_v1 }
 0xa46   :  { %6732 = vmatpush1.bf16.msra.mxu0 %v18285_v35 }
 0xa47   :  { %6733 = vmatprep.subr.bf16.mxu0 %v18290_v36 }
 0xa4a   :  { %6734 = vmatpush1.bf16.msra.mxu0 %v18288_v44  ;;  %v18343_v44 = vld [vmem:[%s22777_s2] ss:$24 sps:$4 sm:$0xff]  }
 0xa4b   :  { %6735 = vmatprep.subr.bf16.mxu0 %v18293_v28 }
 0xa4e   :  { %6736 = vmatpush1.bf16.msra.mxu0 %v18291_v63  ;;  %v18348_v63 = vld [vmem:[%s22777_s2 + $0x34] ss:$24 sps:$4 sm:$0xff]  }
 0xa4f   :  { %6737 = vmatprep.subr.bf16.mxu0 %v18296_v8  ;;  %v18346_v8 = vld [vmem:[%s22777_s2 + $0x30] ss:$24 sps:$4 sm:$0xff]  }
 0xa52   :  { %6738 = vmatpush1.bf16.msra.mxu0 %v18294_v6  ;;  %v18351_v6 = vld [vmem:[%s22777_s2 + $0x64] ss:$24 sps:$4 sm:$0xff]  }
 0xa53   :  { %6739 = vmatprep.subr.bf16.mxu0 %v18299_v52  ;;  %v18349_v52 = vld [vmem:[%s22777_s2 + $0x60] ss:$24 sps:$4 sm:$0xff]  }
 0xa56   :  { %6740 = vmatpush1.bf16.msra.mxu0 %v18297_v53  ;;  %v18354_v53 = vld [vmem:[%s22777_s2 + $0x94] ss:$24 sps:$4 sm:$0xff]  }
 0xa57   :  { %6741 = vmatprep.subr.bf16.mxu0 %v18302_v50  ;;  %v18352_v50 = vld [vmem:[%s22777_s2 + $0x90] ss:$24 sps:$4 sm:$0xff]  }
 0xa5a   :  { %6742 = vmatpush1.bf16.msra.mxu0 %v18300_v45  ;;  %v18357_v45 = vld [vmem:[%s22777_s2 + $0xc4] ss:$24 sps:$4 sm:$0xff]  }
 0xa5b   :  { %6743 = vmatprep.subr.bf16.mxu0 %v18305_v23  ;;  %v18355_v23 = vld [vmem:[%s22777_s2 + $0xc0] ss:$24 sps:$4 sm:$0xff]  }
 0xa5e   :  { %6744 = vmatpush1.bf16.msra.mxu0 %v18303_v58  ;;  %v18360_v58 = vld [vmem:[%s22777_s2 + $0xf4] ss:$24 sps:$4 sm:$0xff]  }
 0xa5f   :  { %6745 = vmatprep.subr.bf16.mxu0 %v18308_v17  ;;  %v18358_v17 = vld [vmem:[%s22777_s2 + $0xf0] ss:$24 sps:$4 sm:$0xff]  }
 0xa62   :  { %6746 = vmatpush1.bf16.msra.mxu0 %v18306_v48  ;;  %v18363_v48 = vld [vmem:[%s22777_s2 + $0x124] ss:$24 sps:$4 sm:$0xff]  }
 0xa63   :  { %6747 = vmatprep.subr.bf16.mxu0 %v18311_v61  ;;  %v18361_v61 = vld [vmem:[%s22777_s2 + $0x120] ss:$24 sps:$4 sm:$0xff]  }
 0xa66   :  { %6748 = vmatpush1.bf16.msra.mxu0 %v18309_v22  ;;  %v18366_v22 = vld [vmem:[%s22777_s2 + $0x154] ss:$24 sps:$4 sm:$0xff]  }
 0xa67   :  { %6749 = vmatprep.subr.bf16.mxu0 %v18314_v43  ;;  %v18364_v43 = vld [vmem:[%s22777_s2 + $0x150] ss:$24 sps:$4 sm:$0xff]  }
 0xa6a   :  { %6750 = vmatpush1.bf16.msra.mxu0 %v18312_v40  ;;  %v18369_v40 = vld [vmem:[%s22777_s2 + $0x184] ss:$24 sps:$4 sm:$0xff]  }
 0xa6b   :  { %6751 = vmatprep.subr.bf16.mxu0 %v18317_v21  ;;  %v18367_v21 = vld [vmem:[%s22777_s2 + $0x180] ss:$24 sps:$4 sm:$0xff]  }
 0xa6e   :  { %6752 = vmatpush1.bf16.msra.mxu0 %v18315_v49  ;;  %v18372_v49 = vld [vmem:[%s22777_s2 + $0x1b4] ss:$24 sps:$4 sm:$0xff]  }
 0xa6f   :  { %6753 = vmatprep.subr.bf16.mxu0 %v18320_v27  ;;  %v18370_v27 = vld [vmem:[%s22777_s2 + $0x1b0] ss:$24 sps:$4 sm:$0xff]  }
 0xa72   :  { %6754 = vmatpush1.bf16.msra.mxu0 %v18318_v13  ;;  %v18375_v13 = vld [vmem:[%s22777_s2 + $0x1e4] ss:$24 sps:$4 sm:$0xff]  }
 0xa73   :  { %16793 = vmatprep.subr.bf16.mxu0 %v19444_v15 }
 0xa75   :  { %6756 = vmatmul.mubr.bf16.vlgmr.msra.gmra.mrb[32].mxu0 %v6051_v26  ;;  %v18373_v26 = vld [vmem:[%s22777_s2 + $0x1e0] ss:$24 sps:$4 sm:$0xff]  }
 0xa76   :  { %16795 = vmatprep.mubr.msk.bf16.mxu0 %vm19445_vm2, %v19444_v15 }
 0xb48   :  { %v6757_v7 = vpop.f32.mrb[32].mxu0 }
 0xb49   :  { %v17273_v33 = vadd.f32 %v6757_v7, %v6154_v12  ;;  %v6759_v38 = vpop.f32.mrb[33].mxu0  ;;  %v18387_v12 = vld [vmem:[%s22777_s2 + $0x2a4] ss:$24 sps:$4 sm:$0xff]   ;;  %v18390_v7 = vld [vmem:[%s22777_s2 + $0x2d4] ss:$24 sps:$4 sm:$0xff]  }
 0xb4a   :  { %v17274_v32 = vadd.f32 %v6759_v38, %v6158_v37  ;;  %v6761_v46 = vpop.f32.mrb[34].mxu0  ;;  %v18385_v37 = vld [vmem:[%s22777_s2 + $0x2a0] ss:$24 sps:$4 sm:$0xff]   ;;  %v18393_v38 = vld [vmem:[%s22777_s2 + $0xc] ss:$24 sps:$4 sm:$0xff]  }
 0xb4b   :  { %v6764_v3 = vmax.f32 %v17273_v33, 0.0  ;;  %v6762_v31 = vpop.f32.mrb[35].mxu0  ;;  %v18388_v33 = vld [vmem:[%s22777_s2 + $0x2d0] ss:$24 sps:$4 sm:$0xff]  }
 0xb4c   :  { %v6765_v47 = vmax.f32 %v17274_v32, 0.0  ;;  %v6967_v31 = vld [vmem:[#allocation18] sm:$0x3] }
 0xb4d   :  { %v6766_v18 = vpack.c.bf16 %v6764_v3, %v6764_v3 }
 0xb4e   :  { %v6767_v55 = vpack.c.bf16 %v6765_v47, %v6765_v47  ;;  %v6972_v47 = vrot.slane %v6967_v31, %v21163_v34 }
 0xb50   :  { %6935 = vmatprep.mubr.bf16.mxu1 %v6767_v55  ;;  %v6976_v55 = vrot.slane %v6967_v31, %v21166_v39  ;;  %v18460_v31 = vld [vmem:[%s22777_s2 + $0x160] ss:$24 sps:$4 sm:$0xff]  }
 0xb51   :  { %6936 = vmatmul.mubr.bf16.vlgmr.msra.gmra.mrb[60].mxu1 %v6766_v18 }
 0xb52   :  { %7035 = vmatprep.mubr.bf16.mxu1 %v22753_v2  ;;  %7004 = vmatpush1.bf16.msra.mxu1 %v18337_v19 }
 0xb53   :  { %7005 = vmatprep.subr.bf16.mxu1 %v18342_v11  ;;  %v18399_v11 = vld [vmem:[%s22777_s2 + $0x6c] ss:$24 sps:$4 sm:$0xff]  }
 0xb56   :  { %7006 = vmatpush1.bf16.msra.mxu1 %v18340_v59  ;;  %v18394_v59 = vld [vmem:[%s22777_s2 + $0x38] ss:$24 sps:$4 sm:$0xff]  }
 0xb57   :  { %7656 = vmatprep.subr.bf16.mxu1 %v18345_v16  ;;  %v18402_v16 = vld [vmem:[%s22777_s2 + $0x9c] ss:$24 sps:$4 sm:$0xff]  }
 0xc24   :  { %v16263_v0 = vpop.f32.mrb[60].mxu1 }
 0xc25   :  { %v16264_v25 = vpop.f32.mrb[61].mxu1 }
 0xc26   :  { %v16265_v42 = vadd.f32 %v16264_v25, %v16263_v0  ;;  %v16266_v54 = vpop.f32.mrb[62].mxu1 }
 0xc27   :  { %v16267_v51 = vpop.f32.mrb[63].mxu1 }
 0xc28   :  { %v21173_v60 = vadd.f32 %v16265_v42, %v14776_v14 }
 0xc2a   :  { %v6944_v29 = vmul.f32 0.5, %v21173_v60 }
 0xc2c   :  { %v6945_v62 = vmul.f32 1.442695, %v6944_v29 }
 0xc2e   :  { %18999 = vpow2.f32 %v6945_v62  ;;  %v18396_v62 = vld [vmem:[%s22777_s2 + $0x3c] ss:$24 sps:$4 sm:$0xff]  }
 0xc38   :  { %v19000_v20 = vpop.eup %18999 }
 0xc39   :  { %6948 = vrot.lane.b32.xlu0 %v19000_v20, %s19446_s7  ;;  %v18397_v20 = vld [vmem:[%s22777_s2 + $0x68] ss:$24 sps:$4 sm:$0xff]  }
 0xcab   :  { %v6949_v1 = vpop.permute.xlu0 %6948 }
 0xcac   :  { %v6951_v35 = vmul.f32 %v6949_v1, %v6943_v30  ;;  %v18400_v30 = vld [vmem:[%s22777_s2 + $0x98] ss:$24 sps:$4 sm:$0xff]   ;;  %v18405_v1 = vld [vmem:[%s22777_s2 + $0xcc] ss:$24 sps:$4 sm:$0xff]  }
 0xcae   :  { %v6952_v36 = vadd.f32 %v6951_v35, %v21173_v60  ;;  %v18403_v35 = vld [vmem:[%s22777_s2 + $0xc8] ss:$24 sps:$4 sm:$0xff]  }
 0xcb0   :  { %6954 = vrot.lane.b32.xlu0 %v6952_v36, %s19425_s28  ;;  %v6962_v28 = vpack.c.bf16 %v6952_v36, %v6952_v36  ;;  %v18408_v36 = vld [vmem:[%s22777_s2 + $0xfc] ss:$24 sps:$4 sm:$0xff]   ;;  %s22780_s28 = sld [smem:[#allocation46_spill]] }
 0xcb2   :  { %14797 = vmatmul.mubr.msk.bf16.vlgmr.msra.gmra.mrb[64].mxu1 %vm6999_vm5, %v6962_v28  ;;  %v18411_v28 = vld [vmem:[%s22777_s2 + $0x12c] ss:$24 sps:$4 sm:$0xff]  }
 0xcb3   :  { %7657 = vmatpush1.bf16.msra.mxu1 %v18343_v44  ;;  %v18406_v44 = vld [vmem:[%s22777_s2 + $0xf8] ss:$24 sps:$4 sm:$0xff]  }
 0xcb4   :  { %7658 = vmatprep.subr.bf16.mxu1 %v18348_v63  ;;  %v18409_v63 = vld [vmem:[%s22777_s2 + $0x128] ss:$24 sps:$4 sm:$0xff]  }
 0xcb7   :  { %7659 = vmatpush1.bf16.msra.mxu1 %v18346_v8  ;;  %v18414_v8 = vld [vmem:[%s22777_s2 + $0x15c] ss:$24 sps:$4 sm:$0xff]  }
 0xcb8   :  { %7660 = vmatprep.subr.bf16.mxu1 %v18351_v6  ;;  %v18412_v6 = vld [vmem:[%s22777_s2 + $0x158] ss:$24 sps:$4 sm:$0xff]  }
 0xcbb   :  { %7661 = vmatpush1.bf16.msra.mxu1 %v18349_v52  ;;  %v18417_v52 = vld [vmem:[%s22777_s2 + $0x18c] ss:$24 sps:$4 sm:$0xff]  }
 0xcbc   :  { %7662 = vmatprep.subr.bf16.mxu1 %v18354_v53  ;;  %v18415_v53 = vld [vmem:[%s22777_s2 + $0x188] ss:$24 sps:$4 sm:$0xff]  }
 0xcbf   :  { %7663 = vmatpush1.bf16.msra.mxu1 %v18352_v50  ;;  %v18420_v50 = vld [vmem:[%s22777_s2 + $0x1bc] ss:$24 sps:$4 sm:$0xff]  }
 0xcc0   :  { %7664 = vmatprep.subr.bf16.mxu1 %v18357_v45  ;;  %v18418_v45 = vld [vmem:[%s22777_s2 + $0x1b8] ss:$24 sps:$4 sm:$0xff]  }
 0xcc3   :  { %7665 = vmatpush1.bf16.msra.mxu1 %v18355_v23  ;;  %v18423_v23 = vld [vmem:[%s22777_s2 + $0x1ec] ss:$24 sps:$4 sm:$0xff]  }
 0xcc4   :  { %7666 = vmatprep.subr.bf16.mxu1 %v18360_v58  ;;  %v18421_v58 = vld [vmem:[%s22777_s2 + $0x1e8] ss:$24 sps:$4 sm:$0xff]  }
 0xcc7   :  { %7667 = vmatpush1.bf16.msra.mxu1 %v18358_v17  ;;  %v18426_v17 = vld [vmem:[%s22777_s2 + $0x21c] ss:$24 sps:$4 sm:$0xff]  }
 0xcc8   :  { %7668 = vmatprep.subr.bf16.mxu1 %v18363_v48  ;;  %v18424_v48 = vld [vmem:[%s22777_s2 + $0x218] ss:$24 sps:$4 sm:$0xff]  }
 0xccb   :  { %7669 = vmatpush1.bf16.msra.mxu1 %v18361_v61  ;;  %v18429_v61 = vld [vmem:[%s22777_s2 + $0x24c] ss:$24 sps:$4 sm:$0xff]  }
 0xccc   :  { %7670 = vmatprep.subr.bf16.mxu1 %v18366_v22  ;;  %v18427_v22 = vld [vmem:[%s22777_s2 + $0x248] ss:$24 sps:$4 sm:$0xff]  }
 0xccf   :  { %7671 = vmatpush1.bf16.msra.mxu1 %v18364_v43  ;;  %v18432_v43 = vld [vmem:[%s22777_s2 + $0x27c] ss:$24 sps:$4 sm:$0xff]  }
 0xcd0   :  { %7672 = vmatprep.subr.bf16.mxu1 %v18369_v40  ;;  %v18430_v40 = vld [vmem:[%s22777_s2 + $0x278] ss:$24 sps:$4 sm:$0xff]  }
 0xcd3   :  { %7673 = vmatpush1.bf16.msra.mxu1 %v18367_v21  ;;  %v18435_v21 = vld [vmem:[%s22777_s2 + $0x2ac] ss:$24 sps:$4 sm:$0xff]  }
 0xcd4   :  { %7674 = vmatprep.subr.bf16.mxu1 %v18372_v49  ;;  %v18433_v49 = vld [vmem:[%s22777_s2 + $0x2a8] ss:$24 sps:$4 sm:$0xff]  }
 0xcd7   :  { %7675 = vmatpush1.bf16.msra.mxu1 %v18370_v27  ;;  %v18438_v27 = vld [vmem:[%s22777_s2 + $0x2dc] ss:$24 sps:$4 sm:$0xff]  }
 0xcd8   :  { %7676 = vmatprep.subr.bf16.mxu1 %v18375_v13  ;;  %v18436_v13 = vld [vmem:[%s22777_s2 + $0x2d8] ss:$24 sps:$4 sm:$0xff]  }
 0xcdb   :  { %7677 = vmatpush1.bf16.msra.mxu1 %v18373_v26  ;;  %v18441_v26 = vld [vmem:[%s22777_s2 + $0x14] ss:$24 sps:$4 sm:$0xff]  }
 0xcdc   :  { %7678 = vmatprep.subr.bf16.mxu1 %v18378_v5  ;;  %v18439_v5 = vld [vmem:[%s22777_s2 + $0x10] ss:$24 sps:$4 sm:$0xff]  }
 0xcdf   :  { %7679 = vmatpush1.bf16.msra.mxu1 %v18376_v9  ;;  %v18444_v9 = vld [vmem:[%s22777_s2 + $0x44] ss:$24 sps:$4 sm:$0xff]  }
 0xce0   :  { %7680 = vmatprep.subr.bf16.mxu1 %v18381_v4  ;;  %v18442_v4 = vld [vmem:[%s22777_s2 + $0x40] ss:$24 sps:$4 sm:$0xff]  }
 0xce3   :  { %7681 = vmatpush1.bf16.msra.mxu1 %v18379_v57  ;;  %v18447_v57 = vld [vmem:[%s22777_s2 + $0x74] ss:$24 sps:$4 sm:$0xff]  }
 0xce4   :  { %7682 = vmatprep.subr.bf16.mxu1 %v18384_v10  ;;  %v18445_v10 = vld [vmem:[%s22777_s2 + $0x70] ss:$24 sps:$4 sm:$0xff]  }
 0xce7   :  { %7683 = vmatpush1.bf16.msra.mxu1 %v18382_v56  ;;  %v18450_v56 = vld [vmem:[%s22777_s2 + $0xa4] ss:$24 sps:$4 sm:$0xff]  }
 0xce8   :  { %7684 = vmatprep.subr.bf16.mxu1 %v18387_v12  ;;  %v18448_v12 = vld [vmem:[%s22777_s2 + $0xa0] ss:$24 sps:$4 sm:$0xff]  }
 0xceb   :  { %7685 = vmatpush1.bf16.msra.mxu1 %v18385_v37  ;;  %v18453_v37 = vld [vmem:[%s22777_s2 + $0xd4] ss:$24 sps:$4 sm:$0xff]  }
 0xcec   :  { %7686 = vmatprep.subr.bf16.mxu1 %v18390_v7  ;;  %v18451_v7 = vld [vmem:[%s22777_s2 + $0xd0] ss:$24 sps:$4 sm:$0xff]  }
 0xcef   :  { %7687 = vmatpush1.bf16.msra.mxu1 %v18388_v33  ;;  %v18456_v33 = vld [vmem:[%s22777_s2 + $0x104] ss:$24 sps:$4 sm:$0xff]  }
 0xcf0   :  { %7697 = vmatprep.subr.bf16.mxu1 %v18393_v38  ;;  %v18454_v38 = vld [vmem:[%s22777_s2 + $0x100] ss:$24 sps:$4 sm:$0xff]  }
 0xd22   :  { %v6955_v32 = vpop.permute.xlu0 %6954 }
 0xd23   :  { %v6958_v46 = vsel %vm6957_vm6, %v21173_v60, %v6955_v32  ;;  %v18391_v60 = vld [vmem:[%s22777_s2 + $0x8] ss:$24 sps:$4 sm:$0xff]   ;;  %v18459_v32 = vld [vmem:[%s22777_s2 + $0x134] ss:$24 sps:$4 sm:$0xff]  }
 0xd24   :  { %v6960_v3 = vsel %vm6959_vm7, %v6958_v46, 0.0  ;;  %v18457_v46 = vld [vmem:[%s22777_s2 + $0x130] ss:$24 sps:$4 sm:$0xff]  }
 0xd25   :  { %6961 = vst [vmem:[%s19610_s5] sm:$0xff] %v6960_v3  ;;  %v18462_v3 = vld [vmem:[%s22777_s2 + $0x164] ss:$24 sps:$4 sm:$0xff]   ;;  %s22779_s5 = sld [smem:[#allocation45_spill]] }
 0xd85   :  { %v7037_v18 = vpop.f32.mrb[64].mxu1 }
 0xd86   :  { %v7038_v19 = vadd.f32 %v7037_v18, %v6972_v47  ;;  %v7039_v24 = vpop.f32.mrb[65].mxu1  ;;  %v18465_v47 = vld [vmem:[%s22777_s2 + $0x194] ss:$24 sps:$4 sm:$0xff]   ;;  %v18468_v18 = vld [vmem:[%s22777_s2 + $0x1c4] ss:$24 sps:$4 sm:$0xff]  }
 0xd87   :  { %v7040_v0 = vadd.f32 %v7039_v24, %v6976_v55  ;;  %v7041_v14 = vpop.f32.mrb[66].mxu1  ;;  %v18463_v55 = vld [vmem:[%s22777_s2 + $0x190] ss:$24 sps:$4 sm:$0xff]   ;;  %v18471_v24 = vld [vmem:[%s22777_s2 + $0x1f4] ss:$24 sps:$4 sm:$0xff]  }
 0xd88   :  { %v7044_v25 = vmax.f32 %v7038_v19, 0.0  ;;  %v7042_v42 = vpop.f32.mrb[67].mxu1  ;;  %v18466_v19 = vld [vmem:[%s22777_s2 + $0x1c0] ss:$24 sps:$4 sm:$0xff]   ;;  %v18474_v14 = vld [vmem:[%s22777_s2 + $0x224] ss:$24 sps:$4 sm:$0xff]  }
 0xd89   :  { %v7045_v54 = vmax.f32 %v7040_v0, 0.0  ;;  %v18469_v0 = vld [vmem:[%s22777_s2 + $0x1f0] ss:$24 sps:$4 sm:$0xff]   ;;  %v18477_v42 = vld [vmem:[%s22777_s2 + $0x254] ss:$24 sps:$4 sm:$0xff]  }
 0xd8a   :  { %v21221_v29 = vpack.c.bf16 %v7044_v25, %v7044_v25  ;;  %v18472_v25 = vld [vmem:[%s22777_s2 + $0x220] ss:$24 sps:$4 sm:$0xff]  }
 0xd8b   :  { %v21218_v51 = vpack.c.bf16 %v7045_v54, %v7045_v54  ;;  %v18475_v54 = vld [vmem:[%s22777_s2 + $0x250] ss:$24 sps:$4 sm:$0xff]  }
 0xd8d   :  { %7688 = vmatprep.mubr.bf16.mxu1 %v21218_v51 }
 0xd8e   :  { %7689 = vmatmul.mubr.bf16.vlgmr.msra.gmra.mrb[68].mxu1 %v21221_v29 }
 0xd8f   :  { %7698 = vmatpush1.bf16.msra.mxu1 %v18391_v60  ;;  %7729 = vmatprep.mubr.bf16.mxu1 %v21218_v51  ;;  %v18478_v60 = vld [vmem:[%s22777_s2 + $0x280] ss:$24 sps:$4 sm:$0xff]  }
 0xd90   :  { %7699 = vmatprep.subr.bf16.mxu1 %v18396_v62  ;;  %v18483_v62 = vld [vmem:[%s22777_s2 + $0x2b4] ss:$24 sps:$4 sm:$0xff]  }
 0xd93   :  { %7700 = vmatpush1.bf16.msra.mxu1 %v18394_v59  ;;  %v18481_v59 = vld [vmem:[%s22777_s2 + $0x2b0] ss:$24 sps:$4 sm:$0xff]  }
 0xd94   :  { %7701 = vmatprep.subr.bf16.mxu1 %v18399_v11  ;;  %v18486_v11 = vld [vmem:[%s22777_s2 + $0x2e4] ss:$24 sps:$4 sm:$0xff]  }
 0xd97   :  { %7702 = vmatpush1.bf16.msra.mxu1 %v18397_v20  ;;  %v18484_v20 = vld [vmem:[%s22777_s2 + $0x2e0] ss:$24 sps:$4 sm:$0xff]  }
 0xd98   :  { %7703 = vmatprep.subr.bf16.mxu1 %v18402_v16  ;;  %v21294_v16 = vld [vmem:[#allocation19] sm:$0x3f] }
 0xd9b   :  { %7704 = vmatpush1.bf16.msra.mxu1 %v18400_v30  ;;  %v7149_v30 = vrot.slane %v21294_v16, %v21163_v34 }
 0xd9c   :  { %7705 = vmatprep.subr.bf16.mxu1 %v18405_v1  ;;  %v7153_v1 = vrot.slane %v21294_v16, %v21166_v39 }
 0xd9f   :  { %7706 = vmatpush1.bf16.msra.mxu1 %v18403_v35 }
 0xda0   :  { %7707 = vmatprep.subr.bf16.mxu1 %v18408_v36 }
 0xda3   :  { %7708 = vmatpush1.bf16.msra.mxu1 %v18406_v44 }
 0xda4   :  { %7709 = vmatprep.subr.bf16.mxu1 %v18411_v28 }
 0xda7   :  { %7710 = vmatpush1.bf16.msra.mxu1 %v18409_v63 }
 0xda8   :  { %7711 = vmatprep.subr.bf16.mxu1 %v18414_v8 }
 0xdab   :  { %7712 = vmatpush1.bf16.msra.mxu1 %v18412_v6 }
 0xdac   :  { %7713 = vmatprep.subr.bf16.mxu1 %v18417_v52 }
 0xdaf   :  { %7714 = vmatpush1.bf16.msra.mxu1 %v18415_v53 }
 0xdb0   :  { %7715 = vmatprep.subr.bf16.mxu1 %v18420_v50 }
 0xdb3   :  { %7716 = vmatpush1.bf16.msra.mxu1 %v18418_v45  ;;  %v18487_v45 = vld [vmem:[%s22779_s5 + $0x18] sm:$0xff]  }
 0xdb4   :  { %7717 = vmatprep.subr.bf16.mxu1 %v18423_v23 }
 0xdb7   :  { %7718 = vmatpush1.bf16.msra.mxu1 %v18421_v58  ;;  %v18488_v58 = vld [vmem:[%s22779_s5 + $0x20] sm:$0xff]  }
 0xdb8   :  { %7719 = vmatprep.subr.bf16.mxu1 %v18426_v17  ;;  %v18489_v17 = vld [vmem:[%s22779_s5 + $0x28] sm:$0xff]  }
 0xdbb   :  { %7720 = vmatpush1.bf16.msra.mxu1 %v18424_v48  ;;  %v18490_v48 = vld [vmem:[%s22779_s5] sm:$0xff]  }
 0xdbc   :  { %7721 = vmatprep.subr.bf16.mxu1 %v18429_v61  ;;  %v18491_v61 = vld [vmem:[%s22779_s5 + $0x8] sm:$0xff]  }
 0xdbf   :  { %7722 = vmatpush1.bf16.msra.mxu1 %v18427_v22  ;;  %v18492_v22 = vld [vmem:[%s22779_s5 + $0x10] sm:$0xff]  }
 0xdc0   :  { %7723 = vmatprep.subr.bf16.mxu1 %v18432_v43  ;;  %v7156_v43 = vsub.s32 2, %v21160_v41 }
 0xdc3   :  { %7724 = vmatpush1.bf16.msra.mxu1 %v18430_v40  ;;  %v7160_v40 = vsub.s32 3, %v21160_v41 }
 0xdc4   :  { %7725 = vmatprep.subr.bf16.mxu1 %v18435_v21  ;;  %v7157_v21 = vrot.slane %v21294_v16, %v7156_v43  ;;  %v18506_v43 = vld [vmem:[%s22780_s28 + $0x8] sm:$0xff]  }
 0xdc7   :  { %7726 = vmatpush1.bf16.msra.mxu1 %v18433_v49  ;;  %v7161_v49 = vrot.slane %v21294_v16, %v7160_v40  ;;  %v18507_v40 = vld [vmem:[%s22780_s28 + $0x10] sm:$0xff]  }
 0xdc8   :  { %7727 = vmatprep.subr.bf16.mxu1 %v18438_v27 }
 0xdcb   :  { %7728 = vmatpush1.bf16.msra.mxu1 %v18436_v13 }
 0xdcc   :  { %7738 = vmatprep.subr.bf16.mxu1 %v18441_v26 }
 0xdce   :  { %7730 = vmatmul.mubr.bf16.vlgmr.msra.gmra.mrb[72].mxu1 %v21221_v29 }
 0xdcf   :  { %7739 = vmatpush1.bf16.msra.mxu1 %v18439_v5  ;;  %7770 = vmatprep.mubr.bf16.mxu1 %v21218_v51  ;;  %v18480_v51 = vld [vmem:[%s22777_s2 + $0x284] ss:$24 sps:$4 sm:$0xff]  }
 0xdd0   :  { %7740 = vmatprep.subr.bf16.mxu1 %v18444_v9 }
 0xdd3   :  { %7741 = vmatpush1.bf16.msra.mxu1 %v18442_v4 }
 0xdd4   :  { %7742 = vmatprep.subr.bf16.mxu1 %v18447_v57 }
 0xdd7   :  { %7743 = vmatpush1.bf16.msra.mxu1 %v18445_v10 }
 0xdd8   :  { %7744 = vmatprep.subr.bf16.mxu1 %v18450_v56 }
 0xddb   :  { %7745 = vmatpush1.bf16.msra.mxu1 %v18448_v12 }
 0xddc   :  { %7746 = vmatprep.subr.bf16.mxu1 %v18453_v37 }
 0xddf   :  { %7747 = vmatpush1.bf16.msra.mxu1 %v18451_v7  ;;  %v18493_v7 = vld [vmem:[%s22779_s5 + $0x30] sm:$0xff]  }
 0xde0   :  { %7748 = vmatprep.subr.bf16.mxu1 %v18456_v33 }
 0xde3   :  { %7749 = vmatpush1.bf16.msra.mxu1 %v18454_v38  ;;  %v18494_v38 = vld [vmem:[%s22779_s5 + $0x38] sm:$0xff]  }
 0xde4   :  { %7750 = vmatprep.subr.bf16.mxu1 %v18459_v32  ;;  %v18495_v32 = vld [vmem:[%s22779_s5 + $0x40] sm:$0xff]  }
 0xde7   :  { %7751 = vmatpush1.bf16.msra.mxu1 %v18457_v46  ;;  %v18496_v46 = vld [vmem:[%s22779_s5 + $0x48] sm:$0xff]  }
 0xde8   :  { %7752 = vmatprep.subr.bf16.mxu1 %v18462_v3  ;;  %v18497_v3 = vld [vmem:[%s22779_s5 + $0x50] sm:$0xff]  }
 0xdeb   :  { %7753 = vmatpush1.bf16.msra.mxu1 %v18460_v31  ;;  %v18498_v31 = vld [vmem:[%s22779_s5 + $0x58] sm:$0xff]  }
 0xdec   :  { %7754 = vmatprep.subr.bf16.mxu1 %v18465_v47  ;;  %v7164_v47 = vsub.s32 4, %v21160_v41 }
 0xdef   :  { %7755 = vmatpush1.bf16.msra.mxu1 %v18463_v55  ;;  %v7168_v55 = vsub.s32 5, %v21160_v41  ;;  %v18499_v41 = vld [vmem:[%s22779_s5 + $0x60] sm:$0xff]  }
 0xdf0   :  { %7756 = vmatprep.subr.bf16.mxu1 %v18468_v18  ;;  %v7165_v18 = vrot.slane %v21294_v16, %v7164_v47  ;;  %v18529_v47 = vld [vmem:[#allocation21 + $0x20] sm:$0xff]  }
 0xdf3   :  { %7757 = vmatpush1.bf16.msra.mxu1 %v18466_v19  ;;  %v7169_v19 = vrot.slane %v21294_v16, %v7168_v55  ;;  %v18500_v16 = vld [vmem:[%s22779_s5 + $0x68] sm:$0xff]  }
 0xdf4   :  { %7758 = vmatprep.subr.bf16.mxu1 %v18471_v24  ;;  %v18519_v55 = vld [vmem:[%s22780_s28 + $0x68] ss:$0 sps:$4 sm:$0xff]  }
 0xdf7   :  { %7759 = vmatpush1.bf16.msra.mxu1 %v18469_v0 }
 0xdf8   :  { %7760 = vmatprep.subr.bf16.mxu1 %v18474_v14 }
 0xdfb   :  { %7761 = vmatpush1.bf16.msra.mxu1 %v18472_v25 }
 0xdfc   :  { %7762 = vmatprep.subr.bf16.mxu1 %v18477_v42 }
 0xdff   :  { %7763 = vmatpush1.bf16.msra.mxu1 %v18475_v54 }
 0xe00   :  { %7764 = vmatprep.subr.bf16.mxu1 %v18480_v51 }
 0xe03   :  { %7765 = vmatpush1.bf16.msra.mxu1 %v18478_v60 }
 0xe04   :  { %7766 = vmatprep.subr.bf16.mxu1 %v18483_v62 }
 0xe07   :  { %7767 = vmatpush1.bf16.msra.mxu1 %v18481_v59 }
 0xe08   :  { %7768 = vmatprep.subr.bf16.mxu1 %v18486_v11 }
 0xe0b   :  { %7769 = vmatpush1.bf16.msra.mxu1 %v18484_v20 }
 0xe0c   :  { %16877 = vmatprep.subr.bf16.mxu1 %v19444_v15 }
 0xe0e   :  { %7771 = vmatmul.mubr.bf16.vlgmr.msra.gmra.mrb[76].mxu1 %v21221_v29 }
 0xe0f   :  { %16883 = vmatprep.mubr.msk.bf16.mxu1 %vm19445_vm2, %v19444_v15 }
 0xe61   :  { %v7690_v35 = vpop.f32.mrb[68].mxu1 }
 0xe62   :  { %v7691_v36 = vadd.f32 %v7690_v35, %v7149_v30  ;;  %v7692_v44 = vpop.f32.mrb[69].mxu1  ;;  %v18501_v30 = vld [vmem:[%s22779_s5 + $0x70] sm:$0xff]   ;;  %v18503_v35 = vld [vmem:[%s22779_s5 + $0x80] sm:$0xff]  }
 0xe63   :  { %v7693_v28 = vadd.f32 %v7692_v44, %v7153_v1  ;;  %v7694_v63 = vpop.f32.mrb[70].mxu1  ;;  %v18502_v1 = vld [vmem:[%s22779_s5 + $0x78] sm:$0xff]  }
 0xe64   :  { %v7695_v8 = vpop.f32.mrb[71].mxu1  ;;  %v7779_v29 = vmax.f32 %v7691_v36, 0.0  ;;  %v18504_v36 = vld [vmem:[%s22779_s5 + $0x88] sm:$0xff]  }
 0xe65   :  { %v7780_v6 = vmax.f32 %v7693_v28, 0.0 }
 0xe66   :  { %v7785_v53 = vpack.c.bf16 %v7779_v29, %v7779_v29 }
 0xe67   :  { %v7786_v52 = vpack.c.bf16 %v7780_v6, %v7780_v6 }
 0xe68   :  { %v7913_v23 = vsel %vm632_vm0, %v7785_v53, 0 }
 0xe69   :  { %v7829_v50 = vsel %vm632_vm0, %v7786_v52, 0 }
 0xe6a   :  { %16794 = vmatpush3.bf16.msra.mxu0 %v7829_v50 }
 0xe6b   :  { %16807 = vmatprep.subr.bf16.mxu0 %v19444_v15 }
 0xe6d   :  { %16796 = vmatmul.mubr.msk.bf16.vlgmr.msra.gmra.mrb[36].mxu0 %vm604_vm1, %v18487_v45 }
 0xe6e   :  { %16808 = vmatpush3.bf16.msra.mxu0 %v7913_v23  ;;  %16799 = vmatprep.mubr.msk.bf16.mxu0 %vm19445_vm2, %v19444_v15 }
 0xe6f   :  { %16821 = vmatprep.subr.bf16.mxu0 %v19444_v15 }
 0xe75   :  { %16800 = vmatmul.mubr.msk.bf16.gmra.mrb[40].mxu0 %vm604_vm1, %v18488_v58 }
 0xe76   :  { %16803 = vmatprep.mubr.msk.bf16.mxu0 %vm19445_vm2, %v19444_v15 }
 0xe7d   :  { %16804 = vmatmul.mubr.msk.bf16.gmra.mrb[44].mxu0 %vm604_vm1, %v18489_v17 }
 0xe7e   :  { %16809 = vmatprep.mubr.msk.bf16.mxu0 %vm19445_vm2, %v19444_v15 }
 0xe85   :  { %16810 = vmatmul.mubr.msk.bf16.vlgmr.msra.gmra.mrb[36].mxu0 %vm604_vm1, %v18490_v48 }
 0xe86   :  { %16813 = vmatprep.mubr.msk.bf16.mxu0 %vm19445_vm2, %v19444_v15 }
 0xe8d   :  { %16814 = vmatmul.mubr.msk.bf16.gmra.mrb[40].mxu0 %vm604_vm1, %v18491_v61 }
 0xe8e   :  { %16817 = vmatprep.mubr.msk.bf16.mxu0 %vm19445_vm2, %v19444_v15 }
 0xe95   :  { %16818 = vmatmul.mubr.msk.bf16.gmra.mrb[44].mxu0 %vm604_vm1, %v18492_v22  ;;  %v18505_v22 = vld [vmem:[%s22780_s28] sm:$0xff]  }
 0xe96   :  { %16823 = vmatprep.mubr.msk.bf16.mxu0 %vm19445_vm2, %v19444_v15 }
 0xea1   :  { %v7731_v27 = vpop.f32.mrb[72].mxu1 }
 0xea2   :  { %v7732_v13 = vadd.f32 %v7731_v27, %v7157_v21  ;;  %v7733_v26 = vpop.f32.mrb[73].mxu1  ;;  %v18508_v21 = vld [vmem:[%s22780_s28 + $0x18] sm:$0xff]   ;;  %v18510_v27 = vld [vmem:[%s22780_s28 + $0x24] sm:$0xff]  }
 0xea3   :  { %v7734_v5 = vadd.f32 %v7733_v26, %v7161_v49  ;;  %v7735_v9 = vpop.f32.mrb[74].mxu1  ;;  %v18509_v49 = vld [vmem:[%s22780_s28 + $0x20] ss:$0 sps:$4 sm:$0xff]   ;;  %v18512_v26 = vld [vmem:[%s22780_s28 + $0x34] sm:$0xff]  }
 0xea4   :  { %v7781_v4 = vmax.f32 %v7732_v13, 0.0  ;;  %v7736_v57 = vpop.f32.mrb[75].mxu1  ;;  %v18511_v13 = vld [vmem:[%s22780_s28 + $0x2c] sm:$0xff]   ;;  %v18514_v9 = vld [vmem:[%s22780_s28 + $0x44] ss:$0 sps:$4 sm:$0xff]  }
 0xea5   :  { %v7782_v10 = vmax.f32 %v7734_v5, 0.0  ;;  %v18513_v5 = vld [vmem:[%s22780_s28 + $0x3c] sm:$0xff]   ;;  %v18516_v57 = vld [vmem:[%s22780_s28 + $0x50] sm:$0xff]  }
 0xea6   :  { %v7787_v56 = vpack.c.bf16 %v7781_v4, %v7781_v4  ;;  %v18515_v4 = vld [vmem:[%s22780_s28 + $0x48] sm:$0xff]  }
 0xea7   :  { %v7788_v12 = vpack.c.bf16 %v7782_v10, %v7782_v10  ;;  %v18520_v10 = vld [vmem:[#allocation21 + $0x40] sm:$0xff]  }
 0xea8   :  { %v8004_v37 = vsel %vm632_vm0, %v7787_v56, 0  ;;  %v18521_v56 = vld [vmem:[#allocation21] sm:$0xff]  }
 0xea9   :  { %16822 = vmatpush3.bf16.msra.mxu0 %v8004_v37  ;;  %v8101_v33 = vsel %vm632_vm0, %v7788_v12, 0  ;;  %v18522_v12 = vld [vmem:[#allocation21 + $0x48] sm:$0xff]  }
 0xeaa   :  { %16835 = vmatprep.subr.bf16.mxu0 %v19444_v15  ;;  %v18523_v37 = vld [vmem:[#allocation21 + $0x8] sm:$0xff]  }
 0xeac   :  { %16824 = vmatmul.mubr.msk.bf16.vlgmr.msra.gmra.mrb[36].mxu0 %vm604_vm1, %v18493_v7  ;;  %v18517_v7 = vld [vmem:[%s22780_s28 + $0x58] sm:$0xff]  }
 0xead   :  { %16836 = vmatpush3.bf16.msra.mxu0 %v8101_v33  ;;  %16827 = vmatprep.mubr.msk.bf16.mxu0 %vm19445_vm2, %v19444_v15  ;;  %v18524_v33 = vld [vmem:[#allocation21 + $0x50] sm:$0xff]  }
 0xeae   :  { %16849 = vmatprep.subr.bf16.mxu0 %v19444_v15 }
 0xeb4   :  { %16828 = vmatmul.mubr.msk.bf16.gmra.mrb[40].mxu0 %vm604_vm1, %v18494_v38  ;;  %v18525_v38 = vld [vmem:[#allocation21 + $0x10] sm:$0xff]  }
 0xeb5   :  { %16831 = vmatprep.mubr.msk.bf16.mxu0 %vm19445_vm2, %v19444_v15 }
 0xebc   :  { %16832 = vmatmul.mubr.msk.bf16.gmra.mrb[44].mxu0 %vm604_vm1, %v18495_v32  ;;  %v18526_v32 = vld [vmem:[#allocation21 + $0x58] sm:$0xff]  }
 0xebd   :  { %16837 = vmatprep.mubr.msk.bf16.mxu0 %vm19445_vm2, %v19444_v15 }
 0xec4   :  { %16838 = vmatmul.mubr.msk.bf16.vlgmr.msra.gmra.mrb[36].mxu0 %vm604_vm1, %v18496_v46  ;;  %v18527_v46 = vld [vmem:[#allocation21 + $0x18] sm:$0xff]  }
 0xec5   :  { %16841 = vmatprep.mubr.msk.bf16.mxu0 %vm19445_vm2, %v19444_v15 }
 0xecc   :  { %16842 = vmatmul.mubr.msk.bf16.gmra.mrb[40].mxu0 %vm604_vm1, %v18497_v3  ;;  %v18518_v3 = vld [vmem:[%s22780_s28 + $0x60] sm:$0xff]  }
 0xecd   :  { %16845 = vmatprep.mubr.msk.bf16.mxu0 %vm19445_vm2, %v19444_v15 }
 0xed4   :  { %16846 = vmatmul.mubr.msk.bf16.gmra.mrb[44].mxu0 %vm604_vm1, %v18498_v31  ;;  %v18528_v31 = vld [vmem:[#allocation21 + $0x60] sm:$0xff]  }
 0xed5   :  { %16851 = vmatprep.mubr.msk.bf16.mxu0 %vm19445_vm2, %v19444_v15 }
 0xee1   :  { %v7772_v24 = vpop.f32.mrb[76].mxu1 }
 0xee2   :  { %v7773_v0 = vadd.f32 %v7772_v24, %v7165_v18  ;;  %v7774_v14 = vpop.f32.mrb[77].mxu1  ;;  %v18530_v18 = vld [vmem:[#allocation21 + $0x68] sm:$0xff]   ;;  %v18532_v24 = vld [vmem:[#allocation21 + $0x70] sm:$0xff]  }
 0xee3   :  { %v7775_v25 = vadd.f32 %v7774_v14, %v7169_v19  ;;  %v7776_v42 = vpop.f32.mrb[78].mxu1  ;;  %v18531_v19 = vld [vmem:[#allocation21 + $0x28] sm:$0xff]   ;;  %v18534_v14 = vld [vmem:[#allocation21 + $0x78] sm:$0xff]  }
 0xee4   :  { %v7783_v54 = vmax.f32 %v7773_v0, 0.0  ;;  %v7777_v51 = vpop.f32.mrb[79].mxu1  ;;  %v18533_v0 = vld [vmem:[#allocation21 + $0x30] sm:$0xff]   ;;  %v18536_v42 = vld [vmem:[#allocation21 + $0x80] sm:$0xff]  }
 0xee5   :  { %v7784_v60 = vmax.f32 %v7775_v25, 0.0  ;;  %v18535_v25 = vld [vmem:[#allocation21 + $0x38] sm:$0xff]   ;;  %v18538_v51 = vld [vmem:[#allocation21 + $0x90] sm:$0xff]  }
 0xee6   :  { %v7789_v62 = vpack.c.bf16 %v7783_v54, %v7783_v54  ;;  %v18537_v54 = vld [vmem:[#allocation21 + $0x88] sm:$0xff]  }
 0xee7   :  { %v7790_v59 = vpack.c.bf16 %v7784_v60, %v7784_v60  ;;  %v18539_v60 = vld [vmem:[#allocation21 + $0x98] sm:$0xff]  }
 0xee8   :  { %v8198_v11 = vsel %vm632_vm0, %v7789_v62, 0  ;;  %v18540_v62 = vld [vmem:[#allocation21 + $0xa0] sm:$0xff]  }
 0xee9   :  { %16850 = vmatpush3.bf16.msra.mxu0 %v8198_v11  ;;  %v8295_v20 = vsel %vm632_vm0, %v7790_v59, 0  ;;  %v18541_v59 = vld [vmem:[#allocation21 + $0xa8] sm:$0xff]   ;;  %v18542_v11 = vld [vmem:[#allocation21 + $0xb0] sm:$0xff]  }
 0xeea   :  { %16863 = vmatprep.subr.bf16.mxu0 %v19444_v15 }
 0xeec   :  { %16852 = vmatmul.mubr.msk.bf16.vlgmr.msra.gmra.mrb[36].mxu0 %vm604_vm1, %v18499_v41  ;;  %v18543_v41 = vld [vmem:[#allocation21 + $0xb8] sm:$0xff]  }
 0xeed   :  { %16864 = vmatpush3.bf16.msra.mxu0 %v8295_v20  ;;  %16855 = vmatprep.mubr.msk.bf16.mxu0 %vm19445_vm2, %v19444_v15 }
 0xeee   :  { %16317 = vmatprep.subr.bf16.mxu0 %v18520_v10 }
 0xef4   :  { %16856 = vmatmul.mubr.msk.bf16.gmra.mrb[40].mxu0 %vm604_vm1, %v18500_v16 }
 0xef5   :  { %16859 = vmatprep.mubr.msk.bf16.mxu0 %vm19445_vm2, %v19444_v15 }
 0xefc   :  { %16860 = vmatmul.mubr.msk.bf16.gmra.mrb[44].mxu0 %vm604_vm1, %v18501_v30 }
 0xefd   :  { %16865 = vmatprep.mubr.msk.bf16.mxu0 %vm19445_vm2, %v19444_v15 }
 0xf04   :  { %16866 = vmatmul.mubr.msk.bf16.vlgmr.msra.gmra.mrb[36].mxu0 %vm604_vm1, %v18502_v1 }
 0xf05   :  { %16869 = vmatprep.mubr.msk.bf16.mxu0 %vm19445_vm2, %v19444_v15  ;;  %16318 = vmatpush3.bf16.msra.mxu0 %v18521_v56 }
 0xf06   :  { %16319 = vmatprep.subr.bf16.mxu0 %v18522_v12 }
 0xf09   :  { %16320 = vmatpush3.bf16.msra.mxu0 %v18523_v37 }
 0xf0a   :  { %16321 = vmatprep.subr.bf16.mxu0 %v18524_v33 }
 0xf0c   :  { %16870 = vmatmul.mubr.msk.bf16.gmra.mrb[40].mxu0 %vm604_vm1, %v18503_v35 }
 0xf0d   :  { %16873 = vmatprep.mubr.msk.bf16.mxu0 %vm19445_vm2, %v19444_v15  ;;  %16322 = vmatpush3.bf16.msra.mxu0 %v18525_v38 }
 0xf0e   :  { %16323 = vmatprep.subr.bf16.mxu0 %v18526_v32 }
 0xf11   :  { %16324 = vmatpush3.bf16.msra.mxu0 %v18527_v46 }
 0xf12   :  { %16325 = vmatprep.subr.bf16.mxu0 %v18528_v31 }
 0xf14   :  { %16874 = vmatmul.mubr.msk.bf16.gmra.mrb[44].mxu0 %vm604_vm1, %v18504_v36 }
 0xf15   :  { %16326 = vmatpush3.bf16.msra.mxu0 %v18529_v47 }
 0xf16   :  { %16327 = vmatprep.subr.bf16.mxu0 %v18530_v18 }
 0xf19   :  { %16328 = vmatpush3.bf16.msra.mxu0 %v18531_v19 }
 0xf1a   :  { %16329 = vmatprep.subr.bf16.mxu0 %v18532_v24 }
 0xf1d   :  { %16330 = vmatpush3.bf16.msra.mxu0 %v18533_v0 }
 0xf1e   :  { %16331 = vmatprep.subr.bf16.mxu0 %v18534_v14 }
 0xf21   :  { %16332 = vmatpush3.bf16.msra.mxu0 %v18535_v25 }
 0xf22   :  { %16991 = vmatprep.subr.bf16.mxu0 %v19444_v15 }
 0xfd7   :  { %v8331_v44 = vpop.f32.mrb[36].mxu0 }
 0xfd8   :  { %v16867_v28 = vpop.f32.mrb[37].mxu0 }
 0xfd9   :  { %v8334_v63 = vpop.f32.mrb[38].mxu0 }
 0xfda   :  { %v8360_v8 = vpack.c.bf16 %v8334_v63, %v8331_v44  ;;  %v16868_v29 = vpop.f32.mrb[39].mxu0 }
 0xfdc   :  { %16878 = vmatpush3.bf16.msra.mxu1 %v8360_v8 }
 0xfdd   :  { %16879 = vmatprep.subr.bf16.mxu1 %v19444_v15 }
 0xfdf   :  { %v8339_v6 = vpop.f32.mrb[40].mxu0 }
 0xfe0   :  { %v16871_v52 = vpop.f32.mrb[41].mxu0 }
 0xfe1   :  { %v8342_v53 = vpop.f32.mrb[42].mxu0 }
 0xfe2   :  { %v8361_v50 = vpack.c.bf16 %v8342_v53, %v8339_v6  ;;  %v16872_v45 = vpop.f32.mrb[43].mxu0 }
 0xfe4   :  { %16880 = vmatpush3.bf16.msra.mxu1 %v8361_v50 }
 0xfe5   :  { %16881 = vmatprep.subr.bf16.mxu1 %v19444_v15 }
 0xfe7   :  { %v8347_v23 = vpop.f32.mrb[44].mxu0 }
 0xfe8   :  { %v16875_v58 = vpop.f32.mrb[45].mxu0 }
 0xfe9   :  { %v8350_v17 = vpop.f32.mrb[46].mxu0 }
 0xfea   :  { %v8362_v48 = vpack.c.bf16 %v8350_v17, %v8347_v23  ;;  %v16876_v61 = vpop.f32.mrb[47].mxu0 }
 0xfec   :  { %16882 = vmatpush3.bf16.msra.mxu1 %v8362_v48 }
 0xfed   :  { %16903 = vmatprep.subr.bf16.mxu1 %v19444_v15 }
 0xfef   :  { %16884 = vmatmul.mubr.msk.bf16.vlgmr.msra.gmra.mrb[80].mxu1 %vm5778_vm4, %v18505_v22 }
 0xff0   :  { %16904 = vmatpush3.bf16.msra.mxu1 %v8360_v8  ;;  %16887 = vmatprep.mubr.msk.bf16.mxu1 %vm19445_vm2, %v19444_v15 }
 0xff1   :  { %16905 = vmatprep.subr.bf16.mxu1 %v19444_v15 }
 0xff4   :  { %16906 = vmatpush3.bf16.msra.mxu1 %v8361_v50 }
 0xff5   :  { %16907 = vmatprep.subr.bf16.mxu1 %v19444_v15 }
 0xff7   :  { %16888 = vmatmul.mubr.msk.bf16.gmra.mrb[84].mxu1 %vm5778_vm4, %v18506_v43 }
 0xff8   :  { %16908 = vmatpush3.bf16.msra.mxu1 %v8362_v48  ;;  %16891 = vmatprep.mubr.msk.bf16.mxu1 %vm19445_vm2, %v19444_v15 }
 0xff9   :  { %16929 = vmatprep.subr.bf16.mxu1 %v19444_v15 }
 0xfff   :  { %16892 = vmatmul.mubr.msk.bf16.gmra.mrb[88].mxu1 %vm5778_vm4, %v18507_v40 }
0x1000   :  { %16895 = vmatprep.mubr.msk.bf16.mxu1 %vm19445_vm2, %v19444_v15 }
0x1007   :  { %16896 = vmatmul.mubr.msk.bf16.gmra.mrb[92].mxu1 %vm5778_vm4, %v18508_v21 }
0x1008   :  { %16899 = vmatprep.mubr.msk.bf16.mxu1 %vm19445_vm2, %v19444_v15 }
0x100f   :  { %16900 = vmatmul.mubr.msk.bf16.gmra.mrb[96].mxu1 %vm5778_vm4, %v18509_v49 }
0x1010   :  { %16909 = vmatprep.mubr.msk.bf16.mxu1 %vm19445_vm2, %v19444_v15 }
0x1017   :  { %16910 = vmatmul.mubr.msk.bf16.vlgmr.msra.gmra.mrb[100].mxu1 %vm5778_vm4, %v18510_v27 }
0x1018   :  { %16930 = vmatpush3.bf16.msra.mxu1 %v8360_v8  ;;  %16913 = vmatprep.mubr.msk.bf16.mxu1 %vm19445_vm2, %v19444_v15 }
0x1019   :  { %16931 = vmatprep.subr.bf16.mxu1 %v19444_v15 }
0x101c   :  { %16932 = vmatpush3.bf16.msra.mxu1 %v8361_v50 }
0x101d   :  { %16933 = vmatprep.subr.bf16.mxu1 %v19444_v15 }
0x101f   :  { %16914 = vmatmul.mubr.msk.bf16.gmra.mrb[104].mxu1 %vm5778_vm4, %v18511_v13 }
0x1020   :  { %16934 = vmatpush3.bf16.msra.mxu1 %v8362_v48  ;;  %16917 = vmatprep.mubr.msk.bf16.mxu1 %vm19445_vm2, %v19444_v15 }
0x1021   :  { %16955 = vmatprep.subr.bf16.mxu1 %v19444_v15 }
0x1027   :  { %16918 = vmatmul.mubr.msk.bf16.gmra.mrb[108].mxu1 %vm5778_vm4, %v18512_v26 }
0x1028   :  { %16921 = vmatprep.mubr.msk.bf16.mxu1 %vm19445_vm2, %v19444_v15 }
0x102f   :  { %16922 = vmatmul.mubr.msk.bf16.gmra.mrb[112].mxu1 %vm5778_vm4, %v18513_v5 }
0x1030   :  { %16925 = vmatprep.mubr.msk.bf16.mxu1 %vm19445_vm2, %v19444_v15 }
0x1037   :  { %16926 = vmatmul.mubr.msk.bf16.gmra.mrb[116].mxu1 %vm5778_vm4, %v18514_v9 }
0x1038   :  { %16935 = vmatprep.mubr.msk.bf16.mxu1 %vm19445_vm2, %v19444_v15 }
0x103f   :  { %16936 = vmatmul.mubr.msk.bf16.vlgmr.msra.gmra.mrb[120].mxu1 %vm5778_vm4, %v18515_v4 }
0x1040   :  { %16939 = vmatprep.mubr.msk.bf16.mxu1 %vm19445_vm2, %v19444_v15  ;;  %16956 = vmatpush3.bf16.msra.mxu1 %v18536_v42 }
0x1041   :  { %16957 = vmatprep.subr.bf16.mxu1 %v19444_v15 }
0x1044   :  { %16958 = vmatpush3.bf16.msra.mxu1 %v18537_v54 }
0x1045   :  { %16959 = vmatprep.subr.bf16.mxu1 %v19444_v15 }
0x1047   :  { %16940 = vmatmul.mubr.msk.bf16.gmra.mrb[124].mxu1 %vm5778_vm4, %v18516_v57 }
0x1048   :  { %16943 = vmatprep.mubr.msk.bf16.mxu1 %vm19445_vm2, %v19444_v15  ;;  %16960 = vmatpush3.bf16.msra.mxu1 %v18538_v51 }
0x1049   :  { %16961 = vmatprep.subr.bf16.mxu1 %v19444_v15 }
0x104c   :  { %16962 = vmatpush3.bf16.msra.mxu1 %v18539_v60 }
0x104d   :  { %16963 = vmatprep.subr.bf16.mxu1 %v19444_v15 }
0x104f   :  { %16944 = vmatmul.mubr.msk.bf16.gmra.mrb[128].mxu1 %vm5778_vm4, %v18517_v7 }
0x1050   :  { %16947 = vmatprep.mubr.msk.bf16.mxu1 %vm19445_vm2, %v19444_v15  ;;  %16964 = vmatpush3.bf16.msra.mxu1 %v18540_v62 }
0x1051   :  { %16965 = vmatprep.subr.bf16.mxu1 %v19444_v15 }
0x1054   :  { %16966 = vmatpush3.bf16.msra.mxu1 %v18541_v59 }
0x1055   :  { %16967 = vmatprep.subr.bf16.mxu1 %v19444_v15 }
0x1057   :  { %16948 = vmatmul.mubr.msk.bf16.gmra.mrb[132].mxu1 %vm5778_vm4, %v18518_v3 }
0x1058   :  { %16951 = vmatprep.mubr.msk.bf16.mxu1 %vm19445_vm2, %v19444_v15  ;;  %16968 = vmatpush3.bf16.msra.mxu1 %v18542_v11 }
0x1059   :  { %16969 = vmatprep.subr.bf16.mxu1 %v19444_v15 }
0x105c   :  { %16970 = vmatpush3.bf16.msra.mxu1 %v18543_v41 }
0x105d   :  { %17037 = vmatprep.subr.bf16.mxu1 %v19444_v15 }
0x105f   :  { %16952 = vmatmul.mubr.msk.bf16.gmra.mrb[136].mxu1 %vm5778_vm4, %v18519_v55 }
0x1060   :  { %16971 = vmatprep.mubr.msk.bf16.mxu1 %vm19445_vm2, %v19444_v15 }
0x10c2   :  { %v8444_v20 = vpop.f32.mrb[80].mxu1 }
0x10c3   :  { %v16885_v16 = vpop.f32.mrb[81].mxu1 }
0x10c4   :  { %v8447_v30 = vpop.f32.mrb[82].mxu1 }
0x10c5   :  { %v8722_v1 = vpack.c.bf16 %v8447_v30, %v8444_v20  ;;  %v16886_v35 = vpop.f32.mrb[83].mxu1 }
0x10ca   :  { %v8452_v36 = vpop.f32.mrb[84].mxu1 }
0x10cb   :  { %v16889_v44 = vpop.f32.mrb[85].mxu1 }
0x10cc   :  { %v8455_v28 = vpop.f32.mrb[86].mxu1 }
0x10cd   :  { %v8725_v63 = vpack.c.bf16 %v8455_v28, %v8452_v36  ;;  %v16890_v8 = vpop.f32.mrb[87].mxu1 }
0x10d2   :  { %v8460_v29 = vpop.f32.mrb[88].mxu1 }
0x10d3   :  { %v16893_v6 = vpop.f32.mrb[89].mxu1 }
0x10d4   :  { %v8463_v52 = vpop.f32.mrb[90].mxu1 }
0x10d5   :  { %v8728_v53 = vpack.c.bf16 %v8463_v52, %v8460_v29  ;;  %v16894_v50 = vpop.f32.mrb[91].mxu1 }
0x10da   :  { %v8468_v45 = vpop.f32.mrb[92].mxu1 }
0x10db   :  { %v16897_v23 = vpop.f32.mrb[93].mxu1 }
0x10dc   :  { %v8471_v58 = vpop.f32.mrb[94].mxu1 }
0x10dd   :  { %v8731_v17 = vpack.c.bf16 %v8471_v58, %v8468_v45  ;;  %v16898_v48 = vpop.f32.mrb[95].mxu1 }
0x10e2   :  { %v8476_v61 = vpop.f32.mrb[96].mxu1 }
0x10e3   :  { %v16901_v22 = vpop.f32.mrb[97].mxu1  ;;  %v8734_v0 = vpack.c.bf16 %v8476_v61, %v8476_v61 }
0x10e4   :  { %v8479_v43 = vpop.f32.mrb[98].mxu1 }
0x10e5   :  { %v16902_v40 = vpop.f32.mrb[99].mxu1 }
0x10ea   :  { %v8564_v21 = vpop.f32.mrb[100].mxu1 }
0x10eb   :  { %v16911_v49 = vpop.f32.mrb[101].mxu1 }
0x10ec   :  { %v8567_v27 = vpop.f32.mrb[102].mxu1 }
0x10ed   :  { %v8723_v13 = vpack.c.bf16 %v8567_v27, %v8564_v21  ;;  %v16912_v26 = vpop.f32.mrb[103].mxu1 }
0x10ef   :  { %8968 = vmatprep.mubr.bf16.mxu0 %v8723_v13 }
0x10f0   :  { %8969 = vmatmul.mubr.bf16.vlgmr.msra.gmra.mrb[48].mxu0 %v8722_v1 }
0x10f2   :  { %v8572_v5 = vpop.f32.mrb[104].mxu1 }
0x10f3   :  { %v16915_v9 = vpop.f32.mrb[105].mxu1 }
0x10f4   :  { %v8575_v4 = vpop.f32.mrb[106].mxu1 }
0x10f5   :  { %v8726_v57 = vpack.c.bf16 %v8575_v4, %v8572_v5  ;;  %v16916_v10 = vpop.f32.mrb[107].mxu1 }
0x10f7   :  { %8976 = vmatprep.mubr.bf16.mxu0 %v8726_v57 }
0x10f8   :  { %8977 = vmatmul.mubr.bf16.gmra.mrb[52].mxu0 %v8725_v63 }
0x10fa   :  { %v8580_v56 = vpop.f32.mrb[108].mxu1 }
0x10fb   :  { %v16919_v12 = vpop.f32.mrb[109].mxu1 }
0x10fc   :  { %v8583_v37 = vpop.f32.mrb[110].mxu1 }
0x10fd   :  { %v8729_v7 = vpack.c.bf16 %v8583_v37, %v8580_v56  ;;  %v16920_v33 = vpop.f32.mrb[111].mxu1 }
0x10ff   :  { %8984 = vmatprep.mubr.bf16.mxu0 %v8729_v7 }
0x1100   :  { %8985 = vmatmul.mubr.bf16.gmra.mrb[56].mxu0 %v8728_v53 }
0x1102   :  { %v8588_v38 = vpop.f32.mrb[112].mxu1 }
0x1103   :  { %v16923_v32 = vpop.f32.mrb[113].mxu1 }
0x1104   :  { %v8591_v46 = vpop.f32.mrb[114].mxu1 }
0x1105   :  { %v8732_v3 = vpack.c.bf16 %v8591_v46, %v8588_v38  ;;  %v16924_v31 = vpop.f32.mrb[115].mxu1 }
0x1106   :  { %v15008_v31 = vld [vmem:[#allocation22] ss:$0 sm:$0xff] }
0x1107   :  { %8992 = vmatprep.mubr.bf16.mxu0 %v8732_v3 }
0x1108   :  { %8993 = vmatmul.mubr.bf16.gmra.mrb[60].mxu0 %v8731_v17 }
0x110a   :  { %v8596_v47 = vpop.f32.mrb[116].mxu1 }
0x110b   :  { %v16927_v55 = vpop.f32.mrb[117].mxu1  ;;  %v8735_v18 = vpack.c.bf16 %v8596_v47, %v8596_v47 }
0x110c   :  { %v8599_v19 = vpop.f32.mrb[118].mxu1 }
0x110d   :  { %9000 = vmatprep.mubr.bf16.mxu0 %v8735_v18  ;;  %v16928_v24 = vpop.f32.mrb[119].mxu1 }
0x1110   :  { %9001 = vmatmul.mubr.bf16.gmra.mrb[64].mxu0 %v8734_v0 }
0x1111   :  { %17001 = vmatprep.mubr.msk.bf16.mxu0 %vm19445_vm2, %v19444_v15 }
0x1112   :  { %v8684_v14 = vpop.f32.mrb[120].mxu1 }
0x1113   :  { %v16937_v25 = vpop.f32.mrb[121].mxu1 }
0x1114   :  { %v8687_v42 = vpop.f32.mrb[122].mxu1 }
0x1115   :  { %v8724_v54 = vpack.c.bf16 %v8687_v42, %v8684_v14  ;;  %v16938_v51 = vpop.f32.mrb[123].mxu1 }
0x1117   :  { %16972 = vmatmul.mubr.bf16.vlgmr.msra.gmra.mrb[140].mxu1 %v8724_v54 }
0x1118   :  { %16975 = vmatprep.mubr.msk.bf16.mxu1 %vm19445_vm2, %v19444_v15 }
0x111a   :  { %v8692_v60 = vpop.f32.mrb[124].mxu1 }
0x111b   :  { %v16941_v62 = vpop.f32.mrb[125].mxu1 }
0x111c   :  { %v8695_v59 = vpop.f32.mrb[126].mxu1 }
0x111d   :  { %v8727_v11 = vpack.c.bf16 %v8695_v59, %v8692_v60  ;;  %v16942_v41 = vpop.f32.mrb[127].mxu1 }
0x111f   :  { %16976 = vmatmul.mubr.bf16.gmra.mrb[144].mxu1 %v8727_v11 }
0x1120   :  { %16979 = vmatprep.mubr.msk.bf16.mxu1 %vm19445_vm2, %v19444_v15 }
0x1122   :  { %v8700_v20 = vpop.f32.mrb[128].mxu1 }
0x1123   :  { %v16945_v16 = vpop.f32.mrb[129].mxu1 }
0x1124   :  { %v8703_v30 = vpop.f32.mrb[130].mxu1 }
0x1125   :  { %v8730_v1 = vpack.c.bf16 %v8703_v30, %v8700_v20  ;;  %v16946_v35 = vpop.f32.mrb[131].mxu1 }
0x1127   :  { %16980 = vmatmul.mubr.bf16.gmra.mrb[148].mxu1 %v8730_v1 }
0x1128   :  { %16983 = vmatprep.mubr.msk.bf16.mxu1 %vm19445_vm2, %v19444_v15 }
0x112a   :  { %v8708_v36 = vpop.f32.mrb[132].mxu1 }
0x112b   :  { %v16949_v44 = vpop.f32.mrb[133].mxu1 }
0x112c   :  { %v8711_v28 = vpop.f32.mrb[134].mxu1 }
0x112d   :  { %v8733_v63 = vpack.c.bf16 %v8711_v28, %v8708_v36  ;;  %v16950_v8 = vpop.f32.mrb[135].mxu1 }
0x112f   :  { %16984 = vmatmul.mubr.bf16.gmra.mrb[152].mxu1 %v8733_v63 }
0x1130   :  { %16987 = vmatprep.mubr.msk.bf16.mxu1 %vm19445_vm2, %v19444_v15 }
0x1132   :  { %v8716_v29 = vpop.f32.mrb[136].mxu1 }
0x1133   :  { %v8736_v6 = vpack.c.bf16 %v8716_v29, %v8716_v29  ;;  %v16953_v52 = vpop.f32.mrb[137].mxu1 }
0x1134   :  { %v8719_v53 = vpop.f32.mrb[138].mxu1 }
0x1135   :  { %v16954_v50 = vpop.f32.mrb[139].mxu1 }
0x1137   :  { %16988 = vmatmul.mubr.bf16.gmra.mrb[156].mxu1 %v8736_v6 }
0x1138   :  { %17047 = vmatprep.mubr.msk.bf16.mxu1 %vm19445_vm2, %v19444_v15 }
0x11c3   :  { %v16333_v45 = vpop.f32.mrb[48].mxu0 }
0x11c4   :  { %v16334_v23 = vpop.f32.mrb[49].mxu0 }
0x11c5   :  { %v16335_v58 = vadd.f32 %v16334_v23, %v16333_v45  ;;  %v16336_v17 = vpop.f32.mrb[50].mxu0 }
0x11c6   :  { %v16337_v48 = vpop.f32.mrb[51].mxu0 }
0x11c7   :  { %v16338_v61 = vadd.f32 %v16337_v48, %v16336_v17  ;;  %v8971_v55 = vadd.f32 %v16335_v58, %v15008_v31 }
0x11c9   :  { %v8974_v19 = vadd.f32 %v16338_v61, %v15008_v31 }
0x11cb   :  { %v16339_v22 = vpop.f32.mrb[52].mxu0 }
0x11cc   :  { %v16340_v43 = vpop.f32.mrb[53].mxu0 }
0x11cd   :  { %v16341_v40 = vadd.f32 %v16340_v43, %v16339_v22  ;;  %v16342_v21 = vpop.f32.mrb[54].mxu0 }
0x11ce   :  { %v16343_v49 = vpop.f32.mrb[55].mxu0 }
0x11cf   :  { %v16344_v27 = vadd.f32 %v16343_v49, %v16342_v21  ;;  %v8979_v60 = vadd.f32 %v16341_v40, %v15008_v31 }
0x11d1   :  { %v8982_v11 = vadd.f32 %v16344_v27, %v15008_v31 }
0x11d3   :  { %v16345_v13 = vpop.f32.mrb[56].mxu0 }
0x11d4   :  { %v16346_v26 = vpop.f32.mrb[57].mxu0 }
0x11d5   :  { %v16347_v5 = vadd.f32 %v16346_v26, %v16345_v13  ;;  %v16348_v9 = vpop.f32.mrb[58].mxu0 }
0x11d6   :  { %v16349_v4 = vpop.f32.mrb[59].mxu0 }
0x11d7   :  { %v16350_v57 = vadd.f32 %v16349_v4, %v16348_v9  ;;  %v8987_v44 = vadd.f32 %v16347_v5, %v15008_v31 }
0x11d9   :  { %v8990_v8 = vadd.f32 %v16350_v57, %v15008_v31 }
0x11db   :  { %v16351_v10 = vpop.f32.mrb[60].mxu0 }
0x11dc   :  { %v16352_v56 = vpop.f32.mrb[61].mxu0 }
0x11dd   :  { %v16353_v12 = vadd.f32 %v16352_v56, %v16351_v10  ;;  %v16354_v37 = vpop.f32.mrb[62].mxu0 }
0x11de   :  { %v16355_v7 = vpop.f32.mrb[63].mxu0 }
0x11df   :  { %v16356_v33 = vadd.f32 %v16355_v7, %v16354_v37  ;;  %v8995_v58 = vadd.f32 %v16353_v12, %v15008_v31 }
0x11e1   :  { %v8998_v61 = vadd.f32 %v16356_v33, %v15008_v31  ;;  %v18544_v33 = vld [vmem:[%s22781_s24] sm:$0xff]  }
0x11e3   :  { %v16357_v38 = vpop.f32.mrb[64].mxu0 }
0x11e4   :  { %v16358_v32 = vpop.f32.mrb[65].mxu0 }
0x11e5   :  { %v16359_v46 = vadd.f32 %v16358_v32, %v16357_v38  ;;  %v16360_v3 = vpop.f32.mrb[66].mxu0  ;;  %v18545_v38 = vld [vmem:[%s22781_s24 + $0x44] sm:$0xff]  }
0x11e6   :  { %v16361_v47 = vpop.f32.mrb[67].mxu0  ;;  %v18546_v32 = vld [vmem:[%s22781_s24 + $0x8] sm:$0xff]   ;;  %v18548_v3 = vld [vmem:[%s22781_s24 + $0x10] sm:$0xff]  }
0x11e7   :  { %v9003_v26 = vadd.f32 %v16359_v46, %v15008_v31  ;;  %v18547_v46 = vld [vmem:[%s22781_s24 + $0x4c] sm:$0xff]   ;;  %v18549_v31 = vld [vmem:[%s22781_s24 + $0x54] sm:$0xff]  }
0x11e8   :  { %v18550_v47 = vld [vmem:[%s22781_s24 + $0x18] sm:$0xff]  }
0x11ea   :  { %v9042_v18 = vpop.f32.mrb[140].mxu1 }
0x11eb   :  { %v9043_v24 = vadd.f32 %v9042_v18, %v8971_v55  ;;  %v16973_v0 = vpop.f32.mrb[141].mxu1  ;;  %v18551_v55 = vld [vmem:[%s22781_s24 + $0x5c] sm:$0xff]  }
0x11ec   :  { %v9045_v14 = vpop.f32.mrb[142].mxu1  ;;  %v18552_v18 = vld [vmem:[%s22781_s24 + $0x20] sm:$0xff]   ;;  %v18555_v0 = vld [vmem:[%s22781_s24 + $0x6c] sm:$0xff]  }
0x11ed   :  { %v9046_v25 = vadd.f32 %v9045_v14, %v8974_v19  ;;  %v16974_v42 = vpop.f32.mrb[143].mxu1  ;;  %v9080_v54 = vmax.f32 %v9043_v24, 0.0  ;;  %v18553_v19 = vld [vmem:[%s22781_s24 + $0x64] sm:$0xff]   ;;  %v18556_v14 = vld [vmem:[%s22781_s24 + $0x30] sm:$0xff]  }
0x11ee   :  { %v18554_v24 = vld [vmem:[%s22781_s24 + $0x28] sm:$0xff]   ;;  %v18558_v42 = vld [vmem:[%s22781_s24 + $0x38] sm:$0xff]  }
0x11ef   :  { %v9081_v51 = vmax.f32 %v9046_v25, 0.0  ;;  %v18557_v25 = vld [vmem:[%s22781_s24 + $0x74] sm:$0xff]  }
0x11f1   :  { %v21479_v62 = vpack.c.bf16 %v9081_v51, %v9080_v54  ;;  %v18559_v54 = vld [vmem:[%s22781_s24 + $0x7c] sm:$0xff]   ;;  %v18587_v51 = vld [vmem:[#allocation24 + $0x40] sm:$0xff]  }
0x11f2   :  { %v9050_v59 = vpop.f32.mrb[144].mxu1 }
0x11f3   :  { %v9051_v41 = vadd.f32 %v9050_v59, %v8979_v60  ;;  %v16977_v20 = vpop.f32.mrb[145].mxu1  ;;  %16992 = vmatpush3.bf16.msra.mxu0 %v21479_v62  ;;  %17038 = vmatpush3.bf16.msra.mxu1 %v21479_v62  ;;  %v18560_v60 = vld [vmem:[%s22781_s24 + $0x40] ss:$0 sps:$4 sm:$0xff]   ;;  %v18561_v59 = vld [vmem:[%s22781_s24 + $0x84] ss:$0 sps:$4 sm:$0xff]  }
0x11f4   :  { %v9053_v16 = vpop.f32.mrb[146].mxu1  ;;  %16993 = vmatprep.subr.bf16.mxu0 %v19444_v15  ;;  %17039 = vmatprep.subr.bf16.mxu1 %v19444_v15  ;;  %v18588_v20 = vld [vmem:[#allocation24] sm:$0xff]  }
0x11f5   :  { %v9054_v30 = vadd.f32 %v9053_v16, %v8982_v11  ;;  %v16978_v1 = vpop.f32.mrb[147].mxu1  ;;  %v9082_v35 = vmax.f32 %v9051_v41, 0.0  ;;  %v18562_v11 = vld [vmem:[%s22781_s24 + $0x88] sm:$0xff]   ;;  %v18589_v16 = vld [vmem:[#allocation24 + $0x48] sm:$0xff]  }
0x11f6   :  { %v18563_v41 = vld [vmem:[%s22781_s24 + $0xcc] sm:$0xff]  }
0x11f7   :  { %v9083_v36 = vmax.f32 %v9054_v30, 0.0  ;;  %v18590_v30 = vld [vmem:[#allocation24 + $0x8] sm:$0xff]   ;;  %v18564_v1 = vld [vmem:[%s22781_s24 + $0x90] sm:$0xff]  }
0x11f9   :  { %v21485_v28 = vpack.c.bf16 %v9083_v36, %v9082_v35  ;;  %v18565_v35 = vld [vmem:[%s22781_s24 + $0xd4] sm:$0xff]   ;;  %v18593_v36 = vld [vmem:[#allocation24 + $0x10] sm:$0xff]  }
0x11fa   :  { %v9058_v63 = vpop.f32.mrb[148].mxu1 }
0x11fb   :  { %v9059_v29 = vadd.f32 %v9058_v63, %v8987_v44  ;;  %v16981_v6 = vpop.f32.mrb[149].mxu1  ;;  %16994 = vmatpush3.bf16.msra.mxu0 %v21485_v28  ;;  %17040 = vmatpush3.bf16.msra.mxu1 %v21485_v28  ;;  %v18594_v44 = vld [vmem:[#allocation24 + $0x58] sm:$0xff]   ;;  %v18567_v63 = vld [vmem:[%s22781_s24 + $0xdc] sm:$0xff]  }
0x11fc   :  { %v9061_v52 = vpop.f32.mrb[150].mxu1  ;;  %16995 = vmatprep.subr.bf16.mxu0 %v19444_v15  ;;  %17041 = vmatprep.subr.bf16.mxu1 %v19444_v15  ;;  %v18598_v6 = vld [vmem:[#allocation24 + $0x20] sm:$0xff]  }
0x11fd   :  { %v9062_v53 = vadd.f32 %v9061_v52, %v8990_v8  ;;  %v16982_v50 = vpop.f32.mrb[151].mxu1  ;;  %v9084_v45 = vmax.f32 %v9059_v29, 0.0  ;;  %v18595_v8 = vld [vmem:[#allocation24 + $0x18] sm:$0xff]   ;;  %v18597_v29 = vld [vmem:[#allocation24 + $0x60] sm:$0xff]   ;;  %v18599_v52 = vld [vmem:[#allocation24 + $0x68] sm:$0xff]  }
0x11fe   :  { %v18569_v50 = vld [vmem:[%s22781_s24 + $0xe4] sm:$0xff]  }
0x11ff   :  { %v9085_v23 = vmax.f32 %v9062_v53, 0.0  ;;  %v18568_v53 = vld [vmem:[%s22781_s24 + $0xa0] sm:$0xff]  }
0x1201   :  { %v21491_v17 = vpack.c.bf16 %v9085_v23, %v9084_v45  ;;  %v18600_v45 = vld [vmem:[#allocation24 + $0x28] sm:$0xff]   ;;  %v18601_v23 = vld [vmem:[#allocation24 + $0x70] sm:$0xff]  }
0x1202   :  { %v9066_v48 = vpop.f32.mrb[152].mxu1 }
0x1203   :  { %v9067_v22 = vadd.f32 %v9066_v48, %v8995_v58  ;;  %v16985_v43 = vpop.f32.mrb[153].mxu1  ;;  %16996 = vmatpush3.bf16.msra.mxu0 %v21491_v17  ;;  %17042 = vmatpush3.bf16.msra.mxu1 %v21491_v17  ;;  %v18602_v58 = vld [vmem:[#allocation24 + $0x30] sm:$0xff]  }
0x1204   :  { %v9069_v40 = vpop.f32.mrb[154].mxu1  ;;  %16997 = vmatprep.subr.bf16.mxu0 %v19444_v15  ;;  %17043 = vmatprep.subr.bf16.mxu1 %v19444_v15  ;;  %v18570_v48 = vld [vmem:[%s22781_s24 + $0xa8] sm:$0xff]   ;;  %v18572_v43 = vld [vmem:[%s22781_s24 + $0xb0] sm:$0xff]  }
0x1205   :  { %v9070_v21 = vadd.f32 %v9069_v40, %v8998_v61  ;;  %v16986_v49 = vpop.f32.mrb[155].mxu1  ;;  %v9086_v27 = vmax.f32 %v9067_v22, 0.0  ;;  %v18571_v61 = vld [vmem:[%s22781_s24 + $0xec] sm:$0xff]   ;;  %v18573_v40 = vld [vmem:[%s22781_s24 + $0xf4] sm:$0xff]  }
0x1206   :  { %v18604_v22 = vld [vmem:[#allocation24 + $0x38] sm:$0xff]   ;;  %v18575_v49 = vld [vmem:[%s22781_s24 + $0xfc] sm:$0xff]  }
0x1207   :  { %v9087_v13 = vmax.f32 %v9070_v21, 0.0  ;;  %v18574_v21 = vld [vmem:[%s22781_s24 + $0xb8] sm:$0xff]  }
0x1209   :  { %v21497_v5 = vpack.c.bf16 %v9087_v13, %v9086_v27  ;;  %v18605_v27 = vld [vmem:[#allocation24 + $0xc0] sm:$0xff]   ;;  %v18576_v13 = vld [vmem:[%s22781_s24 + $0xc0] sm:$0xff]  }
0x120a   :  { %v9074_v9 = vpop.f32.mrb[156].mxu1 }
0x120b   :  { %v9075_v4 = vadd.f32 %v9074_v9, %v9003_v26  ;;  %16998 = vmatpush3.bf16.msra.mxu0 %v21497_v5  ;;  %17044 = vmatpush3.bf16.msra.mxu1 %v21497_v5  ;;  %v16989_v57 = vpop.f32.mrb[157].mxu1  ;;  %v18577_v26 = vld [vmem:[%s22781_s24 + $0x104] sm:$0xff]   ;;  %v18579_v9 = vld [vmem:[%s22781_s24 + $0x10c] ss:$0 sps:$4 sm:$0xff]  }
0x120c   :  { %16999 = vmatprep.subr.bf16.mxu0 %v19444_v15  ;;  %17045 = vmatprep.subr.bf16.mxu1 %v19444_v15  ;;  %v9077_v10 = vpop.f32.mrb[158].mxu1  ;;  %v18606_v57 = vld [vmem:[#allocation24 + $0x80] sm:$0xff]  }
0x120d   :  { %v9088_v56 = vmax.f32 %v9075_v4, 0.0  ;;  %v16990_v12 = vpop.f32.mrb[159].mxu1  ;;  %v18580_v4 = vld [vmem:[%s22781_s24 + $0x110] sm:$0xff]   ;;  %v18607_v10 = vld [vmem:[#allocation24 + $0xc8] sm:$0xff]  }
0x120e   :  { %v18609_v12 = vld [vmem:[#allocation24 + $0xd0] sm:$0xff]  }
0x120f   :  { %v9093_v37 = vpack.c.bf16 %v9088_v56, %v9088_v56  ;;  %v18608_v56 = vld [vmem:[#allocation24 + $0x88] sm:$0xff]  }
0x1211   :  { %v21504_v7 = vsel %vm632_vm0, %v9093_v37, 0  ;;  %v18581_v37 = vld [vmem:[%s22781_s24 + $0x118] sm:$0xff]  }
0x1212   :  { %17000 = vmatpush3.bf16.msra.mxu0 %v21504_v7  ;;  %17046 = vmatpush3.bf16.msra.mxu1 %v21504_v7 }
0x1213   :  { %17083 = vmatprep.subr.bf16.mxu0 %v19444_v15  ;;  %17129 = vmatprep.subr.bf16.mxu1 %v19444_v15 }
0x1215   :  { %17002 = vmatmul.mubr.msk.bf16.vlgmr.msra.gmra.mrb[68].mxu0 %vm5200_vm3, %v18544_v33  ;;  %17048 = vmatmul.mubr.msk.bf16.vlgmr.msra.gmra.mrb[160].mxu1 %vm5200_vm3, %v18545_v38  ;;  %v18611_v33 = vld [vmem:[#allocation24 + $0xd8] sm:$0xff]  }
0x1216   :  { %17084 = vmatpush3.bf16.msra.mxu0 %v21479_v62  ;;  %17130 = vmatpush3.bf16.msra.mxu1 %v21479_v62  ;;  %v18612_v38 = vld [vmem:[#allocation24 + $0x98] sm:$0xff]  }
0x1217   :  { %17085 = vmatprep.subr.bf16.mxu0 %v19444_v15  ;;  %17131 = vmatprep.subr.bf16.mxu1 %v19444_v15 }
0x1218   :  { %17005 = vmatprep.mubr.msk.bf16.mxu0 %vm19445_vm2, %v19444_v15  ;;  %17051 = vmatprep.mubr.msk.bf16.mxu1 %vm19445_vm2, %v19444_v15 }
0x121a   :  { %17086 = vmatpush3.bf16.msra.mxu0 %v21485_v28  ;;  %17132 = vmatpush3.bf16.msra.mxu1 %v21485_v28 }
0x121b   :  { %17087 = vmatprep.subr.bf16.mxu0 %v19444_v15  ;;  %17133 = vmatprep.subr.bf16.mxu1 %v19444_v15 }
0x121d   :  { %17006 = vmatmul.mubr.msk.bf16.gmra.mrb[72].mxu0 %vm5200_vm3, %v18546_v32  ;;  %17052 = vmatmul.mubr.msk.bf16.gmra.mrb[164].mxu1 %vm5200_vm3, %v18547_v46  ;;  %v18613_v32 = vld [vmem:[#allocation24 + $0xe0] sm:$0xff]   ;;  %v18582_v46 = vld [vmem:[%s22781_s24 + $0x120] sm:$0xff]  }
0x121e   :  { %17088 = vmatpush3.bf16.msra.mxu0 %v21491_v17  ;;  %17134 = vmatpush3.bf16.msra.mxu1 %v21491_v17 }
0x121f   :  { %17089 = vmatprep.subr.bf16.mxu0 %v19444_v15  ;;  %17135 = vmatprep.subr.bf16.mxu1 %v19444_v15 }
0x1220   :  { %17009 = vmatprep.mubr.msk.bf16.mxu0 %vm19445_vm2, %v19444_v15  ;;  %17055 = vmatprep.mubr.msk.bf16.mxu1 %vm19445_vm2, %v19444_v15 }
0x1222   :  { %17090 = vmatpush3.bf16.msra.mxu0 %v21497_v5  ;;  %17136 = vmatpush3.bf16.msra.mxu1 %v21497_v5 }
0x1223   :  { %17091 = vmatprep.subr.bf16.mxu0 %v19444_v15  ;;  %17137 = vmatprep.subr.bf16.mxu1 %v19444_v15 }
0x1225   :  { %17010 = vmatmul.mubr.msk.bf16.gmra.mrb[76].mxu0 %vm5200_vm3, %v18548_v3  ;;  %17056 = vmatmul.mubr.msk.bf16.gmra.mrb[168].mxu1 %vm5200_vm3, %v18549_v31  ;;  %v18614_v3 = vld [vmem:[#allocation24 + $0xa0] sm:$0xff]   ;;  %v18615_v31 = vld [vmem:[#allocation24 + $0xe8] sm:$0xff]  }
0x1226   :  { %17092 = vmatpush3.bf16.msra.mxu0 %v21504_v7  ;;  %17138 = vmatpush3.bf16.msra.mxu1 %v21504_v7 }
0x1227   :  { %17013 = vmatprep.mubr.msk.bf16.mxu0 %vm19445_vm2, %v19444_v15  ;;  %17059 = vmatprep.mubr.msk.bf16.mxu1 %vm19445_vm2, %v19444_v15 }
0x1228   :  { %17175 = vmatprep.subr.bf16.mxu0 %v19444_v15  ;;  %16446 = vmatprep.subr.bf16.mxu1 %v18587_v51  ;;  %v18596_v51 = vld [vmem:[%s22781_s24 + $0x150] ss:$0 sps:$4 sm:$0xff]  }
0x122d   :  { %17014 = vmatmul.mubr.msk.bf16.gmra.mrb[80].mxu0 %vm5200_vm3, %v18550_v47  ;;  %17060 = vmatmul.mubr.msk.bf16.gmra.mrb[172].mxu1 %vm5200_vm3, %v18551_v55  ;;  %v18616_v47 = vld [vmem:[#allocation24 + $0xa8] sm:$0xff]   ;;  %v18617_v55 = vld [vmem:[#allocation24 + $0xf0] sm:$0xff]  }
0x122e   :  { %17017 = vmatprep.mubr.msk.bf16.mxu0 %vm19445_vm2, %v19444_v15  ;;  %17063 = vmatprep.mubr.msk.bf16.mxu1 %vm19445_vm2, %v19444_v15 }
0x1235   :  { %17018 = vmatmul.mubr.msk.bf16.gmra.mrb[84].mxu0 %vm5200_vm3, %v18552_v18  ;;  %17064 = vmatmul.mubr.msk.bf16.gmra.mrb[176].mxu1 %vm5200_vm3, %v18553_v19  ;;  %v18583_v18 = vld [vmem:[%s22781_s24 + $0x128] sm:$0xff]  }
0x1236   :  { %17021 = vmatprep.mubr.msk.bf16.mxu0 %vm19445_vm2, %v19444_v15  ;;  %17067 = vmatprep.mubr.msk.bf16.mxu1 %vm19445_vm2, %v19444_v15  ;;  %v18618_v19 = vld [vmem:[#allocation24 + $0xb0] sm:$0xff]  }
0x123d   :  { %17022 = vmatmul.mubr.msk.bf16.gmra.mrb[88].mxu0 %vm5200_vm3, %v18554_v24  ;;  %17068 = vmatmul.mubr.msk.bf16.gmra.mrb[180].mxu1 %vm5200_vm3, %v18555_v0  ;;  %v18619_v24 = vld [vmem:[#allocation24 + $0xf8] sm:$0xff]  }
0x123e   :  { %17025 = vmatprep.mubr.msk.bf16.mxu0 %vm19445_vm2, %v19444_v15  ;;  %17071 = vmatprep.mubr.msk.bf16.mxu1 %vm19445_vm2, %v19444_v15  ;;  %v18620_v0 = vld [vmem:[#allocation24 + $0xb8] sm:$0xff]  }
0x1245   :  { %17026 = vmatmul.mubr.msk.bf16.gmra.mrb[92].mxu0 %vm5200_vm3, %v18556_v14  ;;  %17072 = vmatmul.mubr.msk.bf16.gmra.mrb[184].mxu1 %vm5200_vm3, %v18557_v25  ;;  %v18584_v14 = vld [vmem:[%s22781_s24 + $0x130] sm:$0xff]   ;;  %v18585_v25 = vld [vmem:[%s22781_s24 + $0x138] sm:$0xff]  }
0x1246   :  { %17029 = vmatprep.mubr.msk.bf16.mxu0 %vm19445_vm2, %v19444_v15  ;;  %17075 = vmatprep.mubr.msk.bf16.mxu1 %vm19445_vm2, %v19444_v15 }
0x124d   :  { %17030 = vmatmul.mubr.msk.bf16.gmra.mrb[96].mxu0 %vm5200_vm3, %v18558_v42  ;;  %17076 = vmatmul.mubr.msk.bf16.gmra.mrb[188].mxu1 %vm5200_vm3, %v18559_v54  ;;  %v18586_v42 = vld [vmem:[%s22781_s24 + $0x140] sm:$0xff]   ;;  %v18591_v54 = vld [vmem:[%s22781_s24 + $0x148] sm:$0xff]  }
0x124e   :  { %17033 = vmatprep.mubr.msk.bf16.mxu0 %vm19445_vm2, %v19444_v15  ;;  %17079 = vmatprep.mubr.msk.bf16.mxu1 %vm19445_vm2, %v19444_v15 }
0x1255   :  { %17034 = vmatmul.mubr.msk.bf16.gmra.mrb[100].mxu0 %vm5200_vm3, %v18560_v60  ;;  %17080 = vmatmul.mubr.msk.bf16.gmra.mrb[192].mxu1 %vm5200_vm3, %v18561_v59 }
0x1256   :  { %17093 = vmatprep.mubr.msk.bf16.mxu0 %vm19445_vm2, %v19444_v15  ;;  %17139 = vmatprep.mubr.msk.bf16.mxu1 %vm19445_vm2, %v19444_v15 }
0x125d   :  { %17094 = vmatmul.mubr.msk.bf16.vlgmr.msra.gmra.mrb[104].mxu0 %vm5200_vm3, %v18562_v11  ;;  %17140 = vmatmul.mubr.msk.bf16.vlgmr.msra.gmra.mrb[196].mxu1 %vm5200_vm3, %v18563_v41 }
0x125e   :  { %17176 = vmatpush3.bf16.msra.mxu0 %v21479_v62  ;;  %17097 = vmatprep.mubr.msk.bf16.mxu0 %vm19445_vm2, %v19444_v15  ;;  %v18592_v62 = vld [vmem:[#allocation24 + $0x50] sm:$0xff]  }
0x125f   :  { %17177 = vmatprep.subr.bf16.mxu0 %v19444_v15  ;;  %17143 = vmatprep.mubr.msk.bf16.mxu1 %vm19445_vm2, %v19444_v15 }
0x1260   :  { %16447 = vmatpush3.bf16.msra.mxu1 %v18588_v20 }
0x1261   :  { %16448 = vmatprep.subr.bf16.mxu1 %v18589_v16 }
0x1262   :  { %17178 = vmatpush3.bf16.msra.mxu0 %v21485_v28  ;;  %v18566_v28 = vld [vmem:[%s22781_s24 + $0x98] sm:$0xff]  }
0x1263   :  { %17179 = vmatprep.subr.bf16.mxu0 %v19444_v15 }
0x1264   :  { %16449 = vmatpush3.bf16.msra.mxu1 %v18590_v30 }
0x1265   :  { %17098 = vmatmul.mubr.msk.bf16.gmra.mrb[108].mxu0 %vm5200_vm3, %v18564_v1  ;;  %17144 = vmatmul.mubr.msk.bf16.gmra.mrb[200].mxu1 %vm5200_vm3, %v18565_v35 }
0x1266   :  { %17180 = vmatpush3.bf16.msra.mxu0 %v21491_v17  ;;  %17101 = vmatprep.mubr.msk.bf16.mxu0 %vm19445_vm2, %v19444_v15  ;;  %v18603_v17 = vld [vmem:[#allocation24 + $0x78] sm:$0xff]  }
0x1267   :  { %17181 = vmatprep.subr.bf16.mxu0 %v19444_v15  ;;  %17147 = vmatprep.mubr.msk.bf16.mxu1 %vm19445_vm2, %v19444_v15 }
0x1268   :  { %16450 = vmatprep.subr.bf16.mxu1 %v18592_v62 }
0x1269   :  { %16451 = vmatpush3.bf16.msra.mxu1 %v18593_v36  ;;  %v18621_v36 = vld [vmem:[#allocation24 + $0x100] sm:$0xff]  }
0x126a   :  { %17182 = vmatpush3.bf16.msra.mxu0 %v21497_v5  ;;  %16452 = vmatprep.subr.bf16.mxu1 %v18594_v44  ;;  %v18578_v5 = vld [vmem:[%s22781_s24 + $0xc8] ss:$0 sps:$4 sm:$0xff]   ;;  %v18622_v44 = vld [vmem:[#allocation24 + $0x108] sm:$0xff]  }
0x126b   :  { %17183 = vmatprep.subr.bf16.mxu0 %v19444_v15 }
0x126d   :  { %17102 = vmatmul.mubr.msk.bf16.gmra.mrb[112].mxu0 %vm5200_vm3, %v18566_v28  ;;  %17148 = vmatmul.mubr.msk.bf16.gmra.mrb[204].mxu1 %vm5200_vm3, %v18567_v63 }
0x126e   :  { %17184 = vmatpush3.bf16.msra.mxu0 %v21504_v7  ;;  %17105 = vmatprep.mubr.msk.bf16.mxu0 %vm19445_vm2, %v19444_v15  ;;  %v18610_v7 = vld [vmem:[#allocation24 + $0x90] sm:$0xff]  }
0x126f   :  { %17151 = vmatprep.mubr.msk.bf16.mxu1 %vm19445_vm2, %v19444_v15  ;;  %16453 = vmatpush3.bf16.msra.mxu1 %v18595_v8 }
0x1270   :  { %16454 = vmatprep.subr.bf16.mxu1 %v18597_v29  ;;  %16516 = vmatprep.subr.bf16.mxu0 %v18605_v27 }
0x1273   :  { %16455 = vmatpush3.bf16.msra.mxu1 %v18598_v6 }
0x1274   :  { %16456 = vmatprep.subr.bf16.mxu1 %v18599_v52 }
0x1275   :  { %17106 = vmatmul.mubr.msk.bf16.gmra.mrb[116].mxu0 %vm5200_vm3, %v18568_v53  ;;  %17152 = vmatmul.mubr.msk.bf16.gmra.mrb[208].mxu1 %vm5200_vm3, %v18569_v50 }
0x1276   :  { %17109 = vmatprep.mubr.msk.bf16.mxu0 %vm19445_vm2, %v19444_v15  ;;  %17155 = vmatprep.mubr.msk.bf16.mxu1 %vm19445_vm2, %v19444_v15 }
0x1277   :  { %16457 = vmatpush3.bf16.msra.mxu1 %v18600_v45 }
0x1278   :  { %16458 = vmatprep.subr.bf16.mxu1 %v18601_v23 }
0x127b   :  { %16459 = vmatpush3.bf16.msra.mxu1 %v18602_v58  ;;  %v18623_v58 = vld [vmem:[#allocation24 + $0x110] sm:$0xff]  }
0x127c   :  { %16460 = vmatprep.subr.bf16.mxu1 %v18603_v17  ;;  %v18624_v17 = vld [vmem:[#allocation24 + $0x118] sm:$0xff]  }
0x127d   :  { %17110 = vmatmul.mubr.msk.bf16.gmra.mrb[120].mxu0 %vm5200_vm3, %v18570_v48  ;;  %17156 = vmatmul.mubr.msk.bf16.gmra.mrb[212].mxu1 %vm5200_vm3, %v18571_v61 }
0x127e   :  { %17113 = vmatprep.mubr.msk.bf16.mxu0 %vm19445_vm2, %v19444_v15  ;;  %17159 = vmatprep.mubr.msk.bf16.mxu1 %vm19445_vm2, %v19444_v15 }
0x127f   :  { %16461 = vmatpush3.bf16.msra.mxu1 %v18604_v22 }
0x1280   :  { %17221 = vmatprep.subr.bf16.mxu1 %v19444_v15 }
0x1285   :  { %17114 = vmatmul.mubr.msk.bf16.gmra.mrb[124].mxu0 %vm5200_vm3, %v18572_v43  ;;  %17160 = vmatmul.mubr.msk.bf16.gmra.mrb[216].mxu1 %vm5200_vm3, %v18573_v40 }
0x1286   :  { %17117 = vmatprep.mubr.msk.bf16.mxu0 %vm19445_vm2, %v19444_v15  ;;  %17163 = vmatprep.mubr.msk.bf16.mxu1 %vm19445_vm2, %v19444_v15 }
0x128d   :  { %17118 = vmatmul.mubr.msk.bf16.gmra.mrb[128].mxu0 %vm5200_vm3, %v18574_v21  ;;  %17164 = vmatmul.mubr.msk.bf16.gmra.mrb[220].mxu1 %vm5200_vm3, %v18575_v49 }
0x128e   :  { %17121 = vmatprep.mubr.msk.bf16.mxu0 %vm19445_vm2, %v19444_v15  ;;  %17167 = vmatprep.mubr.msk.bf16.mxu1 %vm19445_vm2, %v19444_v15 }
0x1295   :  { %17122 = vmatmul.mubr.msk.bf16.gmra.mrb[132].mxu0 %vm5200_vm3, %v18576_v13  ;;  %17168 = vmatmul.mubr.msk.bf16.gmra.mrb[224].mxu1 %vm5200_vm3, %v18577_v26 }
0x1296   :  { %17125 = vmatprep.mubr.msk.bf16.mxu0 %vm19445_vm2, %v19444_v15  ;;  %17171 = vmatprep.mubr.msk.bf16.mxu1 %vm19445_vm2, %v19444_v15 }
0x129d   :  { %17126 = vmatmul.mubr.msk.bf16.gmra.mrb[136].mxu0 %vm5200_vm3, %v18578_v5  ;;  %17172 = vmatmul.mubr.msk.bf16.gmra.mrb[228].mxu1 %vm5200_vm3, %v18579_v9  ;;  %v18625_v5 = vld [vmem:[#allocation24 + $0x120] sm:$0xff]   ;;  %v18626_v9 = vld [vmem:[#allocation24 + $0x128] sm:$0xff]  }
0x129e   :  { %17185 = vmatprep.mubr.msk.bf16.mxu0 %vm19445_vm2, %v19444_v15 }
0x12a5   :  { %17186 = vmatmul.mubr.msk.bf16.vlgmr.msra.gmra.mrb[140].mxu0 %vm5200_vm3, %v18580_v4 }
0x12a6   :  { %17189 = vmatprep.mubr.msk.bf16.mxu0 %vm19445_vm2, %v19444_v15  ;;  %16517 = vmatpush3.bf16.msra.mxu0 %v18606_v57 }
0x12a7   :  { %16518 = vmatprep.subr.bf16.mxu0 %v18607_v10 }
0x12aa   :  { %16519 = vmatpush3.bf16.msra.mxu0 %v18608_v56 }
0x12ab   :  { %16520 = vmatprep.subr.bf16.mxu0 %v18609_v12 }
0x12ad   :  { %17190 = vmatmul.mubr.msk.bf16.gmra.mrb[144].mxu0 %vm5200_vm3, %v18581_v37 }
0x12ae   :  { %17193 = vmatprep.mubr.msk.bf16.mxu0 %vm19445_vm2, %v19444_v15  ;;  %16521 = vmatpush3.bf16.msra.mxu0 %v18610_v7 }
0x12af   :  { %16522 = vmatprep.subr.bf16.mxu0 %v18611_v33 }
0x12b2   :  { %16523 = vmatpush3.bf16.msra.mxu0 %v18612_v38 }
0x12b3   :  { %16524 = vmatprep.subr.bf16.mxu0 %v18613_v32 }
0x12b5   :  { %17194 = vmatmul.mubr.msk.bf16.gmra.mrb[148].mxu0 %vm5200_vm3, %v18582_v46  ;;  %v18627_v46 = vld [vmem:[#allocation24 + $0x130] sm:$0xff]  }
0x12b6   :  { %17197 = vmatprep.mubr.msk.bf16.mxu0 %vm19445_vm2, %v19444_v15  ;;  %16525 = vmatpush3.bf16.msra.mxu0 %v18614_v3  ;;  %v18628_v3 = vld [vmem:[#allocation24 + $0x138] sm:$0xff]  }
0x12b7   :  { %16526 = vmatprep.subr.bf16.mxu0 %v18615_v31 }
0x12ba   :  { %16527 = vmatpush3.bf16.msra.mxu0 %v18616_v47 }
0x12bb   :  { %16528 = vmatprep.subr.bf16.mxu0 %v18617_v55 }
0x12bd   :  { %17198 = vmatmul.mubr.msk.bf16.gmra.mrb[152].mxu0 %vm5200_vm3, %v18583_v18 }
0x12be   :  { %17201 = vmatprep.mubr.msk.bf16.mxu0 %vm19445_vm2, %v19444_v15  ;;  %16529 = vmatpush3.bf16.msra.mxu0 %v18618_v19 }
0x12bf   :  { %16530 = vmatprep.subr.bf16.mxu0 %v18619_v24 }
0x12c2   :  { %16531 = vmatpush3.bf16.msra.mxu0 %v18620_v0 }
0x12c3   :  { %11003 = vmatprep.subr.bf16.mxu0 %v22753_v2 }
0x12c5   :  { %17202 = vmatmul.mubr.msk.bf16.gmra.mrb[156].mxu0 %vm5200_vm3, %v18584_v14 }
0x12c6   :  { %17205 = vmatprep.mubr.msk.bf16.mxu0 %vm19445_vm2, %v19444_v15 }
0x12cd   :  { %17206 = vmatmul.mubr.msk.bf16.gmra.mrb[160].mxu0 %vm5200_vm3, %v18585_v25 }
0x12ce   :  { %17209 = vmatprep.mubr.msk.bf16.mxu0 %vm19445_vm2, %v19444_v15 }
0x12d5   :  { %17210 = vmatmul.mubr.msk.bf16.gmra.mrb[164].mxu0 %vm5200_vm3, %v18586_v42 }
0x12d6   :  { %17213 = vmatprep.mubr.msk.bf16.mxu0 %vm19445_vm2, %v19444_v15 }
0x12dd   :  { %17214 = vmatmul.mubr.msk.bf16.gmra.mrb[168].mxu0 %vm5200_vm3, %v18591_v54 }
0x12de   :  { %17217 = vmatprep.mubr.msk.bf16.mxu0 %vm19445_vm2, %v19444_v15 }
0x12e5   :  { %17218 = vmatmul.mubr.msk.bf16.gmra.mrb[172].mxu0 %vm5200_vm3, %v18596_v51 }
0x12e8   :  { %v9410_v60 = vpop.f32.mrb[160].mxu1  ;;  %v9218_v59 = vpop.f32.mrb[68].mxu0 }
0x12e9   :  { %v17049_v11 = vpop.f32.mrb[161].mxu1  ;;  %v17003_v41 = vpop.f32.mrb[69].mxu0 }
0x12ea   :  { %v9413_v20 = vpop.f32.mrb[162].mxu1  ;;  %v9221_v16 = vpop.f32.mrb[70].mxu0 }
0x12eb   :  { %v10056_v30 = vpack.c.bf16 %v9221_v16, %v9218_v59  ;;  %v10057_v1 = vpack.c.bf16 %v9413_v20, %v9410_v60  ;;  %v17004_v35 = vpop.f32.mrb[71].mxu0  ;;  %v17050_v62 = vpop.f32.mrb[163].mxu1 }
0x12ed   :  { %10460 = vmatprep.mubr.bf16.mxu1 %v10057_v1 }
0x12ee   :  { %10461 = vmatmul.mubr.bf16.vlgmr.msra.gmra.mrb[232].mxu1 %v10056_v30 }
0x12ef   :  { %17222 = vmatpush3.bf16.msra.mxu1 %v18621_v36 }
0x12f0   :  { %v9418_v28 = vpop.f32.mrb[164].mxu1  ;;  %v9226_v63 = vpop.f32.mrb[72].mxu0  ;;  %17223 = vmatprep.subr.bf16.mxu1 %v19444_v15 }
0x12f1   :  { %v17053_v8 = vpop.f32.mrb[165].mxu1  ;;  %v17007_v29 = vpop.f32.mrb[73].mxu0 }
0x12f2   :  { %v9421_v6 = vpop.f32.mrb[166].mxu1  ;;  %v9229_v52 = vpop.f32.mrb[74].mxu0 }
0x12f3   :  { %v10061_v53 = vpack.c.bf16 %v9229_v52, %v9226_v63  ;;  %v10062_v50 = vpack.c.bf16 %v9421_v6, %v9418_v28  ;;  %v17008_v45 = vpop.f32.mrb[75].mxu0  ;;  %v17054_v23 = vpop.f32.mrb[167].mxu1  ;;  %17224 = vmatpush3.bf16.msra.mxu1 %v18622_v44 }
0x12f4   :  { %17225 = vmatprep.subr.bf16.mxu1 %v19444_v15 }
0x12f5   :  { %10468 = vmatprep.mubr.bf16.mxu1 %v10062_v50 }
0x12f6   :  { %10469 = vmatmul.mubr.bf16.gmra.mrb[236].mxu1 %v10061_v53 }
0x12f7   :  { %17226 = vmatpush3.bf16.msra.mxu1 %v18623_v58 }
0x12f8   :  { %v9426_v48 = vpop.f32.mrb[168].mxu1  ;;  %v9234_v61 = vpop.f32.mrb[76].mxu0  ;;  %17227 = vmatprep.subr.bf16.mxu1 %v19444_v15 }
0x12f9   :  { %v17057_v22 = vpop.f32.mrb[169].mxu1  ;;  %v17011_v43 = vpop.f32.mrb[77].mxu0 }
0x12fa   :  { %v9429_v40 = vpop.f32.mrb[170].mxu1  ;;  %v9237_v21 = vpop.f32.mrb[78].mxu0 }
0x12fb   :  { %v10066_v49 = vpack.c.bf16 %v9237_v21, %v9234_v61  ;;  %v10067_v27 = vpack.c.bf16 %v9429_v40, %v9426_v48  ;;  %v17012_v13 = vpop.f32.mrb[79].mxu0  ;;  %v17058_v26 = vpop.f32.mrb[171].mxu1  ;;  %17228 = vmatpush3.bf16.msra.mxu1 %v18624_v17 }
0x12fc   :  { %17229 = vmatprep.subr.bf16.mxu1 %v19444_v15 }
0x12fd   :  { %10476 = vmatprep.mubr.bf16.mxu1 %v10067_v27 }
0x12fe   :  { %10477 = vmatmul.mubr.bf16.gmra.mrb[240].mxu1 %v10066_v49 }
0x12ff   :  { %17230 = vmatpush3.bf16.msra.mxu1 %v18625_v5 }
0x1300   :  { %v9434_v4 = vpop.f32.mrb[172].mxu1  ;;  %v9242_v57 = vpop.f32.mrb[80].mxu0  ;;  %17231 = vmatprep.subr.bf16.mxu1 %v19444_v15 }
0x1301   :  { %v17061_v10 = vpop.f32.mrb[173].mxu1  ;;  %v17015_v56 = vpop.f32.mrb[81].mxu0 }
0x1302   :  { %v9437_v12 = vpop.f32.mrb[174].mxu1  ;;  %v9245_v37 = vpop.f32.mrb[82].mxu0 }
0x1303   :  { %v10071_v7 = vpack.c.bf16 %v9245_v37, %v9242_v57  ;;  %v10072_v33 = vpack.c.bf16 %v9437_v12, %v9434_v4  ;;  %v17016_v38 = vpop.f32.mrb[83].mxu0  ;;  %v17062_v32 = vpop.f32.mrb[175].mxu1  ;;  %17232 = vmatpush3.bf16.msra.mxu1 %v18626_v9 }
0x1304   :  { %17233 = vmatprep.subr.bf16.mxu1 %v19444_v15 }
0x1305   :  { %10484 = vmatprep.mubr.bf16.mxu1 %v10072_v33 }
0x1306   :  { %10485 = vmatmul.mubr.bf16.gmra.mrb[244].mxu1 %v10071_v7 }
0x1307   :  { %17234 = vmatpush3.bf16.msra.mxu1 %v18627_v46 }
0x1308   :  { %v9442_v31 = vpop.f32.mrb[176].mxu1  ;;  %v9250_v47 = vpop.f32.mrb[84].mxu0  ;;  %17235 = vmatprep.subr.bf16.mxu1 %v19444_v15 }
0x1309   :  { %v17065_v55 = vpop.f32.mrb[177].mxu1  ;;  %v17019_v18 = vpop.f32.mrb[85].mxu0 }
0x130a   :  { %v9445_v19 = vpop.f32.mrb[178].mxu1  ;;  %v9253_v24 = vpop.f32.mrb[86].mxu0 }
0x130b   :  { %v10076_v0 = vpack.c.bf16 %v9253_v24, %v9250_v47  ;;  %v10077_v14 = vpack.c.bf16 %v9445_v19, %v9442_v31  ;;  %v17020_v25 = vpop.f32.mrb[87].mxu0  ;;  %v17066_v42 = vpop.f32.mrb[179].mxu1  ;;  %17236 = vmatpush3.bf16.msra.mxu1 %v18628_v3 }
0x130c   :  { %12212 = vmatprep.subr.bf16.mxu1 %v22753_v2 }
0x130d   :  { %10492 = vmatprep.mubr.bf16.mxu1 %v10077_v14 }
0x130e   :  { %10493 = vmatmul.mubr.bf16.gmra.mrb[248].mxu1 %v10076_v0 }
0x1310   :  { %v9450_v54 = vpop.f32.mrb[180].mxu1  ;;  %v9258_v51 = vpop.f32.mrb[88].mxu0 }
0x1311   :  { %v17069_v60 = vpop.f32.mrb[181].mxu1  ;;  %v17023_v59 = vpop.f32.mrb[89].mxu0 }
0x1312   :  { %v9453_v11 = vpop.f32.mrb[182].mxu1  ;;  %v9261_v41 = vpop.f32.mrb[90].mxu0 }
0x1313   :  { %v10081_v20 = vpack.c.bf16 %v9261_v41, %v9258_v51  ;;  %v10082_v16 = vpack.c.bf16 %v9453_v11, %v9450_v54  ;;  %v17024_v30 = vpop.f32.mrb[91].mxu0  ;;  %v17070_v1 = vpop.f32.mrb[183].mxu1 }
0x1315   :  { %10500 = vmatprep.mubr.bf16.mxu1 %v10082_v16 }
0x1316   :  { %10501 = vmatmul.mubr.bf16.gmra.mrb[252].mxu1 %v10081_v20 }
0x1318   :  { %v9458_v35 = vpop.f32.mrb[184].mxu1  ;;  %v9266_v62 = vpop.f32.mrb[92].mxu0 }
0x1319   :  { %v17073_v36 = vpop.f32.mrb[185].mxu1  ;;  %v17027_v44 = vpop.f32.mrb[93].mxu0 }
0x131a   :  { %v9461_v28 = vpop.f32.mrb[186].mxu1  ;;  %v9269_v63 = vpop.f32.mrb[94].mxu0 }
0x131b   :  { %v10087_v8 = vpack.c.bf16 %v9461_v28, %v9458_v35  ;;  %v10086_v29 = vpack.c.bf16 %v9269_v63, %v9266_v62  ;;  %v17028_v6 = vpop.f32.mrb[95].mxu0  ;;  %v17074_v52 = vpop.f32.mrb[187].mxu1 }
0x131d   :  { %10508 = vmatprep.mubr.bf16.mxu1 %v10087_v8 }
0x131e   :  { %10509 = vmatmul.mubr.bf16.gmra.mrb[0].mxu1 %v10086_v29 }
0x1320   :  { %v9466_v53 = vpop.f32.mrb[188].mxu1  ;;  %v9274_v50 = vpop.f32.mrb[96].mxu0 }
0x1321   :  { %v17077_v45 = vpop.f32.mrb[189].mxu1  ;;  %v17031_v23 = vpop.f32.mrb[97].mxu0 }
0x1322   :  { %v9469_v58 = vpop.f32.mrb[190].mxu1  ;;  %v9277_v17 = vpop.f32.mrb[98].mxu0 }
0x1323   :  { %v10092_v48 = vpack.c.bf16 %v9469_v58, %v9466_v53  ;;  %v10091_v61 = vpack.c.bf16 %v9277_v17, %v9274_v50  ;;  %v17078_v22 = vpop.f32.mrb[191].mxu1  ;;  %v17032_v43 = vpop.f32.mrb[99].mxu0 }
0x1325   :  { %10516 = vmatprep.mubr.bf16.mxu1 %v10092_v48 }
0x1326   :  { %10517 = vmatmul.mubr.bf16.gmra.mrb[4].mxu1 %v10091_v61 }
0x1328   :  { %v9474_v40 = vpop.f32.mrb[192].mxu1  ;;  %v9282_v21 = vpop.f32.mrb[100].mxu0 }
0x1329   :  { %v10097_v49 = vpack.c.bf16 %v9474_v40, %v9474_v40  ;;  %v17081_v27 = vpop.f32.mrb[193].mxu1  ;;  %v17035_v13 = vpop.f32.mrb[101].mxu0  ;;  %v10096_v57 = vpack.c.bf16 %v9282_v21, %v9282_v21 }
0x132a   :  { %v9477_v26 = vpop.f32.mrb[194].mxu1  ;;  %v9285_v5 = vpop.f32.mrb[102].mxu0 }
0x132b   :  { %v17082_v9 = vpop.f32.mrb[195].mxu1  ;;  %v17036_v4 = vpop.f32.mrb[103].mxu0  ;;  %10524 = vmatprep.mubr.bf16.mxu1 %v10097_v49 }
0x132e   :  { %10525 = vmatmul.mubr.bf16.gmra.mrb[8].mxu1 %v10096_v57 }
0x132f   :  { %17237 = vmatprep.mubr.msk.bf16.mxu1 %vm19445_vm2, %v19444_v15 }
0x1330   :  { %v9794_v10 = vpop.f32.mrb[196].mxu1  ;;  %v9602_v56 = vpop.f32.mrb[104].mxu0 }
0x1331   :  { %v17141_v12 = vpop.f32.mrb[197].mxu1  ;;  %v17095_v37 = vpop.f32.mrb[105].mxu0 }
0x1332   :  { %v9797_v7 = vpop.f32.mrb[198].mxu1  ;;  %v9605_v33 = vpop.f32.mrb[106].mxu0 }
0x1333   :  { %v10059_v38 = vpack.c.bf16 %v9797_v7, %v9794_v10  ;;  %v10058_v32 = vpack.c.bf16 %v9605_v33, %v9602_v56  ;;  %v17142_v46 = vpop.f32.mrb[199].mxu1  ;;  %v17096_v3 = vpop.f32.mrb[107].mxu0 }
0x1335   :  { %10564 = vmatprep.mubr.bf16.mxu0 %v10059_v38 }
0x1336   :  { %10565 = vmatmul.mubr.bf16.vlgmr.msra.gmra.mrb[176].mxu0 %v10058_v32 }
0x1338   :  { %v9802_v31 = vpop.f32.mrb[200].mxu1  ;;  %v9610_v47 = vpop.f32.mrb[108].mxu0 }
0x1339   :  { %v17145_v55 = vpop.f32.mrb[201].mxu1  ;;  %v17099_v18 = vpop.f32.mrb[109].mxu0 }
0x133a   :  { %v9805_v19 = vpop.f32.mrb[202].mxu1  ;;  %v9613_v24 = vpop.f32.mrb[110].mxu0 }
0x133b   :  { %v10064_v0 = vpack.c.bf16 %v9805_v19, %v9802_v31  ;;  %v10063_v14 = vpack.c.bf16 %v9613_v24, %v9610_v47  ;;  %v17146_v25 = vpop.f32.mrb[203].mxu1  ;;  %v17100_v42 = vpop.f32.mrb[111].mxu0 }
0x133d   :  { %10572 = vmatprep.mubr.bf16.mxu0 %v10064_v0 }
0x133e   :  { %10573 = vmatmul.mubr.bf16.gmra.mrb[180].mxu0 %v10063_v14 }
0x1340   :  { %v9810_v54 = vpop.f32.mrb[204].mxu1  ;;  %v9618_v51 = vpop.f32.mrb[112].mxu0 }
0x1341   :  { %v17149_v60 = vpop.f32.mrb[205].mxu1  ;;  %v17103_v59 = vpop.f32.mrb[113].mxu0 }
0x1342   :  { %v9813_v11 = vpop.f32.mrb[206].mxu1  ;;  %v9621_v41 = vpop.f32.mrb[114].mxu0 }
0x1343   :  { %v10069_v20 = vpack.c.bf16 %v9813_v11, %v9810_v54  ;;  %v10068_v16 = vpack.c.bf16 %v9621_v41, %v9618_v51  ;;  %v17150_v30 = vpop.f32.mrb[207].mxu1  ;;  %v17104_v1 = vpop.f32.mrb[115].mxu0 }
0x1345   :  { %10580 = vmatprep.mubr.bf16.mxu0 %v10069_v20 }
0x1346   :  { %10581 = vmatmul.mubr.bf16.gmra.mrb[184].mxu0 %v10068_v16 }
0x1348   :  { %v9818_v35 = vpop.f32.mrb[208].mxu1  ;;  %v9626_v62 = vpop.f32.mrb[116].mxu0 }
0x1349   :  { %v17153_v36 = vpop.f32.mrb[209].mxu1  ;;  %v17107_v44 = vpop.f32.mrb[117].mxu0 }
0x134a   :  { %v9821_v28 = vpop.f32.mrb[210].mxu1  ;;  %v9629_v63 = vpop.f32.mrb[118].mxu0 }
0x134b   :  { %v10074_v8 = vpack.c.bf16 %v9821_v28, %v9818_v35  ;;  %v10073_v29 = vpack.c.bf16 %v9629_v63, %v9626_v62  ;;  %v17154_v6 = vpop.f32.mrb[211].mxu1  ;;  %v17108_v52 = vpop.f32.mrb[119].mxu0 }
0x134d   :  { %10588 = vmatprep.mubr.bf16.mxu0 %v10074_v8 }
0x134e   :  { %10589 = vmatmul.mubr.bf16.gmra.mrb[188].mxu0 %v10073_v29 }
0x1350   :  { %v9826_v53 = vpop.f32.mrb[212].mxu1  ;;  %v9634_v50 = vpop.f32.mrb[120].mxu0 }
0x1351   :  { %v17157_v45 = vpop.f32.mrb[213].mxu1  ;;  %v17111_v23 = vpop.f32.mrb[121].mxu0 }
0x1352   :  { %v9829_v58 = vpop.f32.mrb[214].mxu1  ;;  %v9637_v17 = vpop.f32.mrb[122].mxu0 }
0x1353   :  { %v10079_v48 = vpack.c.bf16 %v9829_v58, %v9826_v53  ;;  %v10078_v61 = vpack.c.bf16 %v9637_v17, %v9634_v50  ;;  %v17158_v22 = vpop.f32.mrb[215].mxu1  ;;  %v17112_v43 = vpop.f32.mrb[123].mxu0 }
0x1355   :  { %10596 = vmatprep.mubr.bf16.mxu0 %v10079_v48 }
0x1356   :  { %10597 = vmatmul.mubr.bf16.gmra.mrb[192].mxu0 %v10078_v61 }
0x1358   :  { %v9834_v40 = vpop.f32.mrb[216].mxu1  ;;  %v9642_v21 = vpop.f32.mrb[124].mxu0 }
0x1359   :  { %v17161_v49 = vpop.f32.mrb[217].mxu1  ;;  %v17115_v27 = vpop.f32.mrb[125].mxu0 }
0x135a   :  { %v9837_v13 = vpop.f32.mrb[218].mxu1  ;;  %v9645_v26 = vpop.f32.mrb[126].mxu0 }
0x135b   :  { %v10084_v5 = vpack.c.bf16 %v9837_v13, %v9834_v40  ;;  %v10083_v9 = vpack.c.bf16 %v9645_v26, %v9642_v21  ;;  %v17162_v4 = vpop.f32.mrb[219].mxu1  ;;  %v17116_v57 = vpop.f32.mrb[127].mxu0 }
0x135d   :  { %10604 = vmatprep.mubr.bf16.mxu0 %v10084_v5 }
0x135e   :  { %10605 = vmatmul.mubr.bf16.gmra.mrb[196].mxu0 %v10083_v9 }
0x1360   :  { %v9842_v10 = vpop.f32.mrb[220].mxu1  ;;  %v9650_v56 = vpop.f32.mrb[128].mxu0 }
0x1361   :  { %v17165_v12 = vpop.f32.mrb[221].mxu1  ;;  %v17119_v37 = vpop.f32.mrb[129].mxu0 }
0x1362   :  { %v9845_v7 = vpop.f32.mrb[222].mxu1  ;;  %v9653_v33 = vpop.f32.mrb[130].mxu0 }
0x1363   :  { %v10089_v38 = vpack.c.bf16 %v9845_v7, %v9842_v10  ;;  %v10088_v32 = vpack.c.bf16 %v9653_v33, %v9650_v56  ;;  %v17166_v46 = vpop.f32.mrb[223].mxu1  ;;  %v17120_v3 = vpop.f32.mrb[131].mxu0 }
0x1365   :  { %10612 = vmatprep.mubr.bf16.mxu0 %v10089_v38 }
0x1366   :  { %10613 = vmatmul.mubr.bf16.gmra.mrb[200].mxu0 %v10088_v32 }
0x1368   :  { %v9850_v31 = vpop.f32.mrb[224].mxu1  ;;  %v9658_v47 = vpop.f32.mrb[132].mxu0 }
0x1369   :  { %v17169_v55 = vpop.f32.mrb[225].mxu1  ;;  %v17123_v18 = vpop.f32.mrb[133].mxu0 }
0x136a   :  { %v9853_v19 = vpop.f32.mrb[226].mxu1  ;;  %v9661_v24 = vpop.f32.mrb[134].mxu0 }
0x136b   :  { %v10094_v0 = vpack.c.bf16 %v9853_v19, %v9850_v31  ;;  %v10093_v14 = vpack.c.bf16 %v9661_v24, %v9658_v47  ;;  %v17170_v25 = vpop.f32.mrb[227].mxu1  ;;  %v17124_v42 = vpop.f32.mrb[135].mxu0 }
0x136d   :  { %10620 = vmatprep.mubr.bf16.mxu0 %v10094_v0 }
0x136e   :  { %10621 = vmatmul.mubr.bf16.gmra.mrb[204].mxu0 %v10093_v14 }
0x1370   :  { %v9858_v54 = vpop.f32.mrb[228].mxu1  ;;  %v9666_v51 = vpop.f32.mrb[136].mxu0 }
0x1371   :  { %v10099_v60 = vpack.c.bf16 %v9858_v54, %v9858_v54  ;;  %v17127_v59 = vpop.f32.mrb[137].mxu0  ;;  %v17173_v11 = vpop.f32.mrb[229].mxu1  ;;  %v10098_v1 = vpack.c.bf16 %v9666_v51, %v9666_v51 }
0x1372   :  { %v9669_v41 = vpop.f32.mrb[138].mxu0  ;;  %v9861_v20 = vpop.f32.mrb[230].mxu1 }
0x1373   :  { %10628 = vmatprep.mubr.bf16.mxu0 %v10099_v60  ;;  %v17128_v16 = vpop.f32.mrb[139].mxu0  ;;  %v17174_v30 = vpop.f32.mrb[231].mxu1 }
0x1376   :  { %10629 = vmatmul.mubr.bf16.gmra.mrb[208].mxu0 %v10098_v1 }
0x1378   :  { %v9986_v35 = vpop.f32.mrb[140].mxu0 }
0x1379   :  { %v17187_v62 = vpop.f32.mrb[141].mxu0 }
0x137a   :  { %v9989_v36 = vpop.f32.mrb[142].mxu0 }
0x137b   :  { %v10060_v44 = vpack.c.bf16 %v9989_v36, %v9986_v35  ;;  %v17188_v28 = vpop.f32.mrb[143].mxu0 }
0x137d   :  { %17238 = vmatmul.mubr.bf16.vlgmr.msra.gmra.mrb[12].mxu1 %v10060_v44 }
0x137e   :  { %17241 = vmatprep.mubr.msk.bf16.mxu1 %vm19445_vm2, %v19444_v15 }
0x1380   :  { %v9994_v63 = vpop.f32.mrb[144].mxu0 }
0x1381   :  { %v17191_v8 = vpop.f32.mrb[145].mxu0 }
0x1382   :  { %v9997_v29 = vpop.f32.mrb[146].mxu0 }
0x1383   :  { %v10065_v6 = vpack.c.bf16 %v9997_v29, %v9994_v63  ;;  %v17192_v52 = vpop.f32.mrb[147].mxu0 }
0x1385   :  { %17242 = vmatmul.mubr.bf16.gmra.mrb[16].mxu1 %v10065_v6 }
0x1386   :  { %17245 = vmatprep.mubr.msk.bf16.mxu1 %vm19445_vm2, %v19444_v15 }
0x1388   :  { %v10002_v53 = vpop.f32.mrb[148].mxu0 }
0x1389   :  { %v17195_v50 = vpop.f32.mrb[149].mxu0 }
0x138a   :  { %v10005_v45 = vpop.f32.mrb[150].mxu0 }
0x138b   :  { %v10070_v23 = vpack.c.bf16 %v10005_v45, %v10002_v53  ;;  %v17196_v58 = vpop.f32.mrb[151].mxu0 }
0x138d   :  { %17246 = vmatmul.mubr.bf16.gmra.mrb[20].mxu1 %v10070_v23 }
0x138e   :  { %17249 = vmatprep.mubr.msk.bf16.mxu1 %vm19445_vm2, %v19444_v15 }
0x1390   :  { %v10010_v17 = vpop.f32.mrb[152].mxu0 }
0x1391   :  { %v17199_v48 = vpop.f32.mrb[153].mxu0 }
0x1392   :  { %v10013_v61 = vpop.f32.mrb[154].mxu0 }
0x1393   :  { %v10075_v22 = vpack.c.bf16 %v10013_v61, %v10010_v17  ;;  %v17200_v43 = vpop.f32.mrb[155].mxu0 }
0x1395   :  { %17250 = vmatmul.mubr.bf16.gmra.mrb[24].mxu1 %v10075_v22 }
0x1396   :  { %17253 = vmatprep.mubr.msk.bf16.mxu1 %vm19445_vm2, %v19444_v15 }
0x1398   :  { %v10018_v40 = vpop.f32.mrb[156].mxu0 }
0x1399   :  { %v17203_v21 = vpop.f32.mrb[157].mxu0 }
0x139a   :  { %v10021_v49 = vpop.f32.mrb[158].mxu0 }
0x139b   :  { %v10080_v27 = vpack.c.bf16 %v10021_v49, %v10018_v40  ;;  %v17204_v13 = vpop.f32.mrb[159].mxu0 }
0x139d   :  { %17254 = vmatmul.mubr.bf16.gmra.mrb[28].mxu1 %v10080_v27 }
0x139e   :  { %17257 = vmatprep.mubr.msk.bf16.mxu1 %vm19445_vm2, %v19444_v15 }
0x13a0   :  { %v10026_v26 = vpop.f32.mrb[160].mxu0 }
0x13a1   :  { %v17207_v5 = vpop.f32.mrb[161].mxu0 }
0x13a2   :  { %v10029_v9 = vpop.f32.mrb[162].mxu0 }
0x13a3   :  { %v10085_v4 = vpack.c.bf16 %v10029_v9, %v10026_v26  ;;  %v17208_v57 = vpop.f32.mrb[163].mxu0 }
0x13a5   :  { %17258 = vmatmul.mubr.bf16.gmra.mrb[32].mxu1 %v10085_v4 }
0x13a6   :  { %17261 = vmatprep.mubr.msk.bf16.mxu1 %vm19445_vm2, %v19444_v15 }
0x13a8   :  { %v10034_v10 = vpop.f32.mrb[164].mxu0 }
0x13a9   :  { %v17211_v56 = vpop.f32.mrb[165].mxu0 }
0x13aa   :  { %v10037_v12 = vpop.f32.mrb[166].mxu0 }
0x13ab   :  { %v10090_v37 = vpack.c.bf16 %v10037_v12, %v10034_v10  ;;  %v17212_v7 = vpop.f32.mrb[167].mxu0 }
0x13ad   :  { %17262 = vmatmul.mubr.bf16.gmra.mrb[36].mxu1 %v10090_v37 }
0x13ae   :  { %17265 = vmatprep.mubr.msk.bf16.mxu1 %vm19445_vm2, %v19444_v15 }
0x13b0   :  { %v10042_v33 = vpop.f32.mrb[168].mxu0 }
0x13b1   :  { %v17215_v38 = vpop.f32.mrb[169].mxu0 }
0x13b2   :  { %v10045_v32 = vpop.f32.mrb[170].mxu0 }
0x13b3   :  { %v10095_v46 = vpack.c.bf16 %v10045_v32, %v10042_v33  ;;  %v17216_v3 = vpop.f32.mrb[171].mxu0  ;;  %v21768_v32 = vld [vmem:[#allocation25] ss:$0 sm:$0xff] }
0x13b5   :  { %17266 = vmatmul.mubr.bf16.gmra.mrb[40].mxu1 %v10095_v46 }
0x13b6   :  { %17269 = vmatprep.mubr.msk.bf16.mxu1 %vm19445_vm2, %v19444_v15 }
0x13b8   :  { %v10050_v31 = vpop.f32.mrb[172].mxu0 }
0x13b9   :  { %v10100_v47 = vpack.c.bf16 %v10050_v31, %v10050_v31  ;;  %v17219_v55 = vpop.f32.mrb[173].mxu0 }
0x13ba   :  { %v10053_v18 = vpop.f32.mrb[174].mxu0 }
0x13bb   :  { %v17220_v19 = vpop.f32.mrb[175].mxu0 }
0x13bd   :  { %17270 = vmatmul.mubr.bf16.gmra.mrb[44].mxu1 %v10100_v47 }
0x13c1   :  { %v16462_v24 = vpop.f32.mrb[232].mxu1 }
0x13c2   :  { %v16463_v0 = vpop.f32.mrb[233].mxu1 }
0x13c3   :  { %v16464_v14 = vadd.f32 %v16463_v0, %v16462_v24  ;;  %v16465_v25 = vpop.f32.mrb[234].mxu1 }
0x13c4   :  { %v16466_v42 = vpop.f32.mrb[235].mxu1 }
0x13c5   :  { %v16467_v54 = vadd.f32 %v16466_v42, %v16465_v25  ;;  %v10463_v31 = vadd.f32 %v16464_v14, %v21768_v32 }
0x13c7   :  { %v10466_v19 = vadd.f32 %v16467_v54, %v21768_v32  ;;  %v18631_v54 = vld [vmem:[%s22782_s19 + $0x4] ss:$8 sps:$4 sm:$0xff]  }
0x13c8   :  { %15266 = vmatprep.mubr.msk.bf16.mxu0 %vm604_vm1, %v18631_v54 }
0x13c9   :  { %v16468_v51 = vpop.f32.mrb[236].mxu1 }
0x13ca   :  { %v16469_v60 = vpop.f32.mrb[237].mxu1 }
0x13cb   :  { %v16470_v59 = vadd.f32 %v16469_v60, %v16468_v51  ;;  %v16471_v11 = vpop.f32.mrb[238].mxu1 }
0x13cc   :  { %v16472_v41 = vpop.f32.mrb[239].mxu1 }
0x13cd   :  { %v16473_v20 = vadd.f32 %v16472_v41, %v16471_v11  ;;  %v10471_v60 = vadd.f32 %v16470_v59, %v21768_v32 }
0x13cf   :  { %v10474_v14 = vadd.f32 %v16473_v20, %v21768_v32 }
0x13d1   :  { %v16474_v16 = vpop.f32.mrb[240].mxu1 }
0x13d2   :  { %v16475_v15 = vpop.f32.mrb[241].mxu1 }
0x13d3   :  { %v21742_v30 = vadd.f32 %v16475_v15, %v16474_v16  ;;  %v16477_v1 = vpop.f32.mrb[242].mxu1 }
0x13d4   :  { %v16478_v35 = vpop.f32.mrb[243].mxu1 }
0x13d5   :  { %v21744_v62 = vadd.f32 %v16478_v35, %v16477_v1 }
0x13d9   :  { %v16480_v36 = vpop.f32.mrb[244].mxu1 }
0x13da   :  { %v16481_v44 = vpop.f32.mrb[245].mxu1 }
0x13db   :  { %v21746_v28 = vadd.f32 %v16481_v44, %v16480_v36  ;;  %v16483_v63 = vpop.f32.mrb[246].mxu1 }
0x13dc   :  { %v16484_v8 = vpop.f32.mrb[247].mxu1 }
0x13dd   :  { %v21748_v29 = vadd.f32 %v16484_v8, %v16483_v63  ;;  %v10479_v63 = vadd.f32 %v21742_v30, %v21768_v32 }
0x13df   :  { %v10490_v30 = vadd.f32 %v21748_v29, %v21768_v32 }
0x13e1   :  { %v16486_v6 = vpop.f32.mrb[248].mxu1 }
0x13e2   :  { %v16487_v52 = vpop.f32.mrb[249].mxu1 }
0x13e3   :  { %v21750_v53 = vadd.f32 %v16487_v52, %v16486_v6  ;;  %v16489_v50 = vpop.f32.mrb[250].mxu1  ;;  %v10482_v52 = vadd.f32 %v21744_v62, %v21768_v32 }
0x13e4   :  { %v16490_v45 = vpop.f32.mrb[251].mxu1 }
0x13e5   :  { %v21752_v23 = vadd.f32 %v16490_v45, %v16489_v50 }
0x13e9   :  { %v16492_v58 = vpop.f32.mrb[252].mxu1 }
0x13ea   :  { %v16493_v17 = vpop.f32.mrb[253].mxu1 }
0x13eb   :  { %v21754_v48 = vadd.f32 %v16493_v17, %v16492_v58  ;;  %v16495_v61 = vpop.f32.mrb[254].mxu1 }
0x13ec   :  { %v16496_v22 = vpop.f32.mrb[255].mxu1 }
0x13ed   :  { %v21756_v43 = vadd.f32 %v16496_v22, %v16495_v61  ;;  %v10487_v61 = vadd.f32 %v21746_v28, %v21768_v32  ;;  %v10498_v28 = vadd.f32 %v21752_v23, %v21768_v32 }
0x13f1   :  { %v16498_v40 = vpop.f32.mrb[0].mxu1 }
0x13f2   :  { %v16499_v21 = vpop.f32.mrb[1].mxu1 }
0x13f3   :  { %v21758_v49 = vadd.f32 %v16499_v21, %v16498_v40  ;;  %v16501_v27 = vpop.f32.mrb[2].mxu1 }
0x13f4   :  { %v16502_v13 = vpop.f32.mrb[3].mxu1 }
0x13f5   :  { %v21760_v26 = vadd.f32 %v16502_v13, %v16501_v27 }
0x13f9   :  { %v16504_v5 = vpop.f32.mrb[4].mxu1 }
0x13fa   :  { %v16505_v9 = vpop.f32.mrb[5].mxu1 }
0x13fb   :  { %v21762_v4 = vadd.f32 %v16505_v9, %v16504_v5  ;;  %v16507_v57 = vpop.f32.mrb[6].mxu1 }
0x13fc   :  { %v16508_v10 = vpop.f32.mrb[7].mxu1 }
0x13fd   :  { %v21764_v56 = vadd.f32 %v16508_v10, %v16507_v57  ;;  %v10495_v57 = vadd.f32 %v21750_v53, %v21768_v32  ;;  %v10506_v53 = vadd.f32 %v21756_v43, %v21768_v32 }
0x1401   :  { %v16510_v12 = vpop.f32.mrb[8].mxu1 }
0x1402   :  { %v16511_v37 = vpop.f32.mrb[9].mxu1 }
0x1403   :  { %v21766_v7 = vadd.f32 %v16511_v37, %v16510_v12  ;;  %v16513_v33 = vpop.f32.mrb[10].mxu1 }
0x1404   :  { %v16514_v38 = vpop.f32.mrb[11].mxu1 }
0x1409   :  { %v16532_v46 = vpop.f32.mrb[176].mxu0 }
0x140a   :  { %v16533_v3 = vpop.f32.mrb[177].mxu0 }
0x140b   :  { %v16534_v47 = vadd.f32 %v16533_v3, %v16532_v46  ;;  %v16535_v55 = vpop.f32.mrb[178].mxu0 }
0x140c   :  { %v16536_v18 = vpop.f32.mrb[179].mxu0 }
0x140d   :  { %v16537_v24 = vadd.f32 %v16536_v18, %v16535_v55  ;;  %v21772_v0 = vadd.f32 %v16534_v47, %v10463_v31  ;;  %v10503_v31 = vadd.f32 %v21754_v48, %v21768_v32  ;;  %v10514_v48 = vadd.f32 %v21760_v26, %v21768_v32 }
0x140f   :  { %v21774_v25 = vadd.f32 %v16537_v24, %v10466_v19 }
0x1411   :  { %v16538_v42 = vpop.f32.mrb[180].mxu0 }
0x1412   :  { %v16539_v51 = vpop.f32.mrb[181].mxu0 }
0x1413   :  { %v16540_v11 = vadd.f32 %v16539_v51, %v16538_v42  ;;  %v16541_v41 = vpop.f32.mrb[182].mxu0 }
0x1414   :  { %v16542_v16 = vpop.f32.mrb[183].mxu0 }
0x1415   :  { %v16543_v15 = vadd.f32 %v16542_v16, %v16541_v41  ;;  %v21778_v1 = vadd.f32 %v16540_v11, %v10471_v60  ;;  %v10511_v60 = vadd.f32 %v21758_v49, %v21768_v32  ;;  %v10522_v49 = vadd.f32 %v21764_v56, %v21768_v32 }
0x1417   :  { %v21780_v35 = vadd.f32 %v16543_v15, %v10474_v14 }
0x1419   :  { %v16544_v36 = vpop.f32.mrb[184].mxu0 }
0x141a   :  { %v16545_v44 = vpop.f32.mrb[185].mxu0 }
0x141b   :  { %v16546_v8 = vadd.f32 %v16545_v44, %v16544_v36  ;;  %v16547_v59 = vpop.f32.mrb[186].mxu0  ;;  %v10519_v44 = vadd.f32 %v21762_v4, %v21768_v32 }
0x141c   :  { %v16548_v6 = vpop.f32.mrb[187].mxu0 }
0x141d   :  { %v16549_v20 = vadd.f32 %v16548_v6, %v16547_v59  ;;  %v21788_v50 = vadd.f32 %v16546_v8, %v10479_v63 }
0x141f   :  { %v21790_v45 = vadd.f32 %v16549_v20, %v10482_v52 }
0x1421   :  { %v16550_v58 = vpop.f32.mrb[188].mxu0 }
0x1422   :  { %v16551_v17 = vpop.f32.mrb[189].mxu0 }
0x1423   :  { %v16552_v22 = vadd.f32 %v16551_v17, %v16550_v58  ;;  %v16553_v40 = vpop.f32.mrb[190].mxu0  ;;  %v10527_v17 = vadd.f32 %v21766_v7, %v21768_v32 }
0x1424   :  { %v16554_v21 = vpop.f32.mrb[191].mxu0 }
0x1425   :  { %v16555_v27 = vadd.f32 %v16554_v21, %v16553_v40  ;;  %v21796_v13 = vadd.f32 %v16552_v22, %v10487_v61 }
0x1427   :  { %v21798_v62 = vadd.f32 %v16555_v27, %v10490_v30 }
0x1429   :  { %v16556_v5 = vpop.f32.mrb[192].mxu0 }
0x142a   :  { %v16557_v9 = vpop.f32.mrb[193].mxu0 }
0x142b   :  { %v16558_v10 = vadd.f32 %v16557_v9, %v16556_v5  ;;  %v16559_v12 = vpop.f32.mrb[194].mxu0 }
0x142c   :  { %v16560_v37 = vpop.f32.mrb[195].mxu0 }
0x142d   :  { %v16561_v33 = vadd.f32 %v16560_v37, %v16559_v12  ;;  %v21804_v38 = vadd.f32 %v16558_v10, %v10495_v57 }
0x142f   :  { %v21806_v29 = vadd.f32 %v16561_v33, %v10498_v28 }
0x1431   :  { %v16562_v46 = vpop.f32.mrb[196].mxu0 }
0x1432   :  { %v16563_v3 = vpop.f32.mrb[197].mxu0 }
0x1433   :  { %v16564_v47 = vadd.f32 %v16563_v3, %v16562_v46  ;;  %v16565_v55 = vpop.f32.mrb[198].mxu0 }
0x1434   :  { %v16566_v18 = vpop.f32.mrb[199].mxu0 }
0x1435   :  { %v16567_v19 = vadd.f32 %v16566_v18, %v16565_v55  ;;  %v21812_v24 = vadd.f32 %v16564_v47, %v10503_v31 }
0x1437   :  { %v21814_v23 = vadd.f32 %v16567_v19, %v10506_v53 }
0x1439   :  { %v16568_v42 = vpop.f32.mrb[200].mxu0 }
0x143a   :  { %v16569_v51 = vpop.f32.mrb[201].mxu0 }
0x143b   :  { %v16570_v11 = vadd.f32 %v16569_v51, %v16568_v42  ;;  %v16571_v41 = vpop.f32.mrb[202].mxu0 }
0x143c   :  { %v16572_v16 = vpop.f32.mrb[203].mxu0 }
0x143d   :  { %v16573_v14 = vadd.f32 %v16572_v16, %v16571_v41  ;;  %v21820_v15 = vadd.f32 %v16570_v11, %v10511_v60 }
0x143f   :  { %v21822_v43 = vadd.f32 %v16573_v14, %v10514_v48 }
0x1441   :  { %v16574_v54 = vpop.f32.mrb[204].mxu0 }
0x1442   :  { %v16575_v36 = vpop.f32.mrb[205].mxu0 }
0x1443   :  { %v16576_v63 = vadd.f32 %v16575_v36, %v16574_v54  ;;  %v16577_v8 = vpop.f32.mrb[206].mxu0 }
0x1444   :  { %v16578_v59 = vpop.f32.mrb[207].mxu0 }
0x1445   :  { %v16579_v6 = vadd.f32 %v16578_v59, %v16577_v8  ;;  %v21828_v52 = vadd.f32 %v16576_v63, %v10519_v44 }
0x1447   :  { %v21830_v26 = vadd.f32 %v16579_v6, %v10522_v49 }
0x1449   :  { %v16580_v20 = vpop.f32.mrb[208].mxu0 }
0x144a   :  { %v16581_v58 = vpop.f32.mrb[209].mxu0 }
0x144b   :  { %v16582_v61 = vadd.f32 %v16581_v58, %v16580_v20  ;;  %v16583_v22 = vpop.f32.mrb[210].mxu0 }
0x144c   :  { %v16584_v40 = vpop.f32.mrb[211].mxu0 }
0x144d   :  { %v21834_v4 = vadd.f32 %v16582_v61, %v10527_v17 }
0x1450   :  { %v10670_v21 = vpop.f32.mrb[12].mxu1 }
0x1451   :  { %v10671_v30 = vadd.f32 %v10670_v21, %v21772_v0  ;;  %v17239_v27 = vpop.f32.mrb[13].mxu1 }
0x1452   :  { %v10673_v56 = vpop.f32.mrb[14].mxu1 }
0x1453   :  { %v10674_v5 = vadd.f32 %v10673_v56, %v21774_v25  ;;  %v17240_v9 = vpop.f32.mrb[15].mxu1  ;;  %v10740_v57 = vmax.f32 %v10671_v30, 0.0 }
0x1455   :  { %v10741_v10 = vmax.f32 %v10674_v5, 0.0 }
0x1457   :  { %v21838_v12 = vpack.c.bf16 %v10741_v10, %v10740_v57 }
0x1458   :  { %v10678_v37 = vpop.f32.mrb[16].mxu1 }
0x1459   :  { %v10679_v7 = vadd.f32 %v10678_v37, %v21778_v1  ;;  %v17243_v32 = vpop.f32.mrb[17].mxu1  ;;  %11004 = vmatpush1.bf16.msra.mxu0 %v21838_v12  ;;  %12213 = vmatpush1.bf16.msra.mxu1 %v21838_v12 }
0x145a   :  { %v10681_v28 = vpop.f32.mrb[18].mxu1  ;;  %11005 = vmatprep.subr.bf16.mxu0 %v22753_v2  ;;  %12214 = vmatprep.subr.bf16.mxu1 %v22753_v2 }
0x145b   :  { %v10682_v0 = vadd.f32 %v10681_v28, %v21780_v35  ;;  %v17244_v25 = vpop.f32.mrb[19].mxu1  ;;  %v10742_v33 = vmax.f32 %v10679_v7, 0.0 }
0x145d   :  { %v10743_v46 = vmax.f32 %v10682_v0, 0.0 }
0x145f   :  { %v21846_v3 = vpack.c.bf16 %v10743_v46, %v10742_v33 }
0x1460   :  { %v10686_v31 = vpop.f32.mrb[20].mxu1 }
0x1461   :  { %v10687_v1 = vadd.f32 %v10686_v31, %v21788_v50  ;;  %v17247_v47 = vpop.f32.mrb[21].mxu1  ;;  %11006 = vmatpush1.bf16.msra.mxu0 %v21846_v3  ;;  %12215 = vmatpush1.bf16.msra.mxu1 %v21846_v3 }
0x1462   :  { %v10689_v55 = vpop.f32.mrb[22].mxu1  ;;  %11007 = vmatprep.subr.bf16.mxu0 %v22753_v2  ;;  %12216 = vmatprep.subr.bf16.mxu1 %v22753_v2 }
0x1463   :  { %v10690_v35 = vadd.f32 %v10689_v55, %v21790_v45  ;;  %v17248_v18 = vpop.f32.mrb[23].mxu1  ;;  %v10744_v53 = vmax.f32 %v10687_v1, 0.0 }
0x1464   :  { %v18632_v18 = vld [vmem:[%s22782_s19 + $0x10] ss:$8 sps:$4 sm:$0xff]  }
0x1465   :  { %v10745_v19 = vmax.f32 %v10690_v35, 0.0  ;;  %v18629_v35 = vld [vmem:[%s22782_s19] ss:$8 sps:$4 sm:$0xff]  }
0x1467   :  { %v21854_v42 = vpack.c.bf16 %v10745_v19, %v10744_v53  ;;  %v18637_v53 = vld [vmem:[%s22782_s19 + $0x24] ss:$8 sps:$4 sm:$0xff]   ;;  %v18635_v19 = vld [vmem:[%s22782_s19 + $0x20] ss:$8 sps:$4 sm:$0xff]  }
0x1468   :  { %v10694_v51 = vpop.f32.mrb[24].mxu1 }
0x1469   :  { %v10695_v50 = vadd.f32 %v10694_v51, %v21796_v13  ;;  %v17251_v60 = vpop.f32.mrb[25].mxu1  ;;  %11008 = vmatpush1.bf16.msra.mxu0 %v21854_v42  ;;  %12217 = vmatpush1.bf16.msra.mxu1 %v21854_v42  ;;  %v18640_v51 = vld [vmem:[%s22782_s19 + $0x34] ss:$8 sps:$4 sm:$0xff]  }
0x146a   :  { %v10697_v11 = vpop.f32.mrb[26].mxu1  ;;  %11009 = vmatprep.subr.bf16.mxu0 %v22753_v2  ;;  %12218 = vmatprep.subr.bf16.mxu1 %v22753_v2  ;;  %v18643_v60 = vld [vmem:[%s22782_s19 + $0x44] ss:$8 sps:$4 sm:$0xff]  }
0x146b   :  { %v10698_v45 = vadd.f32 %v10697_v11, %v21798_v62  ;;  %v17252_v41 = vpop.f32.mrb[27].mxu1  ;;  %v10746_v16 = vmax.f32 %v10695_v50, 0.0  ;;  %v18638_v50 = vld [vmem:[%s22782_s19 + $0x30] ss:$8 sps:$4 sm:$0xff]   ;;  %v18641_v11 = vld [vmem:[%s22782_s19 + $0x40] ss:$8 sps:$4 sm:$0xff]  }
0x146c   :  { %v18644_v41 = vld [vmem:[%s22782_s19 + $0x50] ss:$8 sps:$4 sm:$0xff]  }
0x146d   :  { %v10747_v48 = vmax.f32 %v10698_v45, 0.0  ;;  %v18646_v45 = vld [vmem:[%s22782_s19 + $0x54] ss:$8 sps:$4 sm:$0xff]  }
0x146f   :  { %v21862_v14 = vpack.c.bf16 %v10747_v48, %v10746_v16  ;;  %v18649_v16 = vld [vmem:[%s22782_s19 + $0x64] ss:$8 sps:$4 sm:$0xff]   ;;  %v18647_v48 = vld [vmem:[%s22782_s19 + $0x60] ss:$8 sps:$4 sm:$0xff]  }
0x1470   :  { %v10702_v54 = vpop.f32.mrb[28].mxu1 }
0x1471   :  { %v10703_v13 = vadd.f32 %v10702_v54, %v21804_v38  ;;  %v17255_v36 = vpop.f32.mrb[29].mxu1  ;;  %11010 = vmatpush1.bf16.msra.mxu0 %v21862_v14  ;;  %12219 = vmatpush1.bf16.msra.mxu1 %v21862_v14  ;;  %v18652_v54 = vld [vmem:[%s22782_s19 + $0x74] ss:$8 sps:$4 sm:$0xff]  }
0x1472   :  { %v10705_v44 = vpop.f32.mrb[30].mxu1  ;;  %11011 = vmatprep.subr.bf16.mxu0 %v22753_v2  ;;  %12220 = vmatprep.subr.bf16.mxu1 %v22753_v2  ;;  %v18655_v36 = vld [vmem:[%s22782_s19 + $0x84] ss:$8 sps:$4 sm:$0xff]  }
0x1473   :  { %v10706_v62 = vadd.f32 %v10705_v44, %v21806_v29  ;;  %v17256_v63 = vpop.f32.mrb[31].mxu1  ;;  %v10748_v8 = vmax.f32 %v10703_v13, 0.0  ;;  %v18650_v13 = vld [vmem:[%s22782_s19 + $0x70] ss:$8 sps:$4 sm:$0xff]   ;;  %v18653_v44 = vld [vmem:[%s22782_s19 + $0x80] ss:$8 sps:$4 sm:$0xff]  }
0x1474   :  { %v18656_v63 = vld [vmem:[%s22782_s19 + $0x90] ss:$8 sps:$4 sm:$0xff]  }
0x1475   :  { %v10749_v59 = vmax.f32 %v10706_v62, 0.0  ;;  %v18658_v62 = vld [vmem:[%s22782_s19 + $0x94] ss:$8 sps:$4 sm:$0xff]  }
0x1477   :  { %v21870_v49 = vpack.c.bf16 %v10749_v59, %v10748_v8  ;;  %v18661_v8 = vld [vmem:[%s22782_s19 + $0xa4] ss:$8 sps:$4 sm:$0xff]   ;;  %v18659_v59 = vld [vmem:[%s22782_s19 + $0xa0] ss:$8 sps:$4 sm:$0xff]  }
0x1478   :  { %v10710_v6 = vpop.f32.mrb[32].mxu1 }
0x1479   :  { %v10711_v38 = vadd.f32 %v10710_v6, %v21812_v24  ;;  %v17259_v20 = vpop.f32.mrb[33].mxu1  ;;  %11012 = vmatpush1.bf16.msra.mxu0 %v21870_v49  ;;  %12221 = vmatpush1.bf16.msra.mxu1 %v21870_v49  ;;  %v18664_v6 = vld [vmem:[%s22782_s19 + $0xb4] ss:$8 sps:$4 sm:$0xff]  }
0x147a   :  { %v10713_v58 = vpop.f32.mrb[34].mxu1  ;;  %11013 = vmatprep.subr.bf16.mxu0 %v22753_v2  ;;  %12222 = vmatprep.subr.bf16.mxu1 %v22753_v2  ;;  %v18714_v20 = vld [vmem:[%s22782_s19 + $0x31c] ss:$8 sps:$4 sm:$0xff]  }
0x147b   :  { %v10714_v29 = vadd.f32 %v10713_v58, %v21814_v23  ;;  %v17260_v17 = vpop.f32.mrb[35].mxu1  ;;  %v10750_v61 = vmax.f32 %v10711_v38, 0.0  ;;  %v18662_v38 = vld [vmem:[%s22782_s19 + $0xb0] ss:$8 sps:$4 sm:$0xff]   ;;  %v18667_v58 = vld [vmem:[%s22782_s19 + $0xc4] ss:$8 sps:$4 sm:$0xff]   ;;  %15518 = vmatprep.mubr.msk.bf16.mxu1 %vm604_vm1, %v18714_v20 }
0x147c   :  { %v18665_v17 = vld [vmem:[%s22782_s19 + $0xc0] ss:$8 sps:$4 sm:$0xff]  }
0x147d   :  { %v10751_v22 = vmax.f32 %v10714_v29, 0.0  ;;  %v18712_v29 = vld [vmem:[%s22782_s19 + $0x318] ss:$8 sps:$4 sm:$0xff]  }
0x147e   :  { %v18786_v20 = vld [vmem:[%s19595_s27 + $0x60] ss:$8 sps:$4 sm:$0xff]  }
0x147f   :  { %v21878_v40 = vpack.c.bf16 %v10751_v22, %v10750_v61  ;;  %v18720_v61 = vld [vmem:[%s22782_s19 + $0x32c] ss:$8 sps:$4 sm:$0xff]  }
0x1480   :  { %v10718_v21 = vpop.f32.mrb[36].mxu1  ;;  %v18670_v22 = vld [vmem:[%s22782_s19 + $0xd4] ss:$8 sps:$4 sm:$0xff]  }
0x1481   :  { %v10719_v24 = vadd.f32 %v10718_v21, %v21820_v15  ;;  %v17263_v30 = vpop.f32.mrb[37].mxu1  ;;  %11014 = vmatpush1.bf16.msra.mxu0 %v21878_v40  ;;  %12223 = vmatpush1.bf16.msra.mxu1 %v21878_v40  ;;  %v18718_v21 = vld [vmem:[%s22782_s19 + $0x328] ss:$8 sps:$4 sm:$0xff]  }
0x1482   :  { %v10721_v27 = vpop.f32.mrb[38].mxu1  ;;  %11015 = vmatprep.subr.bf16.mxu0 %v22753_v2  ;;  %12224 = vmatprep.subr.bf16.mxu1 %v22753_v2  ;;  %v18726_v30 = vld [vmem:[%s22782_s19 + $0x33c] ss:$8 sps:$4 sm:$0xff]  }
0x1483   :  { %v10722_v23 = vadd.f32 %v10721_v27, %v21822_v43  ;;  %v17264_v56 = vpop.f32.mrb[39].mxu1  ;;  %v10752_v5 = vmax.f32 %v10719_v24, 0.0  ;;  %v18668_v24 = vld [vmem:[%s22782_s19 + $0xd0] ss:$8 sps:$4 sm:$0xff]   ;;  %v18673_v27 = vld [vmem:[%s22782_s19 + $0xe4] ss:$8 sps:$4 sm:$0xff]  }
0x1484   :  { %v18727_v56 = vld [vmem:[%s19595_s27] ss:$8 sps:$4 sm:$0xff]  }
0x1485   :  { %v10753_v9 = vmax.f32 %v10722_v23, 0.0  ;;  %v18724_v23 = vld [vmem:[%s22782_s19 + $0x338] ss:$8 sps:$4 sm:$0xff]  }
0x1487   :  { %v21886_v57 = vpack.c.bf16 %v10753_v9, %v10752_v5  ;;  %v18729_v5 = vld [vmem:[%s19595_s27 + $0x4] ss:$8 sps:$4 sm:$0xff]   ;;  %v18671_v9 = vld [vmem:[%s22782_s19 + $0xe0] ss:$8 sps:$4 sm:$0xff]  }
0x1488   :  { %v10726_v10 = vpop.f32.mrb[40].mxu1 }
0x1489   :  { %v10727_v15 = vadd.f32 %v10726_v10, %v21828_v52  ;;  %v17267_v37 = vpop.f32.mrb[41].mxu1  ;;  %11016 = vmatpush1.bf16.msra.mxu0 %v21886_v57  ;;  %12225 = vmatpush1.bf16.msra.mxu1 %v21886_v57  ;;  %v18735_v10 = vld [vmem:[%s22782_s19 + $0x34c] ss:$8 sps:$4 sm:$0xff]  }
0x148a   :  { %v10729_v7 = vpop.f32.mrb[42].mxu1  ;;  %11017 = vmatprep.subr.bf16.mxu0 %v22753_v2  ;;  %12226 = vmatprep.subr.bf16.mxu1 %v22753_v2  ;;  %v18733_v37 = vld [vmem:[%s22782_s19 + $0x348] ss:$8 sps:$4 sm:$0xff]  }
0x148b   :  { %v10730_v43 = vadd.f32 %v10729_v7, %v21830_v26  ;;  %v17268_v32 = vpop.f32.mrb[43].mxu1  ;;  %v10754_v28 = vmax.f32 %v10727_v15, 0.0  ;;  %v18676_v15 = vld [vmem:[%s22782_s19 + $0xf4] ss:$8 sps:$4 sm:$0xff]   ;;  %v18736_v7 = vld [vmem:[%s19595_s27 + $0x10] ss:$8 sps:$4 sm:$0xff]  }
0x148c   :  { %v10798_v32 = vld [vmem:[%s22782_s19 + $0x100] sm:$0xff] }
0x148d   :  { %v10755_v0 = vmax.f32 %v10730_v43, 0.0  ;;  %v18738_v43 = vld [vmem:[%s19595_s27 + $0x14] ss:$8 sps:$4 sm:$0xff]  }
0x148f   :  { %v21894_v25 = vpack.c.bf16 %v10755_v0, %v10754_v28  ;;  %v18674_v28 = vld [vmem:[%s22782_s19 + $0xf0] ss:$8 sps:$4 sm:$0xff]   ;;  %v18744_v0 = vld [vmem:[%s22782_s19 + $0x35c] ss:$8 sps:$4 sm:$0xff]  }
0x1490   :  { %v10734_v52 = vpop.f32.mrb[44].mxu1 }
0x1491   :  { %v10735_v33 = vadd.f32 %v10734_v52, %v21834_v4  ;;  %11018 = vmatpush1.bf16.msra.mxu0 %v21894_v25  ;;  %12227 = vmatpush1.bf16.msra.mxu1 %v21894_v25  ;;  %v17271_v46 = vpop.f32.mrb[45].mxu1  ;;  %v18634_v4 = vld [vmem:[%s22782_s19 + $0x14] ss:$8 sps:$4 sm:$0xff]   ;;  %v15265_v52 = vcombine.high %v10798_v32, %v10798_v32 }
0x1492   :  { %11019 = vmatprep.subr.bf16.mxu0 %v22753_v2  ;;  %12228 = vmatprep.subr.bf16.mxu1 %v22753_v2  ;;  %v10737_v26 = vpop.f32.mrb[46].mxu1  ;;  %v18745_v46 = vld [vmem:[%s19595_s27 + $0x20] ss:$8 sps:$4 sm:$0xff]  }
0x1493   :  { %v10756_v31 = vmax.f32 %v10735_v33, 0.0  ;;  %v17272_v1 = vpop.f32.mrb[47].mxu1  ;;  %v18742_v33 = vld [vmem:[%s22782_s19 + $0x358] ss:$8 sps:$4 sm:$0xff]   ;;  %v18747_v26 = vld [vmem:[%s19595_s27 + $0x24] ss:$8 sps:$4 sm:$0xff]  }
0x1494   :  { %v18753_v1 = vld [vmem:[%s22782_s19 + $0x36c] ss:$8 sps:$4 sm:$0xff]  }
0x1495   :  { %v10765_v47 = vpack.c.bf16 %v10756_v31, %v10756_v31  ;;  %v15264_v31 = vcombine.low %v10798_v32, %v10798_v32  ;;  %v18815_v32 = vld [vmem:[%s19595_s27 + $0x94] ss:$8 sps:$4 sm:$0xff]  }
0x1497   :  { %v21902_v55 = vsel %vm632_vm0, %v10765_v47, 0  ;;  %v18681_v47 = vld [vmem:[%s22782_s19 + $0x10c] ss:$8 sps:$4 sm:$0xff]  }
0x1498   :  { %11020 = vmatpush1.bf16.msra.mxu0 %v21902_v55  ;;  %12229 = vmatpush1.bf16.msra.mxu1 %v21902_v55 }
0x1499   :  { %11406 = vmatprep.subr.bf16.mxu0 %v22753_v2  ;;  %13360 = vmatprep.subr.bf16.mxu1 %v18729_v5  ;;  %v18804_v5 = vld [vmem:[%s19595_s27 + $0x80] ss:$8 sps:$4 sm:$0xff]  }
0x149b   :  { %11036 = vmatmul.mubr.bf16.vlgmr.msra.gmra.mrb[212].mxu0 %v18629_v35  ;;  %12245 = vmatmul.mubr.bf16.vlgmr.msra.gmra.mrb[48].mxu1 %v18712_v29  ;;  %v18751_v35 = vld [vmem:[%s22782_s19 + $0x368] ss:$8 sps:$4 sm:$0xff]  }
0x149c   :  { %11407 = vmatpush1.bf16.msra.mxu0 %v21838_v12  ;;  %15267 = vmatprep.mubr.msk.bf16.mxu0 %vm604_vm1, %v18634_v4  ;;  %v18756_v4 = vld [vmem:[%s19595_s27 + $0x30] ss:$8 sps:$4 sm:$0xff]  }
0x149d   :  { %11408 = vmatprep.subr.bf16.mxu0 %v22753_v2  ;;  %15519 = vmatprep.mubr.msk.bf16.mxu1 %vm604_vm1, %v18720_v61  ;;  %v18691_v29 = vld [vmem:[%s22782_s19 + $0x148] ss:$8 sps:$4 sm:$0xff]   ;;  %v18696_v61 = vld [vmem:[%s22782_s19 + $0x15c] ss:$8 sps:$4 sm:$0xff]  }
0x149e   :  { %13361 = vmatpush1.bf16.msra.mxu1 %v18727_v56  ;;  %v18801_v56 = vld [vmem:[%s22782_s19 + $0x3c8] ss:$8 sps:$4 sm:$0xff]  }
0x149f   :  { %13362 = vmatprep.subr.bf16.mxu1 %v18738_v43  ;;  %v18813_v43 = vld [vmem:[%s19595_s27 + $0x90] ss:$8 sps:$4 sm:$0xff]  }
0x14a0   :  { %11409 = vmatpush1.bf16.msra.mxu0 %v21846_v3 }
0x14a1   :  { %11410 = vmatprep.subr.bf16.mxu0 %v22753_v2 }
0x14a2   :  { %13363 = vmatpush1.bf16.msra.mxu1 %v18736_v7  ;;  %v18702_v7 = vld [vmem:[%s22782_s19 + $0x17c] ss:$8 sps:$4 sm:$0xff]  }
0x14a3   :  { %11044 = vmatmul.mubr.bf16.gmra.mrb[216].mxu0 %v18632_v18  ;;  %12253 = vmatmul.mubr.bf16.gmra.mrb[52].mxu1 %v18718_v21  ;;  %v18758_v18 = vld [vmem:[%s19595_s27 + $0x34] ss:$8 sps:$4 sm:$0xff]   ;;  %v18795_v21 = vld [vmem:[%s19595_s27 + $0x70] ss:$8 sps:$4 sm:$0xff]  }
0x14a4   :  { %11411 = vmatpush1.bf16.msra.mxu0 %v21854_v42  ;;  %15268 = vmatprep.mubr.msk.bf16.mxu0 %vm604_vm1, %v18637_v53  ;;  %v18679_v53 = vld [vmem:[%s22782_s19 + $0x108] ss:$8 sps:$4 sm:$0xff]  }
0x14a5   :  { %11412 = vmatprep.subr.bf16.mxu0 %v22753_v2  ;;  %15520 = vmatprep.mubr.msk.bf16.mxu1 %vm604_vm1, %v18726_v30  ;;  %v18694_v30 = vld [vmem:[%s22782_s19 + $0x158] ss:$8 sps:$4 sm:$0xff]  }
0x14a6   :  { %13364 = vmatprep.subr.bf16.mxu1 %v18747_v26  ;;  %v18824_v26 = vld [vmem:[%s19595_s27 + $0xa4] ss:$8 sps:$4 sm:$0xff]  }
0x14a7   :  { %13365 = vmatpush1.bf16.msra.mxu1 %v18745_v46  ;;  %v18822_v46 = vld [vmem:[%s19595_s27 + $0xa0] ss:$8 sps:$4 sm:$0xff]  }
0x14a8   :  { %11413 = vmatpush1.bf16.msra.mxu0 %v21862_v14  ;;  %13366 = vmatprep.subr.bf16.mxu1 %v18758_v18  ;;  %v18833_v18 = vld [vmem:[%s19595_s27 + $0xb4] ss:$8 sps:$4 sm:$0xff]  }
0x14a9   :  { %11414 = vmatprep.subr.bf16.mxu0 %v22753_v2 }
0x14ab   :  { %11052 = vmatmul.mubr.bf16.gmra.mrb[220].mxu0 %v18635_v19  ;;  %12261 = vmatmul.mubr.bf16.gmra.mrb[56].mxu1 %v18724_v23  ;;  %v18761_v19 = vld [vmem:[%s22782_s19 + $0x37c] ss:$8 sps:$4 sm:$0xff]   ;;  %v18699_v23 = vld [vmem:[%s22782_s19 + $0x16c] ss:$8 sps:$4 sm:$0xff]  }
0x14ac   :  { %11415 = vmatpush1.bf16.msra.mxu0 %v21870_v49  ;;  %15269 = vmatprep.mubr.msk.bf16.mxu0 %vm604_vm1, %v18640_v51  ;;  %v18684_v51 = vld [vmem:[%s22782_s19 + $0x11c] ss:$8 sps:$4 sm:$0xff]  }
0x14ad   :  { %11416 = vmatprep.subr.bf16.mxu0 %v22753_v2  ;;  %15521 = vmatprep.mubr.msk.bf16.mxu1 %vm604_vm1, %v18735_v10  ;;  %v18812_v10 = vld [vmem:[%s22782_s19 + $0x3dc] ss:$8 sps:$4 sm:$0xff]  }
0x14ae   :  { %13367 = vmatpush1.bf16.msra.mxu1 %v18756_v4  ;;  %v18831_v4 = vld [vmem:[%s19595_s27 + $0xb0] ss:$8 sps:$4 sm:$0xff]  }
0x14b0   :  { %11417 = vmatpush1.bf16.msra.mxu0 %v21878_v40 }
0x14b1   :  { %11418 = vmatprep.subr.bf16.mxu0 %v22753_v2 }
0x14b3   :  { %11060 = vmatmul.mubr.bf16.gmra.mrb[224].mxu0 %v18638_v50  ;;  %12269 = vmatmul.mubr.bf16.gmra.mrb[60].mxu1 %v18733_v37  ;;  %v18759_v50 = vld [vmem:[%s22782_s19 + $0x378] ss:$8 sps:$4 sm:$0xff]   ;;  %v18697_v37 = vld [vmem:[%s22782_s19 + $0x168] ss:$8 sps:$4 sm:$0xff]  }
0x14b4   :  { %11419 = vmatpush1.bf16.msra.mxu0 %v21886_v57  ;;  %15270 = vmatprep.mubr.msk.bf16.mxu0 %vm604_vm1, %v18643_v60  ;;  %v18765_v60 = vld [vmem:[%s19595_s27 + $0x40] ss:$8 sps:$4 sm:$0xff]  }
0x14b5   :  { %11420 = vmatprep.subr.bf16.mxu0 %v22753_v2  ;;  %15522 = vmatprep.mubr.msk.bf16.mxu1 %vm604_vm1, %v18744_v0  ;;  %v18819_v0 = vld [vmem:[%s22782_s19 + $0x3e8] ss:$8 sps:$4 sm:$0xff]  }
0x14b8   :  { %11421 = vmatpush1.bf16.msra.mxu0 %v21894_v25 }
0x14b9   :  { %11422 = vmatprep.subr.bf16.mxu0 %v22753_v2 }
0x14bb   :  { %11068 = vmatmul.mubr.bf16.gmra.mrb[228].mxu0 %v18641_v11  ;;  %12277 = vmatmul.mubr.bf16.gmra.mrb[64].mxu1 %v18742_v33  ;;  %v18767_v11 = vld [vmem:[%s19595_s27 + $0x44] ss:$8 sps:$4 sm:$0xff]  }
0x14bc   :  { %11423 = vmatpush1.bf16.msra.mxu0 %v21902_v55  ;;  %15271 = vmatprep.mubr.msk.bf16.mxu0 %vm604_vm1, %v18646_v45  ;;  %v18682_v45 = vld [vmem:[%s22782_s19 + $0x118] ss:$8 sps:$4 sm:$0xff]   ;;  %v18705_v33 = vld [vmem:[%s22782_s19 + $0x18c] ss:$8 sps:$4 sm:$0xff]  }
0x14bd   :  { %11809 = vmatprep.subr.bf16.mxu0 %v22753_v2  ;;  %15523 = vmatprep.mubr.msk.bf16.mxu1 %vm604_vm1, %v18753_v1  ;;  %v18828_v1 = vld [vmem:[%s22782_s19 + $0x3f8] ss:$8 sps:$4 sm:$0xff]  }
0x14be   :  { %13368 = vmatprep.subr.bf16.mxu1 %v18767_v11  ;;  %v18842_v11 = vld [vmem:[%s19595_s27 + $0xc4] ss:$8 sps:$4 sm:$0xff]  }
0x14bf   :  { %13369 = vmatpush1.bf16.msra.mxu1 %v18765_v60  ;;  %v18840_v60 = vld [vmem:[%s19595_s27 + $0xc0] ss:$8 sps:$4 sm:$0xff]  }
0x14c3   :  { %11076 = vmatmul.mubr.bf16.gmra.mrb[232].mxu0 %v18644_v41  ;;  %12285 = vmatmul.mubr.bf16.gmra.mrb[68].mxu1 %v18751_v35  ;;  %v18770_v41 = vld [vmem:[%s22782_s19 + $0x38c] ss:$8 sps:$4 sm:$0xff]   ;;  %v18708_v35 = vld [vmem:[%s22782_s19 + $0x19c] ss:$8 sps:$4 sm:$0xff]  }
0x14c4   :  { %15272 = vmatprep.mubr.msk.bf16.mxu0 %vm604_vm1, %v18649_v16  ;;  %15524 = vmatprep.mubr.msk.bf16.mxu1 %vm604_vm1, %v18761_v19  ;;  %v18687_v16 = vld [vmem:[%s22782_s19 + $0x12c] ss:$8 sps:$4 sm:$0xff]   ;;  %v18837_v19 = vld [vmem:[%s22782_s19 + $0x408] ss:$8 sps:$4 sm:$0xff]  }
0x14cb   :  { %11084 = vmatmul.mubr.bf16.gmra.mrb[236].mxu0 %v18647_v48  ;;  %12293 = vmatmul.mubr.bf16.gmra.mrb[72].mxu1 %v18759_v50  ;;  %v18768_v48 = vld [vmem:[%s22782_s19 + $0x388] ss:$8 sps:$4 sm:$0xff]   ;;  %v18711_v50 = vld [vmem:[%s22782_s19 + $0x1ac] ss:$8 sps:$4 sm:$0xff]  }
0x14cc   :  { %15273 = vmatprep.mubr.msk.bf16.mxu0 %vm604_vm1, %v18652_v54  ;;  %15525 = vmatprep.mubr.msk.bf16.mxu1 %vm604_vm1, %v18770_v41  ;;  %v18685_v54 = vld [vmem:[%s22782_s19 + $0x128] ss:$8 sps:$4 sm:$0xff]  }
0x14d3   :  { %11092 = vmatmul.mubr.bf16.gmra.mrb[240].mxu0 %v18650_v13  ;;  %12301 = vmatmul.mubr.bf16.gmra.mrb[76].mxu1 %v18768_v48  ;;  %v18776_v13 = vld [vmem:[%s22782_s19 + $0x39c] ss:$8 sps:$4 sm:$0xff]  }
0x14d4   :  { %15274 = vmatprep.mubr.msk.bf16.mxu0 %vm604_vm1, %v18655_v36  ;;  %v18690_v36 = vld [vmem:[%s22782_s19 + $0x13c] ss:$8 sps:$4 sm:$0xff]   ;;  %15526 = vmatprep.mubr.msk.bf16.mxu1 %vm604_vm1, %v18776_v13 }
0x14d5   :  { %v15483_v48 = vld [vmem:[%s22782_s19 + $0x418] sm:$0xff] }
0x14db   :  { %11100 = vmatmul.mubr.bf16.gmra.mrb[244].mxu0 %v18653_v44  ;;  %v18774_v44 = vld [vmem:[%s22782_s19 + $0x398] ss:$8 sps:$4 sm:$0xff]  }
0x14dc   :  { %15275 = vmatprep.mubr.msk.bf16.mxu0 %vm604_vm1, %v18658_v62  ;;  %12309 = vmatmul.mubr.bf16.gmra.mrb[80].mxu1 %v18774_v44  ;;  %v18777_v62 = vld [vmem:[%s19595_s27 + $0x50] ss:$8 sps:$4 sm:$0xff]   ;;  %v15517_v44 = vcombine.high %v15483_v48, %v15483_v48 }
0x14e3   :  { %11108 = vmatmul.mubr.bf16.gmra.mrb[248].mxu0 %v18656_v63  ;;  %v18779_v63 = vld [vmem:[%s19595_s27 + $0x54] ss:$8 sps:$4 sm:$0xff]  }
0x14e4   :  { %15276 = vmatprep.mubr.msk.bf16.mxu0 %vm604_vm1, %v18661_v8  ;;  %13370 = vmatprep.subr.bf16.mxu1 %v18779_v63  ;;  %v18688_v8 = vld [vmem:[%s22782_s19 + $0x138] ss:$8 sps:$4 sm:$0xff]  }
0x14e5   :  { %13371 = vmatpush1.bf16.msra.mxu1 %v18777_v62  ;;  %v18717_v62 = vld [vmem:[%s22782_s19 + $0x1bc] ss:$8 sps:$4 sm:$0xff]  }
0x14eb   :  { %11116 = vmatmul.mubr.bf16.gmra.mrb[252].mxu0 %v18659_v59  ;;  %v18785_v59 = vld [vmem:[%s22782_s19 + $0x3ac] ss:$8 sps:$4 sm:$0xff]  }
0x14ec   :  { %15277 = vmatprep.mubr.msk.bf16.mxu0 %vm604_vm1, %v18664_v6  ;;  %v18693_v6 = vld [vmem:[%s22782_s19 + $0x14c] ss:$8 sps:$4 sm:$0xff]   ;;  %15527 = vmatprep.mubr.msk.bf16.mxu1 %vm604_vm1, %v18785_v59 }
0x14f3   :  { %11124 = vmatmul.mubr.bf16.gmra.mrb[0].mxu0 %v18662_v38  ;;  %v18783_v38 = vld [vmem:[%s22782_s19 + $0x3a8] ss:$8 sps:$4 sm:$0xff]  }
0x14f4   :  { %15278 = vmatprep.mubr.msk.bf16.mxu0 %vm604_vm1, %v18667_v58  ;;  %12317 = vmatmul.mubr.bf16.gmra.mrb[84].mxu1 %v18783_v38  ;;  %v18788_v58 = vld [vmem:[%s19595_s27 + $0x64] ss:$8 sps:$4 sm:$0xff]  }
0x14f5   :  { %13372 = vmatprep.subr.bf16.mxu1 %v18788_v58  ;;  %v18853_v38 = vld [vmem:[%s19595_s27 + $0xe4] ss:$8 sps:$4 sm:$0xff]   ;;  %v18715_v58 = vld [vmem:[%s22782_s19 + $0x1b8] ss:$8 sps:$4 sm:$0xff]  }
0x14f6   :  { %13373 = vmatpush1.bf16.msra.mxu1 %v18786_v20 }
0x14fb   :  { %11132 = vmatmul.mubr.bf16.gmra.mrb[4].mxu0 %v18665_v17  ;;  %v18794_v17 = vld [vmem:[%s22782_s19 + $0x3bc] ss:$8 sps:$4 sm:$0xff]  }
0x14fc   :  { %15279 = vmatprep.mubr.msk.bf16.mxu0 %vm604_vm1, %v18670_v22  ;;  %v18792_v22 = vld [vmem:[%s22782_s19 + $0x3b8] ss:$8 sps:$4 sm:$0xff]   ;;  %15528 = vmatprep.mubr.msk.bf16.mxu1 %vm604_vm1, %v18794_v17  ;;  %v18856_v17 = vld [vmem:[%s19595_s27 + $0xf4] ss:$8 sps:$4 sm:$0xff]  }
0x14fd   :  { %12325 = vmatmul.mubr.bf16.gmra.mrb[88].mxu1 %v18792_v22 }
0x1503   :  { %11140 = vmatmul.mubr.bf16.gmra.mrb[8].mxu0 %v18668_v24  ;;  %v18797_v24 = vld [vmem:[%s19595_s27 + $0x74] ss:$8 sps:$4 sm:$0xff]  }
0x1504   :  { %15280 = vmatprep.mubr.msk.bf16.mxu0 %vm604_vm1, %v18673_v27  ;;  %13374 = vmatprep.subr.bf16.mxu1 %v18797_v24  ;;  %v18803_v27 = vld [vmem:[%s22782_s19 + $0x3cc] ss:$8 sps:$4 sm:$0xff]  }
0x1505   :  { %13375 = vmatpush1.bf16.msra.mxu1 %v18795_v21  ;;  %15529 = vmatprep.mubr.msk.bf16.mxu1 %vm604_vm1, %v18803_v27  ;;  %v18854_v21 = vld [vmem:[%s19595_s27 + $0xf0] ss:$8 sps:$4 sm:$0xff]  }
0x1506   :  { %12333 = vmatmul.mubr.bf16.gmra.mrb[92].mxu1 %v18801_v56 }
0x1507   :  { %15530 = vmatprep.mubr.msk.bf16.mxu1 %vm604_vm1, %v18812_v10 }
0x150b   :  { %11148 = vmatmul.mubr.bf16.gmra.mrb[12].mxu0 %v18671_v9  ;;  %v18806_v9 = vld [vmem:[%s19595_s27 + $0x84] ss:$8 sps:$4 sm:$0xff]  }
0x150c   :  { %15281 = vmatprep.mubr.msk.bf16.mxu0 %vm604_vm1, %v18676_v15  ;;  %13376 = vmatprep.subr.bf16.mxu1 %v18806_v9  ;;  %v18810_v15 = vld [vmem:[%s22782_s19 + $0x3d8] ss:$8 sps:$4 sm:$0xff]  }
0x150d   :  { %13377 = vmatpush1.bf16.msra.mxu1 %v18804_v5  ;;  %v18732_v5 = vld [vmem:[%s22782_s19 + $0x1dc] ss:$8 sps:$4 sm:$0xff]  }
0x150e   :  { %12341 = vmatmul.mubr.bf16.gmra.mrb[96].mxu1 %v18810_v15  ;;  %13378 = vmatprep.subr.bf16.mxu1 %v18815_v32  ;;  %v18741_v32 = vld [vmem:[%s22782_s19 + $0x1ec] ss:$8 sps:$4 sm:$0xff]  }
0x1511   :  { %13379 = vmatpush1.bf16.msra.mxu1 %v18813_v43 }
0x1512   :  { %13380 = vmatprep.subr.bf16.mxu1 %v18824_v26 }
0x1513   :  { %11156 = vmatmul.mubr.bf16.gmra.mrb[16].mxu0 %v18674_v28  ;;  %v18821_v28 = vld [vmem:[%s22782_s19 + $0x3ec] ss:$8 sps:$4 sm:$0xff]  }
0x1514   :  { %15282 = vmatprep.mubr.msk.bf16.mxu0 %vm604_vm1, %v15265_v52  ;;  %15531 = vmatprep.mubr.msk.bf16.mxu1 %vm604_vm1, %v18821_v28  ;;  %v18700_v52 = vld [vmem:[%s22782_s19 + $0x178] ss:$8 sps:$4 sm:$0xff]  }
0x1515   :  { %13381 = vmatpush1.bf16.msra.mxu1 %v18822_v46  ;;  %v18739_v46 = vld [vmem:[%s22782_s19 + $0x1e8] ss:$8 sps:$4 sm:$0xff]  }
0x1516   :  { %12349 = vmatmul.mubr.bf16.gmra.mrb[100].mxu1 %v18819_v0  ;;  %13382 = vmatprep.subr.bf16.mxu1 %v18833_v18  ;;  %v15315_v18 = vld [vmem:[%s22782_s19 + $0x208] sm:$0xff] }
0x1519   :  { %13383 = vmatpush1.bf16.msra.mxu1 %v18831_v4  ;;  %v18868_v4 = vld [vmem:[%s19595_s27 + $0x104] ss:$8 sps:$4 sm:$0xff]  }
0x151a   :  { %13384 = vmatprep.subr.bf16.mxu1 %v18842_v11 }
0x151b   :  { %11164 = vmatmul.mubr.bf16.gmra.mrb[20].mxu0 %v15264_v31  ;;  %v18830_v31 = vld [vmem:[%s22782_s19 + $0x3fc] ss:$8 sps:$4 sm:$0xff]  }
0x151c   :  { %15350 = vmatprep.mubr.msk.bf16.mxu0 %vm604_vm1, %v18681_v47  ;;  %15532 = vmatprep.mubr.msk.bf16.mxu1 %vm604_vm1, %v18830_v31  ;;  %v18703_v47 = vld [vmem:[%s22782_s19 + $0x188] ss:$8 sps:$4 sm:$0xff]   ;;  %v18750_v31 = vld [vmem:[%s22782_s19 + $0x1fc] ss:$8 sps:$4 sm:$0xff]  }
0x151d   :  { %13385 = vmatpush1.bf16.msra.mxu1 %v18840_v60 }
0x151e   :  { %12357 = vmatmul.mubr.bf16.gmra.mrb[104].mxu1 %v18828_v1 }
0x1523   :  { %11439 = vmatmul.mubr.bf16.vlgmr.msra.gmra.mrb[24].mxu0 %v18679_v53  ;;  %v18839_v53 = vld [vmem:[%s22782_s19 + $0x40c] ss:$8 sps:$4 sm:$0xff]  }
0x1524   :  { %11810 = vmatpush1.bf16.msra.mxu0 %v21838_v12  ;;  %15351 = vmatprep.mubr.msk.bf16.mxu0 %vm604_vm1, %v18684_v51  ;;  %v18706_v51 = vld [vmem:[%s22782_s19 + $0x198] ss:$8 sps:$4 sm:$0xff]  }
0x1525   :  { %11811 = vmatprep.subr.bf16.mxu0 %v22753_v2  ;;  %15533 = vmatprep.mubr.msk.bf16.mxu1 %vm604_vm1, %v18839_v53 }
0x1526   :  { %12365 = vmatmul.mubr.bf16.gmra.mrb[108].mxu1 %v18837_v19  ;;  %v18748_v19 = vld [vmem:[%s22782_s19 + $0x1f8] ss:$8 sps:$4 sm:$0xff]  }
0x1527   :  { %15534 = vmatprep.mubr.msk.bf16.mxu1 %vm604_vm1, %v15517_v44  ;;  %v18857_v44 = vld [vmem:[%s22782_s19 + $0x2b0] ss:$8 sps:$4 sm:$0xff]  }
0x1528   :  { %11812 = vmatpush1.bf16.msra.mxu0 %v21846_v3 }
0x1529   :  { %11813 = vmatprep.subr.bf16.mxu0 %v22753_v2 }
0x152b   :  { %11447 = vmatmul.mubr.bf16.gmra.mrb[28].mxu0 %v18682_v45  ;;  %v18845_v45 = vld [vmem:[%s19595_s27 + $0xd4] ss:$8 sps:$4 sm:$0xff]  }
0x152c   :  { %11814 = vmatpush1.bf16.msra.mxu0 %v21854_v42  ;;  %15352 = vmatprep.mubr.msk.bf16.mxu0 %vm604_vm1, %v18687_v16  ;;  %v18843_v16 = vld [vmem:[%s19595_s27 + $0xd0] ss:$8 sps:$4 sm:$0xff]  }
0x152d   :  { %11815 = vmatprep.subr.bf16.mxu0 %v22753_v2  ;;  %13386 = vmatprep.subr.bf16.mxu1 %v18845_v45 }
0x152e   :  { %13387 = vmatpush1.bf16.msra.mxu1 %v18843_v16 }
0x152f   :  { %13388 = vmatprep.subr.bf16.mxu1 %v18853_v38 }
0x1530   :  { %11816 = vmatpush1.bf16.msra.mxu0 %v21862_v14 }
0x1531   :  { %11817 = vmatprep.subr.bf16.mxu0 %v22753_v2 }
0x1533   :  { %11455 = vmatmul.mubr.bf16.gmra.mrb[32].mxu0 %v18685_v54  ;;  %v18709_v54 = vld [vmem:[%s22782_s19 + $0x1a8] ss:$8 sps:$4 sm:$0xff]  }
0x1534   :  { %11818 = vmatpush1.bf16.msra.mxu0 %v21870_v49  ;;  %15353 = vmatprep.mubr.msk.bf16.mxu0 %vm604_vm1, %v18690_v36  ;;  %v15516_v36 = vcombine.low %v15483_v48, %v15483_v48  ;;  %v15348_v48 = vcombine.low %v15315_v18, %v15315_v18 }
0x1535   :  { %11819 = vmatprep.subr.bf16.mxu0 %v22753_v2 }
0x1536   :  { %12373 = vmatmul.mubr.bf16.gmra.mrb[112].mxu1 %v15516_v36 }
0x1538   :  { %11820 = vmatpush1.bf16.msra.mxu0 %v21878_v40 }
0x1539   :  { %11821 = vmatprep.subr.bf16.mxu0 %v22753_v2 }
0x153b   :  { %11463 = vmatmul.mubr.bf16.gmra.mrb[36].mxu0 %v18688_v8 }
0x153c   :  { %11822 = vmatpush1.bf16.msra.mxu0 %v21886_v57  ;;  %15354 = vmatprep.mubr.msk.bf16.mxu0 %vm604_vm1, %v18693_v6  ;;  %v18851_v6 = vld [vmem:[%s19595_s27 + $0xe0] ss:$8 sps:$4 sm:$0xff]  }
0x153d   :  { %11823 = vmatprep.subr.bf16.mxu0 %v22753_v2  ;;  %13389 = vmatpush1.bf16.msra.mxu1 %v18851_v6  ;;  %v18762_v6 = vld [vmem:[%s22782_s19 + $0x210] ss:$8 sps:$4 sm:$0xff]  }
0x153e   :  { %13390 = vmatprep.subr.bf16.mxu1 %v18856_v17 }
0x1540   :  { %11824 = vmatpush1.bf16.msra.mxu0 %v21894_v25 }
0x1541   :  { %11825 = vmatprep.subr.bf16.mxu0 %v22753_v2  ;;  %13391 = vmatpush1.bf16.msra.mxu1 %v18854_v21 }
0x1542   :  { %13561 = vmatprep.subr.bf16.mxu1 %v18868_v4 }
0x1543   :  { %11471 = vmatmul.mubr.bf16.gmra.mrb[40].mxu0 %v18691_v29 }
0x1544   :  { %11826 = vmatpush1.bf16.msra.mxu0 %v21902_v55  ;;  %15355 = vmatprep.mubr.msk.bf16.mxu0 %vm604_vm1, %v18696_v61  ;;  %v18723_v61 = vld [vmem:[%s22782_s19 + $0x1cc] ss:$8 sps:$4 sm:$0xff]  }
0x1545   :  { %12615 = vmatprep.subr.bf16.mxu0 %v22753_v2 }
0x154b   :  { %11479 = vmatmul.mubr.bf16.gmra.mrb[44].mxu0 %v18694_v30 }
0x154c   :  { %15356 = vmatprep.mubr.msk.bf16.mxu0 %vm604_vm1, %v18699_v23  ;;  %v18721_v23 = vld [vmem:[%s22782_s19 + $0x1c8] ss:$8 sps:$4 sm:$0xff]  }
0x1553   :  { %11487 = vmatmul.mubr.bf16.gmra.mrb[48].mxu0 %v18697_v37 }
0x1554   :  { %15357 = vmatprep.mubr.msk.bf16.mxu0 %vm604_vm1, %v18702_v7  ;;  %v18730_v7 = vld [vmem:[%s22782_s19 + $0x1d8] ss:$8 sps:$4 sm:$0xff]  }
0x155b   :  { %11495 = vmatmul.mubr.bf16.gmra.mrb[52].mxu0 %v18700_v52 }
0x155c   :  { %15358 = vmatprep.mubr.msk.bf16.mxu0 %vm604_vm1, %v18705_v33 }
0x1563   :  { %11503 = vmatmul.mubr.bf16.gmra.mrb[56].mxu0 %v18703_v47 }
0x1564   :  { %15359 = vmatprep.mubr.msk.bf16.mxu0 %vm604_vm1, %v18708_v35 }
0x156b   :  { %11511 = vmatmul.mubr.bf16.gmra.mrb[60].mxu0 %v18706_v51 }
0x156c   :  { %15360 = vmatprep.mubr.msk.bf16.mxu0 %vm604_vm1, %v18711_v50  ;;  %v15349_v50 = vcombine.high %v15315_v18, %v15315_v18 }
0x156e   :  { %v22098_v41 = vpop.f32.mrb[212].mxu0 }
0x156f   :  { %v11039_v13 = vpop.f32.mrb[213].mxu0 }
0x1570   :  { %v22104_v63 = vpop.f32.mrb[214].mxu0  ;;  %v18764_v13 = vld [vmem:[%s22782_s19 + $0x214] ss:$8 sps:$4 sm:$0xff]  }
0x1571   :  { %v12783_v8 = vpack.c.bf16 %v22104_v63, %v22098_v41  ;;  %v11042_v59 = vpop.f32.mrb[215].mxu0  ;;  %v18865_v41 = vld [vmem:[%s22782_s19 + $0x2d4] ss:$8 sps:$4 sm:$0xff]  }
0x1573   :  { %11519 = vmatmul.mubr.bf16.gmra.mrb[64].mxu0 %v18709_v54 }
0x1574   :  { %15361 = vmatprep.mubr.msk.bf16.mxu0 %vm604_vm1, %v18717_v62 }
0x1576   :  { %v22112_v20 = vpop.f32.mrb[216].mxu0 }
0x1577   :  { %v11047_v29 = vpop.f32.mrb[217].mxu0 }
0x1578   :  { %v22117_v22 = vpop.f32.mrb[218].mxu0 }
0x1579   :  { %v12788_v24 = vpack.c.bf16 %v22117_v22, %v22112_v20  ;;  %v11050_v30 = vpop.f32.mrb[219].mxu0  ;;  %v18871_v20 = vld [vmem:[%s22782_s19 + $0x2e4] ss:$8 sps:$4 sm:$0xff]  }
0x157a   :  { %v18771_v30 = vld [vmem:[%s22782_s19 + $0x220] ss:$8 sps:$4 sm:$0xff]  }
0x157b   :  { %11527 = vmatmul.mubr.bf16.gmra.mrb[68].mxu0 %v18715_v58  ;;  %v18773_v58 = vld [vmem:[%s22782_s19 + $0x224] ss:$8 sps:$4 sm:$0xff]  }
0x157c   :  { %15362 = vmatprep.mubr.msk.bf16.mxu0 %vm604_vm1, %v18723_v61 }
0x157e   :  { %v22123_v27 = vpop.f32.mrb[220].mxu0 }
0x157f   :  { %v11055_v56 = vpop.f32.mrb[221].mxu0 }
0x1580   :  { %v22127_v9 = vpop.f32.mrb[222].mxu0  ;;  %v18782_v56 = vld [vmem:[%s22782_s19 + $0x234] ss:$8 sps:$4 sm:$0xff]  }
0x1581   :  { %v11058_v15 = vpop.f32.mrb[223].mxu0 }
0x1583   :  { %11535 = vmatmul.mubr.bf16.gmra.mrb[72].mxu0 %v18721_v23 }
0x1584   :  { %15363 = vmatprep.mubr.msk.bf16.mxu0 %vm604_vm1, %v18732_v5 }
0x1586   :  { %v22132_v37 = vpop.f32.mrb[224].mxu0 }
0x1587   :  { %v11063_v43 = vpop.f32.mrb[225].mxu0 }
0x1588   :  { %v22136_v28 = vpop.f32.mrb[226].mxu0 }
0x1589   :  { %v11066_v52 = vpop.f32.mrb[227].mxu0 }
0x158b   :  { %11543 = vmatmul.mubr.bf16.gmra.mrb[76].mxu0 %v18730_v7 }
0x158c   :  { %15364 = vmatprep.mubr.msk.bf16.mxu0 %vm604_vm1, %v18741_v32  ;;  %v18791_v32 = vld [vmem:[%s22782_s19 + $0x244] ss:$8 sps:$4 sm:$0xff]  }
0x158e   :  { %v22141_v33 = vpop.f32.mrb[228].mxu0 }
0x158f   :  { %v11071_v26 = vpop.f32.mrb[229].mxu0 }
0x1590   :  { %v22145_v1 = vpop.f32.mrb[230].mxu0 }
0x1591   :  { %v11074_v35 = vpop.f32.mrb[231].mxu0 }
0x1592   :  { %v18800_v35 = vld [vmem:[%s22782_s19 + $0x254] ss:$8 sps:$4 sm:$0xff]  }
0x1593   :  { %11551 = vmatmul.mubr.bf16.gmra.mrb[80].mxu0 %v18739_v46 }
0x1594   :  { %15365 = vmatprep.mubr.msk.bf16.mxu0 %vm604_vm1, %v18750_v31 }
0x1596   :  { %v22152_v53 = vpop.f32.mrb[232].mxu0 }
0x1597   :  { %v11079_v51 = vpop.f32.mrb[233].mxu0 }
0x1598   :  { %v22155_v60 = vpop.f32.mrb[234].mxu0 }
0x1599   :  { %v11082_v45 = vpop.f32.mrb[235].mxu0 }
0x159b   :  { %11559 = vmatmul.mubr.bf16.gmra.mrb[84].mxu0 %v18748_v19  ;;  %v22218_v19 = vpop.f32.mrb[48].mxu1 }
0x159c   :  { %15366 = vmatprep.mubr.msk.bf16.mxu0 %vm604_vm1, %v15349_v50  ;;  %v12248_v51 = vpop.f32.mrb[49].mxu1  ;;  %v18798_v50 = vld [vmem:[%s22782_s19 + $0x250] ss:$8 sps:$4 sm:$0xff]  }
0x159e   :  { %v22160_v16 = vpop.f32.mrb[236].mxu0 }
0x159f   :  { %v11087_v54 = vpop.f32.mrb[237].mxu0 }
0x15a0   :  { %v22163_v36 = vpop.f32.mrb[238].mxu0  ;;  %v18809_v54 = vld [vmem:[%s22782_s19 + $0x264] ss:$8 sps:$4 sm:$0xff]  }
0x15a1   :  { %v11090_v62 = vpop.f32.mrb[239].mxu0 }
0x15a3   :  { %11567 = vmatmul.mubr.bf16.gmra.mrb[88].mxu0 %v15348_v48  ;;  %v22223_v48 = vpop.f32.mrb[50].mxu1 }
0x15a4   :  { %15434 = vmatprep.mubr.msk.bf16.mxu0 %vm604_vm1, %v18764_v13 }
0x15a6   :  { %v22168_v59 = vpop.f32.mrb[240].mxu0 }
0x15a7   :  { %v11095_v38 = vpop.f32.mrb[241].mxu0 }
0x15a8   :  { %v22172_v29 = vpop.f32.mrb[242].mxu0  ;;  %v18834_v38 = vld [vmem:[%s22782_s19 + $0x290] ss:$8 sps:$4 sm:$0xff]  }
0x15a9   :  { %v11098_v61 = vpop.f32.mrb[243].mxu0 }
0x15ab   :  { %11842 = vmatmul.mubr.bf16.vlgmr.msra.gmra.mrb[92].mxu0 %v18762_v6 }
0x15ac   :  { %12616 = vmatpush1.bf16.msra.mxu0 %v21838_v12  ;;  %15435 = vmatprep.mubr.msk.bf16.mxu0 %vm604_vm1, %v18773_v58 }
0x15ad   :  { %12617 = vmatprep.subr.bf16.mxu0 %v22753_v2 }
0x15ae   :  { %v22179_v21 = vpop.f32.mrb[244].mxu0 }
0x15af   :  { %v11103_v23 = vpop.f32.mrb[245].mxu0 }
0x15b0   :  { %12618 = vmatpush1.bf16.msra.mxu0 %v21846_v3  ;;  %v22184_v5 = vpop.f32.mrb[246].mxu0  ;;  %v18780_v3 = vld [vmem:[%s22782_s19 + $0x230] ss:$8 sps:$4 sm:$0xff]  }
0x15b1   :  { %12619 = vmatprep.subr.bf16.mxu0 %v22753_v2  ;;  %v11106_v15 = vpop.f32.mrb[247].mxu0 }
0x15b2   :  { %v18818_v15 = vld [vmem:[%s22782_s19 + $0x274] ss:$8 sps:$4 sm:$0xff]  }
0x15b3   :  { %11850 = vmatmul.mubr.bf16.gmra.mrb[96].mxu0 %v18771_v30  ;;  %v18807_v30 = vld [vmem:[%s22782_s19 + $0x260] ss:$8 sps:$4 sm:$0xff]  }
0x15b4   :  { %12620 = vmatpush1.bf16.msra.mxu0 %v21854_v42  ;;  %15436 = vmatprep.mubr.msk.bf16.mxu0 %vm604_vm1, %v18782_v56  ;;  %v18846_v42 = vld [vmem:[%s22782_s19 + $0x2a0] ss:$8 sps:$4 sm:$0xff]  }
0x15b5   :  { %12621 = vmatprep.subr.bf16.mxu0 %v22753_v2 }
0x15b6   :  { %v22192_v7 = vpop.f32.mrb[248].mxu0 }
0x15b7   :  { %v11111_v43 = vpop.f32.mrb[249].mxu0 }
0x15b8   :  { %12622 = vmatpush1.bf16.msra.mxu0 %v21862_v14  ;;  %v22197_v52 = vpop.f32.mrb[250].mxu0  ;;  %v18789_v14 = vld [vmem:[%s22782_s19 + $0x240] ss:$8 sps:$4 sm:$0xff]  }
0x15b9   :  { %12623 = vmatprep.subr.bf16.mxu0 %v22753_v2  ;;  %v11114_v46 = vpop.f32.mrb[251].mxu0 }
0x15bb   :  { %11858 = vmatmul.mubr.bf16.gmra.mrb[100].mxu0 %v18780_v3 }
0x15bc   :  { %12624 = vmatpush1.bf16.msra.mxu0 %v21870_v49  ;;  %15437 = vmatprep.mubr.msk.bf16.mxu0 %vm604_vm1, %v18791_v32 }
0x15bd   :  { %12625 = vmatprep.subr.bf16.mxu0 %v22753_v2 }
0x15be   :  { %v22205_v26 = vpop.f32.mrb[252].mxu0 }
0x15bf   :  { %v11119_v31 = vpop.f32.mrb[253].mxu0 }
0x15c0   :  { %12626 = vmatpush1.bf16.msra.mxu0 %v21878_v40  ;;  %v22210_v4 = vpop.f32.mrb[254].mxu0 }
0x15c1   :  { %12627 = vmatprep.subr.bf16.mxu0 %v22753_v2  ;;  %v11122_v18 = vpop.f32.mrb[255].mxu0 }
0x15c2   :  { %v18816_v18 = vld [vmem:[%s22782_s19 + $0x270] ss:$8 sps:$4 sm:$0xff]  }
0x15c3   :  { %11866 = vmatmul.mubr.bf16.gmra.mrb[104].mxu0 %v18789_v14 }
0x15c4   :  { %12628 = vmatpush1.bf16.msra.mxu0 %v21886_v57  ;;  %15438 = vmatprep.mubr.msk.bf16.mxu0 %vm604_vm1, %v18800_v35  ;;  %v12251_v57 = vpop.f32.mrb[51].mxu1 }
0x15c5   :  { %12629 = vmatprep.subr.bf16.mxu0 %v22753_v2 }
0x15c6   :  { %v22220_v40 = vpop.f32.mrb[0].mxu0 }
0x15c7   :  { %v11127_v45 = vpop.f32.mrb[1].mxu0 }
0x15c8   :  { %12630 = vmatpush1.bf16.msra.mxu0 %v21894_v25  ;;  %v22227_v13 = vpop.f32.mrb[2].mxu0  ;;  %v22236_v25 = vpop.f32.mrb[52].mxu1  ;;  %v18827_v45 = vld [vmem:[%s22782_s19 + $0x284] ss:$8 sps:$4 sm:$0xff]  }
0x15c9   :  { %12631 = vmatprep.subr.bf16.mxu0 %v22753_v2  ;;  %v11130_v6 = vpop.f32.mrb[3].mxu0  ;;  %v12256_v61 = vpop.f32.mrb[53].mxu1 }
0x15ca   :  { %v22241_v56 = vpop.f32.mrb[54].mxu1 }
0x15cb   :  { %11874 = vmatmul.mubr.bf16.gmra.mrb[108].mxu0 %v18798_v50  ;;  %v12259_v43 = vpop.f32.mrb[55].mxu1 }
0x15cc   :  { %12632 = vmatpush1.bf16.msra.mxu0 %v21902_v55  ;;  %15439 = vmatprep.mubr.msk.bf16.mxu0 %vm604_vm1, %v18809_v54  ;;  %v22251_v14 = vpop.f32.mrb[56].mxu1 }
0x15cd   :  { %v12264_v35 = vpop.f32.mrb[57].mxu1 }
0x15ce   :  { %v22238_v58 = vpop.f32.mrb[4].mxu0  ;;  %v22256_v50 = vpop.f32.mrb[58].mxu1 }
0x15cf   :  { %v11135_v23 = vpop.f32.mrb[5].mxu0  ;;  %v12267_v57 = vpop.f32.mrb[59].mxu1 }
0x15d0   :  { %v22244_v3 = vpop.f32.mrb[6].mxu0  ;;  %v22266_v23 = vpop.f32.mrb[60].mxu1  ;;  %v18836_v57 = vld [vmem:[%s22782_s19 + $0x294] ss:$8 sps:$4 sm:$0xff]  }
0x15d1   :  { %v11138_v32 = vpop.f32.mrb[7].mxu0  ;;  %v12272_v43 = vpop.f32.mrb[61].mxu1 }
0x15d2   :  { %v18825_v32 = vld [vmem:[%s22782_s19 + $0x280] ss:$8 sps:$4 sm:$0xff]  }
0x15d3   :  { %11882 = vmatmul.mubr.bf16.gmra.mrb[112].mxu0 %v18807_v30 }
0x15d4   :  { %15440 = vmatprep.mubr.msk.bf16.mxu0 %vm604_vm1, %v18818_v15 }
0x15d6   :  { %v22253_v31 = vpop.f32.mrb[8].mxu0 }
0x15d7   :  { %v11143_v51 = vpop.f32.mrb[9].mxu0 }
0x15d8   :  { %v22259_v54 = vpop.f32.mrb[10].mxu0  ;;  %v22271_v51 = vpop.f32.mrb[62].mxu1 }
0x15d9   :  { %v11146_v61 = vpop.f32.mrb[11].mxu0 }
0x15da   :  { %v12275_v61 = vpop.f32.mrb[63].mxu1 }
0x15db   :  { %11890 = vmatmul.mubr.bf16.gmra.mrb[116].mxu0 %v18816_v18  ;;  %v22281_v43 = vpop.f32.mrb[64].mxu1 }
0x15dc   :  { %15441 = vmatprep.mubr.msk.bf16.mxu0 %vm604_vm1, %v18827_v45  ;;  %v12280_v46 = vpop.f32.mrb[65].mxu1 }
0x15dd   :  { %v22286_v55 = vpop.f32.mrb[66].mxu1 }
0x15de   :  { %v22268_v15 = vpop.f32.mrb[12].mxu0  ;;  %v12283_v18 = vpop.f32.mrb[67].mxu1 }
0x15df   :  { %v11151_v35 = vpop.f32.mrb[13].mxu0  ;;  %v22296_v46 = vpop.f32.mrb[68].mxu1 }
0x15e0   :  { %v22274_v2 = vpop.f32.mrb[14].mxu0  ;;  %v12288_v62 = vpop.f32.mrb[69].mxu1 }
0x15e1   :  { %v11154_v30 = vpop.f32.mrb[15].mxu0  ;;  %v22301_v18 = vpop.f32.mrb[70].mxu1 }
0x15e2   :  { %v18848_v30 = vld [vmem:[%s22782_s19 + $0x2a4] ss:$8 sps:$4 sm:$0xff]  }
0x15e3   :  { %11898 = vmatmul.mubr.bf16.gmra.mrb[120].mxu0 %v18825_v32  ;;  %v18859_v32 = vld [vmem:[%s22782_s19 + $0x2b4] ss:$8 sps:$4 sm:$0xff]  }
0x15e4   :  { %15442 = vmatprep.mubr.msk.bf16.mxu0 %vm604_vm1, %v18836_v57 }
0x15e6   :  { %v22283_v35 = vpop.f32.mrb[16].mxu0 }
0x15e7   :  { %v11159_v6 = vpop.f32.mrb[17].mxu0 }
0x15e8   :  { %v22288_v61 = vpop.f32.mrb[18].mxu0 }
0x15e9   :  { %v11162_v45 = vpop.f32.mrb[19].mxu0 }
0x15ea   :  { %v12291_v45 = vpop.f32.mrb[71].mxu1 }
0x15eb   :  { %11906 = vmatmul.mubr.bf16.gmra.mrb[124].mxu0 %v18834_v38  ;;  %v18862_v45 = vld [vmem:[%s22782_s19 + $0x2c4] ss:$8 sps:$4 sm:$0xff]   ;;  %v18866_v38 = vld [vmem:[%s19595_s27 + $0x100] ss:$8 sps:$4 sm:$0xff]  }
0x15ec   :  { %15443 = vmatprep.mubr.msk.bf16.mxu0 %vm604_vm1, %v18848_v30  ;;  %v22307_v30 = vpop.f32.mrb[72].mxu1 }
0x15ee   :  { %v22298_v6 = vpop.f32.mrb[20].mxu0 }
0x15ef   :  { %v11167_v49 = vpop.f32.mrb[21].mxu0 }
0x15f0   :  { %v11168_v12 = vpop.f32.mrb[22].mxu0  ;;  %v12296_v49 = vpop.f32.mrb[73].mxu1 }
0x15f1   :  { %v11169_v17 = vpop.f32.mrb[23].mxu0  ;;  %v22310_v11 = vpop.f32.mrb[74].mxu1  ;;  %v18880_v49 = vld [vmem:[%s19595_s27 + $0x124] ss:$8 sps:$4 sm:$0xff]  }
0x15f2   :  { %v12299_v17 = vpop.f32.mrb[75].mxu1 }
0x15f3   :  { %11914 = vmatmul.mubr.bf16.gmra.mrb[128].mxu0 %v18846_v42  ;;  %v18860_v42 = vld [vmem:[%s22782_s19 + $0x2c0] ss:$8 sps:$4 sm:$0xff]  }
0x15f4   :  { %15444 = vmatprep.mubr.msk.bf16.mxu0 %vm604_vm1, %v18859_v32  ;;  %v18874_v32 = vld [vmem:[%s19595_s27 + $0x114] ss:$8 sps:$4 sm:$0xff]  }
0x15f6   :  { %v11440_v62 = vpop.f32.mrb[24].mxu0 }
0x15f7   :  { %v11442_v57 = vpop.f32.mrb[25].mxu0 }
0x15f8   :  { %v11443_v12 = vpop.f32.mrb[26].mxu0  ;;  %v18872_v57 = vld [vmem:[%s19595_s27 + $0x110] ss:$8 sps:$4 sm:$0xff]  }
0x15f9   :  { %v12784_v47 = vpack.c.bf16 %v11443_v12, %v11440_v62  ;;  %v11445_v0 = vpop.f32.mrb[27].mxu0  ;;  %v22322_v62 = vpop.f32.mrb[76].mxu1 }
0x15fa   :  { %v12304_v12 = vpop.f32.mrb[77].mxu1 }
0x15fb   :  { %13392 = vmatprep.mubr.bf16.mxu1 %v12784_v47  ;;  %11922 = vmatmul.mubr.bf16.gmra.mrb[132].mxu0 %v18857_v44  ;;  %v22326_v47 = vpop.f32.mrb[78].mxu1 }
0x15fc   :  { %13393 = vmatmul.mubr.bf16.vlgmr.msra.gmra.mrb[116].mxu1 %v12783_v8  ;;  %15445 = vmatprep.mubr.msk.bf16.mxu0 %vm604_vm1, %v18862_v45  ;;  %v12307_v63 = vpop.f32.mrb[79].mxu1  ;;  %v18878_v45 = vld [vmem:[%s19595_s27 + $0x120] ss:$8 sps:$4 sm:$0xff]  }
0x15fd   :  { %13562 = vmatpush1.bf16.msra.mxu1 %v18866_v38  ;;  %v18863_v63 = vld [vmem:[%s22782_s19 + $0x2d0] ss:$8 sps:$4 sm:$0xff]  }
0x15fe   :  { %v11448_v0 = vpop.f32.mrb[28].mxu0  ;;  %13563 = vmatprep.subr.bf16.mxu1 %v18874_v32  ;;  %v18886_v32 = vld [vmem:[%s19595_s27 + $0x134] ss:$8 sps:$4 sm:$0xff]  }
0x15ff   :  { %v11450_v17 = vpop.f32.mrb[29].mxu0 }
0x1600   :  { %v11451_v44 = vpop.f32.mrb[30].mxu0  ;;  %v18891_v17 = vld [vmem:[%s19595_s27 + $0x144] ss:$8 sps:$4 sm:$0xff]  }
0x1601   :  { %v12789_v8 = vpack.c.bf16 %v11451_v44, %v11448_v0  ;;  %v11453_v38 = vpop.f32.mrb[31].mxu0  ;;  %13564 = vmatpush1.bf16.msra.mxu1 %v18872_v57  ;;  %v18884_v0 = vld [vmem:[%s19595_s27 + $0x130] ss:$8 sps:$4 sm:$0xff]   ;;  %v22338_v57 = vpop.f32.mrb[80].mxu1 }
0x1602   :  { %13565 = vmatprep.subr.bf16.mxu1 %v18880_v49  ;;  %v12312_v49 = vpop.f32.mrb[81].mxu1  ;;  %v18889_v38 = vld [vmem:[%s19595_s27 + $0x140] ss:$8 sps:$4 sm:$0xff]  }
0x1603   :  { %13402 = vmatprep.mubr.bf16.mxu1 %v12789_v8  ;;  %11930 = vmatmul.mubr.bf16.gmra.mrb[136].mxu0 %v18860_v42  ;;  %v22342_v8 = vpop.f32.mrb[82].mxu1  ;;  %v22783_v49 = vpack.c.bf16 %v22127_v9, %v22123_v27  ;;  %v18877_v27 = vld [vmem:[%s22782_s19 + $0x2f4] ss:$8 sps:$4 sm:$0xff]  }
0x1604   :  { %13403 = vmatmul.mubr.bf16.gmra.mrb[120].mxu1 %v12788_v24  ;;  %15446 = vmatprep.mubr.msk.bf16.mxu0 %vm604_vm1, %v18865_v41  ;;  %v12315_v22 = vpop.f32.mrb[83].mxu1 }
0x1605   :  { %13566 = vmatpush1.bf16.msra.mxu1 %v18878_v45  ;;  %v18928_v45 = vld [vmem:[%s19595_s27 + $0x1a0] ss:$8 sps:$4 sm:$0xff]  }
0x1606   :  { %v11456_v12 = vpop.f32.mrb[32].mxu0  ;;  %13567 = vmatprep.subr.bf16.mxu1 %v18886_v32  ;;  %v18900_v32 = vld [vmem:[%s19595_s27 + $0x154] ss:$8 sps:$4 sm:$0xff]  }
0x1607   :  { %v11458_v44 = vpop.f32.mrb[33].mxu0 }
0x1608   :  { %v11459_v42 = vpop.f32.mrb[34].mxu0 }
0x1609   :  { %v12794_v24 = vpack.c.bf16 %v11459_v42, %v11456_v12  ;;  %v11461_v41 = vpop.f32.mrb[35].mxu0  ;;  %13568 = vmatpush1.bf16.msra.mxu1 %v18884_v0  ;;  %v18898_v12 = vld [vmem:[%s19595_s27 + $0x150] ss:$8 sps:$4 sm:$0xff]   ;;  %v22354_v0 = vpop.f32.mrb[84].mxu1  ;;  %v18906_v42 = vld [vmem:[%s19595_s27 + $0x164] ss:$8 sps:$4 sm:$0xff]  }
0x160a   :  { %13569 = vmatprep.subr.bf16.mxu1 %v18891_v17  ;;  %v12320_v17 = vpop.f32.mrb[85].mxu1  ;;  %v18869_v41 = vld [vmem:[%s22782_s19 + $0x2e0] ss:$8 sps:$4 sm:$0xff]  }
0x160b   :  { %13412 = vmatprep.mubr.bf16.mxu1 %v12794_v24  ;;  %11938 = vmatmul.mubr.bf16.gmra.mrb[140].mxu0 %v18863_v63  ;;  %v22358_v24 = vpop.f32.mrb[86].mxu1  ;;  %v22784_v17 = vpack.c.bf16 %v22136_v28, %v22132_v37  ;;  %v18883_v37 = vld [vmem:[%s22782_s19 + $0x304] ss:$8 sps:$4 sm:$0xff]  }
0x160c   :  { %13413 = vmatmul.mubr.bf16.gmra.mrb[124].mxu1 %v22783_v49  ;;  %15447 = vmatprep.mubr.msk.bf16.mxu0 %vm604_vm1, %v18871_v20  ;;  %v12323_v9 = vpop.f32.mrb[87].mxu1 }
0x160d   :  { %13570 = vmatpush1.bf16.msra.mxu1 %v18889_v38  ;;  %v18904_v38 = vld [vmem:[%s19595_s27 + $0x160] ss:$8 sps:$4 sm:$0xff]  }
0x160e   :  { %v11464_v44 = vpop.f32.mrb[36].mxu0  ;;  %13571 = vmatprep.subr.bf16.mxu1 %v18900_v32  ;;  %v18912_v32 = vld [vmem:[%s19595_s27 + $0x174] ss:$8 sps:$4 sm:$0xff]  }
0x160f   :  { %v11466_v22 = vpop.f32.mrb[37].mxu0 }
0x1610   :  { %v11467_v63 = vpop.f32.mrb[38].mxu0 }
0x1611   :  { %v12799_v49 = vpack.c.bf16 %v11467_v63, %v11464_v44  ;;  %v11469_v20 = vpop.f32.mrb[39].mxu0  ;;  %13572 = vmatpush1.bf16.msra.mxu1 %v18898_v12  ;;  %v18910_v44 = vld [vmem:[%s19595_s27 + $0x170] ss:$8 sps:$4 sm:$0xff]   ;;  %v22370_v12 = vpop.f32.mrb[88].mxu1  ;;  %v18918_v63 = vld [vmem:[%s19595_s27 + $0x184] ss:$8 sps:$4 sm:$0xff]  }
0x1612   :  { %13573 = vmatprep.subr.bf16.mxu1 %v18906_v42  ;;  %v12328_v42 = vpop.f32.mrb[89].mxu1  ;;  %v18875_v20 = vld [vmem:[%s22782_s19 + $0x2f0] ss:$8 sps:$4 sm:$0xff]  }
0x1613   :  { %13422 = vmatprep.mubr.bf16.mxu1 %v12799_v49  ;;  %11946 = vmatmul.mubr.bf16.gmra.mrb[144].mxu0 %v18869_v41  ;;  %v22374_v41 = vpop.f32.mrb[90].mxu1  ;;  %v22785_v42 = vpack.c.bf16 %v22145_v1, %v22141_v33 }
0x1614   :  { %13423 = vmatmul.mubr.bf16.gmra.mrb[128].mxu1 %v22784_v17  ;;  %15448 = vmatprep.mubr.msk.bf16.mxu0 %vm604_vm1, %v18877_v27  ;;  %v12331_v28 = vpop.f32.mrb[91].mxu1  ;;  %v18916_v17 = vld [vmem:[%s19595_s27 + $0x180] ss:$8 sps:$4 sm:$0xff]  }
0x1615   :  { %13574 = vmatpush1.bf16.msra.mxu1 %v18904_v38  ;;  %v18930_v28 = vld [vmem:[%s19595_s27 + $0x1a4] ss:$8 sps:$4 sm:$0xff]  }
0x1616   :  { %v11472_v22 = vpop.f32.mrb[40].mxu0  ;;  %13575 = vmatprep.subr.bf16.mxu1 %v18912_v32  ;;  %v18924_v32 = vld [vmem:[%s19595_s27 + $0x194] ss:$8 sps:$4 sm:$0xff]  }
0x1617   :  { %v11474_v9 = vpop.f32.mrb[41].mxu0 }
0x1618   :  { %v11475_v49 = vpop.f32.mrb[42].mxu0  ;;  %v15399_v9 = vld [vmem:[%s22782_s19 + $0x310] sm:$0xff] }
0x1619   :  { %v12804_v27 = vpack.c.bf16 %v11475_v49, %v11472_v22  ;;  %v11477_v38 = vpop.f32.mrb[43].mxu0  ;;  %13576 = vmatpush1.bf16.msra.mxu1 %v18910_v44  ;;  %v18922_v22 = vld [vmem:[%s19595_s27 + $0x190] ss:$8 sps:$4 sm:$0xff]   ;;  %v22387_v44 = vpop.f32.mrb[92].mxu1  ;;  %v15433_v1 = vcombine.high %v15399_v9, %v15399_v9 }
0x161a   :  { %13577 = vmatprep.subr.bf16.mxu1 %v18918_v63  ;;  %v12336_v63 = vpop.f32.mrb[93].mxu1 }
0x161b   :  { %13432 = vmatprep.mubr.bf16.mxu1 %v12804_v27  ;;  %11954 = vmatmul.mubr.bf16.gmra.mrb[148].mxu0 %v18875_v20  ;;  %v18881_v27 = vld [vmem:[%s22782_s19 + $0x300] ss:$8 sps:$4 sm:$0xff]   ;;  %v22391_v20 = vpop.f32.mrb[94].mxu1  ;;  %v22786_v63 = vpack.c.bf16 %v22155_v60, %v22152_v53  ;;  %v18894_v53 = vld [vmem:[%s22782_s19 + $0x424] ss:$8 sps:$4 sm:$0xff]  }
0x161c   :  { %13433 = vmatmul.mubr.bf16.gmra.mrb[132].mxu1 %v22785_v42  ;;  %15449 = vmatprep.mubr.msk.bf16.mxu0 %vm604_vm1, %v18883_v37  ;;  %v12339_v42 = vpop.f32.mrb[95].mxu1 }
0x161d   :  { %13578 = vmatpush1.bf16.msra.mxu1 %v18916_v17 }
0x161e   :  { %v11480_v49 = vpop.f32.mrb[44].mxu0  ;;  %13579 = vmatprep.subr.bf16.mxu1 %v18924_v32  ;;  %v18936_v32 = vld [vmem:[%s19595_s27 + $0x1b4] ss:$8 sps:$4 sm:$0xff]  }
0x161f   :  { %v11482_v38 = vpop.f32.mrb[45].mxu0 }
0x1620   :  { %v11483_v33 = vpop.f32.mrb[46].mxu0  ;;  %v22402_v38 = vpop.f32.mrb[96].mxu1 }
0x1621   :  { %v12809_v37 = vpack.c.bf16 %v11483_v33, %v11480_v49  ;;  %v11485_v17 = vpop.f32.mrb[47].mxu0  ;;  %13580 = vmatpush1.bf16.msra.mxu1 %v18922_v22  ;;  %v18934_v49 = vld [vmem:[%s19595_s27 + $0x1b0] ss:$8 sps:$4 sm:$0xff]   ;;  %v18942_v33 = vld [vmem:[%s19595_s27 + $0x1c4] ss:$8 sps:$4 sm:$0xff]  }
0x1622   :  { %13581 = vmatprep.subr.bf16.mxu1 %v18930_v28  ;;  %v12344_v28 = vpop.f32.mrb[97].mxu1  ;;  %v15432_v17 = vcombine.low %v15399_v9, %v15399_v9  ;;  %v22787_v9 = vpack.c.bf16 %v22163_v36, %v22160_v16  ;;  %v18897_v16 = vld [vmem:[%s22782_s19 + $0x434] ss:$8 sps:$4 sm:$0xff]  }
0x1623   :  { %13442 = vmatprep.mubr.bf16.mxu1 %v12809_v37  ;;  %11962 = vmatmul.mubr.bf16.gmra.mrb[152].mxu0 %v18881_v27  ;;  %v22405_v37 = vpop.f32.mrb[98].mxu1 }
0x1624   :  { %13443 = vmatmul.mubr.bf16.gmra.mrb[136].mxu1 %v22786_v63  ;;  %15450 = vmatprep.mubr.msk.bf16.mxu0 %vm604_vm1, %v15433_v1  ;;  %v12347_v60 = vpop.f32.mrb[99].mxu1  ;;  %v18940_v1 = vld [vmem:[%s19595_s27 + $0x1c0] ss:$8 sps:$4 sm:$0xff]  }
0x1625   :  { %13582 = vmatpush1.bf16.msra.mxu1 %v18928_v45  ;;  %v18892_v60 = vld [vmem:[%s22782_s19 + $0x420] ss:$8 sps:$4 sm:$0xff]  }
0x1626   :  { %v11488_v22 = vpop.f32.mrb[48].mxu0  ;;  %13583 = vmatprep.subr.bf16.mxu1 %v18936_v32  ;;  %v18945_v32 = vld [vmem:[%s19595_s27 + $0x1d4] ss:$8 sps:$4 sm:$0xff]  }
0x1627   :  { %v11490_v42 = vpop.f32.mrb[49].mxu0 }
0x1628   :  { %v11491_v27 = vpop.f32.mrb[50].mxu0  ;;  %v18951_v42 = vld [vmem:[%s19595_s27 + $0x1e4] ss:$8 sps:$4 sm:$0xff]  }
0x1629   :  { %v12814_v63 = vpack.c.bf16 %v11491_v27, %v11488_v22  ;;  %v11493_v45 = vpop.f32.mrb[51].mxu0  ;;  %13584 = vmatpush1.bf16.msra.mxu1 %v18934_v49  ;;  %v18943_v22 = vld [vmem:[%s19595_s27 + $0x1d0] ss:$8 sps:$4 sm:$0xff]   ;;  %v22417_v49 = vpop.f32.mrb[100].mxu1 }
0x162a   :  { %13585 = vmatprep.subr.bf16.mxu1 %v18942_v33  ;;  %v12352_v33 = vpop.f32.mrb[101].mxu1 }
0x162b   :  { %13452 = vmatprep.mubr.bf16.mxu1 %v12814_v63  ;;  %11970 = vmatmul.mubr.bf16.gmra.mrb[156].mxu0 %v15432_v17  ;;  %v22421_v63 = vpop.f32.mrb[102].mxu1  ;;  %v22788_v33 = vpack.c.bf16 %v22172_v29, %v22168_v59 }
0x162c   :  { %13453 = vmatmul.mubr.bf16.gmra.mrb[140].mxu1 %v22787_v9  ;;  %15602 = vmatprep.mubr.msk.bf16.mxu0 %vm604_vm1, %v18894_v53  ;;  %v12355_v36 = vpop.f32.mrb[103].mxu1 }
0x162d   :  { %13586 = vmatpush1.bf16.msra.mxu1 %v18940_v1  ;;  %v18949_v1 = vld [vmem:[%s19595_s27 + $0x1e0] ss:$8 sps:$4 sm:$0xff]  }
0x162e   :  { %v11496_v28 = vpop.f32.mrb[52].mxu0  ;;  %13587 = vmatprep.subr.bf16.mxu1 %v18945_v32  ;;  %v18954_v32 = vld [vmem:[%s19595_s27 + $0x1f4] ss:$8 sps:$4 sm:$0xff]  }
0x162f   :  { %v11498_v27 = vpop.f32.mrb[53].mxu0 }
0x1630   :  { %v11499_v17 = vpop.f32.mrb[54].mxu0  ;;  %v22433_v27 = vpop.f32.mrb[104].mxu1 }
0x1631   :  { %v12819_v45 = vpack.c.bf16 %v11499_v17, %v11496_v28  ;;  %v11501_v53 = vpop.f32.mrb[55].mxu0  ;;  %13588 = vmatpush1.bf16.msra.mxu1 %v18943_v22  ;;  %v18952_v28 = vld [vmem:[%s19595_s27 + $0x1f0] ss:$8 sps:$4 sm:$0xff]   ;;  %v18966_v17 = vld [vmem:[%s19595_s27 + $0x204] ss:$8 sps:$4 sm:$0xff]   ;;  %v12360_v36 = vpop.f32.mrb[105].mxu1 }
0x1632   :  { %13589 = vmatprep.subr.bf16.mxu1 %v18951_v42  ;;  %v18895_v42 = vld [vmem:[%s22782_s19 + $0x430] ss:$8 sps:$4 sm:$0xff]   ;;  %v22437_v9 = vpop.f32.mrb[106].mxu1  ;;  %v18901_v36 = vld [vmem:[%s22782_s19 + $0x440] ss:$8 sps:$4 sm:$0xff]  }
0x1633   :  { %13462 = vmatprep.mubr.bf16.mxu1 %v12819_v45  ;;  %12648 = vmatmul.mubr.bf16.vlgmr.msra.gmra.mrb[160].mxu0 %v18892_v60  ;;  %v18903_v60 = vld [vmem:[%s22782_s19 + $0x444] ss:$8 sps:$4 sm:$0xff]   ;;  %v12363_v10 = vpop.f32.mrb[107].mxu1 }
0x1634   :  { %13463 = vmatmul.mubr.bf16.gmra.mrb[144].mxu1 %v22788_v33  ;;  %15603 = vmatprep.mubr.msk.bf16.mxu0 %vm604_vm1, %v18897_v16  ;;  %v12856_v16 = vpack.c.bf16 %v22437_v9, %v22433_v27 }
0x1635   :  { %13590 = vmatpush1.bf16.msra.mxu1 %v18949_v1  ;;  %v22789_v1 = vpack.c.bf16 %v22184_v5, %v22179_v21  ;;  %v22790_v5 = vpack.c.bf16 %v22197_v52, %v22192_v7  ;;  %v22791_v7 = vpack.c.bf16 %v22210_v4, %v22205_v26 }
0x1636   :  { %v11504_v22 = vpop.f32.mrb[56].mxu0  ;;  %13591 = vmatprep.subr.bf16.mxu1 %v18954_v32  ;;  %v22446_v32 = vpop.f32.mrb[108].mxu1 }
0x1637   :  { %v11506_v53 = vpop.f32.mrb[57].mxu0  ;;  %v12368_v10 = vpop.f32.mrb[109].mxu1 }
0x1638   :  { %v11507_v45 = vpop.f32.mrb[58].mxu0  ;;  %v18907_v10 = vld [vmem:[%s22782_s19 + $0x450] ss:$8 sps:$4 sm:$0xff]  }
0x1639   :  { %v12824_v59 = vpack.c.bf16 %v11507_v45, %v11504_v22  ;;  %v11509_v29 = vpop.f32.mrb[59].mxu0  ;;  %13592 = vmatpush1.bf16.msra.mxu1 %v18952_v28  ;;  %v22449_v28 = vpop.f32.mrb[110].mxu1 }
0x163a   :  { %13762 = vmatprep.subr.bf16.mxu1 %v18966_v17  ;;  %v18909_v17 = vld [vmem:[%s22782_s19 + $0x454] ss:$8 sps:$4 sm:$0xff]   ;;  %v12371_v45 = vpop.f32.mrb[111].mxu1 }
0x163b   :  { %13472 = vmatprep.mubr.bf16.mxu1 %v12824_v59  ;;  %12656 = vmatmul.mubr.bf16.gmra.mrb[164].mxu0 %v18895_v42  ;;  %v22458_v29 = vpop.f32.mrb[112].mxu1 }
0x163c   :  { %13473 = vmatmul.mubr.bf16.gmra.mrb[148].mxu1 %v22789_v1  ;;  %15604 = vmatprep.mubr.msk.bf16.mxu0 %vm604_vm1, %v18903_v60 }
0x163e   :  { %v11512_v33 = vpop.f32.mrb[60].mxu0 }
0x163f   :  { %v11514_v22 = vpop.f32.mrb[61].mxu0 }
0x1640   :  { %v11515_v53 = vpop.f32.mrb[62].mxu0 }
0x1641   :  { %v12829_v42 = vpack.c.bf16 %v11515_v53, %v11512_v33  ;;  %v11517_v59 = vpop.f32.mrb[63].mxu0  ;;  %v12376_v33 = vpop.f32.mrb[113].mxu1  ;;  %v18915_v53 = vld [vmem:[%s22782_s19 + $0x464] ss:$8 sps:$4 sm:$0xff]  }
0x1642   :  { %v12377_v45 = vpop.f32.mrb[114].mxu1  ;;  %v18921_v33 = vld [vmem:[%s22782_s19 + $0x474] ss:$8 sps:$4 sm:$0xff]  }
0x1643   :  { %13482 = vmatprep.mubr.bf16.mxu1 %v12829_v42  ;;  %12664 = vmatmul.mubr.bf16.gmra.mrb[168].mxu0 %v18901_v36  ;;  %v12378_v36 = vpop.f32.mrb[115].mxu1 }
0x1644   :  { %13483 = vmatmul.mubr.bf16.gmra.mrb[152].mxu1 %v22790_v5  ;;  %15605 = vmatprep.mubr.msk.bf16.mxu0 %vm604_vm1, %v18909_v17  ;;  %v18913_v5 = vld [vmem:[%s22782_s19 + $0x460] ss:$8 sps:$4 sm:$0xff]  }
0x1645   :  { %v18925_v36 = vld [vmem:[%s22782_s19 + $0x480] ss:$8 sps:$4 sm:$0xff]  }
0x1646   :  { %v11520_v60 = vpop.f32.mrb[64].mxu0 }
0x1647   :  { %v11522_v1 = vpop.f32.mrb[65].mxu0 }
0x1648   :  { %v11523_v22 = vpop.f32.mrb[66].mxu0 }
0x1649   :  { %v12834_v59 = vpack.c.bf16 %v11523_v22, %v11520_v60  ;;  %v11525_v42 = vpop.f32.mrb[67].mxu0  ;;  %v22792_v60 = vpack.c.bf16 %v22227_v13, %v22220_v40 }
0x164b   :  { %13492 = vmatprep.mubr.bf16.mxu1 %v12834_v59  ;;  %12672 = vmatmul.mubr.bf16.gmra.mrb[172].mxu0 %v18907_v10  ;;  %v18919_v10 = vld [vmem:[%s22782_s19 + $0x470] ss:$8 sps:$4 sm:$0xff]  }
0x164c   :  { %13493 = vmatmul.mubr.bf16.gmra.mrb[156].mxu1 %v22791_v7  ;;  %15606 = vmatprep.mubr.msk.bf16.mxu0 %vm604_vm1, %v18915_v53  ;;  %v18927_v53 = vld [vmem:[%s22782_s19 + $0x484] ss:$8 sps:$4 sm:$0xff]  }
0x164e   :  { %v11528_v52 = vpop.f32.mrb[68].mxu0 }
0x164f   :  { %v11530_v17 = vpop.f32.mrb[69].mxu0 }
0x1650   :  { %v11531_v1 = vpop.f32.mrb[70].mxu0 }
0x1651   :  { %v12839_v21 = vpack.c.bf16 %v11531_v1, %v11528_v52  ;;  %v11533_v45 = vpop.f32.mrb[71].mxu0  ;;  %v18933_v52 = vld [vmem:[%s22782_s19 + $0x494] ss:$8 sps:$4 sm:$0xff]   ;;  %v22794_v1 = vpack.c.bf16 %v22259_v54, %v22253_v31 }
0x1653   :  { %13502 = vmatprep.mubr.bf16.mxu1 %v12839_v21  ;;  %12680 = vmatmul.mubr.bf16.gmra.mrb[176].mxu0 %v18913_v5  ;;  %v22793_v21 = vpack.c.bf16 %v22244_v3, %v22238_v58 }
0x1654   :  { %13503 = vmatmul.mubr.bf16.gmra.mrb[160].mxu1 %v22792_v60  ;;  %15607 = vmatprep.mubr.msk.bf16.mxu0 %vm604_vm1, %v18921_v33  ;;  %v18931_v33 = vld [vmem:[%s22782_s19 + $0x490] ss:$8 sps:$4 sm:$0xff]   ;;  %v18939_v60 = vld [vmem:[%s22782_s19 + $0x4a4] ss:$8 sps:$4 sm:$0xff]  }
0x1656   :  { %v11536_v26 = vpop.f32.mrb[72].mxu0 }
0x1657   :  { %v11538_v4 = vpop.f32.mrb[73].mxu0 }
0x1658   :  { %v11539_v22 = vpop.f32.mrb[74].mxu0 }
0x1659   :  { %v12844_v59 = vpack.c.bf16 %v11539_v22, %v11536_v26  ;;  %v11541_v42 = vpop.f32.mrb[75].mxu0  ;;  %v18937_v22 = vld [vmem:[%s22782_s19 + $0x4a0] ss:$8 sps:$4 sm:$0xff]  }
0x165b   :  { %13512 = vmatprep.mubr.bf16.mxu1 %v12844_v59  ;;  %12688 = vmatmul.mubr.bf16.gmra.mrb[180].mxu0 %v18919_v10  ;;  %v22795_v10 = vpack.c.bf16 %v22274_v2, %v22268_v15  ;;  %v18948_v59 = vld [vmem:[%s22782_s19 + $0x4b4] ss:$8 sps:$4 sm:$0xff]  }
0x165c   :  { %13513 = vmatmul.mubr.bf16.gmra.mrb[164].mxu1 %v22793_v21  ;;  %15608 = vmatprep.mubr.msk.bf16.mxu0 %vm604_vm1, %v18927_v53 }
0x165e   :  { %v11544_v40 = vpop.f32.mrb[76].mxu0 }
0x165f   :  { %v11546_v13 = vpop.f32.mrb[77].mxu0 }
0x1660   :  { %v11547_v7 = vpop.f32.mrb[78].mxu0  ;;  %v18946_v13 = vld [vmem:[%s22782_s19 + $0x4b0] ss:$8 sps:$4 sm:$0xff]  }
0x1661   :  { %v12849_v17 = vpack.c.bf16 %v11547_v7, %v11544_v40  ;;  %v11549_v5 = vpop.f32.mrb[79].mxu0  ;;  %v22796_v40 = vpack.c.bf16 %v22288_v61, %v22283_v35  ;;  %v22797_v35 = vpack.c.bf16 %v22223_v48, %v22218_v19  ;;  %v22798_v19 = vpack.c.bf16 %v22241_v56, %v22236_v25  ;;  %v18973_v48 = vld [vmem:[%s19595_s27 + $0x210] ss:$8 sps:$4 sm:$0xff]   ;;  %v18986_v25 = vld [vmem:[%s19595_s27 + $0x234] ss:$8 sps:$4 sm:$0xff]  }
0x1662   :  { %v12863_v5 = vpack.c.bf16 %v22298_v6, %v22298_v6  ;;  %v18964_v6 = vld [vmem:[%s19595_s27 + $0x200] ss:$8 sps:$4 sm:$0xff]   ;;  %v22799_v56 = vpack.c.bf16 %v22256_v50, %v22251_v14  ;;  %v18992_v14 = vld [vmem:[%s19595_s27 + $0x254] ss:$8 sps:$4 sm:$0xff]   ;;  %v22800_v50 = vpack.c.bf16 %v22271_v51, %v22266_v23  ;;  %v22801_v51 = vpack.c.bf16 %v22286_v55, %v22281_v43 }
0x1663   :  { %13522 = vmatprep.mubr.bf16.mxu1 %v12849_v17  ;;  %12696 = vmatmul.mubr.bf16.gmra.mrb[184].mxu0 %v18925_v36  ;;  %v18998_v23 = vld [vmem:[%s19595_s27 + $0x274] ss:$8 sps:$4 sm:$0xff]   ;;  %v22802_v55 = vpack.c.bf16 %v22301_v18, %v22296_v46  ;;  %v15567_v43 = vld [vmem:[%s22782_s19 + $0x520] sm:$0xff] }
0x1664   :  { %13523 = vmatmul.mubr.bf16.gmra.mrb[168].mxu1 %v22794_v1  ;;  %15609 = vmatprep.mubr.msk.bf16.mxu0 %vm604_vm1, %v18933_v52  ;;  %v18957_v52 = vld [vmem:[%s22782_s19 + $0x4c4] ss:$8 sps:$4 sm:$0xff]   ;;  %v15600_v46 = vcombine.low %v15567_v43, %v15567_v43 }
0x1666   :  { %v11552_v58 = vpop.f32.mrb[80].mxu0 }
0x1667   :  { %v11554_v3 = vpop.f32.mrb[81].mxu0 }
0x1668   :  { %v11555_v45 = vpop.f32.mrb[82].mxu0 }
0x1669   :  { %v12854_v26 = vpack.c.bf16 %v11555_v45, %v11552_v58  ;;  %v11557_v4 = vpop.f32.mrb[83].mxu0  ;;  %v18955_v58 = vld [vmem:[%s22782_s19 + $0x4c0] ss:$8 sps:$4 sm:$0xff]  }
0x166b   :  { %13532 = vmatprep.mubr.bf16.mxu1 %v12854_v26  ;;  %12704 = vmatmul.mubr.bf16.gmra.mrb[188].mxu0 %v18931_v33  ;;  %v18960_v33 = vld [vmem:[%s22782_s19 + $0x4d4] ss:$8 sps:$4 sm:$0xff]  }
0x166c   :  { %13533 = vmatmul.mubr.bf16.gmra.mrb[172].mxu1 %v22795_v10  ;;  %15610 = vmatprep.mubr.msk.bf16.mxu0 %vm604_vm1, %v18939_v60  ;;  %v18975_v26 = vld [vmem:[%s19595_s27 + $0x214] ss:$8 sps:$4 sm:$0xff]   ;;  %v18983_v10 = vld [vmem:[%s19595_s27 + $0x224] ss:$8 sps:$4 sm:$0xff]  }
0x166e   :  { %v11560_v31 = vpop.f32.mrb[84].mxu0 }
0x166f   :  { %v11562_v54 = vpop.f32.mrb[85].mxu0 }
0x1670   :  { %v11563_v53 = vpop.f32.mrb[86].mxu0  ;;  %v18958_v54 = vld [vmem:[%s22782_s19 + $0x4d0] ss:$8 sps:$4 sm:$0xff]  }
0x1671   :  { %v12859_v42 = vpack.c.bf16 %v11563_v53, %v11560_v31  ;;  %v11565_v21 = vpop.f32.mrb[87].mxu0  ;;  %v18963_v53 = vld [vmem:[%s22782_s19 + $0x4e4] ss:$8 sps:$4 sm:$0xff]  }
0x1672   :  { %v18981_v21 = vld [vmem:[%s19595_s27 + $0x220] ss:$8 sps:$4 sm:$0xff]  }
0x1673   :  { %13542 = vmatprep.mubr.bf16.mxu1 %v12859_v42  ;;  %12712 = vmatmul.mubr.bf16.gmra.mrb[192].mxu0 %v18937_v22 }
0x1674   :  { %13543 = vmatmul.mubr.bf16.gmra.mrb[176].mxu1 %v22796_v40  ;;  %15611 = vmatprep.mubr.msk.bf16.mxu0 %vm604_vm1, %v18948_v59  ;;  %v18984_v40 = vld [vmem:[%s19595_s27 + $0x230] ss:$8 sps:$4 sm:$0xff]  }
0x1676   :  { %v11568_v2 = vpop.f32.mrb[88].mxu0 }
0x1677   :  { %v12864_v15 = vpack.c.bf16 %v11568_v2, %v11568_v2  ;;  %v11570_v36 = vpop.f32.mrb[89].mxu0 }
0x1678   :  { %v11571_v7 = vpop.f32.mrb[90].mxu0  ;;  %v18961_v36 = vld [vmem:[%s22782_s19 + $0x4e0] ss:$8 sps:$4 sm:$0xff]  }
0x1679   :  { %13552 = vmatprep.mubr.bf16.mxu1 %v12864_v15  ;;  %v11572_v17 = vpop.f32.mrb[91].mxu0  ;;  %v18989_v15 = vld [vmem:[%s19595_s27 + $0x244] ss:$8 sps:$4 sm:$0xff]  }
0x167b   :  { %12720 = vmatmul.mubr.bf16.gmra.mrb[196].mxu0 %v18946_v13 }
0x167c   :  { %13553 = vmatmul.mubr.bf16.gmra.mrb[180].mxu1 %v12863_v5  ;;  %15612 = vmatprep.mubr.msk.bf16.mxu0 %vm604_vm1, %v18957_v52  ;;  %v18969_v52 = vld [vmem:[%s22782_s19 + $0x4f4] ss:$8 sps:$4 sm:$0xff]  }
0x167d   :  { %13593 = vmatprep.mubr.bf16.mxu1 %v22797_v35  ;;  %v18987_v35 = vld [vmem:[%s19595_s27 + $0x240] ss:$8 sps:$4 sm:$0xff]  }
0x167e   :  { %v11843_v61 = vpop.f32.mrb[92].mxu0 }
0x167f   :  { %v11845_v1 = vpop.f32.mrb[93].mxu0 }
0x1680   :  { %v11846_v3 = vpop.f32.mrb[94].mxu0 }
0x1681   :  { %v12785_v45 = vpack.c.bf16 %v11846_v3, %v11843_v61  ;;  %v11848_v60 = vpop.f32.mrb[95].mxu0  ;;  %v18990_v61 = vld [vmem:[%s19595_s27 + $0x250] ss:$8 sps:$4 sm:$0xff]  }
0x1682   :  { %v18972_v60 = vld [vmem:[%s22782_s19 + $0x504] ss:$8 sps:$4 sm:$0xff]  }
0x1683   :  { %12728 = vmatmul.mubr.bf16.gmra.mrb[200].mxu0 %v18955_v58  ;;  %v18995_v58 = vld [vmem:[%s19595_s27 + $0x264] ss:$8 sps:$4 sm:$0xff]  }
0x1684   :  { %13594 = vmatmul.mubr.bf16.vlgmr.msra.gmra.mrb[116].mxu1 %v12785_v45  ;;  %15613 = vmatprep.mubr.msk.bf16.mxu0 %vm604_vm1, %v18960_v33  ;;  %v18967_v33 = vld [vmem:[%s22782_s19 + $0x4f0] ss:$8 sps:$4 sm:$0xff]  }
0x1685   :  { %13603 = vmatprep.mubr.bf16.mxu1 %v22798_v19  ;;  %13763 = vmatpush1.bf16.msra.mxu1 %v18964_v6  ;;  %v18993_v19 = vld [vmem:[%s19595_s27 + $0x260] ss:$8 sps:$4 sm:$0xff]  }
0x1686   :  { %v11851_v4 = vpop.f32.mrb[96].mxu0  ;;  %13764 = vmatprep.subr.bf16.mxu1 %v18975_v26 }
0x1687   :  { %v11853_v31 = vpop.f32.mrb[97].mxu0 }
0x1688   :  { %v11854_v22 = vpop.f32.mrb[98].mxu0  ;;  %v18970_v31 = vld [vmem:[%s22782_s19 + $0x500] ss:$8 sps:$4 sm:$0xff]  }
0x1689   :  { %v12790_v59 = vpack.c.bf16 %v11854_v22, %v11851_v4  ;;  %v11856_v42 = vpop.f32.mrb[99].mxu0  ;;  %13765 = vmatpush1.bf16.msra.mxu1 %v18973_v48  ;;  %v18996_v48 = vld [vmem:[%s19595_s27 + $0x270] ss:$8 sps:$4 sm:$0xff]   ;;  %v18978_v22 = vld [vmem:[%s22782_s19 + $0x514] ss:$8 sps:$4 sm:$0xff]  }
0x168a   :  { %13766 = vmatprep.subr.bf16.mxu1 %v18983_v10 }
0x168b   :  { %12736 = vmatmul.mubr.bf16.gmra.mrb[204].mxu0 %v18958_v54 }
0x168c   :  { %13604 = vmatmul.mubr.bf16.gmra.mrb[120].mxu1 %v12790_v59  ;;  %15614 = vmatprep.mubr.msk.bf16.mxu0 %vm604_vm1, %v18963_v53 }
0x168d   :  { %13613 = vmatprep.mubr.bf16.mxu1 %v22799_v56  ;;  %13767 = vmatpush1.bf16.msra.mxu1 %v18981_v21 }
0x168e   :  { %v11859_v2 = vpop.f32.mrb[100].mxu0  ;;  %13768 = vmatprep.subr.bf16.mxu1 %v18986_v25  ;;  %v18976_v25 = vld [vmem:[%s22782_s19 + $0x510] ss:$8 sps:$4 sm:$0xff]  }
0x168f   :  { %v11861_v13 = vpop.f32.mrb[101].mxu0 }
0x1690   :  { %v11862_v7 = vpop.f32.mrb[102].mxu0  ;;  %v22803_v13 = vpack.c.bf16 %v22310_v11, %v22307_v30  ;;  %v22805_v11 = vpack.c.bf16 %v22342_v8, %v22338_v57  ;;  %v22807_v57 = vpack.c.bf16 %v22374_v41, %v22370_v12  ;;  %v22809_v12 = vpack.c.bf16 %v22405_v37, %v22402_v38 }
0x1691   :  { %v12795_v17 = vpack.c.bf16 %v11862_v7, %v11859_v2  ;;  %v11864_v5 = vpop.f32.mrb[103].mxu0  ;;  %13769 = vmatpush1.bf16.msra.mxu1 %v18984_v40  ;;  %v15601_v40 = vcombine.high %v15567_v43, %v15567_v43 }
0x1692   :  { %13770 = vmatprep.subr.bf16.mxu1 %v18989_v15  ;;  %v22804_v5 = vpack.c.bf16 %v22326_v47, %v22322_v62  ;;  %v22806_v62 = vpack.c.bf16 %v22358_v24, %v22354_v0  ;;  %v22808_v0 = vpack.c.bf16 %v22391_v20, %v22387_v44  ;;  %v22810_v44 = vpack.c.bf16 %v22421_v63, %v22417_v49 }
0x1693   :  { %12744 = vmatmul.mubr.bf16.gmra.mrb[208].mxu0 %v18961_v36  ;;  %v22811_v49 = vpack.c.bf16 %v22449_v28, %v22446_v32 }
0x1694   :  { %13614 = vmatmul.mubr.bf16.gmra.mrb[124].mxu1 %v12795_v17  ;;  %15615 = vmatprep.mubr.msk.bf16.mxu0 %vm604_vm1, %v18969_v52 }
0x1695   :  { %13623 = vmatprep.mubr.bf16.mxu1 %v22800_v50  ;;  %13771 = vmatpush1.bf16.msra.mxu1 %v18987_v35 }
0x1696   :  { %v11867_v1 = vpop.f32.mrb[104].mxu0  ;;  %13772 = vmatprep.subr.bf16.mxu1 %v18992_v14 }
0x1697   :  { %v11869_v3 = vpop.f32.mrb[105].mxu0 }
0x1698   :  { %v11870_v45 = vpop.f32.mrb[106].mxu0 }
0x1699   :  { %v12800_v6 = vpack.c.bf16 %v11870_v45, %v11867_v1  ;;  %v11872_v26 = vpop.f32.mrb[107].mxu0  ;;  %13773 = vmatpush1.bf16.msra.mxu1 %v18990_v61 }
0x169a   :  { %13774 = vmatprep.subr.bf16.mxu1 %v18995_v58 }
0x169b   :  { %12752 = vmatmul.mubr.bf16.gmra.mrb[212].mxu0 %v18967_v33 }
0x169c   :  { %13624 = vmatmul.mubr.bf16.gmra.mrb[128].mxu1 %v12800_v6  ;;  %15616 = vmatprep.mubr.msk.bf16.mxu0 %vm604_vm1, %v18972_v60 }
0x169d   :  { %13633 = vmatprep.mubr.bf16.mxu1 %v22801_v51  ;;  %13775 = vmatpush1.bf16.msra.mxu1 %v18993_v19 }
0x169e   :  { %v11875_v4 = vpop.f32.mrb[108].mxu0  ;;  %13776 = vmatprep.subr.bf16.mxu1 %v18998_v23 }
0x169f   :  { %v11877_v10 = vpop.f32.mrb[109].mxu0 }
0x16a0   :  { %v11878_v54 = vpop.f32.mrb[110].mxu0 }
0x16a1   :  { %v12805_v53 = vpack.c.bf16 %v11878_v54, %v11875_v4  ;;  %v11880_v59 = vpop.f32.mrb[111].mxu0  ;;  %13777 = vmatpush1.bf16.msra.mxu1 %v18996_v48 }
0x16a3   :  { %12760 = vmatmul.mubr.bf16.gmra.mrb[216].mxu0 %v18970_v31 }
0x16a4   :  { %13634 = vmatmul.mubr.bf16.gmra.mrb[132].mxu1 %v12805_v53  ;;  %15617 = vmatprep.mubr.msk.bf16.mxu0 %vm604_vm1, %v18978_v22 }
0x16a5   :  { %13643 = vmatprep.mubr.bf16.mxu1 %v22802_v55 }
0x16a6   :  { %v11883_v42 = vpop.f32.mrb[112].mxu0 }
0x16a7   :  { %v11885_v21 = vpop.f32.mrb[113].mxu0 }
0x16a8   :  { %v11886_v56 = vpop.f32.mrb[114].mxu0 }
0x16a9   :  { %v12810_v2 = vpack.c.bf16 %v11886_v56, %v11883_v42  ;;  %v11888_v15 = vpop.f32.mrb[115].mxu0 }
0x16ab   :  { %12768 = vmatmul.mubr.bf16.gmra.mrb[220].mxu0 %v18976_v25 }
0x16ac   :  { %13644 = vmatmul.mubr.bf16.gmra.mrb[136].mxu1 %v12810_v2  ;;  %15618 = vmatprep.mubr.msk.bf16.mxu0 %vm604_vm1, %v15601_v40 }
0x16ad   :  { %13653 = vmatprep.mubr.bf16.mxu1 %v22803_v13 }
0x16ae   :  { %v11891_v36 = vpop.f32.mrb[116].mxu0 }
0x16af   :  { %v11893_v7 = vpop.f32.mrb[117].mxu0 }
0x16b0   :  { %v11894_v18 = vpop.f32.mrb[118].mxu0 }
0x16b1   :  { %v12815_v52 = vpack.c.bf16 %v11894_v18, %v11891_v36  ;;  %v11896_v17 = vpop.f32.mrb[119].mxu0  ;;  %v12866_v18 = vpack.c.bf16 %v22458_v29, %v22458_v29 }
0x16b3   :  { %12776 = vmatmul.mubr.bf16.gmra.mrb[224].mxu0 %v15600_v46 }
0x16b4   :  { %13654 = vmatmul.mubr.bf16.gmra.mrb[140].mxu1 %v12815_v52 }
0x16b5   :  { %13663 = vmatprep.mubr.bf16.mxu1 %v22804_v5  ;;  %v22812_v5 = vmov 0  }
0x16b6   :  { %v11899_v35 = vpop.f32.mrb[120].mxu0 }
0x16b7   :  { %v11901_v14 = vpop.f32.mrb[121].mxu0 }
0x16b8   :  { %v11902_v50 = vpop.f32.mrb[122].mxu0 }
0x16b9   :  { %v12820_v61 = vpack.c.bf16 %v11902_v50, %v11899_v35  ;;  %v11904_v1 = vpop.f32.mrb[123].mxu0 }
0x16bc   :  { %13664 = vmatmul.mubr.bf16.gmra.mrb[144].mxu1 %v12820_v61 }
0x16bd   :  { %13673 = vmatprep.mubr.bf16.mxu1 %v22805_v11 }
0x16be   :  { %v11907_v30 = vpop.f32.mrb[124].mxu0 }
0x16bf   :  { %v11909_v58 = vpop.f32.mrb[125].mxu0 }
0x16c0   :  { %v11910_v3 = vpop.f32.mrb[126].mxu0 }
0x16c1   :  { %v12825_v33 = vpack.c.bf16 %v11910_v3, %v11907_v30  ;;  %v11912_v45 = vpop.f32.mrb[127].mxu0 }
0x16c4   :  { %13674 = vmatmul.mubr.bf16.gmra.mrb[148].mxu1 %v12825_v33 }
0x16c5   :  { %13683 = vmatprep.mubr.bf16.mxu1 %v22806_v62 }
0x16c6   :  { %v11915_v47 = vpop.f32.mrb[128].mxu0 }
0x16c7   :  { %v11917_v60 = vpop.f32.mrb[129].mxu0 }
0x16c8   :  { %v11918_v6 = vpop.f32.mrb[130].mxu0 }
0x16c9   :  { %v12830_v26 = vpack.c.bf16 %v11918_v6, %v11915_v47  ;;  %v11920_v19 = vpop.f32.mrb[131].mxu0 }
0x16cc   :  { %13684 = vmatmul.mubr.bf16.gmra.mrb[152].mxu1 %v12830_v26 }
0x16cd   :  { %13693 = vmatprep.mubr.bf16.mxu1 %v22807_v57 }
0x16ce   :  { %v11923_v8 = vpop.f32.mrb[132].mxu0 }
0x16cf   :  { %v11925_v23 = vpop.f32.mrb[133].mxu0 }
0x16d0   :  { %v11926_v51 = vpop.f32.mrb[134].mxu0 }
0x16d1   :  { %v12835_v48 = vpack.c.bf16 %v11926_v51, %v11923_v8  ;;  %v11928_v4 = vpop.f32.mrb[135].mxu0 }
0x16d4   :  { %13694 = vmatmul.mubr.bf16.gmra.mrb[156].mxu1 %v12835_v48 }
0x16d5   :  { %13703 = vmatprep.mubr.bf16.mxu1 %v22808_v0 }
0x16d6   :  { %v11931_v24 = vpop.f32.mrb[136].mxu0 }
0x16d7   :  { %v11933_v10 = vpop.f32.mrb[137].mxu0 }
0x16d8   :  { %v11934_v31 = vpop.f32.mrb[138].mxu0 }
0x16d9   :  { %v12840_v54 = vpack.c.bf16 %v11934_v31, %v11931_v24  ;;  %v11936_v22 = vpop.f32.mrb[139].mxu0 }
0x16dc   :  { %13704 = vmatmul.mubr.bf16.gmra.mrb[160].mxu1 %v12840_v54 }
0x16dd   :  { %13713 = vmatprep.mubr.bf16.mxu1 %v22809_v12 }
0x16de   :  { %v11939_v41 = vpop.f32.mrb[140].mxu0 }
0x16df   :  { %v11941_v53 = vpop.f32.mrb[141].mxu0 }
0x16e0   :  { %v11942_v59 = vpop.f32.mrb[142].mxu0 }
0x16e1   :  { %v12845_v55 = vpack.c.bf16 %v11942_v59, %v11939_v41  ;;  %v11944_v43 = vpop.f32.mrb[143].mxu0 }
0x16e4   :  { %13714 = vmatmul.mubr.bf16.gmra.mrb[164].mxu1 %v12845_v55 }
0x16e5   :  { %13723 = vmatprep.mubr.bf16.mxu1 %v22810_v44 }
0x16e6   :  { %v11947_v20 = vpop.f32.mrb[144].mxu0 }
0x16e7   :  { %v11949_v42 = vpop.f32.mrb[145].mxu0 }
0x16e8   :  { %v11950_v21 = vpop.f32.mrb[146].mxu0 }
0x16e9   :  { %v12850_v25 = vpack.c.bf16 %v11950_v21, %v11947_v20  ;;  %v11952_v56 = vpop.f32.mrb[147].mxu0 }
0x16ec   :  { %13724 = vmatmul.mubr.bf16.gmra.mrb[168].mxu1 %v12850_v25 }
0x16ed   :  { %13733 = vmatprep.mubr.bf16.mxu1 %v12856_v16 }
0x16ee   :  { %v11955_v38 = vpop.f32.mrb[148].mxu0 }
0x16ef   :  { %v11957_v37 = vpop.f32.mrb[149].mxu0 }
0x16f0   :  { %v11958_v40 = vpop.f32.mrb[150].mxu0 }
0x16f1   :  { %v12855_v2 = vpack.c.bf16 %v11958_v40, %v11955_v38  ;;  %v11960_v15 = vpop.f32.mrb[151].mxu0 }
0x16f4   :  { %13734 = vmatmul.mubr.bf16.gmra.mrb[172].mxu1 %v12855_v2 }
0x16f5   :  { %13743 = vmatprep.mubr.bf16.mxu1 %v22811_v49 }
0x16f6   :  { %v11963_v63 = vpop.f32.mrb[152].mxu0 }
0x16f7   :  { %v11965_v13 = vpop.f32.mrb[153].mxu0 }
0x16f8   :  { %v11966_v36 = vpop.f32.mrb[154].mxu0 }
0x16f9   :  { %v12860_v7 = vpack.c.bf16 %v11966_v36, %v11963_v63  ;;  %v11968_v46 = vpop.f32.mrb[155].mxu0 }
0x16fc   :  { %13744 = vmatmul.mubr.bf16.gmra.mrb[176].mxu1 %v12860_v7 }
0x16fd   :  { %13753 = vmatprep.mubr.bf16.mxu1 %v12866_v18 }
0x16fe   :  { %v11971_v9 = vpop.f32.mrb[156].mxu0 }
0x16ff   :  { %v11973_v27 = vpop.f32.mrb[157].mxu0  ;;  %v12865_v17 = vpack.c.bf16 %v11971_v9, %v11971_v9 }
0x1700   :  { %v11974_v16 = vpop.f32.mrb[158].mxu0 }
0x1701   :  { %v11975_v52 = vpop.f32.mrb[159].mxu0 }
0x1704   :  { %13754 = vmatmul.mubr.bf16.gmra.mrb[180].mxu1 %v12865_v17 }
0x1705   :  { %13794 = vmatprep.mubr.bf16.mxu1 %v22812_v5 }
0x1706   :  { %v12649_v32 = vpop.f32.mrb[160].mxu0 }
0x1707   :  { %v12651_v28 = vpop.f32.mrb[161].mxu0 }
0x1708   :  { %v12652_v35 = vpop.f32.mrb[162].mxu0 }
0x1709   :  { %v12787_v14 = vpack.c.bf16 %v12652_v35, %v12649_v32  ;;  %v12654_v50 = vpop.f32.mrb[163].mxu0 }
0x170c   :  { %13795 = vmatmul.mubr.bf16.vlgmr.msra.gmra.mrb[116].mxu1 %v12787_v14 }
0x170d   :  { %13804 = vmatprep.mubr.bf16.mxu1 %v22812_v5 }
0x170e   :  { %v12657_v61 = vpop.f32.mrb[164].mxu0 }
0x170f   :  { %v12659_v29 = vpop.f32.mrb[165].mxu0 }
0x1710   :  { %v12660_v1 = vpop.f32.mrb[166].mxu0 }
0x1711   :  { %v12792_v11 = vpack.c.bf16 %v12660_v1, %v12657_v61  ;;  %v12662_v30 = vpop.f32.mrb[167].mxu0 }
0x1714   :  { %13805 = vmatmul.mubr.bf16.gmra.mrb[120].mxu1 %v12792_v11 }
0x1715   :  { %13814 = vmatprep.mubr.bf16.mxu1 %v22812_v5 }
0x1716   :  { %v12665_v58 = vpop.f32.mrb[168].mxu0 }
0x1717   :  { %v12667_v3 = vpop.f32.mrb[169].mxu0 }
0x1718   :  { %v12668_v33 = vpop.f32.mrb[170].mxu0 }
0x1719   :  { %v12797_v45 = vpack.c.bf16 %v12668_v33, %v12665_v58  ;;  %v12670_v62 = vpop.f32.mrb[171].mxu0 }
0x171c   :  { %13815 = vmatmul.mubr.bf16.gmra.mrb[124].mxu1 %v12797_v45 }
0x171d   :  { %13824 = vmatprep.mubr.bf16.mxu1 %v22812_v5 }
0x171e   :  { %v12673_v47 = vpop.f32.mrb[172].mxu0 }
0x171f   :  { %v12675_v60 = vpop.f32.mrb[173].mxu0 }
0x1720   :  { %v12676_v6 = vpop.f32.mrb[174].mxu0 }
0x1721   :  { %v12802_v26 = vpack.c.bf16 %v12676_v6, %v12673_v47  ;;  %v12678_v19 = vpop.f32.mrb[175].mxu0 }
0x1724   :  { %13825 = vmatmul.mubr.bf16.gmra.mrb[128].mxu1 %v12802_v26 }
0x1725   :  { %13834 = vmatprep.mubr.bf16.mxu1 %v22812_v5 }
0x1726   :  { %v12681_v57 = vpop.f32.mrb[176].mxu0 }
0x1727   :  { %v12683_v8 = vpop.f32.mrb[177].mxu0 }
0x1728   :  { %v12684_v23 = vpop.f32.mrb[178].mxu0 }
0x1729   :  { %v12807_v51 = vpack.c.bf16 %v12684_v23, %v12681_v57  ;;  %v12686_v48 = vpop.f32.mrb[179].mxu0 }
0x172a   :  { %v12948_v48 = vld [vmem:[#allocation27] sm:$0x3] }
0x172c   :  { %13835 = vmatmul.mubr.bf16.gmra.mrb[132].mxu1 %v12807_v51 }
0x172d   :  { %13844 = vmatprep.mubr.bf16.mxu1 %v22812_v5 }
0x172e   :  { %v12689_v4 = vpop.f32.mrb[180].mxu0 }
0x172f   :  { %v12691_v0 = vpop.f32.mrb[181].mxu0 }
0x1730   :  { %v12692_v24 = vpop.f32.mrb[182].mxu0  ;;  %v22605_v0 = vrot.slane %v12948_v48, %v21166_v39 }
0x1731   :  { %v12812_v10 = vpack.c.bf16 %v12692_v24, %v12689_v4  ;;  %v12694_v31 = vpop.f32.mrb[183].mxu0  ;;  %v22602_v4 = vrot.slane %v12948_v48, %v21163_v34 }
0x1734   :  { %13845 = vmatmul.mubr.bf16.gmra.mrb[136].mxu1 %v12812_v10 }
0x1735   :  { %13854 = vmatprep.mubr.bf16.mxu1 %v22812_v5 }
0x1736   :  { %v12697_v54 = vpop.f32.mrb[184].mxu0 }
0x1737   :  { %v12699_v22 = vpop.f32.mrb[185].mxu0 }
0x1738   :  { %v12700_v12 = vpop.f32.mrb[186].mxu0 }
0x1739   :  { %v12817_v41 = vpack.c.bf16 %v12700_v12, %v12697_v54  ;;  %v12702_v53 = vpop.f32.mrb[187].mxu0 }
0x173c   :  { %13855 = vmatmul.mubr.bf16.gmra.mrb[140].mxu1 %v12817_v41 }
0x173d   :  { %13864 = vmatprep.mubr.bf16.mxu1 %v22812_v5 }
0x173e   :  { %v12705_v59 = vpop.f32.mrb[188].mxu0 }
0x173f   :  { %v12707_v55 = vpop.f32.mrb[189].mxu0 }
0x1740   :  { %v12708_v43 = vpop.f32.mrb[190].mxu0 }
0x1741   :  { %v12822_v44 = vpack.c.bf16 %v12708_v43, %v12705_v59  ;;  %v12710_v20 = vpop.f32.mrb[191].mxu0 }
0x1744   :  { %13865 = vmatmul.mubr.bf16.gmra.mrb[144].mxu1 %v12822_v44 }
0x1745   :  { %13874 = vmatprep.mubr.bf16.mxu1 %v22812_v5 }
0x1746   :  { %v12713_v42 = vpop.f32.mrb[192].mxu0 }
0x1747   :  { %v12715_v21 = vpop.f32.mrb[193].mxu0 }
0x1748   :  { %v12716_v25 = vpop.f32.mrb[194].mxu0 }
0x1749   :  { %v12827_v56 = vpack.c.bf16 %v12716_v25, %v12713_v42  ;;  %v12718_v38 = vpop.f32.mrb[195].mxu0 }
0x174c   :  { %13875 = vmatmul.mubr.bf16.gmra.mrb[148].mxu1 %v12827_v56 }
0x174d   :  { %13884 = vmatprep.mubr.bf16.mxu1 %v22812_v5 }
0x174e   :  { %v12721_v37 = vpop.f32.mrb[196].mxu0 }
0x174f   :  { %v12723_v40 = vpop.f32.mrb[197].mxu0 }
0x1750   :  { %v12724_v2 = vpop.f32.mrb[198].mxu0 }
0x1751   :  { %v12832_v15 = vpack.c.bf16 %v12724_v2, %v12721_v37  ;;  %v12726_v49 = vpop.f32.mrb[199].mxu0 }
0x1754   :  { %13885 = vmatmul.mubr.bf16.gmra.mrb[152].mxu1 %v12832_v15 }
0x1755   :  { %13894 = vmatprep.mubr.bf16.mxu1 %v22812_v5 }
0x1756   :  { %v12729_v63 = vpop.f32.mrb[200].mxu0 }
0x1757   :  { %v12731_v13 = vpop.f32.mrb[201].mxu0 }
0x1758   :  { %v12732_v36 = vpop.f32.mrb[202].mxu0 }
0x1759   :  { %v12837_v7 = vpack.c.bf16 %v12732_v36, %v12729_v63  ;;  %v12734_v46 = vpop.f32.mrb[203].mxu0 }
0x175c   :  { %13895 = vmatmul.mubr.bf16.gmra.mrb[156].mxu1 %v12837_v7 }
0x175d   :  { %13904 = vmatprep.mubr.bf16.mxu1 %v22812_v5 }
0x175e   :  { %v12737_v18 = vpop.f32.mrb[204].mxu0 }
0x175f   :  { %v12739_v9 = vpop.f32.mrb[205].mxu0 }
0x1760   :  { %v12740_v27 = vpop.f32.mrb[206].mxu0 }
0x1761   :  { %v12842_v16 = vpack.c.bf16 %v12740_v27, %v12737_v18  ;;  %v12742_v52 = vpop.f32.mrb[207].mxu0 }
0x1764   :  { %13905 = vmatmul.mubr.bf16.gmra.mrb[160].mxu1 %v12842_v16 }
0x1765   :  { %13914 = vmatprep.mubr.bf16.mxu1 %v22812_v5 }
0x1766   :  { %v12745_v17 = vpop.f32.mrb[208].mxu0 }
0x1767   :  { %v12747_v32 = vpop.f32.mrb[209].mxu0 }
0x1768   :  { %v12748_v28 = vpop.f32.mrb[210].mxu0 }
0x1769   :  { %v12847_v35 = vpack.c.bf16 %v12748_v28, %v12745_v17  ;;  %v12750_v14 = vpop.f32.mrb[211].mxu0 }
0x176c   :  { %13915 = vmatmul.mubr.bf16.gmra.mrb[164].mxu1 %v12847_v35 }
0x176d   :  { %13924 = vmatprep.mubr.bf16.mxu1 %v22812_v5 }
0x176e   :  { %v12753_v50 = vpop.f32.mrb[212].mxu0 }
0x176f   :  { %v12755_v61 = vpop.f32.mrb[213].mxu0 }
0x1770   :  { %v12756_v29 = vpop.f32.mrb[214].mxu0 }
0x1771   :  { %v12852_v1 = vpack.c.bf16 %v12756_v29, %v12753_v50  ;;  %v12758_v11 = vpop.f32.mrb[215].mxu0 }
0x1774   :  { %13925 = vmatmul.mubr.bf16.gmra.mrb[168].mxu1 %v12852_v1 }
0x1775   :  { %13934 = vmatprep.mubr.bf16.mxu1 %v22812_v5 }
0x1776   :  { %v12761_v30 = vpop.f32.mrb[216].mxu0 }
0x1777   :  { %v12763_v58 = vpop.f32.mrb[217].mxu0 }
0x1778   :  { %v12764_v3 = vpop.f32.mrb[218].mxu0 }
0x1779   :  { %v12857_v33 = vpack.c.bf16 %v12764_v3, %v12761_v30  ;;  %v12766_v45 = vpop.f32.mrb[219].mxu0 }
0x177c   :  { %13935 = vmatmul.mubr.bf16.gmra.mrb[172].mxu1 %v12857_v33 }
0x177d   :  { %13944 = vmatprep.mubr.bf16.mxu1 %v22812_v5 }
0x177e   :  { %v12769_v62 = vpop.f32.mrb[220].mxu0 }
0x177f   :  { %v12771_v47 = vpop.f32.mrb[221].mxu0 }
0x1780   :  { %v12772_v60 = vpop.f32.mrb[222].mxu0 }
0x1781   :  { %v12862_v6 = vpack.c.bf16 %v12772_v60, %v12769_v62  ;;  %v12774_v26 = vpop.f32.mrb[223].mxu0 }
0x1784   :  { %13945 = vmatmul.mubr.bf16.gmra.mrb[176].mxu1 %v12862_v6 }
0x1785   :  { %13954 = vmatprep.mubr.bf16.mxu1 %v22812_v5 }
0x1786   :  { %v12777_v19 = vpop.f32.mrb[224].mxu0 }
0x1787   :  { %v12779_v57 = vpop.f32.mrb[225].mxu0  ;;  %v12867_v8 = vpack.c.bf16 %v12777_v19, %v12777_v19 }
0x1788   :  { %v12780_v23 = vpop.f32.mrb[226].mxu0 }
0x1789   :  { %v12781_v51 = vpop.f32.mrb[227].mxu0 }
0x178c   :  { %13955 = vmatmul.mubr.bf16.gmra.mrb[180].mxu1 %v12867_v8 }
0x17df   :  { %v13796_v24 = vpop.f32.mrb[116].mxu1 }
0x17e0   :  { %v17275_v10 = vadd.f32 %v13796_v24, %v22602_v4  ;;  %v13798_v5 = vpop.f32.mrb[117].mxu1 }
0x17e1   :  { %v17276_v31 = vadd.f32 %v13798_v5, %v22605_v0  ;;  %v13800_v54 = vpop.f32.mrb[118].mxu1 }
0x17e2   :  { %13963 = vst [vmem:[%s19605_s9] sm:$0xff] %v17275_v10  ;;  %v17277_v22 = vadd.f32 %v13800_v54, %v22602_v4  ;;  %v13802_v12 = vpop.f32.mrb[119].mxu1 }
0x17e3   :  { %13964 = vst [vmem:[%s19605_s9 + $0x8] sm:$0xff] %v17276_v31  ;;  %v17278_v34 = vadd.f32 %v13802_v12, %v22605_v0 }
0x17e4   :  { %13965 = vst [vmem:[%s19605_s9 + $0x10] sm:$0xff] %v17277_v22 }
0x17e5   :  { %13966 = vst [vmem:[%s19605_s9 + $0x18] sm:$0xff] %v17278_v34 }
0x17e7   :  { %v13806_v39 = vpop.f32.mrb[120].mxu1 }
0x17e8   :  { %v17279_v41 = vadd.f32 %v13806_v39, %v22602_v4  ;;  %v13808_v53 = vpop.f32.mrb[121].mxu1 }
0x17e9   :  { %v17280_v59 = vadd.f32 %v13808_v53, %v22605_v0  ;;  %v13810_v55 = vpop.f32.mrb[122].mxu1 }
0x17ea   :  { %13967 = vst [vmem:[%s19605_s9 + $0x20] sm:$0xff] %v17279_v41  ;;  %v17281_v43 = vadd.f32 %v13810_v55, %v22602_v4  ;;  %v13812_v44 = vpop.f32.mrb[123].mxu1 }
0x17eb   :  { %13968 = vst [vmem:[%s19605_s9 + $0x28] sm:$0xff] %v17280_v59  ;;  %v17282_v20 = vadd.f32 %v13812_v44, %v22605_v0 }
0x17ec   :  { %13969 = vst [vmem:[%s19605_s9 + $0x30] sm:$0xff] %v17281_v43 }
0x17ed   :  { %13970 = vst [vmem:[%s19605_s9 + $0x38] sm:$0xff] %v17282_v20 }
0x17ef   :  { %v13816_v42 = vpop.f32.mrb[124].mxu1 }
0x17f0   :  { %v17283_v21 = vadd.f32 %v13816_v42, %v22602_v4  ;;  %v13818_v25 = vpop.f32.mrb[125].mxu1 }
0x17f1   :  { %v17284_v56 = vadd.f32 %v13818_v25, %v22605_v0  ;;  %v13820_v38 = vpop.f32.mrb[126].mxu1 }
0x17f2   :  { %13971 = vst [vmem:[%s19605_s9 + $0x40] sm:$0xff] %v17283_v21  ;;  %v17285_v37 = vadd.f32 %v13820_v38, %v22602_v4  ;;  %v13822_v40 = vpop.f32.mrb[127].mxu1 }
0x17f3   :  { %13972 = vst [vmem:[%s19605_s9 + $0x48] sm:$0xff] %v17284_v56  ;;  %v17286_v2 = vadd.f32 %v13822_v40, %v22605_v0 }
0x17f4   :  { %13973 = vst [vmem:[%s19605_s9 + $0x50] sm:$0xff] %v17285_v37 }
0x17f5   :  { %13974 = vst [vmem:[%s19605_s9 + $0x58] sm:$0xff] %v17286_v2 }
0x17f7   :  { %v13826_v15 = vpop.f32.mrb[128].mxu1 }
0x17f8   :  { %v17287_v49 = vadd.f32 %v13826_v15, %v22602_v4  ;;  %v13828_v63 = vpop.f32.mrb[129].mxu1 }
0x17f9   :  { %v17288_v13 = vadd.f32 %v13828_v63, %v22605_v0  ;;  %v13830_v36 = vpop.f32.mrb[130].mxu1 }
0x17fa   :  { %13975 = vst [vmem:[%s19605_s9 + $0x60] sm:$0xff] %v17287_v49  ;;  %v17289_v7 = vadd.f32 %v13830_v36, %v22602_v4  ;;  %v13832_v46 = vpop.f32.mrb[131].mxu1 }
0x17fb   :  { %13976 = vst [vmem:[%s19605_s9 + $0x68] sm:$0xff] %v17288_v13  ;;  %v17290_v18 = vadd.f32 %v13832_v46, %v22605_v0 }
0x17fc   :  { %13977 = vst [vmem:[%s19605_s9 + $0x70] sm:$0xff] %v17289_v7 }
0x17fd   :  { %13978 = vst [vmem:[%s19605_s9 + $0x78] sm:$0xff] %v17290_v18 }
0x17ff   :  { %v13836_v9 = vpop.f32.mrb[132].mxu1 }
0x1800   :  { %v17291_v27 = vadd.f32 %v13836_v9, %v22602_v4  ;;  %v13838_v16 = vpop.f32.mrb[133].mxu1 }
0x1801   :  { %v17292_v52 = vadd.f32 %v13838_v16, %v22605_v0  ;;  %v13840_v17 = vpop.f32.mrb[134].mxu1 }
0x1802   :  { %13979 = vst [vmem:[%s19605_s9 + $0x80] sm:$0xff] %v17291_v27  ;;  %v17293_v32 = vadd.f32 %v13840_v17, %v22602_v4  ;;  %v13842_v28 = vpop.f32.mrb[135].mxu1 }
0x1803   :  { %13980 = vst [vmem:[%s19605_s9 + $0x88] sm:$0xff] %v17292_v52  ;;  %v17294_v35 = vadd.f32 %v13842_v28, %v22605_v0 }
0x1804   :  { %13981 = vst [vmem:[%s19605_s9 + $0x90] sm:$0xff] %v17293_v32 }
0x1805   :  { %13982 = vst [vmem:[%s19605_s9 + $0x98] sm:$0xff] %v17294_v35 }
0x1807   :  { %v13846_v14 = vpop.f32.mrb[136].mxu1 }
0x1808   :  { %v17295_v50 = vadd.f32 %v13846_v14, %v22602_v4  ;;  %v13848_v61 = vpop.f32.mrb[137].mxu1 }
0x1809   :  { %v17296_v29 = vadd.f32 %v13848_v61, %v22605_v0  ;;  %v13850_v1 = vpop.f32.mrb[138].mxu1 }
0x180a   :  { %13983 = vst [vmem:[%s19605_s9 + $0xa0] sm:$0xff] %v17295_v50  ;;  %v17297_v11 = vadd.f32 %v13850_v1, %v22602_v4  ;;  %v13852_v30 = vpop.f32.mrb[139].mxu1 }
0x180b   :  { %13984 = vst [vmem:[%s19605_s9 + $0xa8] sm:$0xff] %v17296_v29  ;;  %v17298_v58 = vadd.f32 %v13852_v30, %v22605_v0 }
0x180c   :  { %13985 = vst [vmem:[%s19605_s9 + $0xb0] sm:$0xff] %v17297_v11 }
0x180d   :  { %13986 = vst [vmem:[%s19605_s9 + $0xb8] sm:$0xff] %v17298_v58 }
0x180f   :  { %v13856_v3 = vpop.f32.mrb[140].mxu1 }
0x1810   :  { %v17299_v33 = vadd.f32 %v13856_v3, %v22602_v4  ;;  %v13858_v45 = vpop.f32.mrb[141].mxu1 }
0x1811   :  { %v17300_v62 = vadd.f32 %v13858_v45, %v22605_v0  ;;  %v13860_v47 = vpop.f32.mrb[142].mxu1 }
0x1812   :  { %13987 = vst [vmem:[%s19605_s9 + $0xc0] sm:$0xff] %v17299_v33  ;;  %v17301_v60 = vadd.f32 %v13860_v47, %v22602_v4  ;;  %v13862_v6 = vpop.f32.mrb[143].mxu1 }
0x1813   :  { %13988 = vst [vmem:[%s19605_s9 + $0xc8] sm:$0xff] %v17300_v62  ;;  %v17302_v26 = vadd.f32 %v13862_v6, %v22605_v0 }
0x1814   :  { %13989 = vst [vmem:[%s19605_s9 + $0xd0] sm:$0xff] %v17301_v60 }
0x1815   :  { %13990 = vst [vmem:[%s19605_s9 + $0xd8] sm:$0xff] %v17302_v26 }
0x1817   :  { %v13866_v19 = vpop.f32.mrb[144].mxu1 }
0x1818   :  { %v17303_v57 = vadd.f32 %v13866_v19, %v22602_v4  ;;  %v13868_v8 = vpop.f32.mrb[145].mxu1 }
0x1819   :  { %v17304_v23 = vadd.f32 %v13868_v8, %v22605_v0  ;;  %v13870_v51 = vpop.f32.mrb[146].mxu1 }
0x181a   :  { %13991 = vst [vmem:[%s19605_s9 + $0xe0] sm:$0xff] %v17303_v57  ;;  %v17305_v48 = vadd.f32 %v13870_v51, %v22602_v4  ;;  %v13872_v24 = vpop.f32.mrb[147].mxu1 }
0x181b   :  { %13992 = vst [vmem:[%s19605_s9 + $0xe8] sm:$0xff] %v17304_v23  ;;  %v17306_v10 = vadd.f32 %v13872_v24, %v22605_v0 }
0x181c   :  { %13993 = vst [vmem:[%s19605_s9 + $0xf0] sm:$0xff] %v17305_v48 }
0x181d   :  { %13994 = vst [vmem:[%s19605_s9 + $0xf8] sm:$0xff] %v17306_v10 }
0x181f   :  { %v13876_v5 = vpop.f32.mrb[148].mxu1 }
0x1820   :  { %v17307_v31 = vadd.f32 %v13876_v5, %v22602_v4  ;;  %v13878_v54 = vpop.f32.mrb[149].mxu1 }
0x1821   :  { %v17308_v22 = vadd.f32 %v13878_v54, %v22605_v0  ;;  %v13880_v12 = vpop.f32.mrb[150].mxu1 }
0x1822   :  { %13995 = vst [vmem:[%s19605_s9 + $0x100] sm:$0xff] %v17307_v31  ;;  %v17309_v34 = vadd.f32 %v13880_v12, %v22602_v4  ;;  %v13882_v39 = vpop.f32.mrb[151].mxu1 }
0x1823   :  { %13996 = vst [vmem:[%s19605_s9 + $0x108] sm:$0xff] %v17308_v22  ;;  %v17310_v41 = vadd.f32 %v13882_v39, %v22605_v0 }
0x1824   :  { %13997 = vst [vmem:[%s19605_s9 + $0x110] sm:$0xff] %v17309_v34 }
0x1825   :  { %13998 = vst [vmem:[%s19605_s9 + $0x118] sm:$0xff] %v17310_v41 }
0x1827   :  { %v13886_v53 = vpop.f32.mrb[152].mxu1 }
0x1828   :  { %v17311_v59 = vadd.f32 %v13886_v53, %v22602_v4  ;;  %v13888_v55 = vpop.f32.mrb[153].mxu1 }
0x1829   :  { %v17312_v43 = vadd.f32 %v13888_v55, %v22605_v0  ;;  %v13890_v44 = vpop.f32.mrb[154].mxu1 }
0x182a   :  { %13999 = vst [vmem:[%s19605_s9 + $0x120] sm:$0xff] %v17311_v59  ;;  %v17313_v20 = vadd.f32 %v13890_v44, %v22602_v4  ;;  %v13892_v42 = vpop.f32.mrb[155].mxu1 }
0x182b   :  { %14000 = vst [vmem:[%s19605_s9 + $0x128] sm:$0xff] %v17312_v43  ;;  %v17314_v21 = vadd.f32 %v13892_v42, %v22605_v0 }
0x182c   :  { %14001 = vst [vmem:[%s19605_s9 + $0x130] sm:$0xff] %v17313_v20 }
0x182d   :  { %14002 = vst [vmem:[%s19605_s9 + $0x138] sm:$0xff] %v17314_v21 }
0x182f   :  { %v13896_v25 = vpop.f32.mrb[156].mxu1 }
0x1830   :  { %v17315_v56 = vadd.f32 %v13896_v25, %v22602_v4  ;;  %v13898_v38 = vpop.f32.mrb[157].mxu1 }
0x1831   :  { %v17316_v37 = vadd.f32 %v13898_v38, %v22605_v0  ;;  %v13900_v40 = vpop.f32.mrb[158].mxu1 }
0x1832   :  { %14003 = vst [vmem:[%s19605_s9 + $0x140] sm:$0xff] %v17315_v56  ;;  %v17317_v2 = vadd.f32 %v13900_v40, %v22602_v4  ;;  %v13902_v15 = vpop.f32.mrb[159].mxu1 }
0x1833   :  { %14004 = vst [vmem:[%s19605_s9 + $0x148] sm:$0xff] %v17316_v37  ;;  %v17318_v49 = vadd.f32 %v13902_v15, %v22605_v0 }
0x1834   :  { %14005 = vst [vmem:[%s19605_s9 + $0x150] sm:$0xff] %v17317_v2 }
0x1835   :  { %14006 = vst [vmem:[%s19605_s9 + $0x158] sm:$0xff] %v17318_v49 }
0x1837   :  { %v13906_v63 = vpop.f32.mrb[160].mxu1 }
0x1838   :  { %v17319_v13 = vadd.f32 %v13906_v63, %v22602_v4  ;;  %v13908_v36 = vpop.f32.mrb[161].mxu1 }
0x1839   :  { %v17320_v7 = vadd.f32 %v13908_v36, %v22605_v0  ;;  %v13910_v46 = vpop.f32.mrb[162].mxu1 }
0x183a   :  { %14007 = vst [vmem:[%s19605_s9 + $0x160] sm:$0xff] %v17319_v13  ;;  %v17321_v18 = vadd.f32 %v13910_v46, %v22602_v4  ;;  %v13912_v9 = vpop.f32.mrb[163].mxu1 }
0x183b   :  { %14008 = vst [vmem:[%s19605_s9 + $0x168] sm:$0xff] %v17320_v7  ;;  %v17322_v27 = vadd.f32 %v13912_v9, %v22605_v0 }
0x183c   :  { %14009 = vst [vmem:[%s19605_s9 + $0x170] sm:$0xff] %v17321_v18 }
0x183d   :  { %14010 = vst [vmem:[%s19605_s9 + $0x178] sm:$0xff] %v17322_v27 }
0x183f   :  { %v13916_v16 = vpop.f32.mrb[164].mxu1 }
0x1840   :  { %v17323_v52 = vadd.f32 %v13916_v16, %v22602_v4  ;;  %v13918_v17 = vpop.f32.mrb[165].mxu1 }
0x1841   :  { %v17324_v32 = vadd.f32 %v13918_v17, %v22605_v0  ;;  %v13920_v28 = vpop.f32.mrb[166].mxu1 }
0x1842   :  { %14011 = vst [vmem:[%s19605_s9 + $0x180] sm:$0xff] %v17323_v52  ;;  %v17325_v35 = vadd.f32 %v13920_v28, %v22602_v4  ;;  %v13922_v14 = vpop.f32.mrb[167].mxu1 }
0x1843   :  { %14012 = vst [vmem:[%s19605_s9 + $0x188] sm:$0xff] %v17324_v32  ;;  %v17326_v50 = vadd.f32 %v13922_v14, %v22605_v0 }
0x1844   :  { %14013 = vst [vmem:[%s19605_s9 + $0x190] sm:$0xff] %v17325_v35 }
0x1845   :  { %14014 = vst [vmem:[%s19605_s9 + $0x198] sm:$0xff] %v17326_v50 }
0x1847   :  { %v13926_v61 = vpop.f32.mrb[168].mxu1 }
0x1848   :  { %v17327_v29 = vadd.f32 %v13926_v61, %v22602_v4  ;;  %v13928_v1 = vpop.f32.mrb[169].mxu1 }
0x1849   :  { %v17328_v11 = vadd.f32 %v13928_v1, %v22605_v0  ;;  %v13930_v30 = vpop.f32.mrb[170].mxu1 }
0x184a   :  { %14015 = vst [vmem:[%s19605_s9 + $0x1a0] sm:$0xff] %v17327_v29  ;;  %v17329_v58 = vadd.f32 %v13930_v30, %v22602_v4  ;;  %v13932_v3 = vpop.f32.mrb[171].mxu1 }
0x184b   :  { %14016 = vst [vmem:[%s19605_s9 + $0x1a8] sm:$0xff] %v17328_v11  ;;  %v17330_v33 = vadd.f32 %v13932_v3, %v22605_v0 }
0x184c   :  { %14017 = vst [vmem:[%s19605_s9 + $0x1b0] sm:$0xff] %v17329_v58 }
0x184d   :  { %14018 = vst [vmem:[%s19605_s9 + $0x1b8] sm:$0xff] %v17330_v33 }
0x184f   :  { %v13936_v45 = vpop.f32.mrb[172].mxu1 }
0x1850   :  { %v17331_v62 = vadd.f32 %v13936_v45, %v22602_v4  ;;  %v13938_v47 = vpop.f32.mrb[173].mxu1 }
0x1851   :  { %v17332_v60 = vadd.f32 %v13938_v47, %v22605_v0  ;;  %v13940_v6 = vpop.f32.mrb[174].mxu1 }
0x1852   :  { %14019 = vst [vmem:[%s19605_s9 + $0x1c0] sm:$0xff] %v17331_v62  ;;  %v17333_v26 = vadd.f32 %v13940_v6, %v22602_v4  ;;  %v13942_v19 = vpop.f32.mrb[175].mxu1 }
0x1853   :  { %14020 = vst [vmem:[%s19605_s9 + $0x1c8] sm:$0xff] %v17332_v60  ;;  %v17334_v57 = vadd.f32 %v13942_v19, %v22605_v0 }
0x1854   :  { %14021 = vst [vmem:[%s19605_s9 + $0x1d0] sm:$0xff] %v17333_v26 }
0x1855   :  { %14022 = vst [vmem:[%s19605_s9 + $0x1d8] sm:$0xff] %v17334_v57 }
0x1857   :  { %v13946_v8 = vpop.f32.mrb[176].mxu1 }
0x1858   :  { %v17335_v23 = vadd.f32 %v13946_v8, %v22602_v4  ;;  %v13948_v51 = vpop.f32.mrb[177].mxu1 }
0x1859   :  { %v17336_v48 = vadd.f32 %v13948_v51, %v22605_v0  ;;  %v13950_v24 = vpop.f32.mrb[178].mxu1 }
0x185a   :  { %14023 = vst [vmem:[%s19605_s9 + $0x1e0] sm:$0xff] %v17335_v23  ;;  %v17337_v10 = vadd.f32 %v13950_v24, %v22602_v4  ;;  %v13952_v5 = vpop.f32.mrb[179].mxu1 }
0x185b   :  { %14024 = vst [vmem:[%s19605_s9 + $0x1e8] sm:$0xff] %v17336_v48  ;;  %v17338_v31 = vadd.f32 %v13952_v5, %v22605_v0 }
0x185c   :  { %14025 = vst [vmem:[%s19605_s9 + $0x1f0] sm:$0xff] %v17337_v10 }
0x185d   :  { %14026 = vst [vmem:[%s19605_s9 + $0x1f8] sm:$0xff] %v17338_v31 }
0x185f   :  { %v13956_v54 = vpop.f32.mrb[180].mxu1 }
0x1860   :  { %v17339_v22 = vadd.f32 %v13956_v54, %v22602_v4  ;;  %v13958_v12 = vpop.f32.mrb[181].mxu1 }
0x1861   :  { %v17340_v34 = vadd.f32 %v13958_v12, %v22605_v0  ;;  %v13960_v39 = vpop.f32.mrb[182].mxu1 }
0x1862   :  { %14027 = vst [vmem:[%s19605_s9 + $0x200] sm:$0xff] %v17339_v22  ;;  %v13961_v41 = vpop.f32.mrb[183].mxu1 }
0x1863   :  { %14028 = vst [vmem:[%s19605_s9 + $0x208] sm:$0xff] %v17340_v34 }
0x1864   :  { %14037 = vsyncpa [#allocation3], 1 }
0x1865   :  { %14038 = vsyncpa [#allocation5], 1 }
0x1866   :  { %14039 = vsyncpa [#allocation8], 1 }
0x1867   :  { %14040 = vsyncpa [#allocation11], 1 }
0x1868   :  { %14041 = vsyncpa [#allocation14], 1 }
0x1869   :  { %14042 = vsyncpa [#allocation17], 1 }
0x186a   :  { %14043 = vsyncpa [#allocation20], 1 }
0x186b   :  { %14044 = vsyncpa [#allocation23], 1 }
0x186c   :  { %14045 = vsyncpa [#allocation26], 1 }

</bundles_post_ra>
